<compile_context>
chip_gen: v7x
topology: tpu7x:2x2x1
jax: 0.10.0
libtpu: 0.0.40
codegen_flags: <defaults>
</compile_context>

<pallas_src>
import functools

import jax
import jax.numpy as jnp
from jax import lax
from jax.experimental import pallas as pl
from jax.experimental.pallas import tpu as pltpu


# ---------------------------------------------------------------------------
# Fused kernel: 3x (Conv1d k3 s1 p1, no bias [+ LeakyReLU(0.05)] + AvgPool1d(2))
#               -> (flatten folded into) Linear -> LeakyReLU(0.05) -> Linear
# ---------------------------------------------------------------------------
def _fused_convmlp_kernel(
    # inputs
    x_ref,        # (B, L, Cin)     f32  VMEM
    w1_ref,       # (3, Cin, H1)    f32  VMEM   conv taps
    w2_ref,       # (3, H1, H2)     f32  VMEM   conv taps
    w3_ref,       # (3, H2, H3)     f32  VMEM   conv taps
    pool_ref,     # (L//2, L)       f32  VMEM   0.5-pair AvgPool matrix
    wm1_hbm,      # (Lp, H3, LAT)   bf16 HBM    (pl.ANY -> manual DMA)
    wm2_hbm,      # (LAT, LAT)      bf16 HBM    (pl.ANY -> manual DMA)
    # outputs
    o_ref,        # (B, LAT)        f32  VMEM
    # scratch
    wm1_v,        # (Lp, H3, LAT)   bf16 VMEM
    wm2_v,        # (LAT, LAT)      bf16 VMEM
    dma_sem,      # DMA sems (2,)
    xp_sc,        # (L+2, Cin)      f32  VMEM   padded stage-1 input (per sample)
    h1p_sc,       # (L//2+2, H1)    f32  VMEM   padded stage-2 input (per sample)
    h2p_sc,       # (L//4+2, H2)    f32  VMEM   padded stage-3 input (per sample)
    a3_sc,        # (B, Lp, H3)     bf16 VMEM   encoder output (pre-flatten)
    *, B, L, slope):

    Cin = x_ref.shape[2]
    H1 = w1_ref.shape[2]
    H2 = w2_ref.shape[2]
    L2, L4, Lp = L // 2, L // 4, L // 8
    LAT = o_ref.shape[1]

    # Start the big wm1 DMA first; the whole conv encoder runs under it.
    # (wm2's DMA is intentionally NOT started yet -- see below.)
    cp1 = pltpu.make_async_copy(wm1_hbm, wm1_v, dma_sem.at[0])
    cp1.start()

    # Zero ONLY the two pad rows of each padded activation scratch; the
    # interiors are fully overwritten every sample, and the pad rows stay zero
    # across the batch loop.
    xp_sc[0:1, :] = jnp.zeros((1, Cin), jnp.float32)
    xp_sc[L + 1:L + 2, :] = jnp.zeros((1, Cin), jnp.float32)
    h1p_sc[0:1, :] = jnp.zeros((1, H1), jnp.float32)
    h1p_sc[L2 + 1:L2 + 2, :] = jnp.zeros((1, H1), jnp.float32)
    h2p_sc[0:1, :] = jnp.zeros((1, H2), jnp.float32)
    h2p_sc[L4 + 1:L4 + 2, :] = jnp.zeros((1, H2), jnp.float32)

    def conv_pool(in_sc, w_ref, Lin, relu):
        # Conv1d(k=3, s=1, p=1, bias=False) [+ LeakyReLU(slope)] + AvgPool1d(2).
        # Conv taps via three statically shifted slices of the padded scratch.
        Lh = Lin // 2
        acc = jnp.dot(in_sc[0:Lin, :], w_ref[0],
                      preferred_element_type=jnp.float32)
        acc = acc + jnp.dot(in_sc[1:Lin + 1, :], w_ref[1],
                            preferred_element_type=jnp.float32)
        acc = acc + jnp.dot(in_sc[2:Lin + 2, :], w_ref[2],
                            preferred_element_type=jnp.float32)
        if relu:
            acc = jnp.maximum(acc, slope * acc)          # LeakyReLU(slope)
        # AvgPool1d(2,2) on the live accumulator via a small constant matmul
        # (every stage's pool matrix is the top-left block of pool_ref).
        return jnp.dot(pool_ref[0:Lh, 0:Lin], acc,
                       preferred_element_type=jnp.float32)

    # Conv encoder, per sample.  B is small & static here; the padded
    # activation scratch is reused across samples so VMEM does not grow with B.
    # TODO(synk): for large-B serving, merge batch into the matmul M dimension
    # (or add a batch-chunk grid) instead of unrolling this Python loop.
    for b in range(B):
        xp_sc[1:L + 1, :] = x_ref[b]
        h1p_sc[1:L2 + 1, :] = conv_pool(xp_sc, w1_ref, L, relu=True)
        h2p_sc[1:L4 + 1, :] = conv_pool(h1p_sc, w2_ref, L2, relu=True)
        # Stage 3 has NO activation between Conv and AvgPool.
        a3_sc[b] = conv_pool(h2p_sc, w3_ref, L4, relu=False).astype(a3_sc.dtype)

    # Issue wm2's DMA only now: wm1 got the full HBM bandwidth so far (and is
    # therefore nearly done), and the first Linear + LeakyReLU below overlap
    # wm2's remaining transfer.
    cp2 = pltpu.make_async_copy(wm2_hbm, wm2_v, dma_sem.at[1])
    cp2.start()
    cp1.wait()

    # First Linear with the flatten folded in:
    #   h[b, d] = sum_{l, c} a3[b, l, c] * wm1[l, c, d]   (einsum 'blh,lhd->bd')
    # unrolled over l so each step is a plain (B, H3) @ (H3, LAT) MXU matmul.
    h = jnp.zeros((B, LAT), jnp.float32)
    for l in range(Lp):
        h = h + jnp.dot(a3_sc[:, l, :], wm1_v[l],
                        preferred_element_type=jnp.float32)
    h = jnp.maximum(h, slope * h)                         # LeakyReLU(slope)

    cp2.wait()
    o_ref[...] = jnp.dot(h.astype(jnp.bfloat16), wm2_v[...],
                         preferred_element_type=jnp.float32)


# ---------------------------------------------------------------------------
# Wrapper
# ---------------------------------------------------------------------------
def conv_mlp_forward(x_ncw, params):
    # PyTorch NCW -> channels-last (B, W, Cin): length on sublanes, ch on lanes.
    x = jnp.transpose(x_ncw, (0, 2, 1)).astype(jnp.float32)
    B, L, Cin = x.shape
    assert L % 8 == 0
    H1 = params["w1"].shape[2]
    H2 = params["w2"].shape[2]
    H3 = params["w3"].shape[2]
    Lp, H3w, LAT = params["wm1"].shape
    assert Lp == L // 8 and H3w == H3

    # AvgPool1d(2,2) as a constant 0.5-pair matrix; every stage uses its
    # top-left (Lin//2, Lin) block.  73 KB of VMEM, MXU work hidden under DMA.
    pool = jnp.kron(jnp.eye(L // 2, dtype=jnp.float32),
                    jnp.full((1, 2), 0.5, jnp.float32))          # (L//2, L)

    kernel = functools.partial(_fused_convmlp_kernel, B=B, L=L, slope=0.05)
    vmem = pltpu.MemorySpace.VMEM

    out = pl.pallas_call(
        kernel,
        out_shape=jax.ShapeDtypeStruct((B, LAT), jnp.float32),
        in_specs=[
            pl.BlockSpec(memory_space=vmem),    # x
            pl.BlockSpec(memory_space=vmem),    # w1 taps
            pl.BlockSpec(memory_space=vmem),    # w2 taps
            pl.BlockSpec(memory_space=vmem),    # w3 taps
            pl.BlockSpec(memory_space=vmem),    # pool matrix
            pl.BlockSpec(memory_space=pl.ANY),  # wm1 stays in HBM; DMA'd in-kernel
            pl.BlockSpec(memory_space=pl.ANY),  # wm2 stays in HBM; DMA'd in-kernel
        ],
        out_specs=pl.BlockSpec(memory_space=vmem),
        scratch_shapes=[
            pltpu.VMEM((Lp, H3, LAT), jnp.bfloat16),       # wm1_v
            pltpu.VMEM((LAT, LAT), jnp.bfloat16),          # wm2_v
            pltpu.SemaphoreType.DMA((2,)),                 # dma_sem
            pltpu.VMEM((L + 2, Cin), jnp.float32),         # xp_sc  (padded)
            pltpu.VMEM((L // 2 + 2, H1), jnp.float32),     # h1p_sc (padded)
            pltpu.VMEM((L // 4 + 2, H2), jnp.float32),     # h2p_sc (padded)
            pltpu.VMEM((B, Lp, H3), jnp.bfloat16),         # a3_sc
        ],
        compiler_params=pltpu.CompilerParams(vmem_limit_bytes=32 * 1024 * 1024),
    )(x, params["w1"], params["w2"], params["w3"], pool,
      params["wm1"], params["wm2"])
    return jnp.squeeze(out)   # matches PyTorch output.squeeze()


# ---------------------------------------------------------------------------
# Parameter init: PyTorch-layout reference weights + kernel-layout weights
# ---------------------------------------------------------------------------
def init_params(key, cin, h1, h2, h3, latent, window):
    ks = jax.random.split(key, 5)
    # PyTorch-layout weights (Conv1d: (Cout, Cin, 3); Linear: (out, in)).
    c1 = jax.random.normal(ks[0], (h1, cin, 3), jnp.float32) / jnp.sqrt(3.0 * cin)
    c2 = jax.random.normal(ks[1], (h2, h1, 3), jnp.float32) / jnp.sqrt(3.0 * h1)
    c3 = jax.random.normal(ks[2], (h3, h2, 3), jnp.float32) / jnp.sqrt(3.0 * h2)
    Lp = window // 8
    feat = h3 * Lp
    m1 = jax.random.normal(ks[3], (latent, feat), jnp.float32) / jnp.sqrt(feat)
    m2 = jax.random.normal(ks[4], (latent, latent), jnp.float32) / jnp.sqrt(latent)
    ref = dict(c1=c1, c2=c2, c3=c3, m1=m1, m2=m2)

    tap = lambda w: jnp.transpose(w, (2, 1, 0))   # (Cout,Cin,3) -> (3,Cin,Cout)

    # PyTorch flatten is channel-major (feature index c*Lp + l); the kernel
    # contracts h[b,d] = sum_{l,c} a3[b,l,c] * wm1[l,c,d], so we need
    # wm1[l,c,d] = m1[d, c*Lp + l].  bf16 halves the dominant HBM weight DMA.
    wm1 = jnp.transpose(m1.reshape(latent, h3, Lp), (2, 1, 0))   # (Lp, h3, latent)

    kparams = dict(
        w1=tap(c1), w2=tap(c2), w3=tap(c3),
        wm1=wm1.astype(jnp.bfloat16),
        wm2=m2.T.astype(jnp.bfloat16),
    )
    return kparams, ref


# ---------------------------------------------------------------------------
# Pure-JAX reference mirroring the PyTorch module (sanity check)
# ---------------------------------------------------------------------------
def _torch_style_reference(x_ncw, ref_w, slope=0.05):
    def conv1d(x, w):  # x: (B, C, W), w: (Cout, Cin, 3), stride 1, padding 1
        return lax.conv_general_dilated(
            x, w, window_strides=(1,), padding=((1, 1),),
            dimension_numbers=("NCH", "OIH", "NCH"))

    def lrelu(x):
        return jnp.where(x >= 0, x, slope * x)

    def avgpool2(x):   # (B, C, W) -> (B, C, W//2)
        b, c, w = x.shape
        return x.reshape(b, c, w // 2, 2).mean(-1)

    h = avgpool2(lrelu(conv1d(x_ncw, ref_w["c1"])))
    h = avgpool2(lrelu(conv1d(h, ref_w["c2"])))
    h = avgpool2(conv1d(h, ref_w["c3"]))
    z = h.reshape(h.shape[0], -1)              # channel-major flatten
    out = z @ ref_w["m1"].T
    out = jnp.where(out >= 0, out, slope * out)
    return jnp.squeeze(out @ ref_w["m2"].T)


if __name__ == "__main__":
    hidden1_dim, hidden2_dim, hidden3_dim = 16, 24, 32
    latent_dim, window_size = 1024, 192
    input_channels, batch = 4, 2
    # NOTE: the kernel is weight-DMA bound (~3.5 MB bf16 per call); batching
    # more windows per call amortizes that load nearly for free.

    key = jax.random.PRNGKey(0)
    pkey, xkey = jax.random.split(key)
    params, ref_w = init_params(pkey, input_channels, hidden1_dim, hidden2_dim,
                                hidden3_dim, latent_dim, window_size)
    x = jax.random.normal(xkey, (batch, input_channels, window_size), jnp.float32)

    out = jax.jit(conv_mlp_forward)(x, params)
    out = jax.block_until_ready(out)
    assert out.shape == (batch, latent_dim), out.shape
    assert bool(jnp.all(jnp.isfinite(out)))

    # Loose tolerance: MLP weights and the flattened activations are bf16 in
    # the kernel (intentional -- halves the dominant HBM weight DMA).
    ref = jax.jit(_torch_style_reference)(x, ref_w)
    max_err = float(jnp.max(jnp.abs(out - ref)))
    assert max_err < 0.15, f"max abs err vs reference: {max_err}"
    print("KERNEL_OK")
</pallas_src>

<mosaic_0001>
module attributes {stable_mosaic.version = 11 : i64} {
  func.func @_fused_convmlp_kernel(%arg0: memref<2x192x4xf32, #tpu.memory_space<vmem>>, %arg1: memref<3x4x16xf32, #tpu.memory_space<vmem>>, %arg2: memref<3x16x24xf32, #tpu.memory_space<vmem>>, %arg3: memref<3x24x32xf32, #tpu.memory_space<vmem>>, %arg4: memref<96x192xf32, #tpu.memory_space<vmem>>, %arg5: memref<24x32x1024xbf16, #tpu.memory_space<any>>, %arg6: memref<1024x1024xbf16, #tpu.memory_space<any>>, %arg7: memref<2x1024xf32, #tpu.memory_space<vmem>>, %arg8: memref<24x32x1024xbf16, #tpu.memory_space<vmem>>, %arg9: memref<1024x1024xbf16, #tpu.memory_space<vmem>>, %arg10: memref<2x!tpu.dma_semaphore, #tpu.memory_space<semaphore_mem>>, %arg11: memref<194x4xf32, #tpu.memory_space<vmem>>, %arg12: memref<98x16xf32, #tpu.memory_space<vmem>>, %arg13: memref<50x24xf32, #tpu.memory_space<vmem>>, %arg14: memref<2x24x32xbf16, #tpu.memory_space<vmem>>) attributes {dimension_semantics = [], scalar_prefetch = 0 : i64, scratch_operands = 7 : i64, tpu.core_type = #tpu.core_type<tc>} {
    %c0_i32 = arith.constant 0 : i32
    %0 = tpu.memref_slice %arg10[%c0_i32] : memref<2x!tpu.dma_semaphore, #tpu.memory_space<semaphore_mem>> -> memref<1x!tpu.dma_semaphore, #tpu.memory_space<semaphore_mem>>
    %1 = tpu.memref_squeeze %0 : memref<1x!tpu.dma_semaphore, #tpu.memory_space<semaphore_mem>> -> memref<!tpu.dma_semaphore, #tpu.memory_space<semaphore_mem>>
    tpu.enqueue_dma source(%arg5 : memref<24x32x1024xbf16, #tpu.memory_space<any>>) target(%arg8 : memref<24x32x1024xbf16, #tpu.memory_space<vmem>>) target_semaphore(%1 : memref<!tpu.dma_semaphore, #tpu.memory_space<semaphore_mem>>)
    %cst = arith.constant 0.000000e+00 : f32
    %2 = vector.broadcast %cst : f32 to vector<1x4xf32>
    %c0 = arith.constant 0 : index
    %c0_0 = arith.constant 0 : index
    %3 = vector.load %arg11[%c0, %c0_0] : memref<194x4xf32, #tpu.memory_space<vmem>>, vector<1x4xf32>
    tpu.vector_store %arg11[%c0, %c0_0], %2 {strides = array<i32>} : memref<194x4xf32, #tpu.memory_space<vmem>>, vector<1x4xf32>,
    %cst_1 = arith.constant 0.000000e+00 : f32
    %4 = vector.broadcast %cst_1 : f32 to vector<1x4xf32>
    %c193 = arith.constant 193 : index
    %c0_2 = arith.constant 0 : index
    %5 = vector.load %arg11[%c193, %c0_2] : memref<194x4xf32, #tpu.memory_space<vmem>>, vector<1x4xf32>
    tpu.vector_store %arg11[%c193, %c0_2], %4 {strides = array<i32>} : memref<194x4xf32, #tpu.memory_space<vmem>>, vector<1x4xf32>,
    %cst_3 = arith.constant 0.000000e+00 : f32
    %6 = vector.broadcast %cst_3 : f32 to vector<1x16xf32>
    %c0_4 = arith.constant 0 : index
    %c0_5 = arith.constant 0 : index
    %7 = vector.load %arg12[%c0_4, %c0_5] : memref<98x16xf32, #tpu.memory_space<vmem>>, vector<1x16xf32>
    tpu.vector_store %arg12[%c0_4, %c0_5], %6 {strides = array<i32>} : memref<98x16xf32, #tpu.memory_space<vmem>>, vector<1x16xf32>,
    %cst_6 = arith.constant 0.000000e+00 : f32
    %8 = vector.broadcast %cst_6 : f32 to vector<1x16xf32>
    %c97 = arith.constant 97 : index
    %c0_7 = arith.constant 0 : index
    %9 = vector.load %arg12[%c97, %c0_7] : memref<98x16xf32, #tpu.memory_space<vmem>>, vector<1x16xf32>
    tpu.vector_store %arg12[%c97, %c0_7], %8 {strides = array<i32>} : memref<98x16xf32, #tpu.memory_space<vmem>>, vector<1x16xf32>,
    %cst_8 = arith.constant 0.000000e+00 : f32
    %10 = vector.broadcast %cst_8 : f32 to vector<1x24xf32>
    %c0_9 = arith.constant 0 : index
    %c0_10 = arith.constant 0 : index
    %11 = vector.load %arg13[%c0_9, %c0_10] : memref<50x24xf32, #tpu.memory_space<vmem>>, vector<1x24xf32>
    tpu.vector_store %arg13[%c0_9, %c0_10], %10 {strides = array<i32>} : memref<50x24xf32, #tpu.memory_space<vmem>>, vector<1x24xf32>,
    %cst_11 = arith.constant 0.000000e+00 : f32
    %12 = vector.broadcast %cst_11 : f32 to vector<1x24xf32>
    %c49 = arith.constant 49 : index
    %c0_12 = arith.constant 0 : index
    %13 = vector.load %arg13[%c49, %c0_12] : memref<50x24xf32, #tpu.memory_space<vmem>>, vector<1x24xf32>
    tpu.vector_store %arg13[%c49, %c0_12], %12 {strides = array<i32>} : memref<50x24xf32, #tpu.memory_space<vmem>>, vector<1x24xf32>,
    %c0_13 = arith.constant 0 : index
    %c0_14 = arith.constant 0 : index
    %c0_15 = arith.constant 0 : index
    %14 = vector.load %arg0[%c0_13, %c0_14, %c0_15] : memref<2x192x4xf32, #tpu.memory_space<vmem>>, vector<1x192x4xf32>
    %15 = vector.shape_cast %14 : vector<1x192x4xf32> to vector<192x4xf32>
    %c1 = arith.constant 1 : index
    %c0_16 = arith.constant 0 : index
    %16 = vector.load %arg11[%c1, %c0_16] : memref<194x4xf32, #tpu.memory_space<vmem>>, vector<192x4xf32>
    tpu.vector_store %arg11[%c1, %c0_16], %15 {strides = array<i32>} : memref<194x4xf32, #tpu.memory_space<vmem>>, vector<192x4xf32>,
    %c0_17 = arith.constant 0 : index
    %c0_18 = arith.constant 0 : index
    %17 = vector.load %arg11[%c0_17, %c0_18] : memref<194x4xf32, #tpu.memory_space<vmem>>, vector<192x4xf32>
    %c0_19 = arith.constant 0 : index
    %c0_20 = arith.constant 0 : index
    %c0_21 = arith.constant 0 : index
    %18 = vector.load %arg1[%c0_19, %c0_20, %c0_21] : memref<3x4x16xf32, #tpu.memory_space<vmem>>, vector<1x4x16xf32>
    %19 = vector.shape_cast %18 : vector<1x4x16xf32> to vector<4x16xf32>
    %cst_22 = arith.constant dense<0.000000e+00> : vector<192x16xf32>
    %20 = tpu.matmul %17, %19, %cst_22 {dimension_numbers = #tpu.dot_dimension_numbers<[1], [0], [0], [1], [0, 0, 1, 1], [], []>} : vector<192x4xf32>, vector<4x16xf32>, vector<192x16xf32> -> vector<192x16xf32>
    %c1_23 = arith.constant 1 : index
    %c0_24 = arith.constant 0 : index
    %21 = vector.load %arg11[%c1_23, %c0_24] : memref<194x4xf32, #tpu.memory_space<vmem>>, vector<192x4xf32>
    %c1_25 = arith.constant 1 : index
    %c0_26 = arith.constant 0 : index
    %c0_27 = arith.constant 0 : index
    %22 = vector.load %arg1[%c1_25, %c0_26, %c0_27] : memref<3x4x16xf32, #tpu.memory_space<vmem>>, vector<1x4x16xf32>
    %23 = vector.shape_cast %22 : vector<1x4x16xf32> to vector<4x16xf32>
    %cst_28 = arith.constant dense<0.000000e+00> : vector<192x16xf32>
    %24 = tpu.matmul %21, %23, %cst_28 {dimension_numbers = #tpu.dot_dimension_numbers<[1], [0], [0], [1], [0, 0, 1, 1], [], []>} : vector<192x4xf32>, vector<4x16xf32>, vector<192x16xf32> -> vector<192x16xf32>
    %25 = arith.addf %20, %24 : vector<192x16xf32>
    %c2 = arith.constant 2 : index
    %c0_29 = arith.constant 0 : index
    %26 = vector.load %arg11[%c2, %c0_29] : memref<194x4xf32, #tpu.memory_space<vmem>>, vector<192x4xf32>
    %c2_30 = arith.constant 2 : index
    %c0_31 = arith.constant 0 : index
    %c0_32 = arith.constant 0 : index
    %27 = vector.load %arg1[%c2_30, %c0_31, %c0_32] : memref<3x4x16xf32, #tpu.memory_space<vmem>>, vector<1x4x16xf32>
    %28 = vector.shape_cast %27 : vector<1x4x16xf32> to vector<4x16xf32>
    %cst_33 = arith.constant dense<0.000000e+00> : vector<192x16xf32>
    %29 = tpu.matmul %26, %28, %cst_33 {dimension_numbers = #tpu.dot_dimension_numbers<[1], [0], [0], [1], [0, 0, 1, 1], [], []>} : vector<192x4xf32>, vector<4x16xf32>, vector<192x16xf32> -> vector<192x16xf32>
    %30 = arith.addf %25, %29 : vector<192x16xf32>
    %cst_34 = arith.constant 5.000000e-02 : f32
    %31 = vector.broadcast %cst_34 : f32 to vector<192x16xf32>
    %32 = arith.mulf %31, %30 : vector<192x16xf32>
    %33 = arith.maximumf %30, %32 : vector<192x16xf32>
    %c0_35 = arith.constant 0 : index
    %c0_36 = arith.constant 0 : index
    %34 = vector.load %arg4[%c0_35, %c0_36] : memref<96x192xf32, #tpu.memory_space<vmem>>, vector<96x192xf32>
    %cst_37 = arith.constant dense<0.000000e+00> : vector<96x16xf32>
    %35 = tpu.matmul %34, %33, %cst_37 {dimension_numbers = #tpu.dot_dimension_numbers<[1], [0], [0], [1], [0, 0, 1, 1], [], []>} : vector<96x192xf32>, vector<192x16xf32>, vector<96x16xf32> -> vector<96x16xf32>
    %c1_38 = arith.constant 1 : index
    %c0_39 = arith.constant 0 : index
    %36 = vector.load %arg12[%c1_38, %c0_39] : memref<98x16xf32, #tpu.memory_space<vmem>>, vector<96x16xf32>
    tpu.vector_store %arg12[%c1_38, %c0_39], %35 {strides = array<i32>} : memref<98x16xf32, #tpu.memory_space<vmem>>, vector<96x16xf32>,
    %c0_40 = arith.constant 0 : index
    %c0_41 = arith.constant 0 : index
    %37 = vector.load %arg12[%c0_40, %c0_41] : memref<98x16xf32, #tpu.memory_space<vmem>>, vector<96x16xf32>
    %c0_42 = arith.constant 0 : index
    %c0_43 = arith.constant 0 : index
    %c0_44 = arith.constant 0 : index
    %38 = vector.load %arg2[%c0_42, %c0_43, %c0_44] : memref<3x16x24xf32, #tpu.memory_space<vmem>>, vector<1x16x24xf32>
    %39 = vector.shape_cast %38 : vector<1x16x24xf32> to vector<16x24xf32>
    %cst_45 = arith.constant dense<0.000000e+00> : vector<96x24xf32>
    %40 = tpu.matmul %37, %39, %cst_45 {dimension_numbers = #tpu.dot_dimension_numbers<[1], [0], [0], [1], [0, 0, 1, 1], [], []>} : vector<96x16xf32>, vector<16x24xf32>, vector<96x24xf32> -> vector<96x24xf32>
    %c1_46 = arith.constant 1 : index
    %c0_47 = arith.constant 0 : index
    %41 = vector.load %arg12[%c1_46, %c0_47] : memref<98x16xf32, #tpu.memory_space<vmem>>, vector<96x16xf32>
    %c1_48 = arith.constant 1 : index
    %c0_49 = arith.constant 0 : index
    %c0_50 = arith.constant 0 : index
    %42 = vector.load %arg2[%c1_48, %c0_49, %c0_50] : memref<3x16x24xf32, #tpu.memory_space<vmem>>, vector<1x16x24xf32>
    %43 = vector.shape_cast %42 : vector<1x16x24xf32> to vector<16x24xf32>
    %cst_51 = arith.constant dense<0.000000e+00> : vector<96x24xf32>
    %44 = tpu.matmul %41, %43, %cst_51 {dimension_numbers = #tpu.dot_dimension_numbers<[1], [0], [0], [1], [0, 0, 1, 1], [], []>} : vector<96x16xf32>, vector<16x24xf32>, vector<96x24xf32> -> vector<96x24xf32>
    %45 = arith.addf %40, %44 : vector<96x24xf32>
    %c2_52 = arith.constant 2 : index
    %c0_53 = arith.constant 0 : index
    %46 = vector.load %arg12[%c2_52, %c0_53] : memref<98x16xf32, #tpu.memory_space<vmem>>, vector<96x16xf32>
    %c2_54 = arith.constant 2 : index
    %c0_55 = arith.constant 0 : index
    %c0_56 = arith.constant 0 : index
    %47 = vector.load %arg2[%c2_54, %c0_55, %c0_56] : memref<3x16x24xf32, #tpu.memory_space<vmem>>, vector<1x16x24xf32>
    %48 = vector.shape_cast %47 : vector<1x16x24xf32> to vector<16x24xf32>
    %cst_57 = arith.constant dense<0.000000e+00> : vector<96x24xf32>
    %49 = tpu.matmul %46, %48, %cst_57 {dimension_numbers = #tpu.dot_dimension_numbers<[1], [0], [0], [1], [0, 0, 1, 1], [], []>} : vector<96x16xf32>, vector<16x24xf32>, vector<96x24xf32> -> vector<96x24xf32>
    %50 = arith.addf %45, %49 : vector<96x24xf32>
    %cst_58 = arith.constant 5.000000e-02 : f32
    %51 = vector.broadcast %cst_58 : f32 to vector<96x24xf32>
    %52 = arith.mulf %51, %50 : vector<96x24xf32>
    %53 = arith.maximumf %50, %52 : vector<96x24xf32>
    %c0_59 = arith.constant 0 : index
    %c0_60 = arith.constant 0 : index
    %54 = vector.load %arg4[%c0_59, %c0_60] : memref<96x192xf32, #tpu.memory_space<vmem>>, vector<48x96xf32>
    %cst_61 = arith.constant dense<0.000000e+00> : vector<48x24xf32>
    %55 = tpu.matmul %54, %53, %cst_61 {dimension_numbers = #tpu.dot_dimension_numbers<[1], [0], [0], [1], [0, 0, 1, 1], [], []>} : vector<48x96xf32>, vector<96x24xf32>, vector<48x24xf32> -> vector<48x24xf32>
    %c1_62 = arith.constant 1 : index
    %c0_63 = arith.constant 0 : index
    %56 = vector.load %arg13[%c1_62, %c0_63] : memref<50x24xf32, #tpu.memory_space<vmem>>, vector<48x24xf32>
    tpu.vector_store %arg13[%c1_62, %c0_63], %55 {strides = array<i32>} : memref<50x24xf32, #tpu.memory_space<vmem>>, vector<48x24xf32>,
    %c0_64 = arith.constant 0 : index
    %c0_65 = arith.constant 0 : index
    %57 = vector.load %arg13[%c0_64, %c0_65] : memref<50x24xf32, #tpu.memory_space<vmem>>, vector<48x24xf32>
    %c0_66 = arith.constant 0 : index
    %c0_67 = arith.constant 0 : index
    %c0_68 = arith.constant 0 : index
    %58 = vector.load %arg3[%c0_66, %c0_67, %c0_68] : memref<3x24x32xf32, #tpu.memory_space<vmem>>, vector<1x24x32xf32>
    %59 = vector.shape_cast %58 : vector<1x24x32xf32> to vector<24x32xf32>
    %cst_69 = arith.constant dense<0.000000e+00> : vector<48x32xf32>
    %60 = tpu.matmul %57, %59, %cst_69 {dimension_numbers = #tpu.dot_dimension_numbers<[1], [0], [0], [1], [0, 0, 1, 1], [], []>} : vector<48x24xf32>, vector<24x32xf32>, vector<48x32xf32> -> vector<48x32xf32>
    %c1_70 = arith.constant 1 : index
    %c0_71 = arith.constant 0 : index
    %61 = vector.load %arg13[%c1_70, %c0_71] : memref<50x24xf32, #tpu.memory_space<vmem>>, vector<48x24xf32>
    %c1_72 = arith.constant 1 : index
    %c0_73 = arith.constant 0 : index
    %c0_74 = arith.constant 0 : index
    %62 = vector.load %arg3[%c1_72, %c0_73, %c0_74] : memref<3x24x32xf32, #tpu.memory_space<vmem>>, vector<1x24x32xf32>
    %63 = vector.shape_cast %62 : vector<1x24x32xf32> to vector<24x32xf32>
    %cst_75 = arith.constant dense<0.000000e+00> : vector<48x32xf32>
    %64 = tpu.matmul %61, %63, %cst_75 {dimension_numbers = #tpu.dot_dimension_numbers<[1], [0], [0], [1], [0, 0, 1, 1], [], []>} : vector<48x24xf32>, vector<24x32xf32>, vector<48x32xf32> -> vector<48x32xf32>
    %65 = arith.addf %60, %64 : vector<48x32xf32>
    %c2_76 = arith.constant 2 : index
    %c0_77 = arith.constant 0 : index
    %66 = vector.load %arg13[%c2_76, %c0_77] : memref<50x24xf32, #tpu.memory_space<vmem>>, vector<48x24xf32>
    %c2_78 = arith.constant 2 : index
    %c0_79 = arith.constant 0 : index
    %c0_80 = arith.constant 0 : index
    %67 = vector.load %arg3[%c2_78, %c0_79, %c0_80] : memref<3x24x32xf32, #tpu.memory_space<vmem>>, vector<1x24x32xf32>
    %68 = vector.shape_cast %67 : vector<1x24x32xf32> to vector<24x32xf32>
    %cst_81 = arith.constant dense<0.000000e+00> : vector<48x32xf32>
    %69 = tpu.matmul %66, %68, %cst_81 {dimension_numbers = #tpu.dot_dimension_numbers<[1], [0], [0], [1], [0, 0, 1, 1], [], []>} : vector<48x24xf32>, vector<24x32xf32>, vector<48x32xf32> -> vector<48x32xf32>
    %70 = arith.addf %65, %69 : vector<48x32xf32>
    %c0_82 = arith.constant 0 : index
    %c0_83 = arith.constant 0 : index
    %71 = vector.load %arg4[%c0_82, %c0_83] : memref<96x192xf32, #tpu.memory_space<vmem>>, vector<24x48xf32>
    %cst_84 = arith.constant dense<0.000000e+00> : vector<24x32xf32>
    %72 = tpu.matmul %71, %70, %cst_84 {dimension_numbers = #tpu.dot_dimension_numbers<[1], [0], [0], [1], [0, 0, 1, 1], [], []>} : vector<24x48xf32>, vector<48x32xf32>, vector<24x32xf32> -> vector<24x32xf32>
    %73 = arith.truncf %72 : vector<24x32xf32> to vector<24x32xbf16>
    %c0_85 = arith.constant 0 : index
    %c0_86 = arith.constant 0 : index
    %c0_87 = arith.constant 0 : index
    %74 = vector.load %arg14[%c0_85, %c0_86, %c0_87] : memref<2x24x32xbf16, #tpu.memory_space<vmem>>, vector<1x24x32xbf16>
    %75 = vector.shape_cast %74 : vector<1x24x32xbf16> to vector<24x32xbf16>
    %76 = vector.shape_cast %73 : vector<24x32xbf16> to vector<1x24x32xbf16>
    tpu.vector_store %arg14[%c0_85, %c0_86, %c0_87], %76 {strides = array<i32>} : memref<2x24x32xbf16, #tpu.memory_space<vmem>>, vector<1x24x32xbf16>,
    %c1_88 = arith.constant 1 : index
    %c0_89 = arith.constant 0 : index
    %c0_90 = arith.constant 0 : index
    %77 = vector.load %arg0[%c1_88, %c0_89, %c0_90] : memref<2x192x4xf32, #tpu.memory_space<vmem>>, vector<1x192x4xf32>
    %78 = vector.shape_cast %77 : vector<1x192x4xf32> to vector<192x4xf32>
    %c1_91 = arith.constant 1 : index
    %c0_92 = arith.constant 0 : index
    %79 = vector.load %arg11[%c1_91, %c0_92] : memref<194x4xf32, #tpu.memory_space<vmem>>, vector<192x4xf32>
    tpu.vector_store %arg11[%c1_91, %c0_92], %78 {strides = array<i32>} : memref<194x4xf32, #tpu.memory_space<vmem>>, vector<192x4xf32>,
    %c0_93 = arith.constant 0 : index
    %c0_94 = arith.constant 0 : index
    %80 = vector.load %arg11[%c0_93, %c0_94] : memref<194x4xf32, #tpu.memory_space<vmem>>, vector<192x4xf32>
    %c0_95 = arith.constant 0 : index
    %c0_96 = arith.constant 0 : index
    %c0_97 = arith.constant 0 : index
    %81 = vector.load %arg1[%c0_95, %c0_96, %c0_97] : memref<3x4x16xf32, #tpu.memory_space<vmem>>, vector<1x4x16xf32>
    %82 = vector.shape_cast %81 : vector<1x4x16xf32> to vector<4x16xf32>
    %cst_98 = arith.constant dense<0.000000e+00> : vector<192x16xf32>
    %83 = tpu.matmul %80, %82, %cst_98 {dimension_numbers = #tpu.dot_dimension_numbers<[1], [0], [0], [1], [0, 0, 1, 1], [], []>} : vector<192x4xf32>, vector<4x16xf32>, vector<192x16xf32> -> vector<192x16xf32>
    %c1_99 = arith.constant 1 : index
    %c0_100 = arith.constant 0 : index
    %84 = vector.load %arg11[%c1_99, %c0_100] : memref<194x4xf32, #tpu.memory_space<vmem>>, vector<192x4xf32>
    %c1_101 = arith.constant 1 : index
    %c0_102 = arith.constant 0 : index
    %c0_103 = arith.constant 0 : index
    %85 = vector.load %arg1[%c1_101, %c0_102, %c0_103] : memref<3x4x16xf32, #tpu.memory_space<vmem>>, vector<1x4x16xf32>
    %86 = vector.shape_cast %85 : vector<1x4x16xf32> to vector<4x16xf32>
    %cst_104 = arith.constant dense<0.000000e+00> : vector<192x16xf32>
    %87 = tpu.matmul %84, %86, %cst_104 {dimension_numbers = #tpu.dot_dimension_numbers<[1], [0], [0], [1], [0, 0, 1, 1], [], []>} : vector<192x4xf32>, vector<4x16xf32>, vector<192x16xf32> -> vector<192x16xf32>
    %88 = arith.addf %83, %87 : vector<192x16xf32>
    %c2_105 = arith.constant 2 : index
    %c0_106 = arith.constant 0 : index
    %89 = vector.load %arg11[%c2_105, %c0_106] : memref<194x4xf32, #tpu.memory_space<vmem>>, vector<192x4xf32>
    %c2_107 = arith.constant 2 : index
    %c0_108 = arith.constant 0 : index
    %c0_109 = arith.constant 0 : index
    %90 = vector.load %arg1[%c2_107, %c0_108, %c0_109] : memref<3x4x16xf32, #tpu.memory_space<vmem>>, vector<1x4x16xf32>
    %91 = vector.shape_cast %90 : vector<1x4x16xf32> to vector<4x16xf32>
    %cst_110 = arith.constant dense<0.000000e+00> : vector<192x16xf32>
    %92 = tpu.matmul %89, %91, %cst_110 {dimension_numbers = #tpu.dot_dimension_numbers<[1], [0], [0], [1], [0, 0, 1, 1], [], []>} : vector<192x4xf32>, vector<4x16xf32>, vector<192x16xf32> -> vector<192x16xf32>
    %93 = arith.addf %88, %92 : vector<192x16xf32>
    %cst_111 = arith.constant 5.000000e-02 : f32
    %94 = vector.broadcast %cst_111 : f32 to vector<192x16xf32>
    %95 = arith.mulf %94, %93 : vector<192x16xf32>
    %96 = arith.maximumf %93, %95 : vector<192x16xf32>
    %c0_112 = arith.constant 0 : index
    %c0_113 = arith.constant 0 : index
    %97 = vector.load %arg4[%c0_112, %c0_113] : memref<96x192xf32, #tpu.memory_space<vmem>>, vector<96x192xf32>
    %cst_114 = arith.constant dense<0.000000e+00> : vector<96x16xf32>
    %98 = tpu.matmul %97, %96, %cst_114 {dimension_numbers = #tpu.dot_dimension_numbers<[1], [0], [0], [1], [0, 0, 1, 1], [], []>} : vector<96x192xf32>, vector<192x16xf32>, vector<96x16xf32> -> vector<96x16xf32>
    %c1_115 = arith.constant 1 : index
    %c0_116 = arith.constant 0 : index
    %99 = vector.load %arg12[%c1_115, %c0_116] : memref<98x16xf32, #tpu.memory_space<vmem>>, vector<96x16xf32>
    tpu.vector_store %arg12[%c1_115, %c0_116], %98 {strides = array<i32>} : memref<98x16xf32, #tpu.memory_space<vmem>>, vector<96x16xf32>,
    %c0_117 = arith.constant 0 : index
    %c0_118 = arith.constant 0 : index
    %100 = vector.load %arg12[%c0_117, %c0_118] : memref<98x16xf32, #tpu.memory_space<vmem>>, vector<96x16xf32>
    %c0_119 = arith.constant 0 : index
    %c0_120 = arith.constant 0 : index
    %c0_121 = arith.constant 0 : index
    %101 = vector.load %arg2[%c0_119, %c0_120, %c0_121] : memref<3x16x24xf32, #tpu.memory_space<vmem>>, vector<1x16x24xf32>
    %102 = vector.shape_cast %101 : vector<1x16x24xf32> to vector<16x24xf32>
    %cst_122 = arith.constant dense<0.000000e+00> : vector<96x24xf32>
    %103 = tpu.matmul %100, %102, %cst_122 {dimension_numbers = #tpu.dot_dimension_numbers<[1], [0], [0], [1], [0, 0, 1, 1], [], []>} : vector<96x16xf32>, vector<16x24xf32>, vector<96x24xf32> -> vector<96x24xf32>
    %c1_123 = arith.constant 1 : index
    %c0_124 = arith.constant 0 : index
    %104 = vector.load %arg12[%c1_123, %c0_124] : memref<98x16xf32, #tpu.memory_space<vmem>>, vector<96x16xf32>
    %c1_125 = arith.constant 1 : index
    %c0_126 = arith.constant 0 : index
    %c0_127 = arith.constant 0 : index
    %105 = vector.load %arg2[%c1_125, %c0_126, %c0_127] : memref<3x16x24xf32, #tpu.memory_space<vmem>>, vector<1x16x24xf32>
    %106 = vector.shape_cast %105 : vector<1x16x24xf32> to vector<16x24xf32>
    %cst_128 = arith.constant dense<0.000000e+00> : vector<96x24xf32>
    %107 = tpu.matmul %104, %106, %cst_128 {dimension_numbers = #tpu.dot_dimension_numbers<[1], [0], [0], [1], [0, 0, 1, 1], [], []>} : vector<96x16xf32>, vector<16x24xf32>, vector<96x24xf32> -> vector<96x24xf32>
    %108 = arith.addf %103, %107 : vector<96x24xf32>
    %c2_129 = arith.constant 2 : index
    %c0_130 = arith.constant 0 : index
    %109 = vector.load %arg12[%c2_129, %c0_130] : memref<98x16xf32, #tpu.memory_space<vmem>>, vector<96x16xf32>
    %c2_131 = arith.constant 2 : index
    %c0_132 = arith.constant 0 : index
    %c0_133 = arith.constant 0 : index
    %110 = vector.load %arg2[%c2_131, %c0_132, %c0_133] : memref<3x16x24xf32, #tpu.memory_space<vmem>>, vector<1x16x24xf32>
    %111 = vector.shape_cast %110 : vector<1x16x24xf32> to vector<16x24xf32>
    %cst_134 = arith.constant dense<0.000000e+00> : vector<96x24xf32>
    %112 = tpu.matmul %109, %111, %cst_134 {dimension_numbers = #tpu.dot_dimension_numbers<[1], [0], [0], [1], [0, 0, 1, 1], [], []>} : vector<96x16xf32>, vector<16x24xf32>, vector<96x24xf32> -> vector<96x24xf32>
    %113 = arith.addf %108, %112 : vector<96x24xf32>
    %cst_135 = arith.constant 5.000000e-02 : f32
    %114 = vector.broadcast %cst_135 : f32 to vector<96x24xf32>
    %115 = arith.mulf %114, %113 : vector<96x24xf32>
    %116 = arith.maximumf %113, %115 : vector<96x24xf32>
    %c0_136 = arith.constant 0 : index
    %c0_137 = arith.constant 0 : index
    %117 = vector.load %arg4[%c0_136, %c0_137] : memref<96x192xf32, #tpu.memory_space<vmem>>, vector<48x96xf32>
    %cst_138 = arith.constant dense<0.000000e+00> : vector<48x24xf32>
    %118 = tpu.matmul %117, %116, %cst_138 {dimension_numbers = #tpu.dot_dimension_numbers<[1], [0], [0], [1], [0, 0, 1, 1], [], []>} : vector<48x96xf32>, vector<96x24xf32>, vector<48x24xf32> -> vector<48x24xf32>
    %c1_139 = arith.constant 1 : index
    %c0_140 = arith.constant 0 : index
    %119 = vector.load %arg13[%c1_139, %c0_140] : memref<50x24xf32, #tpu.memory_space<vmem>>, vector<48x24xf32>
    tpu.vector_store %arg13[%c1_139, %c0_140], %118 {strides = array<i32>} : memref<50x24xf32, #tpu.memory_space<vmem>>, vector<48x24xf32>,
    %c0_141 = arith.constant 0 : index
    %c0_142 = arith.constant 0 : index
    %120 = vector.load %arg13[%c0_141, %c0_142] : memref<50x24xf32, #tpu.memory_space<vmem>>, vector<48x24xf32>
    %c0_143 = arith.constant 0 : index
    %c0_144 = arith.constant 0 : index
    %c0_145 = arith.constant 0 : index
    %121 = vector.load %arg3[%c0_143, %c0_144, %c0_145] : memref<3x24x32xf32, #tpu.memory_space<vmem>>, vector<1x24x32xf32>
    %122 = vector.shape_cast %121 : vector<1x24x32xf32> to vector<24x32xf32>
    %cst_146 = arith.constant dense<0.000000e+00> : vector<48x32xf32>
    %123 = tpu.matmul %120, %122, %cst_146 {dimension_numbers = #tpu.dot_dimension_numbers<[1], [0], [0], [1], [0, 0, 1, 1], [], []>} : vector<48x24xf32>, vector<24x32xf32>, vector<48x32xf32> -> vector<48x32xf32>
    %c1_147 = arith.constant 1 : index
    %c0_148 = arith.constant 0 : index
    %124 = vector.load %arg13[%c1_147, %c0_148] : memref<50x24xf32, #tpu.memory_space<vmem>>, vector<48x24xf32>
    %c1_149 = arith.constant 1 : index
    %c0_150 = arith.constant 0 : index
    %c0_151 = arith.constant 0 : index
    %125 = vector.load %arg3[%c1_149, %c0_150, %c0_151] : memref<3x24x32xf32, #tpu.memory_space<vmem>>, vector<1x24x32xf32>
    %126 = vector.shape_cast %125 : vector<1x24x32xf32> to vector<24x32xf32>
    %cst_152 = arith.constant dense<0.000000e+00> : vector<48x32xf32>
    %127 = tpu.matmul %124, %126, %cst_152 {dimension_numbers = #tpu.dot_dimension_numbers<[1], [0], [0], [1], [0, 0, 1, 1], [], []>} : vector<48x24xf32>, vector<24x32xf32>, vector<48x32xf32> -> vector<48x32xf32>
    %128 = arith.addf %123, %127 : vector<48x32xf32>
    %c2_153 = arith.constant 2 : index
    %c0_154 = arith.constant 0 : index
    %129 = vector.load %arg13[%c2_153, %c0_154] : memref<50x24xf32, #tpu.memory_space<vmem>>, vector<48x24xf32>
    %c2_155 = arith.constant 2 : index
    %c0_156 = arith.constant 0 : index
    %c0_157 = arith.constant 0 : index
    %130 = vector.load %arg3[%c2_155, %c0_156, %c0_157] : memref<3x24x32xf32, #tpu.memory_space<vmem>>, vector<1x24x32xf32>
    %131 = vector.shape_cast %130 : vector<1x24x32xf32> to vector<24x32xf32>
    %cst_158 = arith.constant dense<0.000000e+00> : vector<48x32xf32>
    %132 = tpu.matmul %129, %131, %cst_158 {dimension_numbers = #tpu.dot_dimension_numbers<[1], [0], [0], [1], [0, 0, 1, 1], [], []>} : vector<48x24xf32>, vector<24x32xf32>, vector<48x32xf32> -> vector<48x32xf32>
    %133 = arith.addf %128, %132 : vector<48x32xf32>
    %c0_159 = arith.constant 0 : index
    %c0_160 = arith.constant 0 : index
    %134 = vector.load %arg4[%c0_159, %c0_160] : memref<96x192xf32, #tpu.memory_space<vmem>>, vector<24x48xf32>
    %cst_161 = arith.constant dense<0.000000e+00> : vector<24x32xf32>
    %135 = tpu.matmul %134, %133, %cst_161 {dimension_numbers = #tpu.dot_dimension_numbers<[1], [0], [0], [1], [0, 0, 1, 1], [], []>} : vector<24x48xf32>, vector<48x32xf32>, vector<24x32xf32> -> vector<24x32xf32>
    %136 = arith.truncf %135 : vector<24x32xf32> to vector<24x32xbf16>
    %c1_162 = arith.constant 1 : index
    %c0_163 = arith.constant 0 : index
    %c0_164 = arith.constant 0 : index
    %137 = vector.load %arg14[%c1_162, %c0_163, %c0_164] : memref<2x24x32xbf16, #tpu.memory_space<vmem>>, vector<1x24x32xbf16>
    %138 = vector.shape_cast %137 : vector<1x24x32xbf16> to vector<24x32xbf16>
    %139 = vector.shape_cast %136 : vector<24x32xbf16> to vector<1x24x32xbf16>
    tpu.vector_store %arg14[%c1_162, %c0_163, %c0_164], %139 {strides = array<i32>} : memref<2x24x32xbf16, #tpu.memory_space<vmem>>, vector<1x24x32xbf16>,
    %c1_i32 = arith.constant 1 : i32
    %140 = tpu.memref_slice %arg10[%c1_i32] : memref<2x!tpu.dma_semaphore, #tpu.memory_space<semaphore_mem>> -> memref<1x!tpu.dma_semaphore, #tpu.memory_space<semaphore_mem>>
    %141 = tpu.memref_squeeze %140 : memref<1x!tpu.dma_semaphore, #tpu.memory_space<semaphore_mem>> -> memref<!tpu.dma_semaphore, #tpu.memory_space<semaphore_mem>>
    tpu.enqueue_dma source(%arg6 : memref<1024x1024xbf16, #tpu.memory_space<any>>) target(%arg9 : memref<1024x1024xbf16, #tpu.memory_space<vmem>>) target_semaphore(%141 : memref<!tpu.dma_semaphore, #tpu.memory_space<semaphore_mem>>)
    %c0_i32_165 = arith.constant 0 : i32
    %142 = tpu.memref_slice %arg10[%c0_i32_165] : memref<2x!tpu.dma_semaphore, #tpu.memory_space<semaphore_mem>> -> memref<1x!tpu.dma_semaphore, #tpu.memory_space<semaphore_mem>>
    %143 = tpu.memref_squeeze %142 : memref<1x!tpu.dma_semaphore, #tpu.memory_space<semaphore_mem>> -> memref<!tpu.dma_semaphore, #tpu.memory_space<semaphore_mem>>
    tpu.wait_dma2 semaphore(%143 : memref<!tpu.dma_semaphore, #tpu.memory_space<semaphore_mem>>) src(%arg5 : memref<24x32x1024xbf16, #tpu.memory_space<any>>) dst(%arg8 : memref<24x32x1024xbf16, #tpu.memory_space<vmem>>)
    %cst_166 = arith.constant 0.000000e+00 : f32
    %144 = vector.broadcast %cst_166 : f32 to vector<2x1024xf32>
    %c0_167 = arith.constant 0 : index
    %c0_168 = arith.constant 0 : index
    %c0_169 = arith.constant 0 : index
    %145 = vector.load %arg14[%c0_167, %c0_168, %c0_169] : memref<2x24x32xbf16, #tpu.memory_space<vmem>>, vector<2x1x32xbf16>
    %146 = vector.shape_cast %145 : vector<2x1x32xbf16> to vector<2x32xbf16>
    %c0_170 = arith.constant 0 : index
    %c0_171 = arith.constant 0 : index
    %c0_172 = arith.constant 0 : index
    %147 = vector.load %arg8[%c0_170, %c0_171, %c0_172] : memref<24x32x1024xbf16, #tpu.memory_space<vmem>>, vector<1x32x1024xbf16>
    %148 = vector.shape_cast %147 : vector<1x32x1024xbf16> to vector<32x1024xbf16>
    %cst_173 = arith.constant dense<0.000000e+00> : vector<2x1024xf32>
    %149 = tpu.matmul %146, %148, %cst_173 {dimension_numbers = #tpu.dot_dimension_numbers<[1], [0], [0], [1], [0, 0, 1, 1], [], []>} : vector<2x32xbf16>, vector<32x1024xbf16>, vector<2x1024xf32> -> vector<2x1024xf32>
    %150 = arith.addf %144, %149 : vector<2x1024xf32>
    %c0_174 = arith.constant 0 : index
    %c1_175 = arith.constant 1 : index
    %c0_176 = arith.constant 0 : index
    %151 = vector.load %arg14[%c0_174, %c1_175, %c0_176] : memref<2x24x32xbf16, #tpu.memory_space<vmem>>, vector<2x1x32xbf16>
    %152 = vector.shape_cast %151 : vector<2x1x32xbf16> to vector<2x32xbf16>
    %c1_177 = arith.constant 1 : index
    %c0_178 = arith.constant 0 : index
    %c0_179 = arith.constant 0 : index
    %153 = vector.load %arg8[%c1_177, %c0_178, %c0_179] : memref<24x32x1024xbf16, #tpu.memory_space<vmem>>, vector<1x32x1024xbf16>
    %154 = vector.shape_cast %153 : vector<1x32x1024xbf16> to vector<32x1024xbf16>
    %cst_180 = arith.constant dense<0.000000e+00> : vector<2x1024xf32>
    %155 = tpu.matmul %152, %154, %cst_180 {dimension_numbers = #tpu.dot_dimension_numbers<[1], [0], [0], [1], [0, 0, 1, 1], [], []>} : vector<2x32xbf16>, vector<32x1024xbf16>, vector<2x1024xf32> -> vector<2x1024xf32>
    %156 = arith.addf %150, %155 : vector<2x1024xf32>
    %c0_181 = arith.constant 0 : index
    %c2_182 = arith.constant 2 : index
    %c0_183 = arith.constant 0 : index
    %157 = vector.load %arg14[%c0_181, %c2_182, %c0_183] : memref<2x24x32xbf16, #tpu.memory_space<vmem>>, vector<2x1x32xbf16>
    %158 = vector.shape_cast %157 : vector<2x1x32xbf16> to vector<2x32xbf16>
    %c2_184 = arith.constant 2 : index
    %c0_185 = arith.constant 0 : index
    %c0_186 = arith.constant 0 : index
    %159 = vector.load %arg8[%c2_184, %c0_185, %c0_186] : memref<24x32x1024xbf16, #tpu.memory_space<vmem>>, vector<1x32x1024xbf16>
    %160 = vector.shape_cast %159 : vector<1x32x1024xbf16> to vector<32x1024xbf16>
    %cst_187 = arith.constant dense<0.000000e+00> : vector<2x1024xf32>
    %161 = tpu.matmul %158, %160, %cst_187 {dimension_numbers = #tpu.dot_dimension_numbers<[1], [0], [0], [1], [0, 0, 1, 1], [], []>} : vector<2x32xbf16>, vector<32x1024xbf16>, vector<2x1024xf32> -> vector<2x1024xf32>
    %162 = arith.addf %156, %161 : vector<2x1024xf32>
    %c0_188 = arith.constant 0 : index
    %c3 = arith.constant 3 : index
    %c0_189 = arith.constant 0 : index
    %163 = vector.load %arg14[%c0_188, %c3, %c0_189] : memref<2x24x32xbf16, #tpu.memory_space<vmem>>, vector<2x1x32xbf16>
    %164 = vector.shape_cast %163 : vector<2x1x32xbf16> to vector<2x32xbf16>
    %c3_190 = arith.constant 3 : index
    %c0_191 = arith.constant 0 : index
    %c0_192 = arith.constant 0 : index
    %165 = vector.load %arg8[%c3_190, %c0_191, %c0_192] : memref<24x32x1024xbf16, #tpu.memory_space<vmem>>, vector<1x32x1024xbf16>
    %166 = vector.shape_cast %165 : vector<1x32x1024xbf16> to vector<32x1024xbf16>
    %cst_193 = arith.constant dense<0.000000e+00> : vector<2x1024xf32>
    %167 = tpu.matmul %164, %166, %cst_193 {dimension_numbers = #tpu.dot_dimension_numbers<[1], [0], [0], [1], [0, 0, 1, 1], [], []>} : vector<2x32xbf16>, vector<32x1024xbf16>, vector<2x1024xf32> -> vector<2x1024xf32>
    %168 = arith.addf %162, %167 : vector<2x1024xf32>
    %c0_194 = arith.constant 0 : index
    %c4 = arith.constant 4 : index
    %c0_195 = arith.constant 0 : index
    %169 = vector.load %arg14[%c0_194, %c4, %c0_195] : memref<2x24x32xbf16, #tpu.memory_space<vmem>>, vector<2x1x32xbf16>
    %170 = vector.shape_cast %169 : vector<2x1x32xbf16> to vector<2x32xbf16>
    %c4_196 = arith.constant 4 : index
    %c0_197 = arith.constant 0 : index
    %c0_198 = arith.constant 0 : index
    %171 = vector.load %arg8[%c4_196, %c0_197, %c0_198] : memref<24x32x1024xbf16, #tpu.memory_space<vmem>>, vector<1x32x1024xbf16>
    %172 = vector.shape_cast %171 : vector<1x32x1024xbf16> to vector<32x1024xbf16>
    %cst_199 = arith.constant dense<0.000000e+00> : vector<2x1024xf32>
    %173 = tpu.matmul %170, %172, %cst_199 {dimension_numbers = #tpu.dot_dimension_numbers<[1], [0], [0], [1], [0, 0, 1, 1], [], []>} : vector<2x32xbf16>, vector<32x1024xbf16>, vector<2x1024xf32> -> vector<2x1024xf32>
    %174 = arith.addf %168, %173 : vector<2x1024xf32>
    %c0_200 = arith.constant 0 : index
    %c5 = arith.constant 5 : index
    %c0_201 = arith.constant 0 : index
    %175 = vector.load %arg14[%c0_200, %c5, %c0_201] : memref<2x24x32xbf16, #tpu.memory_space<vmem>>, vector<2x1x32xbf16>
    %176 = vector.shape_cast %175 : vector<2x1x32xbf16> to vector<2x32xbf16>
    %c5_202 = arith.constant 5 : index
    %c0_203 = arith.constant 0 : index
    %c0_204 = arith.constant 0 : index
    %177 = vector.load %arg8[%c5_202, %c0_203, %c0_204] : memref<24x32x1024xbf16, #tpu.memory_space<vmem>>, vector<1x32x1024xbf16>
    %178 = vector.shape_cast %177 : vector<1x32x1024xbf16> to vector<32x1024xbf16>
    %cst_205 = arith.constant dense<0.000000e+00> : vector<2x1024xf32>
    %179 = tpu.matmul %176, %178, %cst_205 {dimension_numbers = #tpu.dot_dimension_numbers<[1], [0], [0], [1], [0, 0, 1, 1], [], []>} : vector<2x32xbf16>, vector<32x1024xbf16>, vector<2x1024xf32> -> vector<2x1024xf32>
    %180 = arith.addf %174, %179 : vector<2x1024xf32>
    %c0_206 = arith.constant 0 : index
    %c6 = arith.constant 6 : index
    %c0_207 = arith.constant 0 : index
    %181 = vector.load %arg14[%c0_206, %c6, %c0_207] : memref<2x24x32xbf16, #tpu.memory_space<vmem>>, vector<2x1x32xbf16>
    %182 = vector.shape_cast %181 : vector<2x1x32xbf16> to vector<2x32xbf16>
    %c6_208 = arith.constant 6 : index
    %c0_209 = arith.constant 0 : index
    %c0_210 = arith.constant 0 : index
    %183 = vector.load %arg8[%c6_208, %c0_209, %c0_210] : memref<24x32x1024xbf16, #tpu.memory_space<vmem>>, vector<1x32x1024xbf16>
    %184 = vector.shape_cast %183 : vector<1x32x1024xbf16> to vector<32x1024xbf16>
    %cst_211 = arith.constant dense<0.000000e+00> : vector<2x1024xf32>
    %185 = tpu.matmul %182, %184, %cst_211 {dimension_numbers = #tpu.dot_dimension_numbers<[1], [0], [0], [1], [0, 0, 1, 1], [], []>} : vector<2x32xbf16>, vector<32x1024xbf16>, vector<2x1024xf32> -> vector<2x1024xf32>
    %186 = arith.addf %180, %185 : vector<2x1024xf32>
    %c0_212 = arith.constant 0 : index
    %c7 = arith.constant 7 : index
    %c0_213 = arith.constant 0 : index
    %187 = vector.load %arg14[%c0_212, %c7, %c0_213] : memref<2x24x32xbf16, #tpu.memory_space<vmem>>, vector<2x1x32xbf16>
    %188 = vector.shape_cast %187 : vector<2x1x32xbf16> to vector<2x32xbf16>
    %c7_214 = arith.constant 7 : index
    %c0_215 = arith.constant 0 : index
    %c0_216 = arith.constant 0 : index
    %189 = vector.load %arg8[%c7_214, %c0_215, %c0_216] : memref<24x32x1024xbf16, #tpu.memory_space<vmem>>, vector<1x32x1024xbf16>
    %190 = vector.shape_cast %189 : vector<1x32x1024xbf16> to vector<32x1024xbf16>
    %cst_217 = arith.constant dense<0.000000e+00> : vector<2x1024xf32>
    %191 = tpu.matmul %188, %190, %cst_217 {dimension_numbers = #tpu.dot_dimension_numbers<[1], [0], [0], [1], [0, 0, 1, 1], [], []>} : vector<2x32xbf16>, vector<32x1024xbf16>, vector<2x1024xf32> -> vector<2x1024xf32>
    %192 = arith.addf %186, %191 : vector<2x1024xf32>
    %c0_218 = arith.constant 0 : index
    %c8 = arith.constant 8 : index
    %c0_219 = arith.constant 0 : index
    %193 = vector.load %arg14[%c0_218, %c8, %c0_219] : memref<2x24x32xbf16, #tpu.memory_space<vmem>>, vector<2x1x32xbf16>
    %194 = vector.shape_cast %193 : vector<2x1x32xbf16> to vector<2x32xbf16>
    %c8_220 = arith.constant 8 : index
    %c0_221 = arith.constant 0 : index
    %c0_222 = arith.constant 0 : index
    %195 = vector.load %arg8[%c8_220, %c0_221, %c0_222] : memref<24x32x1024xbf16, #tpu.memory_space<vmem>>, vector<1x32x1024xbf16>
    %196 = vector.shape_cast %195 : vector<1x32x1024xbf16> to vector<32x1024xbf16>
    %cst_223 = arith.constant dense<0.000000e+00> : vector<2x1024xf32>
    %197 = tpu.matmul %194, %196, %cst_223 {dimension_numbers = #tpu.dot_dimension_numbers<[1], [0], [0], [1], [0, 0, 1, 1], [], []>} : vector<2x32xbf16>, vector<32x1024xbf16>, vector<2x1024xf32> -> vector<2x1024xf32>
    %198 = arith.addf %192, %197 : vector<2x1024xf32>
    %c0_224 = arith.constant 0 : index
    %c9 = arith.constant 9 : index
    %c0_225 = arith.constant 0 : index
    %199 = vector.load %arg14[%c0_224, %c9, %c0_225] : memref<2x24x32xbf16, #tpu.memory_space<vmem>>, vector<2x1x32xbf16>
    %200 = vector.shape_cast %199 : vector<2x1x32xbf16> to vector<2x32xbf16>
    %c9_226 = arith.constant 9 : index
    %c0_227 = arith.constant 0 : index
    %c0_228 = arith.constant 0 : index
    %201 = vector.load %arg8[%c9_226, %c0_227, %c0_228] : memref<24x32x1024xbf16, #tpu.memory_space<vmem>>, vector<1x32x1024xbf16>
    %202 = vector.shape_cast %201 : vector<1x32x1024xbf16> to vector<32x1024xbf16>
    %cst_229 = arith.constant dense<0.000000e+00> : vector<2x1024xf32>
    %203 = tpu.matmul %200, %202, %cst_229 {dimension_numbers = #tpu.dot_dimension_numbers<[1], [0], [0], [1], [0, 0, 1, 1], [], []>} : vector<2x32xbf16>, vector<32x1024xbf16>, vector<2x1024xf32> -> vector<2x1024xf32>
    %204 = arith.addf %198, %203 : vector<2x1024xf32>
    %c0_230 = arith.constant 0 : index
    %c10 = arith.constant 10 : index
    %c0_231 = arith.constant 0 : index
    %205 = vector.load %arg14[%c0_230, %c10, %c0_231] : memref<2x24x32xbf16, #tpu.memory_space<vmem>>, vector<2x1x32xbf16>
    %206 = vector.shape_cast %205 : vector<2x1x32xbf16> to vector<2x32xbf16>
    %c10_232 = arith.constant 10 : index
    %c0_233 = arith.constant 0 : index
    %c0_234 = arith.constant 0 : index
    %207 = vector.load %arg8[%c10_232, %c0_233, %c0_234] : memref<24x32x1024xbf16, #tpu.memory_space<vmem>>, vector<1x32x1024xbf16>
    %208 = vector.shape_cast %207 : vector<1x32x1024xbf16> to vector<32x1024xbf16>
    %cst_235 = arith.constant dense<0.000000e+00> : vector<2x1024xf32>
    %209 = tpu.matmul %206, %208, %cst_235 {dimension_numbers = #tpu.dot_dimension_numbers<[1], [0], [0], [1], [0, 0, 1, 1], [], []>} : vector<2x32xbf16>, vector<32x1024xbf16>, vector<2x1024xf32> -> vector<2x1024xf32>
    %210 = arith.addf %204, %209 : vector<2x1024xf32>
    %c0_236 = arith.constant 0 : index
    %c11 = arith.constant 11 : index
    %c0_237 = arith.constant 0 : index
    %211 = vector.load %arg14[%c0_236, %c11, %c0_237] : memref<2x24x32xbf16, #tpu.memory_space<vmem>>, vector<2x1x32xbf16>
    %212 = vector.shape_cast %211 : vector<2x1x32xbf16> to vector<2x32xbf16>
    %c11_238 = arith.constant 11 : index
    %c0_239 = arith.constant 0 : index
    %c0_240 = arith.constant 0 : index
    %213 = vector.load %arg8[%c11_238, %c0_239, %c0_240] : memref<24x32x1024xbf16, #tpu.memory_space<vmem>>, vector<1x32x1024xbf16>
    %214 = vector.shape_cast %213 : vector<1x32x1024xbf16> to vector<32x1024xbf16>
    %cst_241 = arith.constant dense<0.000000e+00> : vector<2x1024xf32>
    %215 = tpu.matmul %212, %214, %cst_241 {dimension_numbers = #tpu.dot_dimension_numbers<[1], [0], [0], [1], [0, 0, 1, 1], [], []>} : vector<2x32xbf16>, vector<32x1024xbf16>, vector<2x1024xf32> -> vector<2x1024xf32>
    %216 = arith.addf %210, %215 : vector<2x1024xf32>
    %c0_242 = arith.constant 0 : index
    %c12 = arith.constant 12 : index
    %c0_243 = arith.constant 0 : index
    %217 = vector.load %arg14[%c0_242, %c12, %c0_243] : memref<2x24x32xbf16, #tpu.memory_space<vmem>>, vector<2x1x32xbf16>
    %218 = vector.shape_cast %217 : vector<2x1x32xbf16> to vector<2x32xbf16>
    %c12_244 = arith.constant 12 : index
    %c0_245 = arith.constant 0 : index
    %c0_246 = arith.constant 0 : index
    %219 = vector.load %arg8[%c12_244, %c0_245, %c0_246] : memref<24x32x1024xbf16, #tpu.memory_space<vmem>>, vector<1x32x1024xbf16>
    %220 = vector.shape_cast %219 : vector<1x32x1024xbf16> to vector<32x1024xbf16>
    %cst_247 = arith.constant dense<0.000000e+00> : vector<2x1024xf32>
    %221 = tpu.matmul %218, %220, %cst_247 {dimension_numbers = #tpu.dot_dimension_numbers<[1], [0], [0], [1], [0, 0, 1, 1], [], []>} : vector<2x32xbf16>, vector<32x1024xbf16>, vector<2x1024xf32> -> vector<2x1024xf32>
    %222 = arith.addf %216, %221 : vector<2x1024xf32>
    %c0_248 = arith.constant 0 : index
    %c13 = arith.constant 13 : index
    %c0_249 = arith.constant 0 : index
    %223 = vector.load %arg14[%c0_248, %c13, %c0_249] : memref<2x24x32xbf16, #tpu.memory_space<vmem>>, vector<2x1x32xbf16>
    %224 = vector.shape_cast %223 : vector<2x1x32xbf16> to vector<2x32xbf16>
    %c13_250 = arith.constant 13 : index
    %c0_251 = arith.constant 0 : index
    %c0_252 = arith.constant 0 : index
    %225 = vector.load %arg8[%c13_250, %c0_251, %c0_252] : memref<24x32x1024xbf16, #tpu.memory_space<vmem>>, vector<1x32x1024xbf16>
    %226 = vector.shape_cast %225 : vector<1x32x1024xbf16> to vector<32x1024xbf16>
    %cst_253 = arith.constant dense<0.000000e+00> : vector<2x1024xf32>
    %227 = tpu.matmul %224, %226, %cst_253 {dimension_numbers = #tpu.dot_dimension_numbers<[1], [0], [0], [1], [0, 0, 1, 1], [], []>} : vector<2x32xbf16>, vector<32x1024xbf16>, vector<2x1024xf32> -> vector<2x1024xf32>
    %228 = arith.addf %222, %227 : vector<2x1024xf32>
    %c0_254 = arith.constant 0 : index
    %c14 = arith.constant 14 : index
    %c0_255 = arith.constant 0 : index
    %229 = vector.load %arg14[%c0_254, %c14, %c0_255] : memref<2x24x32xbf16, #tpu.memory_space<vmem>>, vector<2x1x32xbf16>
    %230 = vector.shape_cast %229 : vector<2x1x32xbf16> to vector<2x32xbf16>
    %c14_256 = arith.constant 14 : index
    %c0_257 = arith.constant 0 : index
    %c0_258 = arith.constant 0 : index
    %231 = vector.load %arg8[%c14_256, %c0_257, %c0_258] : memref<24x32x1024xbf16, #tpu.memory_space<vmem>>, vector<1x32x1024xbf16>
    %232 = vector.shape_cast %231 : vector<1x32x1024xbf16> to vector<32x1024xbf16>
    %cst_259 = arith.constant dense<0.000000e+00> : vector<2x1024xf32>
    %233 = tpu.matmul %230, %232, %cst_259 {dimension_numbers = #tpu.dot_dimension_numbers<[1], [0], [0], [1], [0, 0, 1, 1], [], []>} : vector<2x32xbf16>, vector<32x1024xbf16>, vector<2x1024xf32> -> vector<2x1024xf32>
    %234 = arith.addf %228, %233 : vector<2x1024xf32>
    %c0_260 = arith.constant 0 : index
    %c15 = arith.constant 15 : index
    %c0_261 = arith.constant 0 : index
    %235 = vector.load %arg14[%c0_260, %c15, %c0_261] : memref<2x24x32xbf16, #tpu.memory_space<vmem>>, vector<2x1x32xbf16>
    %236 = vector.shape_cast %235 : vector<2x1x32xbf16> to vector<2x32xbf16>
    %c15_262 = arith.constant 15 : index
    %c0_263 = arith.constant 0 : index
    %c0_264 = arith.constant 0 : index
    %237 = vector.load %arg8[%c15_262, %c0_263, %c0_264] : memref<24x32x1024xbf16, #tpu.memory_space<vmem>>, vector<1x32x1024xbf16>
    %238 = vector.shape_cast %237 : vector<1x32x1024xbf16> to vector<32x1024xbf16>
    %cst_265 = arith.constant dense<0.000000e+00> : vector<2x1024xf32>
    %239 = tpu.matmul %236, %238, %cst_265 {dimension_numbers = #tpu.dot_dimension_numbers<[1], [0], [0], [1], [0, 0, 1, 1], [], []>} : vector<2x32xbf16>, vector<32x1024xbf16>, vector<2x1024xf32> -> vector<2x1024xf32>
    %240 = arith.addf %234, %239 : vector<2x1024xf32>
    %c0_266 = arith.constant 0 : index
    %c16 = arith.constant 16 : index
    %c0_267 = arith.constant 0 : index
    %241 = vector.load %arg14[%c0_266, %c16, %c0_267] : memref<2x24x32xbf16, #tpu.memory_space<vmem>>, vector<2x1x32xbf16>
    %242 = vector.shape_cast %241 : vector<2x1x32xbf16> to vector<2x32xbf16>
    %c16_268 = arith.constant 16 : index
    %c0_269 = arith.constant 0 : index
    %c0_270 = arith.constant 0 : index
    %243 = vector.load %arg8[%c16_268, %c0_269, %c0_270] : memref<24x32x1024xbf16, #tpu.memory_space<vmem>>, vector<1x32x1024xbf16>
    %244 = vector.shape_cast %243 : vector<1x32x1024xbf16> to vector<32x1024xbf16>
    %cst_271 = arith.constant dense<0.000000e+00> : vector<2x1024xf32>
    %245 = tpu.matmul %242, %244, %cst_271 {dimension_numbers = #tpu.dot_dimension_numbers<[1], [0], [0], [1], [0, 0, 1, 1], [], []>} : vector<2x32xbf16>, vector<32x1024xbf16>, vector<2x1024xf32> -> vector<2x1024xf32>
    %246 = arith.addf %240, %245 : vector<2x1024xf32>
    %c0_272 = arith.constant 0 : index
    %c17 = arith.constant 17 : index
    %c0_273 = arith.constant 0 : index
    %247 = vector.load %arg14[%c0_272, %c17, %c0_273] : memref<2x24x32xbf16, #tpu.memory_space<vmem>>, vector<2x1x32xbf16>
    %248 = vector.shape_cast %247 : vector<2x1x32xbf16> to vector<2x32xbf16>
    %c17_274 = arith.constant 17 : index
    %c0_275 = arith.constant 0 : index
    %c0_276 = arith.constant 0 : index
    %249 = vector.load %arg8[%c17_274, %c0_275, %c0_276] : memref<24x32x1024xbf16, #tpu.memory_space<vmem>>, vector<1x32x1024xbf16>
    %250 = vector.shape_cast %249 : vector<1x32x1024xbf16> to vector<32x1024xbf16>
    %cst_277 = arith.constant dense<0.000000e+00> : vector<2x1024xf32>
    %251 = tpu.matmul %248, %250, %cst_277 {dimension_numbers = #tpu.dot_dimension_numbers<[1], [0], [0], [1], [0, 0, 1, 1], [], []>} : vector<2x32xbf16>, vector<32x1024xbf16>, vector<2x1024xf32> -> vector<2x1024xf32>
    %252 = arith.addf %246, %251 : vector<2x1024xf32>
    %c0_278 = arith.constant 0 : index
    %c18 = arith.constant 18 : index
    %c0_279 = arith.constant 0 : index
    %253 = vector.load %arg14[%c0_278, %c18, %c0_279] : memref<2x24x32xbf16, #tpu.memory_space<vmem>>, vector<2x1x32xbf16>
    %254 = vector.shape_cast %253 : vector<2x1x32xbf16> to vector<2x32xbf16>
    %c18_280 = arith.constant 18 : index
    %c0_281 = arith.constant 0 : index
    %c0_282 = arith.constant 0 : index
    %255 = vector.load %arg8[%c18_280, %c0_281, %c0_282] : memref<24x32x1024xbf16, #tpu.memory_space<vmem>>, vector<1x32x1024xbf16>
    %256 = vector.shape_cast %255 : vector<1x32x1024xbf16> to vector<32x1024xbf16>
    %cst_283 = arith.constant dense<0.000000e+00> : vector<2x1024xf32>
    %257 = tpu.matmul %254, %256, %cst_283 {dimension_numbers = #tpu.dot_dimension_numbers<[1], [0], [0], [1], [0, 0, 1, 1], [], []>} : vector<2x32xbf16>, vector<32x1024xbf16>, vector<2x1024xf32> -> vector<2x1024xf32>
    %258 = arith.addf %252, %257 : vector<2x1024xf32>
    %c0_284 = arith.constant 0 : index
    %c19 = arith.constant 19 : index
    %c0_285 = arith.constant 0 : index
    %259 = vector.load %arg14[%c0_284, %c19, %c0_285] : memref<2x24x32xbf16, #tpu.memory_space<vmem>>, vector<2x1x32xbf16>
    %260 = vector.shape_cast %259 : vector<2x1x32xbf16> to vector<2x32xbf16>
    %c19_286 = arith.constant 19 : index
    %c0_287 = arith.constant 0 : index
    %c0_288 = arith.constant 0 : index
    %261 = vector.load %arg8[%c19_286, %c0_287, %c0_288] : memref<24x32x1024xbf16, #tpu.memory_space<vmem>>, vector<1x32x1024xbf16>
    %262 = vector.shape_cast %261 : vector<1x32x1024xbf16> to vector<32x1024xbf16>
    %cst_289 = arith.constant dense<0.000000e+00> : vector<2x1024xf32>
    %263 = tpu.matmul %260, %262, %cst_289 {dimension_numbers = #tpu.dot_dimension_numbers<[1], [0], [0], [1], [0, 0, 1, 1], [], []>} : vector<2x32xbf16>, vector<32x1024xbf16>, vector<2x1024xf32> -> vector<2x1024xf32>
    %264 = arith.addf %258, %263 : vector<2x1024xf32>
    %c0_290 = arith.constant 0 : index
    %c20 = arith.constant 20 : index
    %c0_291 = arith.constant 0 : index
    %265 = vector.load %arg14[%c0_290, %c20, %c0_291] : memref<2x24x32xbf16, #tpu.memory_space<vmem>>, vector<2x1x32xbf16>
    %266 = vector.shape_cast %265 : vector<2x1x32xbf16> to vector<2x32xbf16>
    %c20_292 = arith.constant 20 : index
    %c0_293 = arith.constant 0 : index
    %c0_294 = arith.constant 0 : index
    %267 = vector.load %arg8[%c20_292, %c0_293, %c0_294] : memref<24x32x1024xbf16, #tpu.memory_space<vmem>>, vector<1x32x1024xbf16>
    %268 = vector.shape_cast %267 : vector<1x32x1024xbf16> to vector<32x1024xbf16>
    %cst_295 = arith.constant dense<0.000000e+00> : vector<2x1024xf32>
    %269 = tpu.matmul %266, %268, %cst_295 {dimension_numbers = #tpu.dot_dimension_numbers<[1], [0], [0], [1], [0, 0, 1, 1], [], []>} : vector<2x32xbf16>, vector<32x1024xbf16>, vector<2x1024xf32> -> vector<2x1024xf32>
    %270 = arith.addf %264, %269 : vector<2x1024xf32>
    %c0_296 = arith.constant 0 : index
    %c21 = arith.constant 21 : index
    %c0_297 = arith.constant 0 : index
    %271 = vector.load %arg14[%c0_296, %c21, %c0_297] : memref<2x24x32xbf16, #tpu.memory_space<vmem>>, vector<2x1x32xbf16>
    %272 = vector.shape_cast %271 : vector<2x1x32xbf16> to vector<2x32xbf16>
    %c21_298 = arith.constant 21 : index
    %c0_299 = arith.constant 0 : index
    %c0_300 = arith.constant 0 : index
    %273 = vector.load %arg8[%c21_298, %c0_299, %c0_300] : memref<24x32x1024xbf16, #tpu.memory_space<vmem>>, vector<1x32x1024xbf16>
    %274 = vector.shape_cast %273 : vector<1x32x1024xbf16> to vector<32x1024xbf16>
    %cst_301 = arith.constant dense<0.000000e+00> : vector<2x1024xf32>
    %275 = tpu.matmul %272, %274, %cst_301 {dimension_numbers = #tpu.dot_dimension_numbers<[1], [0], [0], [1], [0, 0, 1, 1], [], []>} : vector<2x32xbf16>, vector<32x1024xbf16>, vector<2x1024xf32> -> vector<2x1024xf32>
    %276 = arith.addf %270, %275 : vector<2x1024xf32>
    %c0_302 = arith.constant 0 : index
    %c22 = arith.constant 22 : index
    %c0_303 = arith.constant 0 : index
    %277 = vector.load %arg14[%c0_302, %c22, %c0_303] : memref<2x24x32xbf16, #tpu.memory_space<vmem>>, vector<2x1x32xbf16>
    %278 = vector.shape_cast %277 : vector<2x1x32xbf16> to vector<2x32xbf16>
    %c22_304 = arith.constant 22 : index
    %c0_305 = arith.constant 0 : index
    %c0_306 = arith.constant 0 : index
    %279 = vector.load %arg8[%c22_304, %c0_305, %c0_306] : memref<24x32x1024xbf16, #tpu.memory_space<vmem>>, vector<1x32x1024xbf16>
    %280 = vector.shape_cast %279 : vector<1x32x1024xbf16> to vector<32x1024xbf16>
    %cst_307 = arith.constant dense<0.000000e+00> : vector<2x1024xf32>
    %281 = tpu.matmul %278, %280, %cst_307 {dimension_numbers = #tpu.dot_dimension_numbers<[1], [0], [0], [1], [0, 0, 1, 1], [], []>} : vector<2x32xbf16>, vector<32x1024xbf16>, vector<2x1024xf32> -> vector<2x1024xf32>
    %282 = arith.addf %276, %281 : vector<2x1024xf32>
    %c0_308 = arith.constant 0 : index
    %c23 = arith.constant 23 : index
    %c0_309 = arith.constant 0 : index
    %283 = vector.load %arg14[%c0_308, %c23, %c0_309] : memref<2x24x32xbf16, #tpu.memory_space<vmem>>, vector<2x1x32xbf16>
    %284 = vector.shape_cast %283 : vector<2x1x32xbf16> to vector<2x32xbf16>
    %c23_310 = arith.constant 23 : index
    %c0_311 = arith.constant 0 : index
    %c0_312 = arith.constant 0 : index
    %285 = vector.load %arg8[%c23_310, %c0_311, %c0_312] : memref<24x32x1024xbf16, #tpu.memory_space<vmem>>, vector<1x32x1024xbf16>
    %286 = vector.shape_cast %285 : vector<1x32x1024xbf16> to vector<32x1024xbf16>
    %cst_313 = arith.constant dense<0.000000e+00> : vector<2x1024xf32>
    %287 = tpu.matmul %284, %286, %cst_313 {dimension_numbers = #tpu.dot_dimension_numbers<[1], [0], [0], [1], [0, 0, 1, 1], [], []>} : vector<2x32xbf16>, vector<32x1024xbf16>, vector<2x1024xf32> -> vector<2x1024xf32>
    %288 = arith.addf %282, %287 : vector<2x1024xf32>
    %cst_314 = arith.constant 5.000000e-02 : f32
    %289 = vector.broadcast %cst_314 : f32 to vector<2x1024xf32>
    %290 = arith.mulf %289, %288 : vector<2x1024xf32>
    %291 = arith.maximumf %288, %290 : vector<2x1024xf32>
    %c1_i32_315 = arith.constant 1 : i32
    %292 = tpu.memref_slice %arg10[%c1_i32_315] : memref<2x!tpu.dma_semaphore, #tpu.memory_space<semaphore_mem>> -> memref<1x!tpu.dma_semaphore, #tpu.memory_space<semaphore_mem>>
    %293 = tpu.memref_squeeze %292 : memref<1x!tpu.dma_semaphore, #tpu.memory_space<semaphore_mem>> -> memref<!tpu.dma_semaphore, #tpu.memory_space<semaphore_mem>>
    tpu.wait_dma2 semaphore(%293 : memref<!tpu.dma_semaphore, #tpu.memory_space<semaphore_mem>>) src(%arg6 : memref<1024x1024xbf16, #tpu.memory_space<any>>) dst(%arg9 : memref<1024x1024xbf16, #tpu.memory_space<vmem>>)
    %294 = arith.truncf %291 : vector<2x1024xf32> to vector<2x1024xbf16>
    %c0_316 = arith.constant 0 : index
    %c0_317 = arith.constant 0 : index
    %295 = vector.load %arg9[%c0_316, %c0_317] : memref<1024x1024xbf16, #tpu.memory_space<vmem>>, vector<1024x1024xbf16>
    %cst_318 = arith.constant dense<0.000000e+00> : vector<2x1024xf32>
    %296 = tpu.matmul %294, %295, %cst_318 {dimension_numbers = #tpu.dot_dimension_numbers<[1], [0], [0], [1], [0, 0, 1, 1], [], []>} : vector<2x1024xbf16>, vector<1024x1024xbf16>, vector<2x1024xf32> -> vector<2x1024xf32>
    %c0_319 = arith.constant 0 : index
    %c0_320 = arith.constant 0 : index
    %297 = vector.load %arg7[%c0_319, %c0_320] : memref<2x1024xf32, #tpu.memory_space<vmem>>, vector<2x1024xf32>
    tpu.vector_store %arg7[%c0_319, %c0_320], %296 {strides = array<i32>} : memref<2x1024xf32, #tpu.memory_space<vmem>>, vector<2x1024xf32>,
    return
  }
}

</mosaic_0001>

<bundles_post_ra>
// kernel: conv_mlp_forward.1
= control target key start
LH: loop header
LB: loop body
LE: loop exit
PB: predicated region body
PF: predicated region fallthrough
CT: control target
= control target key end

     0   :  { %12 = vsyncpa [#allocation10], 0  ;;  %s14691_s0 = inlined_call_operand.vmem [shape: f32[2,192,4], index: 0, kind: input, shape index: {}]   ;;  %s14692_s1 = inlined_call_operand.hbm [shape: f32[3,4,16], index: 1, kind: input, shape index: {}]   ;;  %s14693_s2 = inlined_call_operand.hbm [shape: f32[3,16,24], index: 2, kind: input, shape index: {}]   ;;  %s14694_s3 = inlined_call_operand.hbm [shape: f32[3,24,32], index: 3, kind: input, shape index: {}]   ;;  %s14695_s4 = inlined_call_operand.vmem [shape: f32[96,192], index: 4, kind: input, shape index: {}]   ;;  %s14696_s5 = inlined_call_operand.hbm [shape: bf16[24,32,1024], index: 5, kind: input, shape index: {}]   ;;  %s14697_s6 = inlined_call_operand.hbm [shape: bf16[1024,1024], index: 6, kind: input, shape index: {}]   ;;  %s14698_s7 = inlined_call_operand.hbm [shape: f32[2,1024], index: 7, kind: output, shape index: {}]  }
   0x1   :  { %13 = vsyncpa [#allocation13], 0 }
   0x2   :  { %14 = vsyncpa [#allocation11], 0  ;;  %s13191_s24 = smov [#allocation12]   ;;  %s13093_s28 = scalar_lea.hbm %s14693_s2, 768 }
   0x3   :  { %s34_s25 = sshll.u32 %s13191_s24, 4  ;;  %p13094_p0 = scmp.ne.s32.totalorder %s14693_s2, %s13093_s28  ;;  %s35_s25 = int_to_ptr.vmem [resolvable:$true] %s34_s25 }
   0x4   :  { %p13097_p1 = scmp.lt.u32.totalorder %s13093_s28, %s14693_s2 }
   0x6   :  { %p13099_p2 = pnand %p13097_p1, %p13094_p0 }
   0x8   :  { %13102 = shalt.err (!%p13099_p2)
}
   0x9   :  { %s13103_s10 = scalar_lea.vmem %s35_s25, 768  ;;  %p13108_p4 = scmp.lt.s32.totalorder %s35_s25, %s35_s25 }
   0xa   :  { %p13104_p3 = scmp.ne.s32.totalorder %s35_s25, %s13103_s10  ;;  %p13109_p5 = scmp.lt.s32.totalorder %s13103_s10, %s13103_s10 }
   0xc   :  { %p13110_p6 = por %p13109_p5, %p13108_p4 }
   0xe   :  { %p13111_p7 = pnand %p13110_p6, %p13104_p3 }
  0x10   :  { %13114 = shalt.err (!%p13111_p7)
}
  0x11   :  { %s13192_s11 = smov 128   ;;  %s13193_s12 = smov 8  }
  0x12   :  { %40 = dma.hbm_to_vmem [thread:$0]  %s14693_s2, 768, %s35_s25, [#allocation13], %s13192_s11, %s13192_s11, %s13193_s12  }
  0x13   :  { %s13194_s15 = smov [#allocation9]   ;;  %s13115_s19 = scalar_lea.hbm %s14692_s1, 192 }
  0x14   :  { %s22_s16 = sshll.u32 %s13194_s15, 4  ;;  %p13116_p8 = scmp.ne.s32.totalorder %s14692_s1, %s13115_s19  ;;  %s23_s16 = int_to_ptr.vmem [resolvable:$true] %s22_s16 }
  0x15   :  { %p13119_p9 = scmp.lt.u32.totalorder %s13115_s19, %s14692_s1 }
  0x17   :  { %p13121_p10 = pnand %p13119_p9, %p13116_p8 }
  0x19   :  { %13124 = shalt.err (!%p13121_p10)
}
  0x1a   :  { %s13125_s24 = scalar_lea.vmem %s23_s16, 192  ;;  %p13130_p12 = scmp.lt.s32.totalorder %s23_s16, %s23_s16 }
  0x1b   :  { %p13126_p11 = scmp.ne.s32.totalorder %s23_s16, %s13125_s24  ;;  %p13131_p13 = scmp.lt.s32.totalorder %s13125_s24, %s13125_s24 }
  0x1d   :  { %p13132_p0 = por %p13131_p13, %p13130_p12 }
  0x1f   :  { %p13133_p1 = pnand %p13132_p0, %p13126_p11 }
  0x21   :  { %13136 = shalt.err (!%p13133_p1)
}
  0x22   :  { %s13195_s2 = smov 64   ;;  %s13196_s25 = smov 4  }
  0x23   :  { %28 = dma.hbm_to_vmem [thread:$0]  %s14692_s1, 192, %s23_s16, [#allocation10], %s13195_s2, %s13195_s2, %s13196_s25  }
  0x24   :  { %s13197_s28 = smov [#allocation14]   ;;  %s13137_s9 = scalar_lea.hbm %s14694_s3, 1152 }
  0x25   :  { %s46_s29 = sshll.u32 %s13197_s28, 4  ;;  %p13138_p2 = scmp.ne.s32.totalorder %s14694_s3, %s13137_s9  ;;  %s47_s29 = int_to_ptr.vmem [resolvable:$true] %s46_s29 }
  0x26   :  { %p13141_p3 = scmp.lt.u32.totalorder %s13137_s9, %s14694_s3 }
  0x28   :  { %p13143_p4 = pnand %p13141_p3, %p13138_p2 }
  0x2a   :  { %13146 = shalt.err (!%p13143_p4)
}
  0x2b   :  { %s13147_s17 = scalar_lea.vmem %s47_s29, 1152  ;;  %p13152_p6 = scmp.lt.s32.totalorder %s47_s29, %s47_s29 }
  0x2c   :  { %p13148_p5 = scmp.ne.s32.totalorder %s47_s29, %s13147_s17  ;;  %p13153_p7 = scmp.lt.s32.totalorder %s13147_s17, %s13147_s17 }
  0x2e   :  { %p13154_p8 = por %p13153_p7, %p13152_p6 }
  0x30   :  { %p13155_p9 = pnand %p13154_p8, %p13148_p5 }
  0x32   :  { %13158 = shalt.err (!%p13155_p9)
}
  0x33   :  { %52 = dma.hbm_to_vmem [thread:$0]  %s14694_s3, 1152, %s47_s29, [#allocation13], %s13192_s11, %s13192_s11, %s13193_s12  }
  0x34   :  { %13181 = dma.done.wait [#allocation10], 192  }
  0x35   :  { %13182 = vsyncadd [#allocation10], 4294967104 }
  0x36   :  { %13183 = dma.done.wait [#allocation13], 1920  }
  0x37   :  { %13184 = vsyncadd [#allocation13], 4294965376  ;;  %s69_s18 = sld [smem:[#allocation0]]   ;;  %s13198_s19 = smov 1024   ;;  %vm100_vm0 = vcmask 24576   ;;  %v13204_v0 = vmov 0.0  }
  0x38   :  { %81 = sst [smem:[#allocation17]] %s13198_s19  ;;  %s13199_s20 = smov [#allocation2]   ;;  %vm281_vm1 = vcmask 1043456   ;;  %vm133_vm2 = vcmask 31744   ;;  %vm1112_vm3 = vcmask 523264   ;;  %vm103_vm4 = vcmask 122880  }
  0x39   :  { %83 = sst [smem:[#allocation17 + $0x1]] %s13198_s19  ;;  %s77_s21 = sshll.u32 %s13199_s20, 4  ;;  %vm1274_vm5 = vcmask 130048   ;;  %vm1856_vm6 = vcmask 785408   ;;  %vm106_vm7 = vcmask 188416   ;;  %vm1970_vm8 = vcmask 195584   ;;  %s78_s21 = int_to_ptr.vmem [resolvable:$true] %s77_s21 }
  0x3a   :  { %85 = sst [smem:[#allocation17 + $0x2]] %s13193_s12  ;;  %s13200_s22 = smov 2   ;;  %vm13206_vm9 = vmmov 0   ;;  %vm2354_vm10 = vcmask 392192   ;;  %vm2457_vm11 = vcmask 257024  }
  0x3b   :  { %87 = sst [smem:[#allocation17 + $0x3]] %s13195_s2  ;;  %s13201_s23 = smov 512  }
  0x3c   :  { %89 = sst [smem:[#allocation17 + $0x4]] %s13192_s11  ;;  %s13202_s26 = smov [#allocation4]  }
  0x3d   :  { %91 = sst [smem:[#allocation17 + $0x5]] %s13200_s22  ;;  %s10915_s3 = sshll.u32 %s69_s18, 26 }
  0x3e   :  { %93 = sst [smem:[#allocation17 + $0x6]] %s13201_s23  ;;  %s13301_s24 = sadd.s32 134217728, %s10915_s3 }
  0x3f   :  { %95 = sst [smem:[#allocation17 + $0x7]] %s13195_s2  ;;  %s13203_s27 = smov [#allocation16]  }
  0x40   :  { %97 = sst [smem:[#allocation17 + $0x8]] %s13196_s25  ;;  %s13208_s13 = smov [#allocation4 + $0x1]  }
  0x41   :  { %99 = dma.general %s14696_s5, 49152, %s78_s21, %s13202_s26, %s13203_s27, [#allocation17], %s13301_s24, 0  }
  0x42   :  { %101 = vst.msk [vmem:[#allocation5] sm:$0x1] %vm100_vm0, %v13204_v0  ;;  %102 = vst.msk [vmem:[#allocation5 + $0xc1] sm:$0x1] %vm100_vm0, %v13204_v0  ;;  %4817 = sst [smem:[#allocation19]] %s13198_s19  ;;  %v109_v2 = vld [vmem:[%s14691_s0] sm:$0xff] }
  0x43   :  { %4819 = sst [smem:[#allocation19 + $0x1]] %s13198_s19  ;;  %v208_v1 = vld [vmem:[#allocation9 + $0x4] sm:$0xf]  ;;  %v110_v3 = vld [vmem:[%s14691_s0 + $0x8] sm:$0xff]  ;;  %134 = vst.msk [vmem:[#allocation5 + $0x1] sm:$0xff] %vm133_vm2, %v109_v2  ;;  %v111_v4 = vld [vmem:[%s14691_s0 + $0x10] sm:$0xff] }
  0x44   :  { %4821 = sst [smem:[#allocation19 + $0x2]] %s13193_s12  ;;  %11719 = vmatprep.subr.msk.mxu0 %vm281_vm1, %v208_v1  ;;  %135 = vst.msk [vmem:[#allocation5 + $0x9] sm:$0xff] %vm133_vm2, %v110_v3  ;;  %v112_v5 = vld [vmem:[%s14691_s0 + $0x18] sm:$0xff]  ;;  %v113_v6 = vld [vmem:[%s14691_s0 + $0x20] sm:$0xff]  ;;  %136 = vst.msk [vmem:[#allocation5 + $0x11] sm:$0xff] %vm133_vm2, %v111_v4  ;;  %s13209_s14 = smov [#allocation18]  }
  0x45   :  { %4823 = sst [smem:[#allocation19 + $0x3]] %s13195_s2  ;;  %11720 = vmatpush3.msk.msra.mxu0 %vm281_vm1, %v208_v1  ;;  %137 = vst.msk [vmem:[#allocation5 + $0x19] sm:$0xff] %vm133_vm2, %v112_v5  ;;  %138 = vst.msk [vmem:[#allocation5 + $0x21] sm:$0xff] %vm133_vm2, %v113_v6  ;;  %v114_v7 = vld [vmem:[%s14691_s0 + $0x28] sm:$0xff]  ;;  %v115_v8 = vld [vmem:[%s14691_s0 + $0x30] sm:$0xff] }
  0x46   :  { %4825 = sst [smem:[#allocation19 + $0x4]] %s13192_s11  ;;  %v116_v9 = vld [vmem:[%s14691_s0 + $0x38] sm:$0xff]  ;;  %139 = vst.msk [vmem:[#allocation5 + $0x29] sm:$0xff] %vm133_vm2, %v114_v7  ;;  %140 = vst.msk [vmem:[#allocation5 + $0x31] sm:$0xff] %vm133_vm2, %v115_v8  ;;  %v117_v10 = vld [vmem:[%s14691_s0 + $0x40] sm:$0xff] }
  0x47   :  { %4827 = sst [smem:[#allocation19 + $0x5]] %s13200_s22  ;;  %141 = vst.msk [vmem:[#allocation5 + $0x39] sm:$0xff] %vm133_vm2, %v116_v9  ;;  %v118_v11 = vld [vmem:[%s14691_s0 + $0x48] sm:$0xff]  ;;  %v119_v12 = vld [vmem:[%s14691_s0 + $0x50] sm:$0xff]  ;;  %142 = vst.msk [vmem:[#allocation5 + $0x41] sm:$0xff] %vm133_vm2, %v117_v10 }
  0x48   :  { %4829 = sst [smem:[#allocation19 + $0x6]] %s13201_s23  ;;  %143 = vst.msk [vmem:[#allocation5 + $0x49] sm:$0xff] %vm133_vm2, %v118_v11  ;;  %144 = vst.msk [vmem:[#allocation5 + $0x51] sm:$0xff] %vm133_vm2, %v119_v12  ;;  %v120_v13 = vld [vmem:[%s14691_s0 + $0x58] sm:$0xff]  ;;  %v121_v14 = vld [vmem:[%s14691_s0 + $0x60] sm:$0xff] }
  0x49   :  { %4831 = sst [smem:[#allocation19 + $0x7]] %s13195_s2  ;;  %v122_v15 = vld [vmem:[%s14691_s0 + $0x68] sm:$0xff]  ;;  %145 = vst.msk [vmem:[#allocation5 + $0x59] sm:$0xff] %vm133_vm2, %v120_v13  ;;  %146 = vst.msk [vmem:[#allocation5 + $0x61] sm:$0xff] %vm133_vm2, %v121_v14  ;;  %v182_v16 = vld [vmem:[#allocation9] sm:$0xf] }
  0x4a   :  { %4833 = sst [smem:[#allocation19 + $0x8]] %s13196_s25  ;;  %147 = vst.msk [vmem:[#allocation5 + $0x69] sm:$0xff] %vm133_vm2, %v122_v15  ;;  %v123_v17 = vld [vmem:[%s14691_s0 + $0x70] sm:$0xff]  ;;  %v124_v18 = vld [vmem:[%s14691_s0 + $0x78] sm:$0xff]  ;;  %11757 = vmatprep.subr.msk.mxu0 %vm281_vm1, %v182_v16  ;;  %v125_v19 = vld [vmem:[%s14691_s0 + $0x80] sm:$0xff] }
  0x4b   :  { %148 = vst.msk [vmem:[#allocation5 + $0x71] sm:$0xff] %vm133_vm2, %v123_v17  ;;  %149 = vst.msk [vmem:[#allocation5 + $0x79] sm:$0xff] %vm133_vm2, %v124_v18  ;;  %v126_v20 = vld [vmem:[%s14691_s0 + $0x88] sm:$0xff]  ;;  %v127_v21 = vld [vmem:[%s14691_s0 + $0x90] sm:$0xff] }
  0x4c   :  { %150 = vst.msk [vmem:[#allocation5 + $0x81] sm:$0xff] %vm133_vm2, %v125_v19  ;;  %151 = vst.msk [vmem:[#allocation5 + $0x89] sm:$0xff] %vm133_vm2, %v126_v20  ;;  %v128_v22 = vld [vmem:[%s14691_s0 + $0x98] sm:$0xff]  ;;  %v129_v23 = vld [vmem:[%s14691_s0 + $0xa0] sm:$0xff] }
  0x4d   :  { %152 = vst.msk [vmem:[#allocation5 + $0x91] sm:$0xff] %vm133_vm2, %v127_v21  ;;  %v130_v24 = vld [vmem:[%s14691_s0 + $0xa8] sm:$0xff]  ;;  %153 = vst.msk [vmem:[#allocation5 + $0x99] sm:$0xff] %vm133_vm2, %v128_v22  ;;  %v131_v27 = vld [vmem:[%s14691_s0 + $0xb0] sm:$0xff] }
  0x4e   :  { %v183_v25 = vld [vmem:[#allocation5 + $0x1] sm:$0xff]  ;;  %v184_v26 = vld [vmem:[#allocation5 + $0x9] sm:$0xff]  ;;  %154 = vst.msk [vmem:[#allocation5 + $0xa1] sm:$0xff] %vm133_vm2, %v129_v23  ;;  %155 = vst.msk [vmem:[#allocation5 + $0xa9] sm:$0xff] %vm133_vm2, %v130_v24 }
  0x4f   :  { %11721 = vmatprep.mubr.msk.f32.mxu0 %vm133_vm2, %v183_v25  ;;  %v185_v28 = vld [vmem:[#allocation5 + $0x11] sm:$0xff]  ;;  %156 = vst.msk [vmem:[#allocation5 + $0xb1] sm:$0xff] %vm133_vm2, %v131_v27  ;;  %v186_v29 = vld [vmem:[#allocation5 + $0x19] sm:$0xff]  ;;  %v187_v30 = vld [vmem:[#allocation5 + $0x21] sm:$0xff] }
  0x50   :  { %11722 = vmatmul.mubr.msk.f32.vlgmr.msra.gmra.mrb[0].mxu0 %vm133_vm2, %v184_v26  ;;  %v132_v31 = vld [vmem:[%s14691_s0 + $0xb8] sm:$0xff]  ;;  %v188_v32 = vld [vmem:[#allocation5 + $0x29] sm:$0xff]  ;;  %v191_v35 = vld [vmem:[#allocation5 + $0x41] sm:$0xff]  ;;  %104 = vst.msk [vmem:[#allocation6] sm:$0x1] %vm103_vm4, %v13204_v0 }
  0x51   :  { %11724 = vmatprep.mubr.msk.f32.mxu0 %vm133_vm2, %v185_v28  ;;  %11758 = vmatpush3.msk.msra.mxu0 %vm281_vm1, %v182_v16  ;;  %157 = vst.msk [vmem:[#allocation5 + $0xb9] sm:$0xff] %vm133_vm2, %v132_v31  ;;  %v189_v33 = vld [vmem:[#allocation5 + $0x31] sm:$0xff]  ;;  %v190_v34 = vld [vmem:[#allocation5 + $0x39] sm:$0xff]  ;;  %v13423_v36 = vld [vmem:[#allocation9 + $0x8] sm:$0xf] }
  0x52   :  { %11795 = vmatprep.subr.msk.mxu0 %vm281_vm1, %v13423_v36  ;;  %v192_v37 = vld [vmem:[#allocation5 + $0x49] sm:$0xff]  ;;  %v193_v38 = vld [vmem:[#allocation5 + $0x51] sm:$0xff]  ;;  %v13429_v39 = vld [vmem:[#allocation5] sm:$0xff]  ;;  %105 = vst.msk [vmem:[#allocation6 + $0x61] sm:$0x1] %vm103_vm4, %v13204_v0 }
  0x53   :  { %v13431_v40 = vld [vmem:[#allocation5 + $0x8] sm:$0xff]  ;;  %v13433_v41 = vld [vmem:[#allocation5 + $0x10] sm:$0xff]  ;;  %v13435_v42 = vld [vmem:[#allocation5 + $0x18] sm:$0xff]  ;;  %107 = vst.msk [vmem:[#allocation7] sm:$0x1] %vm106_vm7, %v13204_v0 }
  0x54   :  { %11725 = vmatmul.mubr.msk.f32.gmra.mrb[2].mxu0 %vm133_vm2, %v186_v29  ;;  %v194_v43 = vld [vmem:[#allocation5 + $0x59] sm:$0xff]  ;;  %v13439_v45 = vld [vmem:[#allocation5 + $0x2] sm:$0xff]  ;;  %v13444_v47 = vld [vmem:[#allocation5 + $0xa] sm:$0xff]  ;;  %108 = vst.msk [vmem:[#allocation7 + $0x31] sm:$0x1] %vm106_vm7, %v13204_v0 }
  0x55   :  { %11727 = vmatprep.mubr.msk.f32.mxu0 %vm133_vm2, %v187_v30  ;;  %v13437_v44 = vld [vmem:[#allocation5 + $0x20] sm:$0xff]  ;;  %v13447_v49 = vld [vmem:[#allocation5 + $0x28] sm:$0xff]  ;;  %v13449_v50 = vld [vmem:[#allocation5 + $0x30] sm:$0xff] }
  0x56   :  { %v11070_v46 = vld [vmem:[%s14691_s0 + $0xc0] sm:$0xff]  ;;  %v11071_v51 = vld [vmem:[%s14691_s0 + $0xc8] sm:$0xff]  ;;  %v13455_v52 = vld [vmem:[#allocation5 + $0x12] sm:$0xff] }
  0x57   :  { %v195_v48 = vld [vmem:[#allocation5 + $0x61] sm:$0xff]  ;;  %2486 = vst.msk [vmem:[#allocation5 + $0x1] sm:$0xff] %vm133_vm2, %v11070_v46  ;;  %v11072_v53 = vld [vmem:[%s14691_s0 + $0xd0] sm:$0xff]  ;;  %v13461_v54 = vld [vmem:[#allocation5 + $0x38] sm:$0xff] }
  0x58   :  { %11728 = vmatmul.mubr.msk.f32.gmra.mrb[4].mxu0 %vm133_vm2, %v188_v32  ;;  %2487 = vst.msk [vmem:[#allocation5 + $0x9] sm:$0xff] %vm133_vm2, %v11071_v51  ;;  %2488 = vst.msk [vmem:[#allocation5 + $0x11] sm:$0xff] %vm133_vm2, %v11072_v53  ;;  %v13465_v55 = vld [vmem:[#allocation5 + $0x1a] sm:$0xff]  ;;  %v13470_v57 = vld [vmem:[#allocation5 + $0x22] sm:$0xff] }
  0x59   :  { %11730 = vmatprep.mubr.msk.f32.mxu0 %vm133_vm2, %v189_v33  ;;  %v11073_v56 = vld [vmem:[%s14691_s0 + $0xd8] sm:$0xff]  ;;  %v13472_v58 = vld [vmem:[#allocation5 + $0x40] sm:$0xff]  ;;  %v13474_v59 = vld [vmem:[#allocation5 + $0x48] sm:$0xff] }
  0x5a   :  { %2489 = vst.msk [vmem:[#allocation5 + $0x19] sm:$0xff] %vm133_vm2, %v11073_v56  ;;  %v11074_v60 = vld [vmem:[%s14691_s0 + $0xe0] sm:$0xff]  ;;  %v13480_v61 = vld [vmem:[#allocation5 + $0x2a] sm:$0xff]  ;;  %v13489_v2 = vld [vmem:[#allocation5 + $0x32] sm:$0xff] }
  0x5b   :  { %v11075_v62 = vld [vmem:[%s14691_s0 + $0xe8] sm:$0xff]  ;;  %v13485_v1 = vld [vmem:[#allocation5 + $0x50] sm:$0xff]  ;;  %2490 = vst.msk [vmem:[#allocation5 + $0x21] sm:$0xff] %vm133_vm2, %v11074_v60  ;;  %v13494_v4 = vld [vmem:[#allocation5 + $0x3a] sm:$0xff] }
  0x5c   :  { %11731 = vmatmul.mubr.msk.f32.gmra.mrb[6].mxu0 %vm133_vm2, %v190_v34  ;;  %v196_v63 = vld [vmem:[#allocation5 + $0x69] sm:$0xff]  ;;  %2491 = vst.msk [vmem:[#allocation5 + $0x29] sm:$0xff] %vm133_vm2, %v11075_v62  ;;  %v197_v5 = vld [vmem:[#allocation5 + $0x71] sm:$0xff]  ;;  %v13499_v7 = vld [vmem:[#allocation5 + $0x60] sm:$0xff] }
  0x5d   :  { %11733 = vmatprep.mubr.msk.f32.mxu0 %vm133_vm2, %v191_v35  ;;  %v11076_v3 = vld [vmem:[%s14691_s0 + $0xf0] sm:$0xff]  ;;  %v13497_v6 = vld [vmem:[#allocation5 + $0x58] sm:$0xff]  ;;  %v13505_v9 = vld [vmem:[#allocation5 + $0x42] sm:$0xff] }
  0x5e   :  { %2492 = vst.msk [vmem:[#allocation5 + $0x31] sm:$0xff] %vm133_vm2, %v11076_v3  ;;  %v11077_v8 = vld [vmem:[%s14691_s0 + $0xf8] sm:$0xff]  ;;  %v11078_v10 = vld [vmem:[%s14691_s0 + $0x100] sm:$0xff]  ;;  %v13511_v11 = vld [vmem:[#allocation5 + $0x68] sm:$0xff] }
  0x5f   :  { %2493 = vst.msk [vmem:[#allocation5 + $0x39] sm:$0xff] %vm133_vm2, %v11077_v8  ;;  %2494 = vst.msk [vmem:[#allocation5 + $0x41] sm:$0xff] %vm133_vm2, %v11078_v10  ;;  %v13515_v12 = vld [vmem:[#allocation5 + $0x4a] sm:$0xff]  ;;  %v13520_v14 = vld [vmem:[#allocation5 + $0x52] sm:$0xff] }
  0x60   :  { %11734 = vmatmul.mubr.msk.f32.gmra.mrb[8].mxu0 %vm133_vm2, %v192_v37  ;;  %v11079_v13 = vld [vmem:[%s14691_s0 + $0x108] sm:$0xff]  ;;  %v13522_v15 = vld [vmem:[#allocation5 + $0x70] sm:$0xff]  ;;  %v13524_v16 = vld [vmem:[#allocation5 + $0x78] sm:$0xff] }
  0x61   :  { %11736 = vmatprep.mubr.msk.f32.mxu0 %vm133_vm2, %v193_v38  ;;  %2495 = vst.msk [vmem:[#allocation5 + $0x49] sm:$0xff] %vm133_vm2, %v11079_v13  ;;  %v11080_v17 = vld [vmem:[%s14691_s0 + $0x110] sm:$0xff]  ;;  %v13530_v18 = vld [vmem:[#allocation5 + $0x5a] sm:$0xff]  ;;  %v13539_v22 = vld [vmem:[#allocation5 + $0x62] sm:$0xff] }
  0x62   :  { %v11081_v19 = vld [vmem:[%s14691_s0 + $0x118] sm:$0xff]  ;;  %v13535_v21 = vld [vmem:[#allocation5 + $0x80] sm:$0xff]  ;;  %2496 = vst.msk [vmem:[#allocation5 + $0x51] sm:$0xff] %vm133_vm2, %v11080_v17  ;;  %v13544_v24 = vld [vmem:[#allocation5 + $0x6a] sm:$0xff] }
  0x63   :  { %v198_v20 = vld [vmem:[#allocation5 + $0x79] sm:$0xff]  ;;  %2497 = vst.msk [vmem:[#allocation5 + $0x59] sm:$0xff] %vm133_vm2, %v11081_v19  ;;  %v199_v25 = vld [vmem:[#allocation5 + $0x81] sm:$0xff]  ;;  %v200_v26 = vld [vmem:[#allocation5 + $0x89] sm:$0xff] }
  0x64   :  { %11737 = vmatmul.mubr.msk.f32.gmra.mrb[10].mxu0 %vm133_vm2, %v194_v43  ;;  %v11082_v23 = vld [vmem:[%s14691_s0 + $0x120] sm:$0xff]  ;;  %v13547_v27 = vld [vmem:[#allocation5 + $0x88] sm:$0xff]  ;;  %v13549_v28 = vld [vmem:[#allocation5 + $0x90] sm:$0xff] }
  0x65   :  { %11739 = vmatprep.mubr.msk.f32.mxu0 %vm133_vm2, %v195_v48  ;;  %2498 = vst.msk [vmem:[#allocation5 + $0x61] sm:$0xff] %vm133_vm2, %v11082_v23  ;;  %v11083_v29 = vld [vmem:[%s14691_s0 + $0x128] sm:$0xff]  ;;  %v13555_v30 = vld [vmem:[#allocation5 + $0x72] sm:$0xff]  ;;  %v13565_v34 = vld [vmem:[#allocation5 + $0x7a] sm:$0xff] }
  0x66   :  { %v11084_v31 = vld [vmem:[%s14691_s0 + $0x130] sm:$0xff]  ;;  %v13561_v33 = vld [vmem:[#allocation5 + $0x98] sm:$0xff]  ;;  %2499 = vst.msk [vmem:[#allocation5 + $0x69] sm:$0xff] %vm133_vm2, %v11083_v29  ;;  %v13570_v37 = vld [vmem:[#allocation5 + $0x82] sm:$0xff] }
  0x67   :  { %v201_v32 = vld [vmem:[#allocation5 + $0x91] sm:$0xff]  ;;  %2500 = vst.msk [vmem:[#allocation5 + $0x71] sm:$0xff] %vm133_vm2, %v11084_v31  ;;  %v202_v38 = vld [vmem:[#allocation5 + $0x99] sm:$0xff]  ;;  %v203_v43 = vld [vmem:[#allocation5 + $0xa1] sm:$0xff] }
  0x68   :  { %11740 = vmatmul.mubr.msk.f32.gmra.mrb[12].mxu0 %vm133_vm2, %v196_v63  ;;  %v11085_v35 = vld [vmem:[%s14691_s0 + $0x138] sm:$0xff]  ;;  %v178_v46 = vld [vmem:[#allocation5 + $0xa0] sm:$0xff]  ;;  %v179_v48 = vld [vmem:[#allocation5 + $0xa8] sm:$0xff] }
  0x69   :  { %11742 = vmatprep.mubr.msk.f32.mxu0 %vm133_vm2, %v197_v5  ;;  %2501 = vst.msk [vmem:[#allocation5 + $0x79] sm:$0xff] %vm133_vm2, %v11085_v35  ;;  %v11086_v51 = vld [vmem:[%s14691_s0 + $0x140] sm:$0xff]  ;;  %v13576_v53 = vld [vmem:[#allocation5 + $0x8a] sm:$0xff]  ;;  %v13583_v63 = vld [vmem:[#allocation5 + $0x92] sm:$0xff] }
  0x6a   :  { %v11087_v56 = vld [vmem:[%s14691_s0 + $0x148] sm:$0xff]  ;;  %v180_v62 = vld [vmem:[#allocation5 + $0xb0] sm:$0xff]  ;;  %2502 = vst.msk [vmem:[#allocation5 + $0x81] sm:$0xff] %vm133_vm2, %v11086_v51  ;;  %v13588_v5 = vld [vmem:[#allocation5 + $0x9a] sm:$0xff] }
  0x6b   :  { %v204_v60 = vld [vmem:[#allocation5 + $0xa9] sm:$0xff]  ;;  %2503 = vst.msk [vmem:[#allocation5 + $0x89] sm:$0xff] %vm133_vm2, %v11087_v56  ;;  %v205_v8 = vld [vmem:[#allocation5 + $0xb1] sm:$0xff]  ;;  %v206_v10 = vld [vmem:[#allocation5 + $0xb9] sm:$0xff] }
  0x6c   :  { %v11088_v3 = vld [vmem:[%s14691_s0 + $0x150] sm:$0xff]  ;;  %11743 = vmatmul.mubr.msk.f32.gmra.mrb[14].mxu0 %vm133_vm2, %v198_v20  ;;  %v181_v13 = vld [vmem:[#allocation5 + $0xb8] sm:$0xff]  ;;  %v13595_v19 = vld [vmem:[#allocation5 + $0xa2] sm:$0xff] }
  0x6d   :  { %2504 = vst.msk [vmem:[#allocation5 + $0x91] sm:$0xff] %vm133_vm2, %v11088_v3  ;;  %v11089_v17 = vld [vmem:[%s14691_s0 + $0x158] sm:$0xff]  ;;  %v11090_v23 = vld [vmem:[%s14691_s0 + $0x160] sm:$0xff]  ;;  %11745 = vmatprep.mubr.msk.f32.mxu0 %vm133_vm2, %v199_v25  ;;  %v751_v20 = vld [vmem:[#allocation5 + $0xaa] sm:$0xff] }
  0x6e   :  { %2505 = vst.msk [vmem:[#allocation5 + $0x99] sm:$0xff] %vm133_vm2, %v11089_v17  ;;  %2506 = vst.msk [vmem:[#allocation5 + $0xa1] sm:$0xff] %vm133_vm2, %v11090_v23  ;;  %v11091_v29 = vld [vmem:[%s14691_s0 + $0x168] sm:$0xff]  ;;  %v752_v31 = vld [vmem:[#allocation5 + $0xb2] sm:$0xff] }
  0x6f   :  { %2507 = vst.msk [vmem:[#allocation5 + $0xa9] sm:$0xff] %vm133_vm2, %v11091_v29  ;;  %v11092_v35 = vld [vmem:[%s14691_s0 + $0x170] sm:$0xff]  ;;  %v753_v51 = vld [vmem:[#allocation5 + $0xba] sm:$0xff] }
  0x70   :  { %v11093_v25 = vld [vmem:[%s14691_s0 + $0x178] sm:$0xff]  ;;  %2508 = vst.msk [vmem:[#allocation5 + $0xb1] sm:$0xff] %vm133_vm2, %v11092_v35  ;;  %11746 = vmatmul.mubr.msk.f32.gmra.mrb[16].mxu0 %vm133_vm2, %v200_v26 }
  0x71   :  { %2509 = vst.msk [vmem:[#allocation5 + $0xb9] sm:$0xff] %vm133_vm2, %v11093_v25  ;;  %11748 = vmatprep.mubr.msk.f32.mxu0 %vm133_vm2, %v201_v32 }
  0x74   :  { %11749 = vmatmul.mubr.msk.f32.gmra.mrb[18].mxu0 %vm133_vm2, %v202_v38 }
  0x75   :  { %11751 = vmatprep.mubr.msk.f32.mxu0 %vm133_vm2, %v203_v43 }
  0x78   :  { %11752 = vmatmul.mubr.msk.f32.gmra.mrb[20].mxu0 %vm133_vm2, %v204_v60 }
  0x79   :  { %11754 = vmatprep.mubr.msk.f32.mxu0 %vm133_vm2, %v205_v8 }
  0x7c   :  { %11755 = vmatmul.mubr.msk.f32.gmra.mrb[22].mxu0 %vm133_vm2, %v206_v10 }
  0x7d   :  { %11759 = vmatprep.mubr.msk.f32.mxu0 %vm133_vm2, %v13429_v39  ;;  %v1089_v39 = vld [vmem:[%s14695_s4 + $0x8] sm:$0xff] }
  0x80   :  { %11760 = vmatmul.mubr.msk.f32.vlgmr.msra.gmra.mrb[0].mxu0 %vm133_vm2, %v13431_v40 }
  0x81   :  { %11762 = vmatprep.mubr.msk.f32.mxu0 %vm133_vm2, %v13433_v41  ;;  %11796 = vmatpush3.msk.msra.mxu0 %vm281_vm1, %v13423_v36  ;;  %v13205_v36 = vmov 0.0|0.0  }
  0x82   :  { %12277 = vmatprep.subr.bf16.mxu0 %v13205_v36 }
  0x84   :  { %11763 = vmatmul.mubr.msk.f32.gmra.mrb[2].mxu0 %vm133_vm2, %v13435_v42 }
  0x85   :  { %11765 = vmatprep.mubr.msk.f32.mxu0 %vm133_vm2, %v13437_v44 }
  0x88   :  { %11766 = vmatmul.mubr.msk.f32.gmra.mrb[4].mxu0 %vm133_vm2, %v13447_v49 }
  0x89   :  { %11768 = vmatprep.mubr.msk.f32.mxu0 %vm133_vm2, %v13449_v50 }
  0x8c   :  { %11769 = vmatmul.mubr.msk.f32.gmra.mrb[6].mxu0 %vm133_vm2, %v13461_v54 }
  0x8d   :  { %11771 = vmatprep.mubr.msk.f32.mxu0 %vm133_vm2, %v13472_v58 }
  0x90   :  { %11772 = vmatmul.mubr.msk.f32.gmra.mrb[8].mxu0 %vm133_vm2, %v13474_v59 }
  0x91   :  { %11774 = vmatprep.mubr.msk.f32.mxu0 %vm133_vm2, %v13485_v1 }
  0x94   :  { %11775 = vmatmul.mubr.msk.f32.gmra.mrb[10].mxu0 %vm133_vm2, %v13497_v6 }
  0x95   :  { %11777 = vmatprep.mubr.msk.f32.mxu0 %vm133_vm2, %v13499_v7 }
  0x98   :  { %11778 = vmatmul.mubr.msk.f32.gmra.mrb[12].mxu0 %vm133_vm2, %v13511_v11 }
  0x99   :  { %11780 = vmatprep.mubr.msk.f32.mxu0 %vm133_vm2, %v13522_v15 }
  0x9c   :  { %11781 = vmatmul.mubr.msk.f32.gmra.mrb[14].mxu0 %vm133_vm2, %v13524_v16 }
  0x9d   :  { %11783 = vmatprep.mubr.msk.f32.mxu0 %vm133_vm2, %v13535_v21 }
  0xa0   :  { %11784 = vmatmul.mubr.msk.f32.gmra.mrb[16].mxu0 %vm133_vm2, %v13547_v27 }
  0xa1   :  { %11786 = vmatprep.mubr.msk.f32.mxu0 %vm133_vm2, %v13549_v28 }
  0xa4   :  { %11787 = vmatmul.mubr.msk.f32.gmra.mrb[18].mxu0 %vm133_vm2, %v13561_v33 }
  0xa5   :  { %11789 = vmatprep.mubr.msk.f32.mxu0 %vm133_vm2, %v178_v46 }
  0xa8   :  { %11790 = vmatmul.mubr.msk.f32.gmra.mrb[20].mxu0 %vm133_vm2, %v179_v48 }
  0xa9   :  { %11792 = vmatprep.mubr.msk.f32.mxu0 %vm133_vm2, %v180_v62 }
  0xac   :  { %11793 = vmatmul.mubr.msk.f32.gmra.mrb[22].mxu0 %vm133_vm2, %v181_v13 }
  0xad   :  { %11797 = vmatprep.mubr.msk.f32.mxu0 %vm133_vm2, %v13439_v45 }
  0xb0   :  { %11798 = vmatmul.mubr.msk.f32.vlgmr.msra.gmra.mrb[0].mxu0 %vm133_vm2, %v13444_v47 }
  0xb1   :  { %11800 = vmatprep.mubr.msk.f32.mxu0 %vm133_vm2, %v13455_v52 }
  0xb4   :  { %11801 = vmatmul.mubr.msk.f32.gmra.mrb[2].mxu0 %vm133_vm2, %v13465_v55 }
  0xb5   :  { %11803 = vmatprep.mubr.msk.f32.mxu0 %vm133_vm2, %v13470_v57 }
  0xb8   :  { %11804 = vmatmul.mubr.msk.f32.gmra.mrb[4].mxu0 %vm133_vm2, %v13480_v61 }
  0xb9   :  { %11806 = vmatprep.mubr.msk.f32.mxu0 %vm133_vm2, %v13489_v2 }
  0xbc   :  { %11807 = vmatmul.mubr.msk.f32.gmra.mrb[6].mxu0 %vm133_vm2, %v13494_v4 }
  0xbd   :  { %11809 = vmatprep.mubr.msk.f32.mxu0 %vm133_vm2, %v13505_v9 }
  0xc0   :  { %11810 = vmatmul.mubr.msk.f32.gmra.mrb[8].mxu0 %vm133_vm2, %v13515_v12 }
  0xc1   :  { %11812 = vmatprep.mubr.msk.f32.mxu0 %vm133_vm2, %v13520_v14 }
  0xc4   :  { %11813 = vmatmul.mubr.msk.f32.gmra.mrb[10].mxu0 %vm133_vm2, %v13530_v18 }
  0xc5   :  { %11815 = vmatprep.mubr.msk.f32.mxu0 %vm133_vm2, %v13539_v22 }
  0xc8   :  { %11816 = vmatmul.mubr.msk.f32.gmra.mrb[12].mxu0 %vm133_vm2, %v13544_v24 }
  0xc9   :  { %11818 = vmatprep.mubr.msk.f32.mxu0 %vm133_vm2, %v13555_v30 }
  0xcc   :  { %11819 = vmatmul.mubr.msk.f32.gmra.mrb[14].mxu0 %vm133_vm2, %v13565_v34 }
  0xcd   :  { %11821 = vmatprep.mubr.msk.f32.mxu0 %vm133_vm2, %v13570_v37 }
  0xd0   :  { %11822 = vmatmul.mubr.msk.f32.gmra.mrb[16].mxu0 %vm133_vm2, %v13576_v53 }
  0xd1   :  { %11824 = vmatprep.mubr.msk.f32.mxu0 %vm133_vm2, %v13583_v63 }
  0xd4   :  { %11825 = vmatmul.mubr.msk.f32.gmra.mrb[18].mxu0 %vm133_vm2, %v13588_v5 }
  0xd5   :  { %11827 = vmatprep.mubr.msk.f32.mxu0 %vm133_vm2, %v13595_v19 }
  0xd8   :  { %11828 = vmatmul.mubr.msk.f32.gmra.mrb[20].mxu0 %vm133_vm2, %v751_v20 }
  0xd9   :  { %11830 = vmatprep.mubr.msk.f32.mxu0 %vm133_vm2, %v752_v31 }
  0xdc   :  { %11831 = vmatmul.mubr.msk.f32.gmra.mrb[22].mxu0 %vm133_vm2, %v753_v51 }
  0xdd   :  { %10992 = vmatprep.mubr.msk.f32.mxu0 %vm1112_vm3, %v1089_v39 }
 0x183   :  { %v11799_v40 = vpop.f32.mrb[0].mxu0 }
 0x184   :  { %v1041_v41 = vmul.f32 0.05, %v11799_v40  ;;  %v897_v42 = vpop.f32.mrb[1].mxu0 }
 0x185   :  { %v1040_v44 = vmul.f32 0.05, %v897_v42 }
 0x186   :  { %v1065_v45 = vmax.f32 %v11799_v40, %v1041_v41 }
 0x187   :  { %v1064_v47 = vmax.f32 %v897_v42, %v1040_v44  ;;  %v11802_v49 = vpop.f32.mrb[2].mxu0 }
 0x188   :  { %v1043_v50 = vmul.f32 0.05, %v11802_v49  ;;  %v907_v52 = vpop.f32.mrb[3].mxu0 }
 0x189   :  { %v12278_v54 = vpack.c.bf16 %v1065_v45, %v1064_v47  ;;  %v1042_v55 = vmul.f32 0.05, %v907_v52 }
 0x18a   :  { %v1067_v57 = vmax.f32 %v11802_v49, %v1043_v50 }
 0x18b   :  { %v1066_v58 = vmax.f32 %v907_v52, %v1042_v55  ;;  %v11805_v59 = vpop.f32.mrb[4].mxu0  ;;  %12279 = vmatpush1.bf16.msra.mxu0 %v12278_v54 }
 0x18c   :  { %v1045_v61 = vmul.f32 0.05, %v11805_v59  ;;  %v917_v1 = vpop.f32.mrb[5].mxu0  ;;  %12280 = vmatprep.subr.bf16.mxu0 %v13205_v36 }
 0x18d   :  { %v12281_v2 = vpack.c.bf16 %v1067_v57, %v1066_v58  ;;  %v1044_v4 = vmul.f32 0.05, %v917_v1 }
 0x18e   :  { %v1069_v6 = vmax.f32 %v11805_v59, %v1045_v61 }
 0x18f   :  { %v1068_v7 = vmax.f32 %v917_v1, %v1044_v4  ;;  %v11808_v9 = vpop.f32.mrb[6].mxu0  ;;  %12282 = vmatpush1.bf16.msra.mxu0 %v12281_v2 }
 0x190   :  { %v1047_v11 = vmul.f32 0.05, %v11808_v9  ;;  %v927_v12 = vpop.f32.mrb[7].mxu0  ;;  %12283 = vmatprep.subr.bf16.mxu0 %v13205_v36 }
 0x191   :  { %v12284_v14 = vpack.c.bf16 %v1069_v6, %v1068_v7  ;;  %v1046_v15 = vmul.f32 0.05, %v927_v12 }
 0x192   :  { %v1071_v16 = vmax.f32 %v11808_v9, %v1047_v11 }
 0x193   :  { %v1070_v18 = vmax.f32 %v927_v12, %v1046_v15  ;;  %v11811_v21 = vpop.f32.mrb[8].mxu0  ;;  %12285 = vmatpush1.bf16.msra.mxu0 %v12284_v14  ;;  %v13732_v12 = vld [vmem:[%s14695_s4] sm:$0xff]  ;;  %v1091_v14 = vld [vmem:[%s14695_s4 + $0x18] sm:$0xff]  ;;  %v13742_v15 = vld [vmem:[%s14695_s4 + $0x10] sm:$0xff] }
 0x194   :  { %v1049_v22 = vmul.f32 0.05, %v11811_v21  ;;  %v937_v24 = vpop.f32.mrb[9].mxu0  ;;  %12286 = vmatprep.subr.bf16.mxu0 %v13205_v36 }
 0x195   :  { %v12287_v26 = vpack.c.bf16 %v1071_v16, %v1070_v18  ;;  %v1048_v27 = vmul.f32 0.05, %v937_v24  ;;  %v1093_v16 = vld [vmem:[%s14695_s4 + $0x28] sm:$0xff]  ;;  %v13752_v18 = vld [vmem:[%s14695_s4 + $0x20] sm:$0xff] }
 0x196   :  { %v1073_v28 = vmax.f32 %v11811_v21, %v1049_v22  ;;  %v1095_v21 = vld [vmem:[%s14695_s4 + $0x38] sm:$0xff]  ;;  %v13762_v22 = vld [vmem:[%s14695_s4 + $0x30] sm:$0xff] }
 0x197   :  { %v1072_v30 = vmax.f32 %v937_v24, %v1048_v27  ;;  %v11814_v32 = vpop.f32.mrb[10].mxu0  ;;  %12288 = vmatpush1.bf16.msra.mxu0 %v12287_v26  ;;  %v1097_v24 = vld [vmem:[%s14695_s4 + $0x48] sm:$0xff]  ;;  %v13772_v26 = vld [vmem:[%s14695_s4 + $0x40] sm:$0xff]  ;;  %v1099_v27 = vld [vmem:[%s14695_s4 + $0x58] sm:$0xff] }
 0x198   :  { %v1051_v33 = vmul.f32 0.05, %v11814_v32  ;;  %v947_v34 = vpop.f32.mrb[11].mxu0  ;;  %12289 = vmatprep.subr.bf16.mxu0 %v13205_v36 }
 0x199   :  { %v12290_v37 = vpack.c.bf16 %v1073_v28, %v1072_v30  ;;  %v1050_v38 = vmul.f32 0.05, %v947_v34  ;;  %v13782_v28 = vld [vmem:[%s14695_s4 + $0x50] sm:$0xff]  ;;  %v1101_v30 = vld [vmem:[%s14695_s4 + $0x68] sm:$0xff] }
 0x19a   :  { %v1075_v43 = vmax.f32 %v11814_v32, %v1051_v33  ;;  %v1100_v32 = vld [vmem:[%s14695_s4 + $0x60] sm:$0xff]  ;;  %v1103_v33 = vld [vmem:[%s14695_s4 + $0x78] sm:$0xff] }
 0x19b   :  { %v1074_v46 = vmax.f32 %v947_v34, %v1050_v38  ;;  %v11817_v48 = vpop.f32.mrb[12].mxu0  ;;  %12291 = vmatpush1.bf16.msra.mxu0 %v12290_v37  ;;  %v1102_v34 = vld [vmem:[%s14695_s4 + $0x70] sm:$0xff]  ;;  %v1105_v37 = vld [vmem:[%s14695_s4 + $0x88] sm:$0xff]  ;;  %v1104_v38 = vld [vmem:[%s14695_s4 + $0x80] sm:$0xff] }
 0x19c   :  { %v1053_v53 = vmul.f32 0.05, %v11817_v48  ;;  %v957_v56 = vpop.f32.mrb[13].mxu0  ;;  %12292 = vmatprep.subr.bf16.mxu0 %v13205_v36 }
 0x19d   :  { %v12293_v60 = vpack.c.bf16 %v1075_v43, %v1074_v46  ;;  %v1052_v62 = vmul.f32 0.05, %v957_v56  ;;  %v1107_v43 = vld [vmem:[%s14695_s4 + $0x98] sm:$0xff]  ;;  %v1106_v46 = vld [vmem:[%s14695_s4 + $0x90] sm:$0xff] }
 0x19e   :  { %v1077_v63 = vmax.f32 %v11817_v48, %v1053_v53  ;;  %v1109_v48 = vld [vmem:[%s14695_s4 + $0xa8] sm:$0xff]  ;;  %v1108_v53 = vld [vmem:[%s14695_s4 + $0xa0] sm:$0xff] }
 0x19f   :  { %v1076_v3 = vmax.f32 %v957_v56, %v1052_v62  ;;  %v11820_v5 = vpop.f32.mrb[14].mxu0  ;;  %12294 = vmatpush1.bf16.msra.mxu0 %v12293_v60  ;;  %v1111_v56 = vld [vmem:[%s14695_s4 + $0xb8] sm:$0xff]  ;;  %v1110_v60 = vld [vmem:[%s14695_s4 + $0xb0] sm:$0xff] }
 0x1a0   :  { %v1055_v8 = vmul.f32 0.05, %v11820_v5  ;;  %v967_v10 = vpop.f32.mrb[15].mxu0  ;;  %12295 = vmatprep.subr.bf16.mxu0 %v13205_v36  ;;  %v1314_v62 = vld [vmem:[#allocation12 + $0x10] sm:$0xff] }
 0x1a1   :  { %v12296_v13 = vpack.c.bf16 %v1077_v63, %v1076_v3  ;;  %v1054_v17 = vmul.f32 0.05, %v967_v10  ;;  %v1315_v63 = vld [vmem:[#allocation12 + $0x18] sm:$0xff] }
 0x1a2   :  { %v1079_v19 = vmax.f32 %v11820_v5, %v1055_v8  ;;  %v12313_v3 = vpack.c.bf16 %v1315_v63, %v1314_v62  ;;  %v1299_v5 = vld [vmem:[#allocation12] sm:$0xff]  ;;  %v1300_v8 = vld [vmem:[#allocation12 + $0x8] sm:$0xff] }
 0x1a3   :  { %v1078_v23 = vmax.f32 %v967_v10, %v1054_v17  ;;  %v11823_v20 = vpop.f32.mrb[16].mxu0  ;;  %12297 = vmatpush1.bf16.msra.mxu0 %v12296_v13  ;;  %v12317_v10 = vpack.c.bf16 %v1300_v8, %v1299_v5 }
 0x1a4   :  { %v1057_v29 = vmul.f32 0.05, %v11823_v20  ;;  %v977_v31 = vpop.f32.mrb[17].mxu0  ;;  %12298 = vmatprep.subr.bf16.mxu0 %v13205_v36  ;;  %12314 = vmatprep.subr.bf16.mxu1 %v12313_v3 }
 0x1a5   :  { %v12299_v35 = vpack.c.bf16 %v1079_v19, %v1078_v23  ;;  %v1056_v51 = vmul.f32 0.05, %v977_v31  ;;  %12316 = vmatpush3.bf16.msra.mxu1 %v12313_v3 }
 0x1a6   :  { %v1081_v25 = vmax.f32 %v11823_v20, %v1057_v29  ;;  %12318 = vmatprep.subr.bf16.mxu1 %v12317_v10 }
 0x1a7   :  { %v1080_v39 = vmax.f32 %v977_v31, %v1056_v51  ;;  %v11826_v40 = vpop.f32.mrb[18].mxu0  ;;  %12300 = vmatpush1.bf16.msra.mxu0 %v12299_v35  ;;  %v1651_v31 = vld [vmem:[#allocation12 + $0x20] sm:$0xff]  ;;  %v1652_v35 = vld [vmem:[#allocation12 + $0x28] sm:$0xff] }
 0x1a8   :  { %v1059_v41 = vmul.f32 0.05, %v11826_v40  ;;  %v987_v42 = vpop.f32.mrb[19].mxu0  ;;  %12301 = vmatprep.subr.bf16.mxu0 %v13205_v36 }
 0x1a9   :  { %v12302_v44 = vpack.c.bf16 %v1081_v25, %v1080_v39  ;;  %v1058_v45 = vmul.f32 0.05, %v987_v42  ;;  %v12321_v25 = vpack.c.bf16 %v1652_v35, %v1651_v31 }
 0x1aa   :  { %v1083_v47 = vmax.f32 %v11826_v40, %v1059_v41 }
 0x1ab   :  { %v1082_v49 = vmax.f32 %v987_v42, %v1058_v45  ;;  %v11829_v50 = vpop.f32.mrb[20].mxu0  ;;  %12303 = vmatpush1.bf16.msra.mxu0 %v12302_v44 }
 0x1ac   :  { %v1061_v52 = vmul.f32 0.05, %v11829_v50  ;;  %v997_v54 = vpop.f32.mrb[21].mxu0  ;;  %12304 = vmatprep.subr.bf16.mxu0 %v13205_v36 }
 0x1ad   :  { %v12305_v55 = vpack.c.bf16 %v1083_v47, %v1082_v49  ;;  %v1060_v57 = vmul.f32 0.05, %v997_v54 }
 0x1ae   :  { %v1085_v58 = vmax.f32 %v11829_v50, %v1061_v52 }
 0x1af   :  { %v1084_v59 = vmax.f32 %v997_v54, %v1060_v57  ;;  %v11832_v61 = vpop.f32.mrb[22].mxu0  ;;  %12306 = vmatpush1.bf16.msra.mxu0 %v12305_v55 }
 0x1b0   :  { %v1063_v1 = vmul.f32 0.05, %v11832_v61  ;;  %v1007_v2 = vpop.f32.mrb[23].mxu0  ;;  %12307 = vmatprep.subr.bf16.mxu0 %v13205_v36 }
 0x1b1   :  { %v12308_v4 = vpack.c.bf16 %v1085_v58, %v1084_v59  ;;  %v1062_v6 = vmul.f32 0.05, %v1007_v2 }
 0x1b2   :  { %v1087_v7 = vmax.f32 %v11832_v61, %v1063_v1 }
 0x1b3   :  { %v1086_v9 = vmax.f32 %v1007_v2, %v1062_v6  ;;  %12309 = vmatpush1.bf16.msra.mxu0 %v12308_v4 }
 0x1b4   :  { %12310 = vmatprep.subr.bf16.mxu0 %v13205_v36 }
 0x1b5   :  { %v12311_v11 = vpack.c.bf16 %v1087_v7, %v1086_v9 }
 0x1b7   :  { %12312 = vmatpush1.bf16.msra.mxu0 %v12311_v11 }
 0x1ba   :  { %1214 = vmatmul.mubr.f32.vlgmr.msra.gmra.mrb[24].mxu0 %v13732_v12 }
 0x1bb   :  { %10993 = vmatprep.mubr.msk.f32.mxu0 %vm1112_vm3, %v1091_v14 }
 0x1be   :  { %1219 = vmatmul.mubr.f32.gmra.mrb[26].mxu0 %v13742_v15 }
 0x1bf   :  { %10994 = vmatprep.mubr.msk.f32.mxu0 %vm1112_vm3, %v1093_v16 }
 0x1c2   :  { %1224 = vmatmul.mubr.f32.gmra.mrb[28].mxu0 %v13752_v18 }
 0x1c3   :  { %10995 = vmatprep.mubr.msk.f32.mxu0 %vm1112_vm3, %v1095_v21 }
 0x1c6   :  { %1229 = vmatmul.mubr.f32.gmra.mrb[30].mxu0 %v13762_v22 }
 0x1c7   :  { %10996 = vmatprep.mubr.msk.f32.mxu0 %vm1112_vm3, %v1097_v24 }
 0x1ca   :  { %1234 = vmatmul.mubr.f32.gmra.mrb[32].mxu0 %v13772_v26 }
 0x1cb   :  { %10997 = vmatprep.mubr.msk.f32.mxu0 %vm1112_vm3, %v1099_v27 }
 0x1ce   :  { %1239 = vmatmul.mubr.f32.gmra.mrb[34].mxu0 %v13782_v28 }
 0x1cf   :  { %10998 = vmatprep.mubr.msk.f32.mxu0 %vm1112_vm3, %v1101_v30 }
 0x1d2   :  { %1244 = vmatmul.mubr.f32.gmra.mrb[36].mxu0 %v1100_v32 }
 0x1d3   :  { %10999 = vmatprep.mubr.msk.f32.mxu0 %vm1112_vm3, %v1103_v33 }
 0x1d6   :  { %1249 = vmatmul.mubr.f32.gmra.mrb[38].mxu0 %v1102_v34 }
 0x1d7   :  { %11000 = vmatprep.mubr.msk.f32.mxu0 %vm1112_vm3, %v1105_v37 }
 0x1da   :  { %1254 = vmatmul.mubr.f32.gmra.mrb[40].mxu0 %v1104_v38 }
 0x1db   :  { %11001 = vmatprep.mubr.msk.f32.mxu0 %vm1112_vm3, %v1107_v43 }
 0x1de   :  { %1259 = vmatmul.mubr.f32.gmra.mrb[42].mxu0 %v1106_v46 }
 0x1df   :  { %11002 = vmatprep.mubr.msk.f32.mxu0 %vm1112_vm3, %v1109_v48 }
 0x1e2   :  { %1264 = vmatmul.mubr.f32.gmra.mrb[44].mxu0 %v1108_v53 }
 0x1e3   :  { %11003 = vmatprep.mubr.msk.f32.mxu0 %vm1112_vm3, %v1111_v56 }
 0x1e6   :  { %1269 = vmatmul.mubr.f32.gmra.mrb[46].mxu0 %v1110_v60 }
 0x1e7   :  { %11923 = vmatprep.mubr.msk.f32.mxu0 %vm1856_vm6, %v13732_v12 }
 0x28d   :  { %v1215_v13 = vpop.f32.mrb[24].mxu0 }
 0x28e   :  { %1275 = vst.msk [vmem:[#allocation6 + $0x1] sm:$0xff] %vm1274_vm5, %v1215_v13  ;;  %v1217_v17 = vpop.f32.mrb[25].mxu0 }
 0x291   :  { %v1220_v19 = vpop.f32.mrb[26].mxu0 }
 0x292   :  { %1276 = vst.msk [vmem:[#allocation6 + $0x9] sm:$0xff] %vm1274_vm5, %v1220_v19  ;;  %v1222_v23 = vpop.f32.mrb[27].mxu0 }
 0x295   :  { %v1225_v20 = vpop.f32.mrb[28].mxu0  ;;  %v1301_v29 = vld [vmem:[#allocation6 + $0x1] sm:$0xff] }
 0x296   :  { %1277 = vst.msk [vmem:[#allocation6 + $0x11] sm:$0xff] %vm1274_vm5, %v1225_v20  ;;  %v1227_v51 = vpop.f32.mrb[29].mxu0  ;;  %11837 = vmatprep.mubr.msk.f32.mxu1 %vm1274_vm5, %v1301_v29  ;;  %v1287_v32 = vld [vmem:[#allocation6] sm:$0xff] }
 0x299   :  { %v1230_v39 = vpop.f32.mrb[30].mxu0  ;;  %v1302_v40 = vld [vmem:[#allocation6 + $0x9] sm:$0xff] }
 0x29a   :  { %1278 = vst.msk [vmem:[#allocation6 + $0x19] sm:$0xff] %vm1274_vm5, %v1230_v39  ;;  %v1232_v41 = vpop.f32.mrb[31].mxu0  ;;  %11838 = vmatmul.mubr.msk.f32.vlgmr.msra.gmra.mrb[0].mxu1 %vm1274_vm5, %v1302_v40  ;;  %v1288_v33 = vld [vmem:[#allocation6 + $0x8] sm:$0xff] }
 0x29b   :  { %12320 = vmatpush3.bf16.msra.mxu1 %v12317_v10  ;;  %v1638_v63 = vld [vmem:[#allocation6 + $0x2] sm:$0xff] }
 0x29c   :  { %12322 = vmatprep.subr.bf16.mxu1 %v12321_v25 }
 0x29d   :  { %v1235_v42 = vpop.f32.mrb[32].mxu0  ;;  %v1303_v44 = vld [vmem:[#allocation6 + $0x11] sm:$0xff] }
 0x29e   :  { %1279 = vst.msk [vmem:[#allocation6 + $0x21] sm:$0xff] %vm1274_vm5, %v1235_v42  ;;  %v1237_v45 = vpop.f32.mrb[33].mxu0  ;;  %11840 = vmatprep.mubr.msk.f32.mxu1 %vm1274_vm5, %v1303_v44  ;;  %v1289_v34 = vld [vmem:[#allocation6 + $0x10] sm:$0xff] }
 0x29f   :  { %v1639_v3 = vld [vmem:[#allocation6 + $0xa] sm:$0xff] }
 0x2a1   :  { %v1240_v47 = vpop.f32.mrb[34].mxu0  ;;  %v1304_v49 = vld [vmem:[#allocation6 + $0x19] sm:$0xff] }
 0x2a2   :  { %1280 = vst.msk [vmem:[#allocation6 + $0x29] sm:$0xff] %vm1274_vm5, %v1240_v47  ;;  %v1242_v50 = vpop.f32.mrb[35].mxu0  ;;  %11841 = vmatmul.mubr.msk.f32.gmra.mrb[2].mxu1 %vm1274_vm5, %v1304_v49  ;;  %v1290_v37 = vld [vmem:[#allocation6 + $0x18] sm:$0xff] }
 0x2a3   :  { %v1640_v5 = vld [vmem:[#allocation6 + $0x12] sm:$0xff] }
 0x2a5   :  { %v1245_v52 = vpop.f32.mrb[36].mxu0  ;;  %v1305_v54 = vld [vmem:[#allocation6 + $0x21] sm:$0xff] }
 0x2a6   :  { %1281 = vst.msk [vmem:[#allocation6 + $0x31] sm:$0xff] %vm1274_vm5, %v1245_v52  ;;  %v1247_v55 = vpop.f32.mrb[37].mxu0  ;;  %11843 = vmatprep.mubr.msk.f32.mxu1 %vm1274_vm5, %v1305_v54  ;;  %v1291_v38 = vld [vmem:[#allocation6 + $0x20] sm:$0xff] }
 0x2a7   :  { %v1641_v8 = vld [vmem:[#allocation6 + $0x1a] sm:$0xff] }
 0x2a9   :  { %v1250_v57 = vpop.f32.mrb[38].mxu0  ;;  %v1306_v58 = vld [vmem:[#allocation6 + $0x29] sm:$0xff] }
 0x2aa   :  { %1282 = vst.msk [vmem:[#allocation6 + $0x39] sm:$0xff] %vm1274_vm5, %v1250_v57  ;;  %v1252_v59 = vpop.f32.mrb[39].mxu0  ;;  %11844 = vmatmul.mubr.msk.f32.gmra.mrb[4].mxu1 %vm1274_vm5, %v1306_v58  ;;  %v1292_v43 = vld [vmem:[#allocation6 + $0x28] sm:$0xff] }
 0x2ab   :  { %v1642_v10 = vld [vmem:[#allocation6 + $0x22] sm:$0xff] }
 0x2ad   :  { %v1255_v61 = vpop.f32.mrb[40].mxu0  ;;  %v1307_v1 = vld [vmem:[#allocation6 + $0x31] sm:$0xff] }
 0x2ae   :  { %1283 = vst.msk [vmem:[#allocation6 + $0x41] sm:$0xff] %vm1274_vm5, %v1255_v61  ;;  %v1257_v2 = vpop.f32.mrb[41].mxu0  ;;  %11846 = vmatprep.mubr.msk.f32.mxu1 %vm1274_vm5, %v1307_v1  ;;  %v1293_v46 = vld [vmem:[#allocation6 + $0x30] sm:$0xff] }
 0x2af   :  { %v1643_v13 = vld [vmem:[#allocation6 + $0x2a] sm:$0xff] }
 0x2b1   :  { %v1260_v4 = vpop.f32.mrb[42].mxu0  ;;  %v1308_v6 = vld [vmem:[#allocation6 + $0x39] sm:$0xff] }
 0x2b2   :  { %1284 = vst.msk [vmem:[#allocation6 + $0x49] sm:$0xff] %vm1274_vm5, %v1260_v4  ;;  %v1262_v7 = vpop.f32.mrb[43].mxu0  ;;  %11847 = vmatmul.mubr.msk.f32.gmra.mrb[6].mxu1 %vm1274_vm5, %v1308_v6  ;;  %v1294_v48 = vld [vmem:[#allocation6 + $0x38] sm:$0xff] }
 0x2b3   :  { %v1644_v17 = vld [vmem:[#allocation6 + $0x32] sm:$0xff] }
 0x2b5   :  { %v1265_v9 = vpop.f32.mrb[44].mxu0  ;;  %v1309_v11 = vld [vmem:[#allocation6 + $0x41] sm:$0xff] }
 0x2b6   :  { %1285 = vst.msk [vmem:[#allocation6 + $0x51] sm:$0xff] %vm1274_vm5, %v1265_v9  ;;  %v1267_v14 = vpop.f32.mrb[45].mxu0  ;;  %11849 = vmatprep.mubr.msk.f32.mxu1 %vm1274_vm5, %v1309_v11  ;;  %v1295_v53 = vld [vmem:[#allocation6 + $0x40] sm:$0xff] }
 0x2b7   :  { %v1645_v19 = vld [vmem:[#allocation6 + $0x3a] sm:$0xff] }
 0x2b9   :  { %v1270_v16 = vpop.f32.mrb[46].mxu0  ;;  %v1310_v21 = vld [vmem:[#allocation6 + $0x49] sm:$0xff] }
 0x2ba   :  { %1286 = vst.msk [vmem:[#allocation6 + $0x59] sm:$0xff] %vm1274_vm5, %v1270_v16  ;;  %v1272_v24 = vpop.f32.mrb[47].mxu0  ;;  %11850 = vmatmul.mubr.msk.f32.gmra.mrb[8].mxu1 %vm1274_vm5, %v1310_v21  ;;  %v1296_v56 = vld [vmem:[#allocation6 + $0x48] sm:$0xff] }
 0x2bb   :  { %v1646_v23 = vld [vmem:[#allocation6 + $0x42] sm:$0xff] }
 0x2bd   :  { %v1311_v27 = vld [vmem:[#allocation6 + $0x51] sm:$0xff] }
 0x2be   :  { %11852 = vmatprep.mubr.msk.f32.mxu1 %vm1274_vm5, %v1311_v27  ;;  %v1297_v60 = vld [vmem:[#allocation6 + $0x50] sm:$0xff] }
 0x2bf   :  { %v1647_v20 = vld [vmem:[#allocation6 + $0x4a] sm:$0xff] }
 0x2c1   :  { %v1312_v30 = vld [vmem:[#allocation6 + $0x59] sm:$0xff] }
 0x2c2   :  { %11853 = vmatmul.mubr.msk.f32.gmra.mrb[10].mxu1 %vm1274_vm5, %v1312_v30  ;;  %v1298_v62 = vld [vmem:[#allocation6 + $0x58] sm:$0xff] }
 0x2c3   :  { %11859 = vmatprep.mubr.msk.f32.mxu1 %vm1274_vm5, %v1287_v32  ;;  %v1648_v29 = vld [vmem:[#allocation6 + $0x52] sm:$0xff]  ;;  %v1649_v31 = vld [vmem:[#allocation6 + $0x5a] sm:$0xff] }
 0x2c6   :  { %11860 = vmatmul.mubr.msk.f32.vlgmr.msra.gmra.mrb[0].mxu1 %vm1274_vm5, %v1288_v33 }
 0x2c7   :  { %11862 = vmatprep.mubr.msk.f32.mxu1 %vm1274_vm5, %v1289_v34  ;;  %12324 = vmatpush3.bf16.msra.mxu1 %v12321_v25 }
 0x2c8   :  { %12361 = vmatprep.subr.bf16.mxu1 %v13205_v36 }
 0x2ca   :  { %11863 = vmatmul.mubr.msk.f32.gmra.mrb[2].mxu1 %vm1274_vm5, %v1290_v37 }
 0x2cb   :  { %11865 = vmatprep.mubr.msk.f32.mxu1 %vm1274_vm5, %v1291_v38 }
 0x2ce   :  { %11866 = vmatmul.mubr.msk.f32.gmra.mrb[4].mxu1 %vm1274_vm5, %v1292_v43 }
 0x2cf   :  { %11868 = vmatprep.mubr.msk.f32.mxu1 %vm1274_vm5, %v1293_v46 }
 0x2d2   :  { %11869 = vmatmul.mubr.msk.f32.gmra.mrb[6].mxu1 %vm1274_vm5, %v1294_v48 }
 0x2d3   :  { %11871 = vmatprep.mubr.msk.f32.mxu1 %vm1274_vm5, %v1295_v53 }
 0x2d6   :  { %11872 = vmatmul.mubr.msk.f32.gmra.mrb[8].mxu1 %vm1274_vm5, %v1296_v56 }
 0x2d7   :  { %11874 = vmatprep.mubr.msk.f32.mxu1 %vm1274_vm5, %v1297_v60  ;;  %v1993_v60 = vld [vmem:[#allocation14 + $0x18] sm:$0xff] }
 0x2da   :  { %11875 = vmatmul.mubr.msk.f32.gmra.mrb[10].mxu1 %vm1274_vm5, %v1298_v62  ;;  %v1994_v62 = vld [vmem:[#allocation14 + $0x20] sm:$0xff] }
 0x2db   :  { %11881 = vmatprep.mubr.msk.f32.mxu1 %vm1274_vm5, %v1638_v63  ;;  %v12349_v63 = vpack.c.bf16 %v1994_v62, %v1993_v60  ;;  %v2549_v60 = vld [vmem:[#allocation5 + $0x71] sm:$0xff]  ;;  %v2550_v62 = vld [vmem:[#allocation5 + $0x79] sm:$0xff] }
 0x2de   :  { %11882 = vmatmul.mubr.msk.f32.vlgmr.msra.gmra.mrb[0].mxu1 %vm1274_vm5, %v1639_v3  ;;  %v1995_v3 = vld [vmem:[#allocation14 + $0x28] sm:$0xff] }
 0x2df   :  { %11884 = vmatprep.mubr.msk.f32.mxu1 %vm1274_vm5, %v1640_v5  ;;  %v1984_v5 = vld [vmem:[#allocation14 + $0x8] sm:$0xff] }
 0x2e2   :  { %11885 = vmatmul.mubr.msk.f32.gmra.mrb[2].mxu1 %vm1274_vm5, %v1641_v8 }
 0x2e3   :  { %11887 = vmatprep.mubr.msk.f32.mxu1 %vm1274_vm5, %v1642_v10 }
 0x2e6   :  { %11888 = vmatmul.mubr.msk.f32.gmra.mrb[4].mxu1 %vm1274_vm5, %v1643_v13 }
 0x2e7   :  { %11890 = vmatprep.mubr.msk.f32.mxu1 %vm1274_vm5, %v1644_v17 }
 0x2ea   :  { %11891 = vmatmul.mubr.msk.f32.gmra.mrb[6].mxu1 %vm1274_vm5, %v1645_v19 }
 0x2eb   :  { %11893 = vmatprep.mubr.msk.f32.mxu1 %vm1274_vm5, %v1646_v23 }
 0x2ee   :  { %11894 = vmatmul.mubr.msk.f32.gmra.mrb[8].mxu1 %vm1274_vm5, %v1647_v20  ;;  %v1985_v20 = vld [vmem:[#allocation14 + $0x10] sm:$0xff] }
 0x2ef   :  { %11896 = vmatprep.mubr.msk.f32.mxu1 %vm1274_vm5, %v1648_v29 }
 0x2f2   :  { %11897 = vmatmul.mubr.msk.f32.gmra.mrb[10].mxu1 %vm1274_vm5, %v1649_v31  ;;  %v2229_v31 = vld [vmem:[#allocation14 + $0x30] sm:$0xff] }
 0x2f3   :  { %11989 = vmatprep.mubr.msk.f32.mxu1 %vm13206_vm9, %v13204_v0 }
 0x3b1   :  { %v11883_v35 = vpop.f32.mrb[0].mxu1 }
 0x3b2   :  { %v1827_v51 = vmul.f32 0.05, %v11883_v35  ;;  %v1755_v25 = vpop.f32.mrb[1].mxu1 }
 0x3b3   :  { %v1826_v39 = vmul.f32 0.05, %v1755_v25 }
 0x3b4   :  { %v1839_v40 = vmax.f32 %v11883_v35, %v1827_v51  ;;  %v2230_v35 = vld [vmem:[#allocation14 + $0x38] sm:$0xff] }
 0x3b5   :  { %v1838_v41 = vmax.f32 %v1755_v25, %v1826_v39  ;;  %v11886_v42 = vpop.f32.mrb[2].mxu1  ;;  %v12357_v25 = vpack.c.bf16 %v2230_v35, %v2229_v31  ;;  %v2516_v31 = vld [vmem:[#allocation5 + $0x30] sm:$0xff]  ;;  %v2517_v35 = vld [vmem:[#allocation5 + $0x38] sm:$0xff] }
 0x3b6   :  { %v1829_v44 = vmul.f32 0.05, %v11886_v42  ;;  %v1765_v45 = vpop.f32.mrb[3].mxu1 }
 0x3b7   :  { %v12325_v47 = vpack.c.bf16 %v1839_v40, %v1838_v41  ;;  %v1828_v49 = vmul.f32 0.05, %v1765_v45 }
 0x3b8   :  { %v1841_v50 = vmax.f32 %v11886_v42, %v1829_v44 }
 0x3b9   :  { %v1840_v52 = vmax.f32 %v1765_v45, %v1828_v49  ;;  %v11889_v54 = vpop.f32.mrb[4].mxu1  ;;  %12326 = vmatprep.subr.bf16.mxu0 %v12325_v47  ;;  %v2231_v45 = vld [vmem:[#allocation14 + $0x40] sm:$0xff] }
 0x3ba   :  { %v1831_v55 = vmul.f32 0.05, %v11889_v54  ;;  %v1775_v57 = vpop.f32.mrb[5].mxu1  ;;  %12328 = vmatpush3.bf16.msra.mxu0 %v12325_v47 }
 0x3bb   :  { %v12329_v58 = vpack.c.bf16 %v1841_v50, %v1840_v52  ;;  %v1830_v59 = vmul.f32 0.05, %v1775_v57 }
 0x3bc   :  { %v1843_v61 = vmax.f32 %v11889_v54, %v1831_v55 }
 0x3bd   :  { %v1842_v1 = vmax.f32 %v1775_v57, %v1830_v59  ;;  %v11892_v2 = vpop.f32.mrb[6].mxu1  ;;  %12330 = vmatprep.subr.bf16.mxu0 %v12329_v58 }
 0x3be   :  { %v1833_v4 = vmul.f32 0.05, %v11892_v2  ;;  %v1785_v6 = vpop.f32.mrb[7].mxu1  ;;  %12332 = vmatpush3.bf16.msra.mxu0 %v12329_v58 }
 0x3bf   :  { %v12333_v7 = vpack.c.bf16 %v1843_v61, %v1842_v1  ;;  %v1832_v9 = vmul.f32 0.05, %v1785_v6 }
 0x3c0   :  { %v1845_v11 = vmax.f32 %v11892_v2, %v1833_v4 }
 0x3c1   :  { %v1844_v14 = vmax.f32 %v1785_v6, %v1832_v9  ;;  %v11895_v16 = vpop.f32.mrb[8].mxu1  ;;  %12334 = vmatprep.subr.bf16.mxu0 %v12333_v7 }
 0x3c2   :  { %v1835_v21 = vmul.f32 0.05, %v11895_v16  ;;  %v1795_v24 = vpop.f32.mrb[9].mxu1  ;;  %12336 = vmatpush3.bf16.msra.mxu0 %v12333_v7 }
 0x3c3   :  { %v12337_v27 = vpack.c.bf16 %v1845_v11, %v1844_v14  ;;  %v1834_v30 = vmul.f32 0.05, %v1795_v24 }
 0x3c4   :  { %v1847_v32 = vmax.f32 %v11895_v16, %v1835_v21  ;;  %v2559_v21 = vld [vmem:[#allocation9 + $0x4] sm:$0xf] }
 0x3c5   :  { %v1846_v33 = vmax.f32 %v1795_v24, %v1834_v30  ;;  %v11898_v34 = vpop.f32.mrb[10].mxu1  ;;  %12338 = vmatprep.subr.bf16.mxu0 %v12337_v27  ;;  %v2534_v24 = vld [vmem:[#allocation9] sm:$0xf]  ;;  %v2537_v30 = vld [vmem:[#allocation5 + $0x11] sm:$0xff] }
 0x3c6   :  { %v1837_v37 = vmul.f32 0.05, %v11898_v34  ;;  %v1805_v38 = vpop.f32.mrb[11].mxu1  ;;  %12340 = vmatpush3.bf16.msra.mxu0 %v12337_v27  ;;  %v2535_v27 = vld [vmem:[#allocation5 + $0x1] sm:$0xff] }
 0x3c7   :  { %v12341_v43 = vpack.c.bf16 %v1847_v32, %v1846_v33  ;;  %v1836_v46 = vmul.f32 0.05, %v1805_v38  ;;  %v3104_v32 = vld [vmem:[#allocation9 + $0x8] sm:$0xf]  ;;  %v2538_v33 = vld [vmem:[#allocation5 + $0x19] sm:$0xff] }
 0x3c8   :  { %v1849_v48 = vmax.f32 %v11898_v34, %v1837_v37  ;;  %v2541_v34 = vld [vmem:[#allocation5 + $0x31] sm:$0xff]  ;;  %v2542_v37 = vld [vmem:[#allocation5 + $0x39] sm:$0xff] }
 0x3c9   :  { %v1848_v53 = vmax.f32 %v1805_v38, %v1836_v46  ;;  %12342 = vmatprep.subr.bf16.mxu0 %v12341_v43  ;;  %v2543_v38 = vld [vmem:[#allocation5 + $0x41] sm:$0xff]  ;;  %v2545_v46 = vld [vmem:[#allocation5 + $0x51] sm:$0xff] }
 0x3ca   :  { %12344 = vmatpush3.bf16.msra.mxu0 %v12341_v43  ;;  %v2544_v43 = vld [vmem:[#allocation5 + $0x49] sm:$0xff] }
 0x3cb   :  { %v12345_v56 = vpack.c.bf16 %v1849_v48, %v1848_v53  ;;  %v2546_v48 = vld [vmem:[#allocation5 + $0x59] sm:$0xff]  ;;  %v2547_v53 = vld [vmem:[#allocation5 + $0x61] sm:$0xff] }
 0x3cd   :  { %12346 = vmatprep.subr.bf16.mxu0 %v12345_v56 }
 0x3ce   :  { %12348 = vmatpush3.bf16.msra.mxu0 %v12345_v56  ;;  %v2548_v56 = vld [vmem:[#allocation5 + $0x69] sm:$0xff] }
 0x3cf   :  { %12350 = vmatprep.subr.bf16.mxu0 %v12349_v63 }
 0x3d1   :  { %11924 = vmatmul.mubr.msk.f32.vlgmr.msra.gmra.mrb[48].mxu0 %vm1856_vm6, %v13742_v15 }
 0x3d2   :  { %11926 = vmatprep.mubr.msk.f32.mxu0 %vm1856_vm6, %v13752_v18  ;;  %12352 = vmatpush3.bf16.msra.mxu0 %v12349_v63  ;;  %v2551_v63 = vld [vmem:[#allocation5 + $0x81] sm:$0xff] }
 0x3d3   :  { %11936 = vmatprep.subr.mxu0 %v1995_v3 }
 0x3d5   :  { %11927 = vmatmul.mubr.msk.f32.gmra.mrb[50].mxu0 %vm1856_vm6, %v13762_v22  ;;  %v1983_v22 = vld [vmem:[#allocation14] sm:$0xff] }
 0x3d6   :  { %11929 = vmatprep.mubr.msk.f32.mxu0 %vm1856_vm6, %v13772_v26  ;;  %11937 = vmatpush3.msra.mxu0 %v1995_v3  ;;  %v12353_v8 = vpack.c.bf16 %v1984_v5, %v1983_v22  ;;  %v2552_v3 = vld [vmem:[#allocation5 + $0x89] sm:$0xff]  ;;  %v2553_v22 = vld [vmem:[#allocation5 + $0x91] sm:$0xff]  ;;  %v2554_v5 = vld [vmem:[#allocation5 + $0x99] sm:$0xff] }
 0x3d8   :  { %12354 = vmatprep.subr.bf16.mxu0 %v12353_v8 }
 0x3d9   :  { %11930 = vmatmul.mubr.msk.f32.gmra.mrb[52].mxu0 %vm1856_vm6, %v13782_v28 }
 0x4a4   :  { %v11925_v26 = vpop.f32.mrb[48].mxu0 }
 0x4a5   :  { %1972 = vst.msk [vmem:[#allocation7 + $0x9] sm:$0xff] %vm1970_vm8, %v11925_v26  ;;  %v1941_v28 = vpop.f32.mrb[49].mxu0  ;;  %v2556_v26 = vld [vmem:[#allocation5 + $0xa9] sm:$0xff] }
 0x4a6   :  { %1971 = vst.msk [vmem:[#allocation7 + $0x1] sm:$0xff] %vm1970_vm8, %v1941_v28  ;;  %v2557_v28 = vld [vmem:[#allocation5 + $0xb1] sm:$0xff] }
 0x4a8   :  { %v11928_v10 = vpop.f32.mrb[50].mxu0 }
 0x4a9   :  { %1974 = vst.msk [vmem:[#allocation7 + $0x19] sm:$0xff] %vm1970_vm8, %v11928_v10  ;;  %v1951_v13 = vpop.f32.mrb[51].mxu0  ;;  %v2558_v10 = vld [vmem:[#allocation5 + $0xb9] sm:$0xff] }
 0x4aa   :  { %1973 = vst.msk [vmem:[#allocation7 + $0x11] sm:$0xff] %vm1970_vm8, %v1951_v13  ;;  %v2510_v13 = vld [vmem:[#allocation5] sm:$0xff] }
 0x4ac   :  { %v11931_v17 = vpop.f32.mrb[52].mxu0  ;;  %v1987_v29 = vld [vmem:[#allocation7 + $0x9] sm:$0xff] }
 0x4ad   :  { %1976 = vst.msk [vmem:[#allocation7 + $0x29] sm:$0xff] %vm1970_vm8, %v11931_v17  ;;  %v1961_v19 = vpop.f32.mrb[53].mxu0  ;;  %v1986_v23 = vld [vmem:[#allocation7 + $0x1] sm:$0xff]  ;;  %v2511_v17 = vld [vmem:[#allocation5 + $0x8] sm:$0xff] }
 0x4ae   :  { %1975 = vst.msk [vmem:[#allocation7 + $0x21] sm:$0xff] %vm1970_vm8, %v1961_v19  ;;  %11938 = vmatprep.mubr.msk.f32.mxu0 %vm1970_vm8, %v1986_v23  ;;  %v1977_v42 = vld [vmem:[#allocation7] sm:$0xff]  ;;  %v1978_v44 = vld [vmem:[#allocation7 + $0x8] sm:$0xff] }
 0x4af   :  { %11939 = vmatmul.mubr.msk.f32.vlgmr.msra.gmra.mrb[54].mxu0 %vm1970_vm8, %v1987_v29  ;;  %v2222_v54 = vld [vmem:[#allocation7 + $0x2] sm:$0xff]  ;;  %v2515_v29 = vld [vmem:[#allocation5 + $0x28] sm:$0xff] }
 0x4b0   :  { %12356 = vmatpush3.bf16.msra.mxu0 %v12353_v8  ;;  %v1989_v39 = vld [vmem:[#allocation7 + $0x19] sm:$0xff]  ;;  %v2555_v8 = vld [vmem:[#allocation5 + $0xa1] sm:$0xff]  ;;  %v2513_v23 = vld [vmem:[#allocation5 + $0x18] sm:$0xff] }
 0x4b1   :  { %v1988_v51 = vld [vmem:[#allocation7 + $0x11] sm:$0xff]  ;;  %11951 = vmatprep.subr.mxu0 %v1985_v20  ;;  %v2512_v19 = vld [vmem:[#allocation5 + $0x10] sm:$0xff] }
 0x4b2   :  { %11941 = vmatprep.mubr.msk.f32.mxu0 %vm1970_vm8, %v1988_v51  ;;  %v1979_v47 = vld [vmem:[#allocation7 + $0x10] sm:$0xff]  ;;  %v1980_v49 = vld [vmem:[#allocation7 + $0x18] sm:$0xff] }
 0x4b3   :  { %11942 = vmatmul.mubr.msk.f32.gmra.mrb[56].mxu0 %vm1970_vm8, %v1989_v39  ;;  %v2223_v55 = vld [vmem:[#allocation7 + $0xa] sm:$0xff]  ;;  %v2224_v57 = vld [vmem:[#allocation7 + $0x12] sm:$0xff]  ;;  %v2520_v39 = vld [vmem:[#allocation5 + $0x50] sm:$0xff] }
 0x4b4   :  { %11952 = vmatpush3.msra.mxu0 %v1985_v20  ;;  %v1991_v41 = vld [vmem:[#allocation7 + $0x29] sm:$0xff] }
 0x4b5   :  { %v1990_v40 = vld [vmem:[#allocation7 + $0x21] sm:$0xff]  ;;  %12358 = vmatprep.subr.bf16.mxu0 %v12357_v25  ;;  %v2227_v61 = vld [vmem:[#allocation7 + $0x2a] sm:$0xff] }
 0x4b6   :  { %11944 = vmatprep.mubr.msk.f32.mxu0 %vm1970_vm8, %v1990_v40  ;;  %v1981_v50 = vld [vmem:[#allocation7 + $0x20] sm:$0xff]  ;;  %v1982_v52 = vld [vmem:[#allocation7 + $0x28] sm:$0xff]  ;;  %v2514_v20 = vld [vmem:[#allocation5 + $0x20] sm:$0xff] }
 0x4b7   :  { %11945 = vmatmul.mubr.msk.f32.gmra.mrb[58].mxu0 %vm1970_vm8, %v1991_v41  ;;  %v2225_v58 = vld [vmem:[#allocation7 + $0x1a] sm:$0xff]  ;;  %v2226_v59 = vld [vmem:[#allocation7 + $0x22] sm:$0xff]  ;;  %v2518_v51 = vld [vmem:[#allocation5 + $0x40] sm:$0xff] }
 0x4b8   :  { %11953 = vmatprep.mubr.msk.f32.mxu0 %vm1970_vm8, %v1977_v42  ;;  %v2521_v40 = vld [vmem:[#allocation5 + $0x58] sm:$0xff]  ;;  %v2522_v41 = vld [vmem:[#allocation5 + $0x60] sm:$0xff]  ;;  %v2523_v42 = vld [vmem:[#allocation5 + $0x68] sm:$0xff] }
 0x4bb   :  { %11954 = vmatmul.mubr.msk.f32.vlgmr.msra.gmra.mrb[54].mxu0 %vm1970_vm8, %v1978_v44  ;;  %v2524_v44 = vld [vmem:[#allocation5 + $0x70] sm:$0xff] }
 0x4bc   :  { %11956 = vmatprep.mubr.msk.f32.mxu0 %vm1970_vm8, %v1979_v47  ;;  %12360 = vmatpush3.bf16.msra.mxu0 %v12357_v25  ;;  %v2519_v25 = vld [vmem:[#allocation5 + $0x48] sm:$0xff]  ;;  %v2526_v47 = vld [vmem:[#allocation5 + $0x80] sm:$0xff] }
 0x4bd   :  { %11966 = vmatprep.subr.mxu0 %v2231_v45 }
 0x4bf   :  { %11957 = vmatmul.mubr.msk.f32.gmra.mrb[56].mxu0 %vm1970_vm8, %v1980_v49  ;;  %v2527_v49 = vld [vmem:[#allocation5 + $0x88] sm:$0xff] }
 0x4c0   :  { %11959 = vmatprep.mubr.msk.f32.mxu0 %vm1970_vm8, %v1981_v50  ;;  %11967 = vmatpush3.msra.mxu0 %v2231_v45  ;;  %v2525_v45 = vld [vmem:[#allocation5 + $0x78] sm:$0xff]  ;;  %v2528_v50 = vld [vmem:[#allocation5 + $0x90] sm:$0xff] }
 0x4c1   :  { %12370 = vmatprep.subr.bf16.mxu0 %v13205_v36 }
 0x4c3   :  { %11960 = vmatmul.mubr.msk.f32.gmra.mrb[58].mxu0 %vm1970_vm8, %v1982_v52  ;;  %v2529_v52 = vld [vmem:[#allocation5 + $0x98] sm:$0xff] }
 0x4c4   :  { %11968 = vmatprep.mubr.msk.f32.mxu0 %vm1970_vm8, %v2222_v54  ;;  %v2530_v54 = vld [vmem:[#allocation5 + $0xa0] sm:$0xff] }
 0x4c7   :  { %11969 = vmatmul.mubr.msk.f32.vlgmr.msra.gmra.mrb[54].mxu0 %vm1970_vm8, %v2223_v55  ;;  %v2531_v55 = vld [vmem:[#allocation5 + $0xa8] sm:$0xff] }
 0x4c8   :  { %11971 = vmatprep.mubr.msk.f32.mxu0 %vm1970_vm8, %v2224_v57  ;;  %v2532_v57 = vld [vmem:[#allocation5 + $0xb0] sm:$0xff] }
 0x4cb   :  { %11972 = vmatmul.mubr.msk.f32.gmra.mrb[56].mxu0 %vm1970_vm8, %v2225_v58  ;;  %v2533_v58 = vld [vmem:[#allocation5 + $0xb8] sm:$0xff] }
 0x4cc   :  { %11974 = vmatprep.mubr.msk.f32.mxu0 %vm1970_vm8, %v2226_v59  ;;  %v3080_v59 = vld [vmem:[#allocation5 + $0x2] sm:$0xff] }
 0x4cf   :  { %11975 = vmatmul.mubr.msk.f32.gmra.mrb[58].mxu0 %vm1970_vm8, %v2227_v61  ;;  %v3081_v61 = vld [vmem:[#allocation5 + $0xa] sm:$0xff] }
 0x59a   :  { %v11970_v1 = vpop.f32.mrb[54].mxu0 }
 0x59b   :  { %v2316_v2 = vpop.f32.mrb[55].mxu0 }
 0x59c   :  { %v12362_v4 = vpack.c.bf16 %v11970_v1, %v2316_v2  ;;  %v3082_v1 = vld [vmem:[#allocation5 + $0x12] sm:$0xff]  ;;  %v3083_v2 = vld [vmem:[#allocation5 + $0x1a] sm:$0xff] }
 0x59e   :  { %v11973_v6 = vpop.f32.mrb[56].mxu0  ;;  %12363 = vmatpush3.bf16.msra.mxu1 %v12362_v4  ;;  %v3084_v4 = vld [vmem:[#allocation5 + $0x22] sm:$0xff] }
 0x59f   :  { %v2326_v7 = vpop.f32.mrb[57].mxu0  ;;  %12364 = vmatprep.subr.bf16.mxu1 %v13205_v36 }
 0x5a0   :  { %v12365_v9 = vpack.c.bf16 %v11973_v6, %v2326_v7  ;;  %v3085_v6 = vld [vmem:[#allocation5 + $0x2a] sm:$0xff]  ;;  %v3086_v7 = vld [vmem:[#allocation5 + $0x32] sm:$0xff] }
 0x5a2   :  { %v11976_v11 = vpop.f32.mrb[58].mxu0  ;;  %12366 = vmatpush3.bf16.msra.mxu1 %v12365_v9  ;;  %v3087_v9 = vld [vmem:[#allocation5 + $0x3a] sm:$0xff] }
 0x5a3   :  { %v2336_v14 = vpop.f32.mrb[59].mxu0  ;;  %12367 = vmatprep.subr.bf16.mxu1 %v13205_v36 }
 0x5a4   :  { %v12368_v16 = vpack.c.bf16 %v11976_v11, %v2336_v14  ;;  %v3088_v11 = vld [vmem:[#allocation5 + $0x42] sm:$0xff]  ;;  %v3089_v14 = vld [vmem:[#allocation5 + $0x4a] sm:$0xff] }
 0x5a6   :  { %12369 = vmatpush3.bf16.msra.mxu1 %v12368_v16  ;;  %v3090_v16 = vld [vmem:[#allocation5 + $0x52] sm:$0xff] }
 0x5a7   :  { %11998 = vmatprep.subr.msk.mxu1 %vm281_vm1, %v2559_v21 }
 0x5a9   :  { %11990 = vmatmul.mubr.msk.f32.vlgmr.msra.gmra.mrb[12].mxu1 %vm2354_vm10, %v13732_v12  ;;  %v2536_v12 = vld [vmem:[#allocation5 + $0x9] sm:$0xff] }
 0x5aa   :  { %11992 = vmatprep.mubr.msk.f32.mxu1 %vm13206_vm9, %v13204_v0  ;;  %11999 = vmatpush3.msk.msra.mxu1 %vm281_vm1, %v2559_v21  ;;  %v3091_v21 = vld [vmem:[#allocation5 + $0x5a] sm:$0xff] }
 0x5ab   :  { %12036 = vmatprep.subr.msk.mxu1 %vm281_vm1, %v2534_v24 }
 0x5ad   :  { %11993 = vmatmul.mubr.msk.f32.gmra.mrb[14].mxu1 %vm2354_vm10, %v13742_v15  ;;  %v2539_v15 = vld [vmem:[#allocation5 + $0x21] sm:$0xff] }
 0x5ae   :  { %11995 = vmatprep.mubr.msk.f32.mxu1 %vm13206_vm9, %v13204_v0 }
 0x5b1   :  { %11996 = vmatmul.mubr.msk.f32.gmra.mrb[16].mxu1 %vm2354_vm10, %v13752_v18  ;;  %v2540_v18 = vld [vmem:[#allocation5 + $0x29] sm:$0xff] }
 0x5b2   :  { %12000 = vmatprep.mubr.msk.f32.mxu1 %vm133_vm2, %v2535_v27  ;;  %v3093_v27 = vld [vmem:[#allocation5 + $0x6a] sm:$0xff] }
 0x5b5   :  { %12001 = vmatmul.mubr.msk.f32.vlgmr.msra.gmra.mrb[18].mxu1 %vm133_vm2, %v2536_v12  ;;  %v3094_v12 = vld [vmem:[#allocation5 + $0x72] sm:$0xff] }
 0x5b6   :  { %12003 = vmatprep.mubr.msk.f32.mxu1 %vm133_vm2, %v2537_v30  ;;  %12037 = vmatpush3.msk.msra.mxu1 %vm281_vm1, %v2534_v24  ;;  %v3092_v24 = vld [vmem:[#allocation5 + $0x62] sm:$0xff]  ;;  %v3095_v30 = vld [vmem:[#allocation5 + $0x7a] sm:$0xff] }
 0x5b7   :  { %12074 = vmatprep.subr.msk.mxu1 %vm281_vm1, %v3104_v32 }
 0x5b9   :  { %12004 = vmatmul.mubr.msk.f32.gmra.mrb[20].mxu1 %vm133_vm2, %v2538_v33  ;;  %v3097_v33 = vld [vmem:[#allocation5 + $0x8a] sm:$0xff] }
 0x5ba   :  { %12006 = vmatprep.mubr.msk.f32.mxu1 %vm133_vm2, %v2539_v15  ;;  %v3098_v15 = vld [vmem:[#allocation5 + $0x92] sm:$0xff] }
 0x5bd   :  { %12007 = vmatmul.mubr.msk.f32.gmra.mrb[22].mxu1 %vm133_vm2, %v2540_v18  ;;  %v3099_v18 = vld [vmem:[#allocation5 + $0x9a] sm:$0xff] }
 0x5be   :  { %12009 = vmatprep.mubr.msk.f32.mxu1 %vm133_vm2, %v2541_v34  ;;  %v3100_v34 = vld [vmem:[#allocation5 + $0xa2] sm:$0xff] }
 0x5c1   :  { %12010 = vmatmul.mubr.msk.f32.gmra.mrb[24].mxu1 %vm133_vm2, %v2542_v37  ;;  %v3101_v37 = vld [vmem:[#allocation5 + $0xaa] sm:$0xff] }
 0x5c2   :  { %12012 = vmatprep.mubr.msk.f32.mxu1 %vm133_vm2, %v2543_v38  ;;  %v3102_v38 = vld [vmem:[#allocation5 + $0xb2] sm:$0xff] }
 0x5c5   :  { %12013 = vmatmul.mubr.msk.f32.gmra.mrb[26].mxu1 %vm133_vm2, %v2544_v43  ;;  %v3103_v43 = vld [vmem:[#allocation5 + $0xba] sm:$0xff] }
 0x5c6   :  { %12015 = vmatprep.mubr.msk.f32.mxu1 %vm133_vm2, %v2545_v46 }
 0x5c9   :  { %12016 = vmatmul.mubr.msk.f32.gmra.mrb[28].mxu1 %vm133_vm2, %v2546_v48 }
 0x5ca   :  { %12018 = vmatprep.mubr.msk.f32.mxu1 %vm133_vm2, %v2547_v53 }
 0x5cd   :  { %12019 = vmatmul.mubr.msk.f32.gmra.mrb[30].mxu1 %vm133_vm2, %v2548_v56 }
 0x5ce   :  { %12021 = vmatprep.mubr.msk.f32.mxu1 %vm133_vm2, %v2549_v60 }
 0x5d1   :  { %12022 = vmatmul.mubr.msk.f32.gmra.mrb[32].mxu1 %vm133_vm2, %v2550_v62 }
 0x5d2   :  { %12024 = vmatprep.mubr.msk.f32.mxu1 %vm133_vm2, %v2551_v63 }
 0x5d5   :  { %12025 = vmatmul.mubr.msk.f32.gmra.mrb[34].mxu1 %vm133_vm2, %v2552_v3 }
 0x5d6   :  { %12027 = vmatprep.mubr.msk.f32.mxu1 %vm133_vm2, %v2553_v22 }
 0x5d9   :  { %12028 = vmatmul.mubr.msk.f32.gmra.mrb[36].mxu1 %vm133_vm2, %v2554_v5  ;;  %v3438_v5 = vld [vmem:[%s14695_s4 + $0x8] sm:$0xff] }
 0x5da   :  { %12030 = vmatprep.mubr.msk.f32.mxu1 %vm133_vm2, %v2555_v8  ;;  %v14018_v8 = vld [vmem:[%s14695_s4] sm:$0xff]  ;;  %11169 = vmatprep.mubr.msk.f32.mxu0 %vm1112_vm3, %v3438_v5 }
 0x5dd   :  { %12031 = vmatmul.mubr.msk.f32.gmra.mrb[38].mxu1 %vm133_vm2, %v2556_v26 }
 0x5de   :  { %12033 = vmatprep.mubr.msk.f32.mxu1 %vm133_vm2, %v2557_v28 }
 0x5e1   :  { %12034 = vmatmul.mubr.msk.f32.gmra.mrb[40].mxu1 %vm133_vm2, %v2558_v10 }
 0x5e2   :  { %12038 = vmatprep.mubr.msk.f32.mxu1 %vm133_vm2, %v2510_v13 }
 0x5e5   :  { %12039 = vmatmul.mubr.msk.f32.vlgmr.msra.gmra.mrb[18].mxu1 %vm133_vm2, %v2511_v17 }
 0x5e6   :  { %12041 = vmatprep.mubr.msk.f32.mxu1 %vm133_vm2, %v2512_v19  ;;  %12075 = vmatpush3.msk.msra.mxu1 %vm281_vm1, %v3104_v32  ;;  %v3096_v32 = vld [vmem:[#allocation5 + $0x82] sm:$0xff] }
 0x5e9   :  { %12042 = vmatmul.mubr.msk.f32.gmra.mrb[20].mxu1 %vm133_vm2, %v2513_v23 }
 0x5ea   :  { %12044 = vmatprep.mubr.msk.f32.mxu1 %vm133_vm2, %v2514_v20 }
 0x5ed   :  { %12045 = vmatmul.mubr.msk.f32.gmra.mrb[22].mxu1 %vm133_vm2, %v2515_v29 }
 0x5ee   :  { %12047 = vmatprep.mubr.msk.f32.mxu1 %vm133_vm2, %v2516_v31 }
 0x5f1   :  { %12048 = vmatmul.mubr.msk.f32.gmra.mrb[24].mxu1 %vm133_vm2, %v2517_v35 }
 0x5f2   :  { %12050 = vmatprep.mubr.msk.f32.mxu1 %vm133_vm2, %v2518_v51 }
 0x5f5   :  { %12051 = vmatmul.mubr.msk.f32.gmra.mrb[26].mxu1 %vm133_vm2, %v2519_v25 }
 0x5f6   :  { %12053 = vmatprep.mubr.msk.f32.mxu1 %vm133_vm2, %v2520_v39 }
 0x5f9   :  { %12054 = vmatmul.mubr.msk.f32.gmra.mrb[28].mxu1 %vm133_vm2, %v2521_v40 }
 0x5fa   :  { %12056 = vmatprep.mubr.msk.f32.mxu1 %vm133_vm2, %v2522_v41 }
 0x5fd   :  { %12057 = vmatmul.mubr.msk.f32.gmra.mrb[30].mxu1 %vm133_vm2, %v2523_v42 }
 0x5fe   :  { %12059 = vmatprep.mubr.msk.f32.mxu1 %vm133_vm2, %v2524_v44 }
 0x601   :  { %12060 = vmatmul.mubr.msk.f32.gmra.mrb[32].mxu1 %vm133_vm2, %v2525_v45 }
 0x602   :  { %12062 = vmatprep.mubr.msk.f32.mxu1 %vm133_vm2, %v2526_v47 }
 0x605   :  { %12063 = vmatmul.mubr.msk.f32.gmra.mrb[34].mxu1 %vm133_vm2, %v2527_v49 }
 0x606   :  { %12065 = vmatprep.mubr.msk.f32.mxu1 %vm133_vm2, %v2528_v50 }
 0x609   :  { %12066 = vmatmul.mubr.msk.f32.gmra.mrb[36].mxu1 %vm133_vm2, %v2529_v52 }
 0x60a   :  { %12068 = vmatprep.mubr.msk.f32.mxu1 %vm133_vm2, %v2530_v54 }
 0x60d   :  { %12069 = vmatmul.mubr.msk.f32.gmra.mrb[38].mxu1 %vm133_vm2, %v2531_v55 }
 0x60e   :  { %12071 = vmatprep.mubr.msk.f32.mxu1 %vm133_vm2, %v2532_v57 }
 0x611   :  { %12072 = vmatmul.mubr.msk.f32.gmra.mrb[40].mxu1 %vm133_vm2, %v2533_v58 }
 0x612   :  { %12076 = vmatprep.mubr.msk.f32.mxu1 %vm133_vm2, %v3080_v59 }
 0x615   :  { %12077 = vmatmul.mubr.msk.f32.vlgmr.msra.gmra.mrb[18].mxu1 %vm133_vm2, %v3081_v61 }
 0x616   :  { %12079 = vmatprep.mubr.msk.f32.mxu1 %vm133_vm2, %v3082_v1 }
 0x619   :  { %12080 = vmatmul.mubr.msk.f32.gmra.mrb[20].mxu1 %vm133_vm2, %v3083_v2 }
 0x61a   :  { %12082 = vmatprep.mubr.msk.f32.mxu1 %vm133_vm2, %v3084_v4 }
 0x61d   :  { %12083 = vmatmul.mubr.msk.f32.gmra.mrb[22].mxu1 %vm133_vm2, %v3085_v6 }
 0x61e   :  { %12085 = vmatprep.mubr.msk.f32.mxu1 %vm133_vm2, %v3086_v7 }
 0x621   :  { %12086 = vmatmul.mubr.msk.f32.gmra.mrb[24].mxu1 %vm133_vm2, %v3087_v9 }
 0x622   :  { %12088 = vmatprep.mubr.msk.f32.mxu1 %vm133_vm2, %v3088_v11 }
 0x625   :  { %12089 = vmatmul.mubr.msk.f32.gmra.mrb[26].mxu1 %vm133_vm2, %v3089_v14 }
 0x626   :  { %12091 = vmatprep.mubr.msk.f32.mxu1 %vm133_vm2, %v3090_v16 }
 0x629   :  { %12092 = vmatmul.mubr.msk.f32.gmra.mrb[28].mxu1 %vm133_vm2, %v3091_v21 }
 0x62a   :  { %12094 = vmatprep.mubr.msk.f32.mxu1 %vm133_vm2, %v3092_v24 }
 0x62d   :  { %12095 = vmatmul.mubr.msk.f32.gmra.mrb[30].mxu1 %vm133_vm2, %v3093_v27 }
 0x62e   :  { %12097 = vmatprep.mubr.msk.f32.mxu1 %vm133_vm2, %v3094_v12 }
 0x631   :  { %12098 = vmatmul.mubr.msk.f32.gmra.mrb[32].mxu1 %vm133_vm2, %v3095_v30 }
 0x632   :  { %12100 = vmatprep.mubr.msk.f32.mxu1 %vm133_vm2, %v3096_v32 }
 0x635   :  { %12101 = vmatmul.mubr.msk.f32.gmra.mrb[34].mxu1 %vm133_vm2, %v3097_v33 }
 0x636   :  { %12103 = vmatprep.mubr.msk.f32.mxu1 %vm133_vm2, %v3098_v15 }
 0x639   :  { %12104 = vmatmul.mubr.msk.f32.gmra.mrb[36].mxu1 %vm133_vm2, %v3099_v18 }
 0x63a   :  { %12106 = vmatprep.mubr.msk.f32.mxu1 %vm133_vm2, %v3100_v34 }
 0x63d   :  { %12107 = vmatmul.mubr.msk.f32.gmra.mrb[38].mxu1 %vm133_vm2, %v3101_v37 }
 0x63e   :  { %12109 = vmatprep.mubr.msk.f32.mxu1 %vm133_vm2, %v3102_v38 }
 0x641   :  { %12110 = vmatmul.mubr.msk.f32.gmra.mrb[40].mxu1 %vm133_vm2, %v3103_v43 }
 0x642   :  { %12202 = vmatprep.mubr.msk.f32.mxu1 %vm1856_vm6, %v14018_v8 }
 0x67c   :  { %v2430_v46 = vpop.f32.mrb[12].mxu1 }
 0x67d   :  { %v11371_v48 = vpack.c.bf16 %v2430_v46, %v2430_v46  ;;  %v11991_v53 = vpop.f32.mrb[13].mxu1 }
 0x67f   :  { %2458 = vst.msk [vmem:[#allocation8] sm:$0xf] %vm2457_vm11, %v11371_v48 }
 0x680   :  { %v2435_v56 = vpop.f32.mrb[14].mxu1 }
 0x681   :  { %v11372_v60 = vpack.c.bf16 %v2435_v56, %v2435_v56  ;;  %v11994_v62 = vpop.f32.mrb[15].mxu1 }
 0x683   :  { %2459 = vst.msk [vmem:[#allocation8 + $0x4] sm:$0xf] %vm2457_vm11, %v11372_v60 }
 0x684   :  { %v2440_v63 = vpop.f32.mrb[16].mxu1 }
 0x685   :  { %v11373_v3 = vpack.c.bf16 %v2440_v63, %v2440_v63  ;;  %v11997_v22 = vpop.f32.mrb[17].mxu1 }
 0x687   :  { %2460 = vst.msk [vmem:[#allocation8 + $0x8] sm:$0xf] %vm2457_vm11, %v11373_v3 }
 0x6e8   :  { %v12078_v26 = vpop.f32.mrb[18].mxu1 }
 0x6e9   :  { %v3390_v28 = vmul.f32 0.05, %v12078_v26  ;;  %v3246_v10 = vpop.f32.mrb[19].mxu1 }
 0x6ea   :  { %v3389_v13 = vmul.f32 0.05, %v3246_v10 }
 0x6eb   :  { %v3414_v17 = vmax.f32 %v12078_v26, %v3390_v28 }
 0x6ec   :  { %v3413_v19 = vmax.f32 %v3246_v10, %v3389_v13  ;;  %v12081_v23 = vpop.f32.mrb[20].mxu1 }
 0x6ed   :  { %v3392_v20 = vmul.f32 0.05, %v12081_v23  ;;  %v3256_v29 = vpop.f32.mrb[21].mxu1 }
 0x6ee   :  { %v12371_v31 = vpack.c.bf16 %v3414_v17, %v3413_v19  ;;  %v3391_v35 = vmul.f32 0.05, %v3256_v29 }
 0x6ef   :  { %v3416_v51 = vmax.f32 %v12081_v23, %v3392_v20 }
 0x6f0   :  { %v3415_v25 = vmax.f32 %v3256_v29, %v3391_v35  ;;  %v12084_v39 = vpop.f32.mrb[22].mxu1  ;;  %12372 = vmatpush1.bf16.msra.mxu0 %v12371_v31 }
 0x6f1   :  { %v3394_v40 = vmul.f32 0.05, %v12084_v39  ;;  %v3266_v41 = vpop.f32.mrb[23].mxu1  ;;  %12373 = vmatprep.subr.bf16.mxu0 %v13205_v36 }
 0x6f2   :  { %v12374_v42 = vpack.c.bf16 %v3416_v51, %v3415_v25  ;;  %v3393_v44 = vmul.f32 0.05, %v3266_v41 }
 0x6f3   :  { %v3418_v45 = vmax.f32 %v12084_v39, %v3394_v40 }
 0x6f4   :  { %v3417_v47 = vmax.f32 %v3266_v41, %v3393_v44  ;;  %v12087_v49 = vpop.f32.mrb[24].mxu1  ;;  %12375 = vmatpush1.bf16.msra.mxu0 %v12374_v42 }
 0x6f5   :  { %v3396_v50 = vmul.f32 0.05, %v12087_v49  ;;  %v3276_v52 = vpop.f32.mrb[25].mxu1  ;;  %12376 = vmatprep.subr.bf16.mxu0 %v13205_v36 }
 0x6f6   :  { %v12377_v54 = vpack.c.bf16 %v3418_v45, %v3417_v47  ;;  %v3395_v55 = vmul.f32 0.05, %v3276_v52 }
 0x6f7   :  { %v3420_v57 = vmax.f32 %v12087_v49, %v3396_v50 }
 0x6f8   :  { %v3419_v58 = vmax.f32 %v3276_v52, %v3395_v55  ;;  %v12090_v59 = vpop.f32.mrb[26].mxu1  ;;  %12378 = vmatpush1.bf16.msra.mxu0 %v12377_v54  ;;  %v3440_v54 = vld [vmem:[%s14695_s4 + $0x18] sm:$0xff]  ;;  %v14042_v55 = vld [vmem:[%s14695_s4 + $0x10] sm:$0xff] }
 0x6f9   :  { %v3398_v61 = vmul.f32 0.05, %v12090_v59  ;;  %v3286_v1 = vpop.f32.mrb[27].mxu1  ;;  %12379 = vmatprep.subr.bf16.mxu0 %v13205_v36 }
 0x6fa   :  { %v12380_v2 = vpack.c.bf16 %v3420_v57, %v3419_v58  ;;  %v3397_v4 = vmul.f32 0.05, %v3286_v1  ;;  %v3442_v57 = vld [vmem:[%s14695_s4 + $0x28] sm:$0xff]  ;;  %v14052_v58 = vld [vmem:[%s14695_s4 + $0x20] sm:$0xff] }
 0x6fb   :  { %v3422_v6 = vmax.f32 %v12090_v59, %v3398_v61  ;;  %v3444_v59 = vld [vmem:[%s14695_s4 + $0x38] sm:$0xff]  ;;  %v14062_v61 = vld [vmem:[%s14695_s4 + $0x30] sm:$0xff] }
 0x6fc   :  { %v3421_v7 = vmax.f32 %v3286_v1, %v3397_v4  ;;  %v12093_v9 = vpop.f32.mrb[28].mxu1  ;;  %12381 = vmatpush1.bf16.msra.mxu0 %v12380_v2  ;;  %v3446_v1 = vld [vmem:[%s14695_s4 + $0x48] sm:$0xff]  ;;  %v14072_v2 = vld [vmem:[%s14695_s4 + $0x40] sm:$0xff]  ;;  %v3448_v4 = vld [vmem:[%s14695_s4 + $0x58] sm:$0xff] }
 0x6fd   :  { %v3400_v11 = vmul.f32 0.05, %v12093_v9  ;;  %v3296_v14 = vpop.f32.mrb[29].mxu1  ;;  %12382 = vmatprep.subr.bf16.mxu0 %v13205_v36 }
 0x6fe   :  { %v12383_v16 = vpack.c.bf16 %v3422_v6, %v3421_v7  ;;  %v3399_v21 = vmul.f32 0.05, %v3296_v14  ;;  %v14082_v6 = vld [vmem:[%s14695_s4 + $0x50] sm:$0xff]  ;;  %v3450_v7 = vld [vmem:[%s14695_s4 + $0x68] sm:$0xff] }
 0x6ff   :  { %v3424_v24 = vmax.f32 %v12093_v9, %v3400_v11  ;;  %v3449_v9 = vld [vmem:[%s14695_s4 + $0x60] sm:$0xff]  ;;  %v3452_v11 = vld [vmem:[%s14695_s4 + $0x78] sm:$0xff] }
 0x700   :  { %v3423_v27 = vmax.f32 %v3296_v14, %v3399_v21  ;;  %v12096_v12 = vpop.f32.mrb[30].mxu1  ;;  %12384 = vmatpush1.bf16.msra.mxu0 %v12383_v16  ;;  %v3451_v14 = vld [vmem:[%s14695_s4 + $0x70] sm:$0xff]  ;;  %v3454_v16 = vld [vmem:[%s14695_s4 + $0x88] sm:$0xff]  ;;  %v3453_v21 = vld [vmem:[%s14695_s4 + $0x80] sm:$0xff] }
 0x701   :  { %v3402_v30 = vmul.f32 0.05, %v12096_v12  ;;  %v3306_v32 = vpop.f32.mrb[31].mxu1  ;;  %12385 = vmatprep.subr.bf16.mxu0 %v13205_v36 }
 0x702   :  { %v12386_v33 = vpack.c.bf16 %v3424_v24, %v3423_v27  ;;  %v3401_v15 = vmul.f32 0.05, %v3306_v32  ;;  %v3456_v24 = vld [vmem:[%s14695_s4 + $0x98] sm:$0xff]  ;;  %v3455_v27 = vld [vmem:[%s14695_s4 + $0x90] sm:$0xff] }
 0x703   :  { %v3426_v18 = vmax.f32 %v12096_v12, %v3402_v30  ;;  %v3458_v12 = vld [vmem:[%s14695_s4 + $0xa8] sm:$0xff]  ;;  %v3457_v30 = vld [vmem:[%s14695_s4 + $0xa0] sm:$0xff] }
 0x704   :  { %v3425_v34 = vmax.f32 %v3306_v32, %v3401_v15  ;;  %v12099_v37 = vpop.f32.mrb[32].mxu1  ;;  %12387 = vmatpush1.bf16.msra.mxu0 %v12386_v33  ;;  %v3460_v32 = vld [vmem:[%s14695_s4 + $0xb8] sm:$0xff]  ;;  %v3459_v33 = vld [vmem:[%s14695_s4 + $0xb0] sm:$0xff]  ;;  %s13207_s4 = smov [#allocation3]  }
 0x705   :  { %v3404_v38 = vmul.f32 0.05, %v12099_v37  ;;  %v3316_v43 = vpop.f32.mrb[33].mxu1  ;;  %12388 = vmatprep.subr.bf16.mxu0 %v13205_v36  ;;  %v3660_v15 = vld [vmem:[#allocation12 + $0x10] sm:$0xff]  ;;  %s4813_s11 = sshll.u32 %s13207_s4, 4  ;;  %s4814_s11 = int_to_ptr.vmem [resolvable:$true] %s4813_s11 }
 0x706   :  { %v12389_v46 = vpack.c.bf16 %v3426_v18, %v3425_v34  ;;  %v3403_v48 = vmul.f32 0.05, %v3316_v43  ;;  %v3661_v18 = vld [vmem:[#allocation12 + $0x18] sm:$0xff] }
 0x707   :  { %v3428_v53 = vmax.f32 %v12099_v37, %v3404_v38  ;;  %v12406_v34 = vpack.c.bf16 %v3661_v18, %v3660_v15  ;;  %v3646_v37 = vld [vmem:[#allocation12] sm:$0xff]  ;;  %v3647_v38 = vld [vmem:[#allocation12 + $0x8] sm:$0xff] }
 0x708   :  { %v3427_v56 = vmax.f32 %v3316_v43, %v3403_v48  ;;  %v12102_v60 = vpop.f32.mrb[34].mxu1  ;;  %12390 = vmatpush1.bf16.msra.mxu0 %v12389_v46  ;;  %v12410_v43 = vpack.c.bf16 %v3647_v38, %v3646_v37 }
 0x709   :  { %v3406_v62 = vmul.f32 0.05, %v12102_v60  ;;  %v3326_v63 = vpop.f32.mrb[35].mxu1  ;;  %12391 = vmatprep.subr.bf16.mxu0 %v13205_v36 }
 0x70a   :  { %v12392_v3 = vpack.c.bf16 %v3428_v53, %v3427_v56  ;;  %v3405_v22 = vmul.f32 0.05, %v3326_v63 }
 0x70b   :  { %v3430_v5 = vmax.f32 %v12102_v60, %v3406_v62 }
 0x70c   :  { %v3429_v26 = vmax.f32 %v3326_v63, %v3405_v22  ;;  %v12105_v28 = vpop.f32.mrb[36].mxu1  ;;  %12393 = vmatpush1.bf16.msra.mxu0 %v12392_v3  ;;  %v3996_v63 = vld [vmem:[#allocation12 + $0x20] sm:$0xff]  ;;  %v3997_v3 = vld [vmem:[#allocation12 + $0x28] sm:$0xff] }
 0x70d   :  { %v3408_v10 = vmul.f32 0.05, %v12105_v28  ;;  %v3336_v13 = vpop.f32.mrb[37].mxu1  ;;  %12394 = vmatprep.subr.bf16.mxu0 %v13205_v36 }
 0x70e   :  { %v12395_v17 = vpack.c.bf16 %v3430_v5, %v3429_v26  ;;  %v3407_v19 = vmul.f32 0.05, %v3336_v13  ;;  %v12414_v5 = vpack.c.bf16 %v3997_v3, %v3996_v63 }
 0x70f   :  { %v3432_v23 = vmax.f32 %v12105_v28, %v3408_v10 }
 0x710   :  { %v3431_v20 = vmax.f32 %v3336_v13, %v3407_v19  ;;  %v12108_v29 = vpop.f32.mrb[38].mxu1  ;;  %12396 = vmatpush1.bf16.msra.mxu0 %v12395_v17 }
 0x711   :  { %v3410_v31 = vmul.f32 0.05, %v12108_v29  ;;  %v3346_v35 = vpop.f32.mrb[39].mxu1  ;;  %12397 = vmatprep.subr.bf16.mxu0 %v13205_v36 }
 0x712   :  { %v12398_v51 = vpack.c.bf16 %v3432_v23, %v3431_v20  ;;  %v3409_v25 = vmul.f32 0.05, %v3346_v35 }
 0x713   :  { %v3434_v39 = vmax.f32 %v12108_v29, %v3410_v31 }
 0x714   :  { %v3433_v40 = vmax.f32 %v3346_v35, %v3409_v25  ;;  %v12111_v41 = vpop.f32.mrb[40].mxu1  ;;  %12399 = vmatpush1.bf16.msra.mxu0 %v12398_v51 }
 0x715   :  { %v3412_v42 = vmul.f32 0.05, %v12111_v41  ;;  %v3356_v44 = vpop.f32.mrb[41].mxu1  ;;  %12400 = vmatprep.subr.bf16.mxu0 %v13205_v36 }
 0x716   :  { %v12401_v45 = vpack.c.bf16 %v3434_v39, %v3433_v40  ;;  %v3411_v47 = vmul.f32 0.05, %v3356_v44 }
 0x717   :  { %v3436_v49 = vmax.f32 %v12111_v41, %v3412_v42 }
 0x718   :  { %v3435_v50 = vmax.f32 %v3356_v44, %v3411_v47  ;;  %12402 = vmatpush1.bf16.msra.mxu0 %v12401_v45 }
 0x719   :  { %12403 = vmatprep.subr.bf16.mxu0 %v13205_v36 }
 0x71a   :  { %v12404_v52 = vpack.c.bf16 %v3436_v49, %v3435_v50 }
 0x71c   :  { %12405 = vmatpush1.bf16.msra.mxu0 %v12404_v52 }
 0x71d   :  { %12407 = vmatprep.subr.bf16.mxu0 %v12406_v34 }
 0x71f   :  { %3562 = vmatmul.mubr.f32.vlgmr.msra.gmra.mrb[60].mxu0 %v14018_v8 }
 0x720   :  { %11170 = vmatprep.mubr.msk.f32.mxu0 %vm1112_vm3, %v3440_v54  ;;  %12409 = vmatpush3.bf16.msra.mxu0 %v12406_v34 }
 0x721   :  { %12411 = vmatprep.subr.bf16.mxu0 %v12410_v43 }
 0x723   :  { %3567 = vmatmul.mubr.f32.gmra.mrb[62].mxu0 %v14042_v55 }
 0x724   :  { %11171 = vmatprep.mubr.msk.f32.mxu0 %vm1112_vm3, %v3442_v57 }
 0x727   :  { %3572 = vmatmul.mubr.f32.gmra.mrb[64].mxu0 %v14052_v58 }
 0x728   :  { %11172 = vmatprep.mubr.msk.f32.mxu0 %vm1112_vm3, %v3444_v59 }
 0x72b   :  { %3577 = vmatmul.mubr.f32.gmra.mrb[66].mxu0 %v14062_v61 }
 0x72c   :  { %11173 = vmatprep.mubr.msk.f32.mxu0 %vm1112_vm3, %v3446_v1 }
 0x72f   :  { %3582 = vmatmul.mubr.f32.gmra.mrb[68].mxu0 %v14072_v2 }
 0x730   :  { %11174 = vmatprep.mubr.msk.f32.mxu0 %vm1112_vm3, %v3448_v4 }
 0x733   :  { %3587 = vmatmul.mubr.f32.gmra.mrb[70].mxu0 %v14082_v6 }
 0x734   :  { %11175 = vmatprep.mubr.msk.f32.mxu0 %vm1112_vm3, %v3450_v7 }
 0x737   :  { %3592 = vmatmul.mubr.f32.gmra.mrb[72].mxu0 %v3449_v9 }
 0x738   :  { %11176 = vmatprep.mubr.msk.f32.mxu0 %vm1112_vm3, %v3452_v11 }
 0x73b   :  { %3597 = vmatmul.mubr.f32.gmra.mrb[74].mxu0 %v3451_v14 }
 0x73c   :  { %11177 = vmatprep.mubr.msk.f32.mxu0 %vm1112_vm3, %v3454_v16 }
 0x73f   :  { %3602 = vmatmul.mubr.f32.gmra.mrb[76].mxu0 %v3453_v21 }
 0x740   :  { %11178 = vmatprep.mubr.msk.f32.mxu0 %vm1112_vm3, %v3456_v24 }
 0x743   :  { %3607 = vmatmul.mubr.f32.gmra.mrb[78].mxu0 %v3455_v27 }
 0x744   :  { %11179 = vmatprep.mubr.msk.f32.mxu0 %vm1112_vm3, %v3458_v12 }
 0x747   :  { %3612 = vmatmul.mubr.f32.gmra.mrb[80].mxu0 %v3457_v30 }
 0x748   :  { %11180 = vmatprep.mubr.msk.f32.mxu0 %vm1112_vm3, %v3460_v32 }
 0x74b   :  { %3617 = vmatmul.mubr.f32.gmra.mrb[82].mxu0 %v3459_v33 }
 0x7f2   :  { %v3563_v46 = vpop.f32.mrb[60].mxu0 }
 0x7f3   :  { %3622 = vst.msk [vmem:[#allocation6 + $0x1] sm:$0xff] %vm1274_vm5, %v3563_v46  ;;  %v3565_v48 = vpop.f32.mrb[61].mxu0 }
 0x7f6   :  { %v3568_v53 = vpop.f32.mrb[62].mxu0 }
 0x7f7   :  { %3623 = vst.msk [vmem:[#allocation6 + $0x9] sm:$0xff] %vm1274_vm5, %v3568_v53  ;;  %v3570_v56 = vpop.f32.mrb[63].mxu0 }
 0x7fa   :  { %v3573_v60 = vpop.f32.mrb[64].mxu0  ;;  %v3648_v62 = vld [vmem:[#allocation6 + $0x1] sm:$0xff] }
 0x7fb   :  { %3624 = vst.msk [vmem:[#allocation6 + $0x11] sm:$0xff] %vm1274_vm5, %v3573_v60  ;;  %v3575_v22 = vpop.f32.mrb[65].mxu0  ;;  %12116 = vmatprep.mubr.msk.f32.mxu0 %vm1274_vm5, %v3648_v62  ;;  %v3634_v9 = vld [vmem:[#allocation6] sm:$0xff] }
 0x7fe   :  { %v3578_v26 = vpop.f32.mrb[66].mxu0  ;;  %v3649_v28 = vld [vmem:[#allocation6 + $0x9] sm:$0xff] }
 0x7ff   :  { %3625 = vst.msk [vmem:[#allocation6 + $0x19] sm:$0xff] %vm1274_vm5, %v3578_v26  ;;  %v3580_v10 = vpop.f32.mrb[67].mxu0  ;;  %12117 = vmatmul.mubr.msk.f32.vlgmr.msra.gmra.mrb[84].mxu0 %vm1274_vm5, %v3649_v28  ;;  %v3635_v11 = vld [vmem:[#allocation6 + $0x8] sm:$0xff] }
 0x800   :  { %12413 = vmatpush3.bf16.msra.mxu0 %v12410_v43  ;;  %v3984_v18 = vld [vmem:[#allocation6 + $0x2] sm:$0xff] }
 0x801   :  { %12415 = vmatprep.subr.bf16.mxu0 %v12414_v5 }
 0x802   :  { %v3583_v13 = vpop.f32.mrb[68].mxu0  ;;  %v3650_v17 = vld [vmem:[#allocation6 + $0x11] sm:$0xff] }
 0x803   :  { %3626 = vst.msk [vmem:[#allocation6 + $0x21] sm:$0xff] %vm1274_vm5, %v3583_v13  ;;  %v3585_v19 = vpop.f32.mrb[69].mxu0  ;;  %12119 = vmatprep.mubr.msk.f32.mxu0 %vm1274_vm5, %v3650_v17  ;;  %v3636_v14 = vld [vmem:[#allocation6 + $0x10] sm:$0xff] }
 0x804   :  { %v3985_v34 = vld [vmem:[#allocation6 + $0xa] sm:$0xff] }
 0x806   :  { %v3588_v23 = vpop.f32.mrb[70].mxu0  ;;  %v3651_v20 = vld [vmem:[#allocation6 + $0x19] sm:$0xff] }
 0x807   :  { %3627 = vst.msk [vmem:[#allocation6 + $0x29] sm:$0xff] %vm1274_vm5, %v3588_v23  ;;  %v3590_v29 = vpop.f32.mrb[71].mxu0  ;;  %12120 = vmatmul.mubr.msk.f32.gmra.mrb[86].mxu0 %vm1274_vm5, %v3651_v20  ;;  %v3637_v16 = vld [vmem:[#allocation6 + $0x18] sm:$0xff] }
 0x808   :  { %v3986_v37 = vld [vmem:[#allocation6 + $0x12] sm:$0xff] }
 0x80a   :  { %v3593_v31 = vpop.f32.mrb[72].mxu0  ;;  %v3652_v35 = vld [vmem:[#allocation6 + $0x21] sm:$0xff] }
 0x80b   :  { %3628 = vst.msk [vmem:[#allocation6 + $0x31] sm:$0xff] %vm1274_vm5, %v3593_v31  ;;  %v3595_v51 = vpop.f32.mrb[73].mxu0  ;;  %12122 = vmatprep.mubr.msk.f32.mxu0 %vm1274_vm5, %v3652_v35  ;;  %v3638_v21 = vld [vmem:[#allocation6 + $0x20] sm:$0xff] }
 0x80c   :  { %v3987_v38 = vld [vmem:[#allocation6 + $0x1a] sm:$0xff] }
 0x80e   :  { %v3598_v25 = vpop.f32.mrb[74].mxu0  ;;  %v3653_v39 = vld [vmem:[#allocation6 + $0x29] sm:$0xff] }
 0x80f   :  { %3629 = vst.msk [vmem:[#allocation6 + $0x39] sm:$0xff] %vm1274_vm5, %v3598_v25  ;;  %v3600_v40 = vpop.f32.mrb[75].mxu0  ;;  %12123 = vmatmul.mubr.msk.f32.gmra.mrb[88].mxu0 %vm1274_vm5, %v3653_v39  ;;  %v3639_v24 = vld [vmem:[#allocation6 + $0x28] sm:$0xff] }
 0x810   :  { %v3988_v43 = vld [vmem:[#allocation6 + $0x22] sm:$0xff] }
 0x812   :  { %v3603_v41 = vpop.f32.mrb[76].mxu0  ;;  %v3654_v42 = vld [vmem:[#allocation6 + $0x31] sm:$0xff] }
 0x813   :  { %3630 = vst.msk [vmem:[#allocation6 + $0x41] sm:$0xff] %vm1274_vm5, %v3603_v41  ;;  %v3605_v44 = vpop.f32.mrb[77].mxu0  ;;  %12125 = vmatprep.mubr.msk.f32.mxu0 %vm1274_vm5, %v3654_v42  ;;  %v3640_v27 = vld [vmem:[#allocation6 + $0x30] sm:$0xff] }
 0x814   :  { %v3989_v46 = vld [vmem:[#allocation6 + $0x2a] sm:$0xff] }
 0x816   :  { %v3608_v45 = vpop.f32.mrb[78].mxu0  ;;  %v3655_v47 = vld [vmem:[#allocation6 + $0x39] sm:$0xff] }
 0x817   :  { %3631 = vst.msk [vmem:[#allocation6 + $0x49] sm:$0xff] %vm1274_vm5, %v3608_v45  ;;  %v3610_v49 = vpop.f32.mrb[79].mxu0  ;;  %12126 = vmatmul.mubr.msk.f32.gmra.mrb[90].mxu0 %vm1274_vm5, %v3655_v47  ;;  %v3641_v12 = vld [vmem:[#allocation6 + $0x38] sm:$0xff] }
 0x818   :  { %v3990_v48 = vld [vmem:[#allocation6 + $0x32] sm:$0xff] }
 0x81a   :  { %v3613_v50 = vpop.f32.mrb[80].mxu0  ;;  %v3656_v52 = vld [vmem:[#allocation6 + $0x41] sm:$0xff] }
 0x81b   :  { %3632 = vst.msk [vmem:[#allocation6 + $0x51] sm:$0xff] %vm1274_vm5, %v3613_v50  ;;  %v3615_v54 = vpop.f32.mrb[81].mxu0  ;;  %12128 = vmatprep.mubr.msk.f32.mxu0 %vm1274_vm5, %v3656_v52  ;;  %v3642_v30 = vld [vmem:[#allocation6 + $0x40] sm:$0xff] }
 0x81c   :  { %v3991_v53 = vld [vmem:[#allocation6 + $0x3a] sm:$0xff] }
 0x81e   :  { %v3618_v57 = vpop.f32.mrb[82].mxu0  ;;  %v3657_v59 = vld [vmem:[#allocation6 + $0x49] sm:$0xff] }
 0x81f   :  { %3633 = vst.msk [vmem:[#allocation6 + $0x59] sm:$0xff] %vm1274_vm5, %v3618_v57  ;;  %v3620_v1 = vpop.f32.mrb[83].mxu0  ;;  %12129 = vmatmul.mubr.msk.f32.gmra.mrb[92].mxu0 %vm1274_vm5, %v3657_v59  ;;  %v3643_v32 = vld [vmem:[#allocation6 + $0x48] sm:$0xff] }
 0x820   :  { %v3992_v56 = vld [vmem:[#allocation6 + $0x42] sm:$0xff] }
 0x822   :  { %v3658_v4 = vld [vmem:[#allocation6 + $0x51] sm:$0xff] }
 0x823   :  { %12131 = vmatprep.mubr.msk.f32.mxu0 %vm1274_vm5, %v3658_v4  ;;  %v3644_v33 = vld [vmem:[#allocation6 + $0x50] sm:$0xff] }
 0x824   :  { %v3993_v60 = vld [vmem:[#allocation6 + $0x4a] sm:$0xff] }
 0x826   :  { %v3659_v7 = vld [vmem:[#allocation6 + $0x59] sm:$0xff] }
 0x827   :  { %12132 = vmatmul.mubr.msk.f32.gmra.mrb[94].mxu0 %vm1274_vm5, %v3659_v7  ;;  %v3645_v15 = vld [vmem:[#allocation6 + $0x58] sm:$0xff] }
 0x828   :  { %12138 = vmatprep.mubr.msk.f32.mxu0 %vm1274_vm5, %v3634_v9  ;;  %v3994_v62 = vld [vmem:[#allocation6 + $0x52] sm:$0xff]  ;;  %v3995_v63 = vld [vmem:[#allocation6 + $0x5a] sm:$0xff] }
 0x82b   :  { %12139 = vmatmul.mubr.msk.f32.vlgmr.msra.gmra.mrb[84].mxu0 %vm1274_vm5, %v3635_v11 }
 0x82c   :  { %12141 = vmatprep.mubr.msk.f32.mxu0 %vm1274_vm5, %v3636_v14  ;;  %12417 = vmatpush3.bf16.msra.mxu0 %v12414_v5 }
 0x82d   :  { %12454 = vmatprep.subr.bf16.mxu0 %v13205_v36 }
 0x82f   :  { %12142 = vmatmul.mubr.msk.f32.gmra.mrb[86].mxu0 %vm1274_vm5, %v3637_v16 }
 0x830   :  { %12144 = vmatprep.mubr.msk.f32.mxu0 %vm1274_vm5, %v3638_v21 }
 0x833   :  { %12145 = vmatmul.mubr.msk.f32.gmra.mrb[88].mxu0 %vm1274_vm5, %v3639_v24 }
 0x834   :  { %12147 = vmatprep.mubr.msk.f32.mxu0 %vm1274_vm5, %v3640_v27 }
 0x837   :  { %12148 = vmatmul.mubr.msk.f32.gmra.mrb[90].mxu0 %vm1274_vm5, %v3641_v12 }
 0x838   :  { %12150 = vmatprep.mubr.msk.f32.mxu0 %vm1274_vm5, %v3642_v30 }
 0x83b   :  { %12151 = vmatmul.mubr.msk.f32.gmra.mrb[92].mxu0 %vm1274_vm5, %v3643_v32 }
 0x83c   :  { %12153 = vmatprep.mubr.msk.f32.mxu0 %vm1274_vm5, %v3644_v33  ;;  %v4335_v33 = vld [vmem:[#allocation14 + $0x18] sm:$0xff] }
 0x83f   :  { %12154 = vmatmul.mubr.msk.f32.gmra.mrb[94].mxu0 %vm1274_vm5, %v3645_v15  ;;  %v4336_v15 = vld [vmem:[#allocation14 + $0x20] sm:$0xff] }
 0x840   :  { %12160 = vmatprep.mubr.msk.f32.mxu0 %vm1274_vm5, %v3984_v18  ;;  %v12442_v18 = vpack.c.bf16 %v4336_v15, %v4335_v33 }
 0x843   :  { %12161 = vmatmul.mubr.msk.f32.vlgmr.msra.gmra.mrb[84].mxu0 %vm1274_vm5, %v3985_v34  ;;  %v4337_v34 = vld [vmem:[#allocation14 + $0x28] sm:$0xff] }
 0x844   :  { %12163 = vmatprep.mubr.msk.f32.mxu0 %vm1274_vm5, %v3986_v37  ;;  %v4326_v37 = vld [vmem:[#allocation14] sm:$0xff] }
 0x847   :  { %12164 = vmatmul.mubr.msk.f32.gmra.mrb[86].mxu0 %vm1274_vm5, %v3987_v38  ;;  %v4327_v38 = vld [vmem:[#allocation14 + $0x8] sm:$0xff] }
 0x848   :  { %12166 = vmatprep.mubr.msk.f32.mxu0 %vm1274_vm5, %v3988_v43  ;;  %v12446_v43 = vpack.c.bf16 %v4327_v38, %v4326_v37 }
 0x84b   :  { %12167 = vmatmul.mubr.msk.f32.gmra.mrb[88].mxu0 %vm1274_vm5, %v3989_v46 }
 0x84c   :  { %12169 = vmatprep.mubr.msk.f32.mxu0 %vm1274_vm5, %v3990_v48 }
 0x84f   :  { %12170 = vmatmul.mubr.msk.f32.gmra.mrb[90].mxu0 %vm1274_vm5, %v3991_v53 }
 0x850   :  { %12172 = vmatprep.mubr.msk.f32.mxu0 %vm1274_vm5, %v3992_v56 }
 0x853   :  { %12173 = vmatmul.mubr.msk.f32.gmra.mrb[92].mxu0 %vm1274_vm5, %v3993_v60  ;;  %v4328_v60 = vld [vmem:[#allocation14 + $0x10] sm:$0xff] }
 0x854   :  { %12175 = vmatprep.mubr.msk.f32.mxu0 %vm1274_vm5, %v3994_v62 }
 0x857   :  { %12176 = vmatmul.mubr.msk.f32.gmra.mrb[94].mxu0 %vm1274_vm5, %v3995_v63  ;;  %v4570_v63 = vld [vmem:[#allocation14 + $0x30] sm:$0xff] }
 0x858   :  { %12268 = vmatprep.mubr.msk.f32.mxu0 %vm13206_vm9, %v13204_v0 }
 0x916   :  { %v12162_v3 = vpop.f32.mrb[84].mxu0 }
 0x917   :  { %v4172_v22 = vmul.f32 0.05, %v12162_v3  ;;  %v4100_v5 = vpop.f32.mrb[85].mxu0 }
 0x918   :  { %v4171_v26 = vmul.f32 0.05, %v4100_v5 }
 0x919   :  { %v4184_v28 = vmax.f32 %v12162_v3, %v4172_v22  ;;  %v4571_v3 = vld [vmem:[#allocation14 + $0x38] sm:$0xff] }
 0x91a   :  { %v4183_v10 = vmax.f32 %v4100_v5, %v4171_v26  ;;  %v12165_v13 = vpop.f32.mrb[86].mxu0  ;;  %v12450_v5 = vpack.c.bf16 %v4571_v3, %v4570_v63 }
 0x91b   :  { %v4174_v17 = vmul.f32 0.05, %v12165_v13  ;;  %v4110_v19 = vpop.f32.mrb[87].mxu0 }
 0x91c   :  { %v12418_v23 = vpack.c.bf16 %v4184_v28, %v4183_v10  ;;  %v4173_v20 = vmul.f32 0.05, %v4110_v19 }
 0x91d   :  { %v4186_v29 = vmax.f32 %v12165_v13, %v4174_v17 }
 0x91e   :  { %v4185_v31 = vmax.f32 %v4110_v19, %v4173_v20  ;;  %v12168_v35 = vpop.f32.mrb[88].mxu0  ;;  %12419 = vmatprep.subr.bf16.mxu1 %v12418_v23  ;;  %v4572_v19 = vld [vmem:[#allocation14 + $0x40] sm:$0xff] }
 0x91f   :  { %v4176_v51 = vmul.f32 0.05, %v12168_v35  ;;  %v4120_v25 = vpop.f32.mrb[89].mxu0  ;;  %12421 = vmatpush3.bf16.msra.mxu1 %v12418_v23 }
 0x920   :  { %v12422_v39 = vpack.c.bf16 %v4186_v29, %v4185_v31  ;;  %v4175_v40 = vmul.f32 0.05, %v4120_v25 }
 0x921   :  { %v4188_v41 = vmax.f32 %v12168_v35, %v4176_v51 }
 0x922   :  { %v4187_v42 = vmax.f32 %v4120_v25, %v4175_v40  ;;  %v12171_v44 = vpop.f32.mrb[90].mxu0  ;;  %12423 = vmatprep.subr.bf16.mxu1 %v12422_v39 }
 0x923   :  { %v4178_v45 = vmul.f32 0.05, %v12171_v44  ;;  %v4130_v47 = vpop.f32.mrb[91].mxu0  ;;  %12425 = vmatpush3.bf16.msra.mxu1 %v12422_v39 }
 0x924   :  { %v12426_v49 = vpack.c.bf16 %v4188_v41, %v4187_v42  ;;  %v4177_v50 = vmul.f32 0.05, %v4130_v47 }
 0x925   :  { %v4190_v52 = vmax.f32 %v12171_v44, %v4178_v45 }
 0x926   :  { %v4189_v54 = vmax.f32 %v4130_v47, %v4177_v50  ;;  %v12174_v57 = vpop.f32.mrb[92].mxu0  ;;  %12427 = vmatprep.subr.bf16.mxu1 %v12426_v49 }
 0x927   :  { %v4180_v59 = vmul.f32 0.05, %v12174_v57  ;;  %v4140_v1 = vpop.f32.mrb[93].mxu0  ;;  %12429 = vmatpush3.bf16.msra.mxu1 %v12426_v49 }
 0x928   :  { %v12430_v4 = vpack.c.bf16 %v4190_v52, %v4189_v54  ;;  %v4179_v7 = vmul.f32 0.05, %v4140_v1 }
 0x929   :  { %v4192_v9 = vmax.f32 %v12174_v57, %v4180_v59 }
 0x92a   :  { %v4191_v11 = vmax.f32 %v4140_v1, %v4179_v7  ;;  %v12177_v14 = vpop.f32.mrb[94].mxu0  ;;  %12431 = vmatprep.subr.bf16.mxu1 %v12430_v4 }
 0x92b   :  { %v4182_v16 = vmul.f32 0.05, %v12177_v14  ;;  %v4150_v21 = vpop.f32.mrb[95].mxu0  ;;  %12433 = vmatpush3.bf16.msra.mxu1 %v12430_v4 }
 0x92c   :  { %v12434_v24 = vpack.c.bf16 %v4192_v9, %v4191_v11  ;;  %v4181_v27 = vmul.f32 0.05, %v4150_v21 }
 0x92d   :  { %v4194_v12 = vmax.f32 %v12177_v14, %v4182_v16 }
 0x92e   :  { %v4193_v30 = vmax.f32 %v4150_v21, %v4181_v27  ;;  %12435 = vmatprep.subr.bf16.mxu1 %v12434_v24 }
 0x92f   :  { %12437 = vmatpush3.bf16.msra.mxu1 %v12434_v24 }
 0x930   :  { %v12438_v32 = vpack.c.bf16 %v4194_v12, %v4193_v30 }
 0x932   :  { %12439 = vmatprep.subr.bf16.mxu1 %v12438_v32 }
 0x933   :  { %12441 = vmatpush3.bf16.msra.mxu1 %v12438_v32 }
 0x934   :  { %12443 = vmatprep.subr.bf16.mxu1 %v12442_v18 }
 0x936   :  { %12203 = vmatmul.mubr.msk.f32.vlgmr.msra.gmra.mrb[42].mxu1 %vm1856_vm6, %v14042_v55 }
 0x937   :  { %12205 = vmatprep.mubr.msk.f32.mxu1 %vm1856_vm6, %v14052_v58  ;;  %12445 = vmatpush3.bf16.msra.mxu1 %v12442_v18 }
 0x938   :  { %12215 = vmatprep.subr.mxu1 %v4337_v34 }
 0x93a   :  { %12206 = vmatmul.mubr.msk.f32.gmra.mrb[44].mxu1 %vm1856_vm6, %v14062_v61 }
 0x93b   :  { %12208 = vmatprep.mubr.msk.f32.mxu1 %vm1856_vm6, %v14072_v2  ;;  %12216 = vmatpush3.msra.mxu1 %v4337_v34 }
 0x93c   :  { %12447 = vmatprep.subr.bf16.mxu1 %v12446_v43 }
 0x93e   :  { %12209 = vmatmul.mubr.msk.f32.gmra.mrb[46].mxu1 %vm1856_vm6, %v14082_v6 }
 0xa09   :  { %v12204_v46 = vpop.f32.mrb[42].mxu1 }
 0xa0a   :  { %4315 = vst.msk [vmem:[#allocation7 + $0x9] sm:$0xff] %vm1970_vm8, %v12204_v46  ;;  %v4285_v61 = vpop.f32.mrb[43].mxu1 }
 0xa0b   :  { %4314 = vst.msk [vmem:[#allocation7 + $0x1] sm:$0xff] %vm1970_vm8, %v4285_v61 }
 0xa0d   :  { %v12207_v2 = vpop.f32.mrb[44].mxu1 }
 0xa0e   :  { %4317 = vst.msk [vmem:[#allocation7 + $0x19] sm:$0xff] %vm1970_vm8, %v12207_v2  ;;  %v4295_v6 = vpop.f32.mrb[45].mxu1 }
 0xa0f   :  { %4316 = vst.msk [vmem:[#allocation7 + $0x11] sm:$0xff] %vm1970_vm8, %v4295_v6 }
 0xa11   :  { %v12210_v48 = vpop.f32.mrb[46].mxu1  ;;  %v4330_v62 = vld [vmem:[#allocation7 + $0x9] sm:$0xff] }
 0xa12   :  { %4319 = vst.msk [vmem:[#allocation7 + $0x29] sm:$0xff] %vm1970_vm8, %v12210_v48  ;;  %v4305_v53 = vpop.f32.mrb[47].mxu1  ;;  %v4329_v56 = vld [vmem:[#allocation7 + $0x1] sm:$0xff] }
 0xa13   :  { %4318 = vst.msk [vmem:[#allocation7 + $0x21] sm:$0xff] %vm1970_vm8, %v4305_v53  ;;  %12217 = vmatprep.mubr.msk.f32.mxu1 %vm1970_vm8, %v4329_v56  ;;  %v4320_v13 = vld [vmem:[#allocation7] sm:$0xff]  ;;  %v4321_v17 = vld [vmem:[#allocation7 + $0x8] sm:$0xff] }
 0xa14   :  { %12218 = vmatmul.mubr.msk.f32.vlgmr.msra.gmra.mrb[48].mxu1 %vm1970_vm8, %v4330_v62  ;;  %v4564_v35 = vld [vmem:[#allocation7 + $0x2] sm:$0xff] }
 0xa15   :  { %12449 = vmatpush3.bf16.msra.mxu1 %v12446_v43  ;;  %v4332_v26 = vld [vmem:[#allocation7 + $0x19] sm:$0xff] }
 0xa16   :  { %v4331_v22 = vld [vmem:[#allocation7 + $0x11] sm:$0xff]  ;;  %12230 = vmatprep.subr.mxu1 %v4328_v60 }
 0xa17   :  { %12220 = vmatprep.mubr.msk.f32.mxu1 %vm1970_vm8, %v4331_v22  ;;  %v4322_v23 = vld [vmem:[#allocation7 + $0x10] sm:$0xff]  ;;  %v4323_v20 = vld [vmem:[#allocation7 + $0x18] sm:$0xff] }
 0xa18   :  { %12221 = vmatmul.mubr.msk.f32.gmra.mrb[50].mxu1 %vm1970_vm8, %v4332_v26  ;;  %v4565_v51 = vld [vmem:[#allocation7 + $0xa] sm:$0xff]  ;;  %v4566_v25 = vld [vmem:[#allocation7 + $0x12] sm:$0xff] }
 0xa19   :  { %12231 = vmatpush3.msra.mxu1 %v4328_v60  ;;  %v4334_v10 = vld [vmem:[#allocation7 + $0x29] sm:$0xff] }
 0xa1a   :  { %v4333_v28 = vld [vmem:[#allocation7 + $0x21] sm:$0xff]  ;;  %12451 = vmatprep.subr.bf16.mxu1 %v12450_v5  ;;  %v4569_v41 = vld [vmem:[#allocation7 + $0x2a] sm:$0xff] }
 0xa1b   :  { %12223 = vmatprep.mubr.msk.f32.mxu1 %vm1970_vm8, %v4333_v28  ;;  %v4324_v29 = vld [vmem:[#allocation7 + $0x20] sm:$0xff]  ;;  %v4325_v31 = vld [vmem:[#allocation7 + $0x28] sm:$0xff] }
 0xa1c   :  { %12224 = vmatmul.mubr.msk.f32.gmra.mrb[52].mxu1 %vm1970_vm8, %v4334_v10  ;;  %v4567_v39 = vld [vmem:[#allocation7 + $0x1a] sm:$0xff]  ;;  %v4568_v40 = vld [vmem:[#allocation7 + $0x22] sm:$0xff] }
 0xa1d   :  { %12232 = vmatprep.mubr.msk.f32.mxu1 %vm1970_vm8, %v4320_v13 }
 0xa20   :  { %12233 = vmatmul.mubr.msk.f32.vlgmr.msra.gmra.mrb[48].mxu1 %vm1970_vm8, %v4321_v17 }
 0xa21   :  { %12235 = vmatprep.mubr.msk.f32.mxu1 %vm1970_vm8, %v4322_v23  ;;  %12453 = vmatpush3.bf16.msra.mxu1 %v12450_v5 }
 0xa22   :  { %12245 = vmatprep.subr.mxu1 %v4572_v19 }
 0xa24   :  { %12236 = vmatmul.mubr.msk.f32.gmra.mrb[50].mxu1 %vm1970_vm8, %v4323_v20 }
 0xa25   :  { %12238 = vmatprep.mubr.msk.f32.mxu1 %vm1970_vm8, %v4324_v29  ;;  %12246 = vmatpush3.msra.mxu1 %v4572_v19 }
 0xa28   :  { %12239 = vmatmul.mubr.msk.f32.gmra.mrb[52].mxu1 %vm1970_vm8, %v4325_v31 }
 0xa29   :  { %12247 = vmatprep.mubr.msk.f32.mxu1 %vm1970_vm8, %v4564_v35 }
 0xa2c   :  { %12248 = vmatmul.mubr.msk.f32.vlgmr.msra.gmra.mrb[48].mxu1 %vm1970_vm8, %v4565_v51 }
 0xa2d   :  { %12250 = vmatprep.mubr.msk.f32.mxu1 %vm1970_vm8, %v4566_v25 }
 0xa30   :  { %12251 = vmatmul.mubr.msk.f32.gmra.mrb[50].mxu1 %vm1970_vm8, %v4567_v39 }
 0xa31   :  { %12253 = vmatprep.mubr.msk.f32.mxu1 %vm1970_vm8, %v4568_v40 }
 0xa34   :  { %12254 = vmatmul.mubr.msk.f32.gmra.mrb[52].mxu1 %vm1970_vm8, %v4569_v41 }
 0xaff   :  { %v12249_v42 = vpop.f32.mrb[48].mxu1 }
 0xb00   :  { %v4657_v44 = vpop.f32.mrb[49].mxu1 }
 0xb01   :  { %v12455_v45 = vpack.c.bf16 %v12249_v42, %v4657_v44 }
 0xb03   :  { %v12252_v47 = vpop.f32.mrb[50].mxu1  ;;  %12456 = vmatpush3.bf16.msra.mxu0 %v12455_v45 }
 0xb04   :  { %v4667_v49 = vpop.f32.mrb[51].mxu1  ;;  %12457 = vmatprep.subr.bf16.mxu0 %v13205_v36 }
 0xb05   :  { %v12458_v50 = vpack.c.bf16 %v12252_v47, %v4667_v49 }
 0xb07   :  { %v12255_v52 = vpop.f32.mrb[52].mxu1  ;;  %12459 = vmatpush3.bf16.msra.mxu0 %v12458_v50 }
 0xb08   :  { %v4677_v54 = vpop.f32.mrb[53].mxu1  ;;  %12460 = vmatprep.subr.bf16.mxu0 %v13205_v36 }
 0xb09   :  { %v12461_v57 = vpack.c.bf16 %v12255_v52, %v4677_v54 }
 0xb0b   :  { %12462 = vmatpush3.bf16.msra.mxu0 %v12461_v57 }
 0xb0e   :  { %12269 = vmatmul.mubr.msk.f32.vlgmr.msra.gmra.mrb[96].mxu0 %vm2354_vm10, %v14018_v8 }
 0xb0f   :  { %12271 = vmatprep.mubr.msk.f32.mxu0 %vm13206_vm9, %v13204_v0 }
 0xb12   :  { %12272 = vmatmul.mubr.msk.f32.gmra.mrb[98].mxu0 %vm2354_vm10, %v14042_v55 }
 0xb13   :  { %12274 = vmatprep.mubr.msk.f32.mxu0 %vm13206_vm9, %v13204_v0 }
 0xb16   :  { %12275 = vmatmul.mubr.msk.f32.gmra.mrb[100].mxu0 %vm2354_vm10, %v14052_v58 }
 0xbe1   :  { %v4770_v59 = vpop.f32.mrb[96].mxu0 }
 0xbe2   :  { %v11374_v1 = vpack.c.bf16 %v4770_v59, %v4770_v59  ;;  %v12270_v36 = vpop.f32.mrb[97].mxu0 }
 0xbe4   :  { %4798 = vst.msk [vmem:[#allocation8 + $0xc] sm:$0xf] %vm2457_vm11, %v11374_v1 }
 0xbe5   :  { %v4775_v4 = vpop.f32.mrb[98].mxu0 }
 0xbe6   :  { %v11375_v8 = vpack.c.bf16 %v4775_v4, %v4775_v4  ;;  %v12273_v7 = vpop.f32.mrb[99].mxu0 }
 0xbe8   :  { %4799 = vst.msk [vmem:[#allocation8 + $0x10] sm:$0xf] %vm2457_vm11, %v11375_v8 }
 0xbe9   :  { %v4780_v55 = vpop.f32.mrb[100].mxu0 }
 0xbea   :  { %v11376_v9 = vpack.c.bf16 %v4780_v55, %v4780_v55  ;;  %v12276_v11 = vpop.f32.mrb[101].mxu0 }
 0xbec   :  { %4800 = vst.msk [vmem:[#allocation8 + $0x14] sm:$0xf] %vm2457_vm11, %v11376_v9 }
 0xbed   :  { %4835 = dma.general %s14697_s6, 65536, %s4814_s11, %s13208_s13, %s13209_s14, [#allocation19], %s13301_s24, 0  }
 0xbee   :  { %13185 = dma.done.wait [#allocation4], 49152 }
 0xbef   :  { %13186 = vsyncadd [#allocation4], 4294918144  ;;  %v13210_v0 = vmov 0   ;;  %v4861_v58 = vld [vmem:[#allocation2 + $0x88] sm:$0xff]  ;;  %v4860_v14 = vld [vmem:[#allocation2 + $0x80] sm:$0xff]  ;;  %vm4885_vm12 = vcmask 1041409  }
 0xbf0   :  { %4924 = vmatprep.mubr.bf16.mxu0 %v13210_v0  ;;  %5006 = vmatprep.mubr.bf16.mxu1 %v13210_v0  ;;  %v4869_v16 = vld [vmem:[#allocation2 + $0xc8] sm:$0xff]  ;;  %v4868_v24 = vld [vmem:[#allocation2 + $0xc0] sm:$0xff]  ;;  %v13070_v27 = vld [vmem:[#allocation8 + $0xc] ss:$0 sps:$4 sm:$0x11]   ;;  %vm4888_vm13 = vcmask 261120  }
 0xbf1   :  { %4892 = vmatprep.subr.bf16.mxu0 %v4861_v58  ;;  %v13069_v21 = vld [vmem:[#allocation8] ss:$0 sps:$4 sm:$0x11]   ;;  %v4863_v12 = vld [vmem:[#allocation2 + $0x98] sm:$0xff]  ;;  %v4864_v33 = vld [vmem:[#allocation2 + $0xa0] sm:$0xff]  ;;  %v4883_v15 = vunpack.c.l.b16 %v13070_v27 }
 0xbf2   :  { %4893 = vmatpush1.bf16.msra.mxu0 %v4860_v14  ;;  %v4882_v30 = vunpack.c.l.b16 %v13069_v21  ;;  %v4865_v32 = vld [vmem:[#allocation2 + $0xa8] sm:$0xff]  ;;  %v4872_v37 = vld [vmem:[#allocation2 + $0xe0] sm:$0xff]  ;;  %v4862_v61 = vld [vmem:[#allocation2 + $0x90] sm:$0xff] }
 0xbf3   :  { %4894 = vmatprep.subr.bf16.mxu0 %v4869_v16  ;;  %4974 = vmatprep.subr.bf16.mxu1 %v4865_v32  ;;  %v4873_v18 = vld [vmem:[#allocation2 + $0xe8] sm:$0xff]  ;;  %v4871_v2 = vld [vmem:[#allocation2 + $0xd8] sm:$0xff]  ;;  %v4847_v6 = vld [vmem:[#allocation2 + $0x20] sm:$0xff]  ;;  %v5056_v56 = vrot.slane %v4883_v15, 7 }
 0xbf4   :  { %v4884_v34 = vrot.slane %v4882_v30, 1  ;;  %4975 = vmatpush1.bf16.msra.mxu1 %v4864_v33  ;;  %v4848_v43 = vld [vmem:[#allocation2 + $0x28] sm:$0xff]  ;;  %v4870_v53 = vld [vmem:[#allocation2 + $0xd0] sm:$0xff]  ;;  %v4867_v60 = vld [vmem:[#allocation2 + $0xb8] sm:$0xff] }
 0xbf5   :  { %4976 = vmatprep.subr.bf16.mxu1 %v4873_v18  ;;  %v4856_v48 = vld [vmem:[#allocation2 + $0x68] sm:$0xff]  ;;  %v4855_v62 = vld [vmem:[#allocation2 + $0x60] sm:$0xff]  ;;  %v4866_v3 = vld [vmem:[#allocation2 + $0xb0] sm:$0xff]  ;;  %v5057_v5 = vsel %vm4885_vm12, %v5056_v56, %v4882_v30 }
 0xbf6   :  { %4895 = vmatpush1.bf16.msra.mxu0 %v4868_v24  ;;  %v4886_v38 = vsel %vm4885_vm12, %v4883_v15, %v4884_v34  ;;  %v5234_v63 = vld [vmem:[#allocation2 + $0x128] sm:$0xff]  ;;  %v4875_v22 = vld [vmem:[#allocation2 + $0xf8] sm:$0xff]  ;;  %v13072_v28 = vld [vmem:[#allocation8 + $0xc] ss:$0 sps:$4 sm:$0x22]   ;;  %v14241_v13 = vpack.c.b16 %v5057_v5, %v5057_v5 }
 0xbf7   :  { %4933 = vmatprep.subr.bf16.mxu0 %v4863_v12  ;;  %v4887_v46 = vpack.c.b16 %v4886_v38, %v4886_v38  ;;  %v13071_v26 = vld [vmem:[#allocation8] ss:$0 sps:$4 sm:$0x22]   ;;  %v4874_v10 = vld [vmem:[#allocation2 + $0xf0] sm:$0xff]  ;;  %v5252_v23 = vunpack.c.l.b16 %v13072_v28  ;;  %v5233_v20 = vld [vmem:[#allocation2 + $0x120] sm:$0xff] }
 0xbf8   :  { %4977 = vmatpush1.bf16.msra.mxu1 %v4872_v37  ;;  %v4844_v17 = vld [vmem:[#allocation2 + $0x8] sm:$0xff]  ;;  %v5251_v19 = vunpack.c.l.b16 %v13071_v26  ;;  %v4843_v31 = vld [vmem:[#allocation2] sm:$0xff]  ;;  %v4846_v42 = vld [vmem:[#allocation2 + $0x18] sm:$0xff] }
 0xbf9   :  { %11251 = vmatmul.mubr.msk.bf16.vlgmr.msra.gmra.mrb[104].mxu0 %vm4888_vm13, %v4887_v46  ;;  %5144 = vmatprep.subr.bf16.mxu1 %v4848_v43  ;;  %v5242_v29 = vld [vmem:[#allocation2 + $0x168] sm:$0xff]  ;;  %v5254_v25 = vrot.slane %v5252_v23, 1  ;;  %v5241_v39 = vld [vmem:[#allocation2 + $0x160] sm:$0xff]  ;;  %v4845_v45 = vld [vmem:[#allocation2 + $0x10] sm:$0xff]  ;;  %v5450_v1 = vrot.slane %v5252_v23, 2 }
 0xbfa   :  { %4934 = vmatpush1.bf16.msra.mxu0 %v4862_v61  ;;  %4965 = vmatprep.mubr.bf16.mxu0 %v13210_v0  ;;  %v4852_v35 = vld [vmem:[#allocation2 + $0x48] sm:$0xff]  ;;  %v5253_v51 = vrot.slane %v5251_v19, 2  ;;  %v4851_v41 = vld [vmem:[#allocation2 + $0x40] sm:$0xff]  ;;  %v4854_v49 = vld [vmem:[#allocation2 + $0x58] sm:$0xff]  ;;  %v5449_v59 = vrot.slane %v5251_v19, 3 }
 0xbfb   :  { %4935 = vmatprep.subr.bf16.mxu0 %v4871_v2  ;;  %11253 = vmatmul.mubr.msk.bf16.vlgmr.msra.gmra.mrb[56].mxu1 %vm4888_vm13, %v4887_v46  ;;  %v5438_v40 = vld [vmem:[#allocation2 + $0x1a8] sm:$0xff]  ;;  %v5437_v50 = vld [vmem:[#allocation2 + $0x1a0] sm:$0xff]  ;;  %v4853_v54 = vld [vmem:[#allocation2 + $0x50] sm:$0xff] }
 0xbfc   :  { %5145 = vmatpush1.bf16.msra.mxu1 %v4847_v6  ;;  %5176 = vmatprep.mubr.bf16.mxu1 %v13210_v0  ;;  %v5255_v44 = vsel %vm4885_vm12, %v5254_v25, %v5253_v51  ;;  %v5446_v52 = vld [vmem:[#allocation2 + $0x1e8] sm:$0xff]  ;;  %v4850_v57 = vld [vmem:[#allocation2 + $0x38] sm:$0xff]  ;;  %v5445_v36 = vld [vmem:[#allocation2 + $0x1e0] sm:$0xff]  ;;  %v5451_v55 = vsel %vm4885_vm12, %v5450_v1, %v5449_v59 }
 0xbfd   :  { %5146 = vmatprep.subr.bf16.mxu1 %v4856_v48  ;;  %v14249_v47 = vpack.c.b16 %v5255_v44, %v5255_v44  ;;  %v5636_v4 = vld [vmem:[#allocation2 + $0x228] sm:$0xff]  ;;  %v4849_v8 = vld [vmem:[#allocation2 + $0x30] sm:$0xff]  ;;  %v4858_v7 = vld [vmem:[#allocation2 + $0x78] sm:$0xff]  ;;  %v14261_v14 = vpack.c.b16 %v5451_v55, %v5451_v55 }
 0xbfe   :  { %4936 = vmatpush1.bf16.msra.mxu0 %v4870_v53  ;;  %v13073_v9 = vld [vmem:[#allocation8] ss:$0 sps:$4 sm:$0x44]   ;;  %v13074_v11 = vld [vmem:[#allocation8 + $0xc] ss:$0 sps:$4 sm:$0x44]  }
 0xbff   :  { %5015 = vmatprep.subr.bf16.mxu0 %v4867_v60  ;;  %v4857_v58 = vld [vmem:[#allocation2 + $0x70] sm:$0xff]  ;;  %v5230_v16 = vld [vmem:[#allocation2 + $0x108] sm:$0xff]  ;;  %v5653_v21 = vunpack.c.l.b16 %v13073_v9  ;;  %v5654_v24 = vunpack.c.l.b16 %v13074_v11  ;;  %v5635_v27 = vld [vmem:[#allocation2 + $0x220] sm:$0xff] }
 0xc00   :  { %5147 = vmatpush1.bf16.msra.mxu1 %v4855_v62  ;;  %v5644_v12 = vld [vmem:[#allocation2 + $0x268] sm:$0xff]  ;;  %v5229_v30 = vld [vmem:[#allocation2 + $0x100] sm:$0xff]  ;;  %v5232_v38 = vld [vmem:[#allocation2 + $0x118] sm:$0xff] }
 0xc01   :  { %11252 = vmatmul.mubr.msk.bf16.vlgmr.msra.gmra.mrb[108].mxu0 %vm4888_vm13, %v4887_v46  ;;  %5342 = vmatprep.subr.bf16.mxu1 %v5234_v63  ;;  %v5238_v32 = vld [vmem:[#allocation2 + $0x148] sm:$0xff]  ;;  %v5655_v33 = vrot.slane %v5653_v21, 4  ;;  %v5656_v15 = vrot.slane %v5654_v24, 3  ;;  %v5643_v18 = vld [vmem:[#allocation2 + $0x260] sm:$0xff]  ;;  %v5240_v2 = vld [vmem:[#allocation2 + $0x158] sm:$0xff]  ;;  %v5851_v60 = vrot.slane %v5653_v21, 5 }
 0xc02   :  { %5016 = vmatpush1.bf16.msra.mxu0 %v4866_v3  ;;  %5047 = vmatprep.mubr.bf16.mxu0 %v13210_v0  ;;  %v5840_v34 = vld [vmem:[#allocation2 + $0x2a8] sm:$0xff]  ;;  %v5237_v37 = vld [vmem:[#allocation2 + $0x140] sm:$0xff]  ;;  %v5239_v53 = vld [vmem:[#allocation2 + $0x150] sm:$0xff]  ;;  %v5852_v62 = vrot.slane %v5654_v24, 4 }
 0xc03   :  { %5017 = vmatprep.subr.bf16.mxu0 %v4875_v22  ;;  %v5657_v43 = vsel %vm4885_vm12, %v5656_v15, %v5655_v33  ;;  %v5839_v6 = vld [vmem:[#allocation2 + $0x2a0] sm:$0xff]  ;;  %v5848_v48 = vld [vmem:[#allocation2 + $0x2e8] sm:$0xff]  ;;  %v5236_v56 = vld [vmem:[#allocation2 + $0x138] sm:$0xff] }
 0xc04   :  { %v14270_v61 = vpack.c.b16 %v5657_v43, %v5657_v43  ;;  %v5235_v63 = vld [vmem:[#allocation2 + $0x130] sm:$0xff]  ;;  %v5847_v3 = vld [vmem:[#allocation2 + $0x2e0] sm:$0xff]  ;;  %v5244_v22 = vld [vmem:[#allocation2 + $0x178] sm:$0xff] }
 0xc05   :  { %v6038_v5 = vld [vmem:[#allocation2 + $0x328] sm:$0xff]  ;;  %v13076_v28 = vld [vmem:[#allocation8 + $0xc] ss:$0 sps:$4 sm:$0x88]   ;;  %v5436_v44 = vld [vmem:[#allocation2 + $0x198] sm:$0xff] }
 0xc06   :  { %5018 = vmatpush1.bf16.msra.mxu0 %v4874_v10  ;;  %v13075_v26 = vld [vmem:[#allocation8] ss:$0 sps:$4 sm:$0x88]   ;;  %v5853_v10 = vsel %vm4885_vm12, %v5852_v62, %v5851_v60  ;;  %v5440_v59 = vld [vmem:[#allocation2 + $0x1b8] sm:$0xff] }
 0xc07   :  { %5062 = vmatprep.subr.bf16.mxu0 %v4844_v17  ;;  %11257 = vmatmul.mubr.msk.bf16.vlgmr.msra.gmra.mrb[56].mxu1 %vm4888_vm13, %v14241_v13  ;;  %v14282_v17 = vpack.c.b16 %v5853_v10, %v5853_v10  ;;  %v5434_v19 = vld [vmem:[#allocation2 + $0x188] sm:$0xff]  ;;  %v6055_v23 = vunpack.c.l.b16 %v13075_v26  ;;  %v5448_v55 = vld [vmem:[#allocation2 + $0x1f8] sm:$0xff] }
 0xc08   :  { %5343 = vmatpush1.bf16.msra.mxu1 %v5233_v20  ;;  %5374 = vmatprep.mubr.bf16.mxu1 %v13210_v0  ;;  %v6056_v20 = vunpack.c.l.b16 %v13076_v28  ;;  %v5442_v51 = vld [vmem:[#allocation2 + $0x1c8] sm:$0xff]  ;;  %v13078_v11 = vld [vmem:[#allocation8 + $0x10] ss:$0 sps:$4 sm:$0x11]  }
 0xc09   :  { %11254 = vmatmul.mubr.msk.bf16.vlgmr.msra.gmra.mrb[112].mxu0 %vm4888_vm13, %v4887_v46  ;;  %5344 = vmatprep.subr.bf16.mxu1 %v5242_v29  ;;  %v5231_v46 = vld [vmem:[#allocation2 + $0x110] sm:$0xff]  ;;  %v6037_v29 = vld [vmem:[#allocation2 + $0x320] sm:$0xff]  ;;  %v6057_v25 = vrot.slane %v6055_v23, 6  ;;  %v6253_v1 = vrot.slane %v6055_v23, 7  ;;  %v5632_v21 = vld [vmem:[#allocation2 + $0x208] sm:$0xff] }
 0xc0a   :  { %5063 = vmatpush1.bf16.msra.mxu0 %v4843_v31  ;;  %5094 = vmatprep.mubr.bf16.mxu0 %v13210_v0  ;;  %v6046_v31 = vld [vmem:[#allocation2 + $0x368] sm:$0xff]  ;;  %v5634_v43 = vld [vmem:[#allocation2 + $0x218] sm:$0xff] }
 0xc0b   :  { %5064 = vmatprep.subr.bf16.mxu0 %v4852_v35  ;;  %v5433_v35 = vld [vmem:[#allocation2 + $0x180] sm:$0xff]  ;;  %v13077_v24 = vld [vmem:[#allocation8 + $0x4] ss:$0 sps:$4 sm:$0x11]   ;;  %v5638_v60 = vld [vmem:[#allocation2 + $0x238] sm:$0xff] }
 0xc0c   :  { %5345 = vmatpush1.bf16.msra.mxu1 %v5241_v39  ;;  %v6058_v39 = vrot.slane %v6056_v20, 5  ;;  %v5640_v33 = vld [vmem:[#allocation2 + $0x248] sm:$0xff]  ;;  %v6457_v15 = vunpack.c.l.b16 %v13077_v24  ;;  %v13080_v10 = vld [vmem:[#allocation8 + $0x10] ss:$0 sps:$4 sm:$0x22]   ;;  %v5849_v24 = vld [vmem:[#allocation2 + $0x2f0] sm:$0xff] }
 0xc0d   :  { %5538 = vmatprep.subr.bf16.mxu1 %v5438_v40  ;;  %v6045_v40 = vld [vmem:[#allocation2 + $0x360] sm:$0xff]  ;;  %v13079_v28 = vld [vmem:[#allocation8 + $0x4] ss:$0 sps:$4 sm:$0x22]  }
 0xc0e   :  { %5065 = vmatpush1.bf16.msra.mxu0 %v4851_v41  ;;  %v6242_v41 = vld [vmem:[#allocation2 + $0x3a8] sm:$0xff]  ;;  %v6654_v62 = vrot.slane %v6457_v15, 1 }
 0xc0f   :  { %5103 = vmatprep.subr.bf16.mxu0 %v4846_v42  ;;  %v5441_v42 = vld [vmem:[#allocation2 + $0x1c0] sm:$0xff]  ;;  %v5836_v23 = vld [vmem:[#allocation2 + $0x288] sm:$0xff] }
 0xc11   :  { %11255 = vmatmul.mubr.msk.bf16.vlgmr.msra.gmra.mrb[104].mxu0 %vm4888_vm13, %v14241_v13 }
 0xc12   :  { %5104 = vmatpush1.bf16.msra.mxu0 %v4845_v45  ;;  %5135 = vmatprep.mubr.bf16.mxu0 %v13210_v0  ;;  %v6059_v45 = vsel %vm4885_vm12, %v6058_v39, %v6057_v25  ;;  %v5844_v25 = vld [vmem:[#allocation2 + $0x2c8] sm:$0xff] }
 0xc13   :  { %5105 = vmatprep.subr.bf16.mxu0 %v4854_v49  ;;  %11263 = vmatmul.mubr.msk.bf16.vlgmr.msra.gmra.mrb[56].mxu1 %vm4888_vm13, %v14249_v47  ;;  %v5435_v49 = vld [vmem:[#allocation2 + $0x190] sm:$0xff] }
 0xc14   :  { %5539 = vmatpush1.bf16.msra.mxu1 %v5437_v50  ;;  %5570 = vmatprep.mubr.bf16.mxu1 %v13210_v0  ;;  %v14291_v50 = vpack.c.b16 %v6059_v45, %v6059_v45  ;;  %v5838_v45 = vld [vmem:[#allocation2 + $0x298] sm:$0xff] }
 0xc15   :  { %5540 = vmatprep.subr.bf16.mxu1 %v5446_v52  ;;  %v5444_v52 = vld [vmem:[#allocation2 + $0x1d8] sm:$0xff] }
 0xc16   :  { %5106 = vmatpush1.bf16.msra.mxu0 %v4853_v54  ;;  %v6250_v54 = vld [vmem:[#allocation2 + $0x3e8] sm:$0xff] }
 0xc17   :  { %5185 = vmatprep.subr.bf16.mxu0 %v4850_v57  ;;  %v5443_v57 = vld [vmem:[#allocation2 + $0x1d0] sm:$0xff] }
 0xc18   :  { %5541 = vmatpush1.bf16.msra.mxu1 %v5445_v36  ;;  %v6254_v36 = vrot.slane %v6056_v20, 6  ;;  %v6857_v20 = vunpack.c.l.b16 %v13079_v28  ;;  %v7644_v28 = vld [vmem:[#allocation2 + $0x728] sm:$0xff] }
 0xc19   :  { %11256 = vmatmul.mubr.msk.bf16.vlgmr.msra.gmra.mrb[108].mxu0 %vm4888_vm13, %v14241_v13  ;;  %5744 = vmatprep.subr.bf16.mxu1 %v5636_v4  ;;  %v6249_v4 = vld [vmem:[#allocation2 + $0x3e0] sm:$0xff] }
 0xc1a   :  { %5186 = vmatpush1.bf16.msra.mxu0 %v4849_v8  ;;  %5217 = vmatprep.mubr.bf16.mxu0 %v13210_v0  ;;  %v6440_v8 = vld [vmem:[#allocation2 + $0x428] sm:$0xff]  ;;  %v6255_v9 = vsel %vm4885_vm12, %v6254_v36, %v6253_v1  ;;  %v6859_v39 = vrot.slane %v6857_v20, 2  ;;  %v5842_v1 = vld [vmem:[#allocation2 + $0x2b8] sm:$0xff]  ;;  %v7055_v36 = vrot.slane %v6857_v20, 3 }
 0xc1b   :  { %5187 = vmatprep.subr.bf16.mxu0 %v4858_v7  ;;  %v5439_v7 = vld [vmem:[#allocation2 + $0x1b0] sm:$0xff]  ;;  %v13083_v20 = vld [vmem:[#allocation8 + $0x4] ss:$0 sps:$4 sm:$0x88]  }
 0xc1e   :  { %5188 = vmatpush1.bf16.msra.mxu0 %v4857_v58  ;;  %v5447_v58 = vld [vmem:[#allocation2 + $0x1f0] sm:$0xff] }
 0xc1f   :  { %5260 = vmatprep.subr.bf16.mxu0 %v5230_v16  ;;  %11267 = vmatmul.mubr.msk.bf16.vlgmr.msra.gmra.mrb[56].mxu1 %vm4888_vm13, %v14261_v14  ;;  %v14303_v16 = vpack.c.b16 %v6255_v9, %v6255_v9  ;;  %v5850_v9 = vld [vmem:[#allocation2 + $0x2f8] sm:$0xff] }
 0xc20   :  { %5745 = vmatpush1.bf16.msra.mxu1 %v5635_v27  ;;  %5776 = vmatprep.mubr.bf16.mxu1 %v13210_v0  ;;  %v6458_v27 = vunpack.c.l.b16 %v13078_v11 }
 0xc21   :  { %11258 = vmatmul.mubr.msk.bf16.vlgmr.msra.gmra.mrb[112].mxu0 %vm4888_vm13, %v14241_v13  ;;  %5746 = vmatprep.subr.bf16.mxu1 %v5644_v12  ;;  %v5243_v13 = vld [vmem:[#allocation2 + $0x170] sm:$0xff]  ;;  %v6439_v12 = vld [vmem:[#allocation2 + $0x420] sm:$0xff] }
 0xc22   :  { %5261 = vmatpush1.bf16.msra.mxu0 %v5229_v30  ;;  %5292 = vmatprep.mubr.bf16.mxu0 %v13210_v0  ;;  %v6448_v30 = vld [vmem:[#allocation2 + $0x468] sm:$0xff]  ;;  %v6655_v26 = vsel %vm4885_vm12, %v6458_v27, %v6654_v62 }
 0xc23   :  { %5262 = vmatprep.subr.bf16.mxu0 %v5238_v32  ;;  %v5631_v32 = vld [vmem:[#allocation2 + $0x200] sm:$0xff]  ;;  %v7454_v62 = vld [vmem:[#allocation2 + $0x6e8] sm:$0xff] }
 0xc24   :  { %5747 = vmatpush1.bf16.msra.mxu1 %v5643_v18  ;;  %v6459_v18 = vrot.slane %v6458_v27, 7 }
 0xc25   :  { %5940 = vmatprep.subr.bf16.mxu1 %v5840_v34  ;;  %v6447_v34 = vld [vmem:[#allocation2 + $0x460] sm:$0xff] }
 0xc26   :  { %5263 = vmatpush1.bf16.msra.mxu0 %v5237_v37  ;;  %v6643_v37 = vld [vmem:[#allocation2 + $0x4a8] sm:$0xff] }
 0xc27   :  { %5301 = vmatprep.subr.bf16.mxu0 %v5232_v38  ;;  %v5639_v38 = vld [vmem:[#allocation2 + $0x240] sm:$0xff] }
 0xc29   :  { %11261 = vmatmul.mubr.msk.bf16.vlgmr.msra.gmra.mrb[104].mxu0 %vm4888_vm13, %v14249_v47 }
 0xc2a   :  { %5302 = vmatpush1.bf16.msra.mxu0 %v5231_v46  ;;  %5333 = vmatprep.mubr.bf16.mxu0 %v13210_v0  ;;  %v6460_v46 = vsel %vm4885_vm12, %v6459_v18, %v6457_v15  ;;  %v7250_v15 = vld [vmem:[#allocation2 + $0x668] sm:$0xff]  ;;  %v6033_v18 = vld [vmem:[#allocation2 + $0x300] sm:$0xff] }
 0xc2b   :  { %5303 = vmatprep.subr.bf16.mxu0 %v5240_v2  ;;  %11273 = vmatmul.mubr.msk.bf16.vlgmr.msra.gmra.mrb[56].mxu1 %vm4888_vm13, %v14270_v61  ;;  %v5633_v2 = vld [vmem:[#allocation2 + $0x210] sm:$0xff] }
 0xc2c   :  { %5941 = vmatpush1.bf16.msra.mxu1 %v5839_v6  ;;  %5972 = vmatprep.mubr.bf16.mxu1 %v13210_v0  ;;  %v14312_v6 = vpack.c.b16 %v6460_v46, %v6460_v46  ;;  %v7446_v46 = vld [vmem:[#allocation2 + $0x6a8] sm:$0xff] }
 0xc2d   :  { %5942 = vmatprep.subr.bf16.mxu1 %v5848_v48  ;;  %v5642_v48 = vld [vmem:[#allocation2 + $0x258] sm:$0xff] }
 0xc2e   :  { %5304 = vmatpush1.bf16.msra.mxu0 %v5239_v53  ;;  %v6651_v53 = vld [vmem:[#allocation2 + $0x4e8] sm:$0xff] }
 0xc2f   :  { %5383 = vmatprep.subr.bf16.mxu0 %v5236_v56  ;;  %v5641_v56 = vld [vmem:[#allocation2 + $0x250] sm:$0xff] }
 0xc30   :  { %5943 = vmatpush1.bf16.msra.mxu1 %v5847_v3  ;;  %v6840_v3 = vld [vmem:[#allocation2 + $0x528] sm:$0xff] }
 0xc31   :  { %11262 = vmatmul.mubr.msk.bf16.vlgmr.msra.gmra.mrb[108].mxu0 %vm4888_vm13, %v14249_v47  ;;  %6146 = vmatprep.subr.bf16.mxu1 %v6038_v5  ;;  %v5646_v5 = vld [vmem:[#allocation2 + $0x278] sm:$0xff] }
 0xc32   :  { %5384 = vmatpush1.bf16.msra.mxu0 %v5235_v63  ;;  %5415 = vmatprep.mubr.bf16.mxu0 %v13210_v0  ;;  %v6650_v63 = vld [vmem:[#allocation2 + $0x4e0] sm:$0xff] }
 0xc33   :  { %5385 = vmatprep.subr.bf16.mxu0 %v5244_v22  ;;  %v5637_v22 = vld [vmem:[#allocation2 + $0x230] sm:$0xff] }
 0xc36   :  { %5386 = vmatpush1.bf16.msra.mxu0 %v5243_v13  ;;  %v5645_v13 = vld [vmem:[#allocation2 + $0x270] sm:$0xff] }
 0xc37   :  { %5456 = vmatprep.subr.bf16.mxu0 %v5434_v19  ;;  %11277 = vmatmul.mubr.msk.bf16.vlgmr.msra.gmra.mrb[56].mxu1 %vm4888_vm13, %v14282_v17  ;;  %v14324_v19 = vpack.c.b16 %v6655_v26, %v6655_v26  ;;  %v7453_v26 = vld [vmem:[#allocation2 + $0x6e0] sm:$0xff] }
 0xc38   :  { %6147 = vmatpush1.bf16.msra.mxu1 %v6037_v29  ;;  %6178 = vmatprep.mubr.bf16.mxu1 %v13210_v0  ;;  %v6858_v29 = vunpack.c.l.b16 %v13080_v10  ;;  %v6039_v10 = vld [vmem:[#allocation2 + $0x330] sm:$0xff] }
 0xc39   :  { %11264 = vmatmul.mubr.msk.bf16.vlgmr.msra.gmra.mrb[112].mxu0 %vm4888_vm13, %v14249_v47  ;;  %6148 = vmatprep.subr.bf16.mxu1 %v6046_v31  ;;  %v6241_v47 = vld [vmem:[#allocation2 + $0x3a0] sm:$0xff] }
 0xc3a   :  { %5457 = vmatpush1.bf16.msra.mxu0 %v5433_v35  ;;  %5488 = vmatprep.mubr.bf16.mxu0 %v13210_v0  ;;  %v6839_v31 = vld [vmem:[#allocation2 + $0x520] sm:$0xff]  ;;  %v6848_v35 = vld [vmem:[#allocation2 + $0x568] sm:$0xff] }
 0xc3b   :  { %5458 = vmatprep.subr.bf16.mxu0 %v5442_v51  ;;  %v5835_v51 = vld [vmem:[#allocation2 + $0x280] sm:$0xff] }
 0xc3c   :  { %6149 = vmatpush1.bf16.msra.mxu1 %v6045_v40  ;;  %v6860_v40 = vrot.slane %v6858_v29, 1 }
 0xc3d   :  { %6342 = vmatprep.subr.bf16.mxu1 %v6242_v41  ;;  %v6847_v41 = vld [vmem:[#allocation2 + $0x560] sm:$0xff] }
 0xc3e   :  { %5459 = vmatpush1.bf16.msra.mxu0 %v5441_v42  ;;  %v7044_v42 = vld [vmem:[#allocation2 + $0x5a8] sm:$0xff] }
 0xc3f   :  { %5497 = vmatprep.subr.bf16.mxu0 %v5436_v44  ;;  %v5843_v44 = vld [vmem:[#allocation2 + $0x2c0] sm:$0xff] }
 0xc41   :  { %11265 = vmatmul.mubr.msk.bf16.vlgmr.msra.gmra.mrb[104].mxu0 %vm4888_vm13, %v14261_v14 }
 0xc42   :  { %5498 = vmatpush1.bf16.msra.mxu0 %v5435_v49  ;;  %5529 = vmatprep.mubr.bf16.mxu0 %v13210_v0  ;;  %v6861_v49 = vsel %vm4885_vm12, %v6860_v40, %v6859_v39  ;;  %v7643_v40 = vld [vmem:[#allocation2 + $0x720] sm:$0xff] }
 0xc43   :  { %5499 = vmatprep.subr.bf16.mxu0 %v5444_v52  ;;  %11283 = vmatmul.mubr.msk.bf16.vlgmr.msra.gmra.mrb[56].mxu1 %vm4888_vm13, %v14291_v50  ;;  %v5837_v52 = vld [vmem:[#allocation2 + $0x290] sm:$0xff] }
 0xc44   :  { %6343 = vmatpush1.bf16.msra.mxu1 %v6241_v47  ;;  %6374 = vmatprep.mubr.bf16.mxu1 %v13210_v0  ;;  %v14333_v47 = vpack.c.b16 %v6861_v49, %v6861_v49 }
 0xc45   :  { %6344 = vmatprep.subr.bf16.mxu1 %v6250_v54  ;;  %v5846_v54 = vld [vmem:[#allocation2 + $0x2d8] sm:$0xff] }
 0xc46   :  { %5500 = vmatpush1.bf16.msra.mxu0 %v5443_v57  ;;  %v7052_v57 = vld [vmem:[#allocation2 + $0x5e8] sm:$0xff] }
 0xc47   :  { %5579 = vmatprep.subr.bf16.mxu0 %v5440_v59  ;;  %v5845_v59 = vld [vmem:[#allocation2 + $0x2d0] sm:$0xff] }
 0xc48   :  { %6345 = vmatpush1.bf16.msra.mxu1 %v6249_v4  ;;  %v7056_v4 = vrot.slane %v6858_v29, 2  ;;  %v13084_v29 = vld [vmem:[#allocation8 + $0x10] ss:$0 sps:$4 sm:$0x88]  }
 0xc49   :  { %11266 = vmatmul.mubr.msk.bf16.vlgmr.msra.gmra.mrb[108].mxu0 %vm4888_vm13, %v14261_v14  ;;  %6547 = vmatprep.subr.bf16.mxu1 %v6440_v8  ;;  %v7051_v8 = vld [vmem:[#allocation2 + $0x5e0] sm:$0xff]  ;;  %v7662_v39 = vunpack.c.l.b16 %v13084_v29  ;;  %v6441_v29 = vld [vmem:[#allocation2 + $0x430] sm:$0xff] }
 0xc4a   :  { %5580 = vmatpush1.bf16.msra.mxu0 %v5439_v7  ;;  %5611 = vmatprep.mubr.bf16.mxu0 %v13210_v0  ;;  %v7242_v7 = vld [vmem:[#allocation2 + $0x628] sm:$0xff]  ;;  %v7057_v11 = vsel %vm4885_vm12, %v7056_v4, %v7055_v36  ;;  %v6248_v4 = vld [vmem:[#allocation2 + $0x3d8] sm:$0xff] }
 0xc4b   :  { %5581 = vmatprep.subr.bf16.mxu0 %v5448_v55  ;;  %v5841_v55 = vld [vmem:[#allocation2 + $0x2b0] sm:$0xff]  ;;  %v14345_v27 = vpack.c.b16 %v7057_v11, %v7057_v11  ;;  %v7664_v49 = vrot.slane %v7662_v39, 5  ;;  %v7860_v11 = vrot.slane %v7662_v39, 6  ;;  %v13088_v39 = vld [vmem:[#allocation8 + $0x14] ss:$0 sps:$4 sm:$0x22]  }
 0xc4e   :  { %5582 = vmatpush1.bf16.msra.mxu0 %v5447_v58  ;;  %v13081_v58 = vld [vmem:[#allocation8 + $0x4] ss:$0 sps:$4 sm:$0x44]  }
 0xc4f   :  { %5662 = vmatprep.subr.bf16.mxu0 %v5632_v21  ;;  %11287 = vmatmul.mubr.msk.bf16.vlgmr.msra.gmra.mrb[56].mxu1 %vm4888_vm13, %v14303_v16  ;;  %v13082_v21 = vld [vmem:[#allocation8 + $0x10] ss:$0 sps:$4 sm:$0x44]  }
 0xc50   :  { %6548 = vmatpush1.bf16.msra.mxu1 %v6439_v12  ;;  %6579 = vmatprep.mubr.bf16.mxu1 %v13210_v0  ;;  %v6034_v12 = vld [vmem:[#allocation2 + $0x308] sm:$0xff] }
 0xc51   :  { %11268 = vmatmul.mubr.msk.bf16.vlgmr.msra.gmra.mrb[112].mxu0 %vm4888_vm13, %v14261_v14  ;;  %6549 = vmatprep.subr.bf16.mxu1 %v6448_v30  ;;  %v6642_v14 = vld [vmem:[#allocation2 + $0x4a0] sm:$0xff]  ;;  %v7259_v30 = vunpack.c.l.b16 %v13081_v58 }
 0xc52   :  { %5663 = vmatpush1.bf16.msra.mxu0 %v5631_v32  ;;  %5694 = vmatprep.mubr.bf16.mxu0 %v13210_v0  ;;  %v7260_v32 = vunpack.c.l.b16 %v13082_v21  ;;  %v7855_v58 = vld [vmem:[#allocation2 + $0x7e0] sm:$0xff]  ;;  %v8046_v21 = vld [vmem:[#allocation2 + $0x828] sm:$0xff] }
 0xc53   :  { %5664 = vmatprep.subr.bf16.mxu0 %v5640_v33  ;;  %v7241_v33 = vld [vmem:[#allocation2 + $0x620] sm:$0xff] }
 0xc54   :  { %6550 = vmatpush1.bf16.msra.mxu1 %v6447_v34  ;;  %v6042_v34 = vld [vmem:[#allocation2 + $0x348] sm:$0xff] }
 0xc55   :  { %6742 = vmatprep.subr.bf16.mxu1 %v6643_v37  ;;  %v7261_v37 = vrot.slane %v7259_v30, 4 }
 0xc56   :  { %5665 = vmatpush1.bf16.msra.mxu0 %v5639_v38  ;;  %v7262_v38 = vrot.slane %v7260_v32, 3 }
 0xc57   :  { %5703 = vmatprep.subr.bf16.mxu0 %v5634_v43  ;;  %v7249_v43 = vld [vmem:[#allocation2 + $0x660] sm:$0xff] }
 0xc59   :  { %11271 = vmatmul.mubr.msk.bf16.vlgmr.msra.gmra.mrb[104].mxu0 %vm4888_vm13, %v14270_v61 }
 0xc5a   :  { %5704 = vmatpush1.bf16.msra.mxu0 %v5633_v2  ;;  %5735 = vmatprep.mubr.bf16.mxu0 %v13210_v0  ;;  %v6041_v2 = vld [vmem:[#allocation2 + $0x340] sm:$0xff] }
 0xc5b   :  { %5705 = vmatprep.subr.bf16.mxu0 %v5642_v48  ;;  %11293 = vmatmul.mubr.msk.bf16.vlgmr.msra.gmra.mrb[56].mxu1 %vm4888_vm13, %v14312_v6  ;;  %v6036_v48 = vld [vmem:[#allocation2 + $0x318] sm:$0xff] }
 0xc5c   :  { %6743 = vmatpush1.bf16.msra.mxu1 %v6642_v14  ;;  %6774 = vmatprep.mubr.bf16.mxu1 %v13210_v0  ;;  %v7263_v14 = vsel %vm4885_vm12, %v7262_v38, %v7261_v37  ;;  %v8045_v38 = vld [vmem:[#allocation2 + $0x820] sm:$0xff] }
 0xc5d   :  { %6744 = vmatprep.subr.bf16.mxu1 %v6651_v53  ;;  %v6035_v53 = vld [vmem:[#allocation2 + $0x310] sm:$0xff] }
 0xc5e   :  { %5706 = vmatpush1.bf16.msra.mxu0 %v5641_v56  ;;  %v14354_v56 = vpack.c.b16 %v7263_v14, %v7263_v14 }
 0xc5f   :  { %5785 = vmatprep.subr.bf16.mxu0 %v5638_v60  ;;  %v6044_v60 = vld [vmem:[#allocation2 + $0x358] sm:$0xff] }
 0xc60   :  { %6745 = vmatpush1.bf16.msra.mxu1 %v6650_v63  ;;  %v6043_v63 = vld [vmem:[#allocation2 + $0x350] sm:$0xff] }
 0xc61   :  { %11272 = vmatmul.mubr.msk.bf16.vlgmr.msra.gmra.mrb[108].mxu0 %vm4888_vm13, %v14270_v61  ;;  %6948 = vmatprep.subr.bf16.mxu1 %v6840_v3  ;;  %v6040_v3 = vld [vmem:[#allocation2 + $0x338] sm:$0xff] }
 0xc62   :  { %5786 = vmatpush1.bf16.msra.mxu0 %v5637_v22  ;;  %5817 = vmatprep.mubr.bf16.mxu0 %v13210_v0  ;;  %v7457_v22 = vrot.slane %v7259_v30, 5 }
 0xc63   :  { %5787 = vmatprep.subr.bf16.mxu0 %v5646_v5  ;;  %v7458_v5 = vrot.slane %v7260_v32, 4  ;;  %v13086_v32 = vld [vmem:[#allocation8 + $0x14] ss:$0 sps:$4 sm:$0x11]  }
 0xc64   :  { %v8064_v37 = vunpack.c.l.b16 %v13086_v32  ;;  %v8657_v32 = vld [vmem:[#allocation2 + $0x9e0] sm:$0xff] }
 0xc66   :  { %5788 = vmatpush1.bf16.msra.mxu0 %v5645_v13  ;;  %v6048_v13 = vld [vmem:[#allocation2 + $0x378] sm:$0xff]  ;;  %v8065_v14 = vrot.slane %v8064_v37, 7 }
 0xc67   :  { %5858 = vmatprep.subr.bf16.mxu0 %v5836_v23  ;;  %11297 = vmatmul.mubr.msk.bf16.vlgmr.msra.gmra.mrb[56].mxu1 %vm4888_vm13, %v14324_v19  ;;  %v7459_v23 = vsel %vm4885_vm12, %v7458_v5, %v7457_v22  ;;  %v6446_v5 = vld [vmem:[#allocation2 + $0x458] sm:$0xff] }
 0xc68   :  { %6949 = vmatpush1.bf16.msra.mxu1 %v6839_v31  ;;  %6980 = vmatprep.mubr.bf16.mxu1 %v13210_v0  ;;  %v6047_v31 = vld [vmem:[#allocation2 + $0x370] sm:$0xff] }
 0xc69   :  { %11274 = vmatmul.mubr.msk.bf16.vlgmr.msra.gmra.mrb[112].mxu0 %vm4888_vm13, %v14270_v61  ;;  %6950 = vmatprep.subr.bf16.mxu1 %v6848_v35  ;;  %v7043_v61 = vld [vmem:[#allocation2 + $0x5a0] sm:$0xff]  ;;  %v14366_v35 = vpack.c.b16 %v7459_v23, %v7459_v23 }
 0xc6a   :  { %5859 = vmatpush1.bf16.msra.mxu0 %v5835_v51  ;;  %5890 = vmatprep.mubr.bf16.mxu0 %v13210_v0  ;;  %v6238_v51 = vld [vmem:[#allocation2 + $0x388] sm:$0xff]  ;;  %v8256_v23 = vld [vmem:[#allocation2 + $0x8e0] sm:$0xff] }
 0xc6b   :  { %5860 = vmatprep.subr.bf16.mxu0 %v5844_v25  ;;  %v7661_v25 = vunpack.c.l.b16 %v13083_v20  ;;  %v8446_v20 = vld [vmem:[#allocation2 + $0x928] sm:$0xff] }
 0xc6c   :  { %6951 = vmatpush1.bf16.msra.mxu1 %v6847_v41  ;;  %v7652_v41 = vld [vmem:[#allocation2 + $0x768] sm:$0xff] }
 0xc6d   :  { %7144 = vmatprep.subr.bf16.mxu1 %v7044_v42  ;;  %v6237_v42 = vld [vmem:[#allocation2 + $0x380] sm:$0xff] }
 0xc6e   :  { %5861 = vmatpush1.bf16.msra.mxu0 %v5843_v44  ;;  %v6246_v44 = vld [vmem:[#allocation2 + $0x3c8] sm:$0xff] }
 0xc6f   :  { %5899 = vmatprep.subr.bf16.mxu0 %v5838_v45  ;;  %v7663_v45 = vrot.slane %v7661_v25, 6 }
 0xc71   :  { %11275 = vmatmul.mubr.msk.bf16.vlgmr.msra.gmra.mrb[104].mxu0 %vm4888_vm13, %v14282_v17 }
 0xc72   :  { %5900 = vmatpush1.bf16.msra.mxu0 %v5837_v52  ;;  %5931 = vmatprep.mubr.bf16.mxu0 %v13210_v0  ;;  %v7651_v52 = vld [vmem:[#allocation2 + $0x760] sm:$0xff] }
 0xc73   :  { %5901 = vmatprep.subr.bf16.mxu0 %v5846_v54  ;;  %11303 = vmatmul.mubr.msk.bf16.vlgmr.msra.gmra.mrb[56].mxu1 %vm4888_vm13, %v14333_v47  ;;  %v7848_v54 = vld [vmem:[#allocation2 + $0x7a8] sm:$0xff] }
 0xc74   :  { %7145 = vmatpush1.bf16.msra.mxu1 %v7043_v61  ;;  %7176 = vmatprep.mubr.bf16.mxu1 %v13210_v0  ;;  %v6245_v61 = vld [vmem:[#allocation2 + $0x3c0] sm:$0xff] }
 0xc75   :  { %7146 = vmatprep.subr.bf16.mxu1 %v7052_v57  ;;  %v6240_v57 = vld [vmem:[#allocation2 + $0x398] sm:$0xff] }
 0xc76   :  { %5902 = vmatpush1.bf16.msra.mxu0 %v5845_v59  ;;  %v7665_v59 = vsel %vm4885_vm12, %v7664_v49, %v7663_v45  ;;  %v8464_v45 = vunpack.c.l.b16 %v13088_v39  ;;  %v8445_v49 = vld [vmem:[#allocation2 + $0x920] sm:$0xff] }
 0xc77   :  { %5981 = vmatprep.subr.bf16.mxu0 %v5842_v1  ;;  %v6239_v1 = vld [vmem:[#allocation2 + $0x390] sm:$0xff]  ;;  %v14375_v36 = vpack.c.b16 %v7665_v59, %v7665_v59 }
 0xc78   :  { %7147 = vmatpush1.bf16.msra.mxu1 %v7051_v8  ;;  %v7856_v8 = vld [vmem:[#allocation2 + $0x7e8] sm:$0xff]  ;;  %v8466_v59 = vrot.slane %v8464_v45, 1 }
 0xc79   :  { %11276 = vmatmul.mubr.msk.bf16.vlgmr.msra.gmra.mrb[108].mxu0 %vm4888_vm13, %v14282_v17  ;;  %7350 = vmatprep.subr.bf16.mxu1 %v7242_v7  ;;  %v6247_v7 = vld [vmem:[#allocation2 + $0x3d0] sm:$0xff] }
 0xc7a   :  { %5982 = vmatpush1.bf16.msra.mxu0 %v5841_v55  ;;  %6013 = vmatprep.mubr.bf16.mxu0 %v13210_v0  ;;  %v6244_v55 = vld [vmem:[#allocation2 + $0x3b8] sm:$0xff] }
 0xc7b   :  { %5983 = vmatprep.subr.bf16.mxu0 %v5850_v9  ;;  %v7859_v9 = vrot.slane %v7661_v25, 7  ;;  %v13087_v25 = vld [vmem:[#allocation8 + $0x8] ss:$0 sps:$4 sm:$0x22]  }
 0xc7d   :  { %v7861_v30 = vsel %vm4885_vm12, %v7860_v11, %v7859_v9  ;;  %v6649_v11 = vld [vmem:[#allocation2 + $0x4d8] sm:$0xff] }
 0xc7e   :  { %5984 = vmatpush1.bf16.msra.mxu0 %v5849_v24  ;;  %v6243_v24 = vld [vmem:[#allocation2 + $0x3b0] sm:$0xff] }
 0xc7f   :  { %6064 = vmatprep.subr.bf16.mxu0 %v6034_v12  ;;  %11307 = vmatmul.mubr.msk.bf16.vlgmr.msra.gmra.mrb[56].mxu1 %vm4888_vm13, %v14345_v27  ;;  %v6252_v12 = vld [vmem:[#allocation2 + $0x3f8] sm:$0xff] }
 0xc80   :  { %7351 = vmatpush1.bf16.msra.mxu1 %v7241_v33  ;;  %7382 = vmatprep.mubr.bf16.mxu1 %v13210_v0  ;;  %v6251_v33 = vld [vmem:[#allocation2 + $0x3f0] sm:$0xff] }
 0xc81   :  { %11278 = vmatmul.mubr.msk.bf16.vlgmr.msra.gmra.mrb[112].mxu0 %vm4888_vm13, %v14282_v17  ;;  %7352 = vmatprep.subr.bf16.mxu1 %v7250_v15  ;;  %v7445_v17 = vld [vmem:[#allocation2 + $0x6a0] sm:$0xff]  ;;  %v14387_v15 = vpack.c.b16 %v7861_v30, %v7861_v30  ;;  %v8662_v30 = vrot.slane %v8464_v45, 2  ;;  %v6841_v45 = vld [vmem:[#allocation2 + $0x530] sm:$0xff] }
 0xc82   :  { %6065 = vmatpush1.bf16.msra.mxu0 %v6033_v18  ;;  %6096 = vmatprep.mubr.bf16.mxu0 %v13210_v0  ;;  %v6436_v18 = vld [vmem:[#allocation2 + $0x408] sm:$0xff] }
 0xc83   :  { %6066 = vmatprep.subr.bf16.mxu0 %v6042_v34  ;;  %v13085_v34 = vld [vmem:[#allocation8 + $0x8] ss:$0 sps:$4 sm:$0x11]  }
 0xc84   :  { %7353 = vmatpush1.bf16.msra.mxu1 %v7249_v43  ;;  %v8054_v43 = vld [vmem:[#allocation2 + $0x868] sm:$0xff] }
 0xc85   :  { %7546 = vmatprep.subr.bf16.mxu1 %v7446_v46  ;;  %v6435_v46 = vld [vmem:[#allocation2 + $0x400] sm:$0xff] }
 0xc86   :  { %6067 = vmatpush1.bf16.msra.mxu0 %v6041_v2  ;;  %v6444_v2 = vld [vmem:[#allocation2 + $0x448] sm:$0xff] }
 0xc87   :  { %6105 = vmatprep.subr.bf16.mxu0 %v6036_v48  ;;  %v8063_v48 = vunpack.c.l.b16 %v13085_v34  ;;  %v6653_v34 = vld [vmem:[#allocation2 + $0x4f8] sm:$0xff] }
 0xc89   :  { %11281 = vmatmul.mubr.msk.bf16.vlgmr.msra.gmra.mrb[104].mxu0 %vm4888_vm13, %v14291_v50 }
 0xc8a   :  { %6106 = vmatpush1.bf16.msra.mxu0 %v6035_v53  ;;  %6137 = vmatprep.mubr.bf16.mxu0 %v13210_v0  ;;  %v8053_v53 = vld [vmem:[#allocation2 + $0x860] sm:$0xff] }
 0xc8b   :  { %6107 = vmatprep.subr.bf16.mxu0 %v6044_v60  ;;  %11313 = vmatmul.mubr.msk.bf16.vlgmr.msra.gmra.mrb[56].mxu1 %vm4888_vm13, %v14354_v56  ;;  %v8249_v60 = vld [vmem:[#allocation2 + $0x8a8] sm:$0xff] }
 0xc8c   :  { %7547 = vmatpush1.bf16.msra.mxu1 %v7445_v17  ;;  %7578 = vmatprep.mubr.bf16.mxu1 %v13210_v0  ;;  %v6443_v17 = vld [vmem:[#allocation2 + $0x440] sm:$0xff] }
 0xc8d   :  { %7548 = vmatprep.subr.bf16.mxu1 %v7454_v62  ;;  %v6438_v62 = vld [vmem:[#allocation2 + $0x418] sm:$0xff] }
 0xc8e   :  { %6108 = vmatpush1.bf16.msra.mxu0 %v6043_v63  ;;  %v8066_v63 = vsel %vm4885_vm12, %v8065_v14, %v8063_v48 }
 0xc8f   :  { %6187 = vmatprep.subr.bf16.mxu0 %v6040_v3  ;;  %v6437_v3 = vld [vmem:[#allocation2 + $0x410] sm:$0xff]  ;;  %v14396_v22 = vpack.c.b16 %v8066_v63, %v8066_v63  ;;  %v6844_v63 = vld [vmem:[#allocation2 + $0x548] sm:$0xff] }
 0xc90   :  { %7549 = vmatpush1.bf16.msra.mxu1 %v7453_v26  ;;  %v8257_v26 = vld [vmem:[#allocation2 + $0x8e8] sm:$0xff] }
 0xc91   :  { %11282 = vmatmul.mubr.msk.bf16.vlgmr.msra.gmra.mrb[108].mxu0 %vm4888_vm13, %v14291_v50  ;;  %7752 = vmatprep.subr.bf16.mxu1 %v7644_v28  ;;  %v6445_v28 = vld [vmem:[#allocation2 + $0x450] sm:$0xff] }
 0xc92   :  { %6188 = vmatpush1.bf16.msra.mxu0 %v6039_v10  ;;  %6219 = vmatprep.mubr.bf16.mxu0 %v13210_v0  ;;  %v6442_v10 = vld [vmem:[#allocation2 + $0x438] sm:$0xff] }
 0xc93   :  { %6189 = vmatprep.subr.bf16.mxu0 %v6048_v13  ;;  %v8260_v13 = vrot.slane %v8063_v48, 1  ;;  %v6836_v48 = vld [vmem:[#allocation2 + $0x508] sm:$0xff] }
 0xc96   :  { %6190 = vmatpush1.bf16.msra.mxu0 %v6047_v31  ;;  %v6450_v31 = vld [vmem:[#allocation2 + $0x478] sm:$0xff] }
 0xc97   :  { %6260 = vmatprep.subr.bf16.mxu0 %v6238_v51  ;;  %11317 = vmatmul.mubr.msk.bf16.vlgmr.msra.gmra.mrb[56].mxu1 %vm4888_vm13, %v14366_v35  ;;  %v8261_v51 = vsel %vm4885_vm12, %v8064_v37, %v8260_v13 }
 0xc98   :  { %7753 = vmatpush1.bf16.msra.mxu1 %v7643_v40  ;;  %7784 = vmatprep.mubr.bf16.mxu1 %v13210_v0  ;;  %v6449_v40 = vld [vmem:[#allocation2 + $0x470] sm:$0xff] }
 0xc99   :  { %11284 = vmatmul.mubr.msk.bf16.vlgmr.msra.gmra.mrb[112].mxu0 %vm4888_vm13, %v14291_v50  ;;  %7754 = vmatprep.subr.bf16.mxu1 %v7652_v41  ;;  %v7847_v50 = vld [vmem:[#allocation2 + $0x7a0] sm:$0xff]  ;;  %v14408_v41 = vpack.c.b16 %v8261_v51, %v8261_v51  ;;  %v6845_v51 = vld [vmem:[#allocation2 + $0x550] sm:$0xff] }
 0xc9a   :  { %6261 = vmatpush1.bf16.msra.mxu0 %v6237_v42  ;;  %6292 = vmatprep.mubr.bf16.mxu0 %v13210_v0  ;;  %v6639_v42 = vld [vmem:[#allocation2 + $0x488] sm:$0xff] }
 0xc9b   :  { %6262 = vmatprep.subr.bf16.mxu0 %v6246_v44  ;;  %v8463_v44 = vunpack.c.l.b16 %v13087_v25  ;;  %v6842_v25 = vld [vmem:[#allocation2 + $0x538] sm:$0xff] }
 0xc9c   :  { %7755 = vmatpush1.bf16.msra.mxu1 %v7651_v52  ;;  %v8454_v52 = vld [vmem:[#allocation2 + $0x968] sm:$0xff] }
 0xc9d   :  { %7948 = vmatprep.subr.bf16.mxu1 %v7848_v54  ;;  %v6638_v54 = vld [vmem:[#allocation2 + $0x480] sm:$0xff] }
 0xc9e   :  { %6263 = vmatpush1.bf16.msra.mxu0 %v6245_v61  ;;  %v6647_v61 = vld [vmem:[#allocation2 + $0x4c8] sm:$0xff] }
 0xc9f   :  { %6301 = vmatprep.subr.bf16.mxu0 %v6240_v57  ;;  %v8465_v57 = vrot.slane %v8463_v44, 2 }
 0xca1   :  { %11285 = vmatmul.mubr.msk.bf16.vlgmr.msra.gmra.mrb[104].mxu0 %vm4888_vm13, %v14303_v16 }
 0xca2   :  { %6302 = vmatpush1.bf16.msra.mxu0 %v6239_v1  ;;  %6333 = vmatprep.mubr.bf16.mxu0 %v13210_v0  ;;  %v8453_v1 = vld [vmem:[#allocation2 + $0x960] sm:$0xff] }
 0xca3   :  { %6303 = vmatprep.subr.bf16.mxu0 %v6248_v4  ;;  %11323 = vmatmul.mubr.msk.bf16.vlgmr.msra.gmra.mrb[56].mxu1 %vm4888_vm13, %v14375_v36  ;;  %v8650_v4 = vld [vmem:[#allocation2 + $0x9a8] sm:$0xff] }
 0xca4   :  { %7949 = vmatpush1.bf16.msra.mxu1 %v7847_v50  ;;  %7980 = vmatprep.mubr.bf16.mxu1 %v13210_v0  ;;  %v6646_v50 = vld [vmem:[#allocation2 + $0x4c0] sm:$0xff] }
 0xca5   :  { %7950 = vmatprep.subr.bf16.mxu1 %v7856_v8  ;;  %v6641_v8 = vld [vmem:[#allocation2 + $0x498] sm:$0xff] }
 0xca6   :  { %6304 = vmatpush1.bf16.msra.mxu0 %v6247_v7  ;;  %v8467_v7 = vsel %vm4885_vm12, %v8466_v59, %v8465_v57  ;;  %v6849_v57 = vld [vmem:[#allocation2 + $0x570] sm:$0xff] }
 0xca7   :  { %6383 = vmatprep.subr.bf16.mxu0 %v6244_v55  ;;  %v6640_v55 = vld [vmem:[#allocation2 + $0x490] sm:$0xff]  ;;  %v14417_v9 = vpack.c.b16 %v8467_v7, %v8467_v7  ;;  %v9258_v7 = vld [vmem:[#allocation2 + $0xb68] sm:$0xff] }
 0xca8   :  { %7951 = vmatpush1.bf16.msra.mxu1 %v7855_v58  ;;  %v8658_v58 = vld [vmem:[#allocation2 + $0x9e8] sm:$0xff] }
 0xca9   :  { %11286 = vmatmul.mubr.msk.bf16.vlgmr.msra.gmra.mrb[108].mxu0 %vm4888_vm13, %v14303_v16  ;;  %8153 = vmatprep.subr.bf16.mxu1 %v8046_v21  ;;  %v6648_v21 = vld [vmem:[#allocation2 + $0x4d0] sm:$0xff] }
 0xcaa   :  { %6384 = vmatpush1.bf16.msra.mxu0 %v6243_v24  ;;  %6415 = vmatprep.mubr.bf16.mxu0 %v13210_v0  ;;  %v6645_v24 = vld [vmem:[#allocation2 + $0x4b8] sm:$0xff] }
 0xcab   :  { %6385 = vmatprep.subr.bf16.mxu0 %v6252_v12  ;;  %v8661_v12 = vrot.slane %v8463_v44, 3  ;;  %v9250_v44 = vld [vmem:[#allocation2 + $0xb28] sm:$0xff] }
 0xcad   :  { %v8663_v37 = vsel %vm4885_vm12, %v8662_v30, %v8661_v12  ;;  %v7047_v12 = vld [vmem:[#allocation2 + $0x5c0] sm:$0xff]  ;;  %v7042_v30 = vld [vmem:[#allocation2 + $0x598] sm:$0xff] }
 0xcae   :  { %6386 = vmatpush1.bf16.msra.mxu0 %v6251_v33  ;;  %v8848_v33 = vld [vmem:[#allocation2 + $0xa28] sm:$0xff] }
 0xcaf   :  { %6465 = vmatprep.subr.bf16.mxu0 %v6436_v18  ;;  %11327 = vmatmul.mubr.msk.bf16.vlgmr.msra.gmra.mrb[56].mxu1 %vm4888_vm13, %v14387_v15  ;;  %v6644_v18 = vld [vmem:[#allocation2 + $0x4b0] sm:$0xff] }
 0xcb0   :  { %8154 = vmatpush1.bf16.msra.mxu1 %v8045_v38  ;;  %8185 = vmatprep.mubr.bf16.mxu1 %v13210_v0  ;;  %v13089_v38 = vld [vmem:[#allocation8 + $0x8] ss:$0 sps:$4 sm:$0x44]  }
 0xcb1   :  { %11288 = vmatmul.mubr.msk.bf16.vlgmr.msra.gmra.mrb[112].mxu0 %vm4888_vm13, %v14303_v16  ;;  %8155 = vmatprep.subr.bf16.mxu1 %v8054_v43  ;;  %v8248_v16 = vld [vmem:[#allocation2 + $0x8a0] sm:$0xff]  ;;  %v13090_v43 = vld [vmem:[#allocation8 + $0x14] ss:$0 sps:$4 sm:$0x44]   ;;  %v8865_v14 = vunpack.c.l.b16 %v13089_v38  ;;  %v7049_v38 = vld [vmem:[#allocation2 + $0x5d0] sm:$0xff] }
 0xcb2   :  { %6466 = vmatpush1.bf16.msra.mxu0 %v6435_v46  ;;  %6497 = vmatprep.mubr.bf16.mxu0 %v13210_v0  ;;  %v6652_v46 = vld [vmem:[#allocation2 + $0x4f0] sm:$0xff] }
 0xcb3   :  { %6467 = vmatprep.subr.bf16.mxu0 %v6444_v2  ;;  %v14429_v2 = vpack.c.b16 %v8663_v37, %v8663_v37  ;;  %v9063_v39 = vrot.slane %v8865_v14, 5  ;;  %v9462_v37 = vld [vmem:[#allocation2 + $0xbe8] sm:$0xff] }
 0xcb4   :  { %8156 = vmatpush1.bf16.msra.mxu1 %v8053_v53  ;;  %v8866_v53 = vunpack.c.l.b16 %v13090_v43  ;;  %v7046_v43 = vld [vmem:[#allocation2 + $0x5b8] sm:$0xff] }
 0xcb5   :  { %8348 = vmatprep.subr.bf16.mxu1 %v8249_v60  ;;  %v8847_v60 = vld [vmem:[#allocation2 + $0xa20] sm:$0xff] }
 0xcb6   :  { %6468 = vmatpush1.bf16.msra.mxu0 %v6443_v17  ;;  %v8856_v17 = vld [vmem:[#allocation2 + $0xa68] sm:$0xff] }
 0xcb7   :  { %6506 = vmatprep.subr.bf16.mxu0 %v6438_v62  ;;  %v6835_v62 = vld [vmem:[#allocation2 + $0x500] sm:$0xff] }
 0xcb9   :  { %11291 = vmatmul.mubr.msk.bf16.vlgmr.msra.gmra.mrb[104].mxu0 %vm4888_vm13, %v14312_v6 }
 0xcba   :  { %6507 = vmatpush1.bf16.msra.mxu0 %v6437_v3  ;;  %6538 = vmatprep.mubr.bf16.mxu0 %v13210_v0  ;;  %v8867_v3 = vrot.slane %v8865_v14, 4  ;;  %v9461_v14 = vld [vmem:[#allocation2 + $0xbe0] sm:$0xff] }
 0xcbb   :  { %6508 = vmatprep.subr.bf16.mxu0 %v6446_v5  ;;  %11333 = vmatmul.mubr.msk.bf16.vlgmr.msra.gmra.mrb[56].mxu1 %vm4888_vm13, %v14396_v22  ;;  %v8868_v5 = vrot.slane %v8866_v53, 3 }
 0xcbc   :  { %8349 = vmatpush1.bf16.msra.mxu1 %v8248_v16  ;;  %8380 = vmatprep.mubr.bf16.mxu1 %v13210_v0  ;;  %v8855_v16 = vld [vmem:[#allocation2 + $0xa60] sm:$0xff] }
 0xcbd   :  { %8350 = vmatprep.subr.bf16.mxu1 %v8257_v26  ;;  %v9052_v26 = vld [vmem:[#allocation2 + $0xaa8] sm:$0xff]  ;;  %v8869_v13 = vsel %vm4885_vm12, %v8868_v5, %v8867_v3  ;;  %v7237_v5 = vld [vmem:[#allocation2 + $0x600] sm:$0xff] }
 0xcbe   :  { %6509 = vmatpush1.bf16.msra.mxu0 %v6445_v28  ;;  %v6843_v28 = vld [vmem:[#allocation2 + $0x540] sm:$0xff]  ;;  %v7238_v3 = vld [vmem:[#allocation2 + $0x608] sm:$0xff] }
 0xcbf   :  { %6588 = vmatprep.subr.bf16.mxu0 %v6442_v10  ;;  %v6838_v10 = vld [vmem:[#allocation2 + $0x518] sm:$0xff] }
 0xcc0   :  { %8351 = vmatpush1.bf16.msra.mxu1 %v8256_v23  ;;  %v6837_v23 = vld [vmem:[#allocation2 + $0x510] sm:$0xff] }
 0xcc1   :  { %11292 = vmatmul.mubr.msk.bf16.vlgmr.msra.gmra.mrb[108].mxu0 %vm4888_vm13, %v14312_v6  ;;  %8554 = vmatprep.subr.bf16.mxu1 %v8446_v20  ;;  %v14438_v20 = vpack.c.b16 %v8869_v13, %v8869_v13  ;;  %v7248_v13 = vld [vmem:[#allocation2 + $0x658] sm:$0xff] }
 0xcc2   :  { %6589 = vmatpush1.bf16.msra.mxu0 %v6441_v29  ;;  %6620 = vmatprep.mubr.bf16.mxu0 %v13210_v0  ;;  %v6846_v29 = vld [vmem:[#allocation2 + $0x558] sm:$0xff] }
 0xcc3   :  { %6590 = vmatprep.subr.bf16.mxu0 %v6450_v31  ;;  %v9060_v31 = vld [vmem:[#allocation2 + $0xae8] sm:$0xff] }
 0xcc6   :  { %6591 = vmatpush1.bf16.msra.mxu0 %v6449_v40  ;;  %v9064_v40 = vrot.slane %v8866_v53, 4  ;;  %v7045_v53 = vld [vmem:[#allocation2 + $0x5b0] sm:$0xff] }
 0xcc7   :  { %6660 = vmatprep.subr.bf16.mxu0 %v6639_v42  ;;  %11337 = vmatmul.mubr.msk.bf16.vlgmr.msra.gmra.mrb[56].mxu1 %vm4888_vm13, %v14408_v41  ;;  %v9059_v42 = vld [vmem:[#allocation2 + $0xae0] sm:$0xff] }
 0xcc8   :  { %8555 = vmatpush1.bf16.msra.mxu1 %v8445_v49  ;;  %8586 = vmatprep.mubr.bf16.mxu1 %v13210_v0  ;;  %v6850_v49 = vld [vmem:[#allocation2 + $0x578] sm:$0xff] }
 0xcc9   :  { %11294 = vmatmul.mubr.msk.bf16.vlgmr.msra.gmra.mrb[112].mxu0 %vm4888_vm13, %v14312_v6  ;;  %8556 = vmatprep.subr.bf16.mxu1 %v8454_v52  ;;  %v8649_v6 = vld [vmem:[#allocation2 + $0x9a0] sm:$0xff]  ;;  %v9065_v52 = vsel %vm4885_vm12, %v9064_v40, %v9063_v39  ;;  %v7450_v39 = vld [vmem:[#allocation2 + $0x6c8] sm:$0xff] }
 0xcca   :  { %6661 = vmatpush1.bf16.msra.mxu0 %v6638_v54  ;;  %6692 = vmatprep.mubr.bf16.mxu0 %v13210_v0  ;;  %v13091_v54 = vld [vmem:[#allocation8 + $0x8] ss:$0 sps:$4 sm:$0x88]   ;;  %v14450_v59 = vpack.c.b16 %v9065_v52, %v9065_v52  ;;  %v7449_v40 = vld [vmem:[#allocation2 + $0x6c0] sm:$0xff]  ;;  %v7448_v52 = vld [vmem:[#allocation2 + $0x6b8] sm:$0xff] }
 0xccb   :  { %6662 = vmatprep.subr.bf16.mxu0 %v6647_v61  ;;  %v13092_v61 = vld [vmem:[#allocation8 + $0x14] ss:$0 sps:$4 sm:$0x88]  }
 0xccc   :  { %8557 = vmatpush1.bf16.msra.mxu1 %v8453_v1  ;;  %v7040_v1 = vld [vmem:[#allocation2 + $0x588] sm:$0xff] }
 0xccd   :  { %8750 = vmatprep.subr.bf16.mxu1 %v8650_v4  ;;  %v9267_v4 = vunpack.c.l.b16 %v13091_v54  ;;  %v7456_v54 = vld [vmem:[#allocation2 + $0x6f8] sm:$0xff] }
 0xcce   :  { %6663 = vmatpush1.bf16.msra.mxu0 %v6646_v50  ;;  %v9268_v50 = vunpack.c.l.b16 %v13092_v61  ;;  %v7455_v61 = vld [vmem:[#allocation2 + $0x6f0] sm:$0xff] }
 0xccf   :  { %6701 = vmatprep.subr.bf16.mxu0 %v6641_v8  ;;  %v9249_v8 = vld [vmem:[#allocation2 + $0xb20] sm:$0xff] }
 0xcd1   :  { %11295 = vmatmul.mubr.msk.bf16.vlgmr.msra.gmra.mrb[104].mxu0 %vm4888_vm13, %v14324_v19 }
 0xcd2   :  { %6702 = vmatpush1.bf16.msra.mxu0 %v6640_v55  ;;  %6733 = vmatprep.mubr.bf16.mxu0 %v13210_v0  ;;  %v7039_v55 = vld [vmem:[#allocation2 + $0x580] sm:$0xff] }
 0xcd3   :  { %6703 = vmatprep.subr.bf16.mxu0 %v6649_v11  ;;  %11343 = vmatmul.mubr.msk.bf16.vlgmr.msra.gmra.mrb[56].mxu1 %vm4888_vm13, %v14417_v9  ;;  %v7048_v11 = vld [vmem:[#allocation2 + $0x5c8] sm:$0xff] }
 0xcd4   :  { %8751 = vmatpush1.bf16.msra.mxu1 %v8649_v6  ;;  %8782 = vmatprep.mubr.bf16.mxu1 %v13210_v0  ;;  %v9269_v6 = vrot.slane %v9267_v4, 6 }
 0xcd5   :  { %8752 = vmatprep.subr.bf16.mxu1 %v8658_v58  ;;  %v9270_v58 = vrot.slane %v9268_v50, 5 }
 0xcd6   :  { %6704 = vmatpush1.bf16.msra.mxu0 %v6648_v21  ;;  %v9257_v21 = vld [vmem:[#allocation2 + $0xb60] sm:$0xff] }
 0xcd7   :  { %6783 = vmatprep.subr.bf16.mxu0 %v6645_v24  ;;  %v9454_v24 = vld [vmem:[#allocation2 + $0xba8] sm:$0xff] }
 0xcd8   :  { %8753 = vmatpush1.bf16.msra.mxu1 %v8657_v32  ;;  %v9271_v32 = vsel %vm4885_vm12, %v9270_v58, %v9269_v6  ;;  %v7646_v6 = vld [vmem:[#allocation2 + $0x738] sm:$0xff] }
 0xcd9   :  { %11296 = vmatmul.mubr.msk.bf16.vlgmr.msra.gmra.mrb[108].mxu0 %vm4888_vm13, %v14324_v19  ;;  %8956 = vmatprep.subr.bf16.mxu1 %v8848_v33  ;;  %v7041_v33 = vld [vmem:[#allocation2 + $0x590] sm:$0xff]  ;;  %v7654_v58 = vld [vmem:[#allocation2 + $0x778] sm:$0xff] }
 0xcda   :  { %6784 = vmatpush1.bf16.msra.mxu0 %v6644_v18  ;;  %6815 = vmatprep.mubr.bf16.mxu0 %v13210_v0  ;;  %v14459_v18 = vpack.c.b16 %v9271_v32, %v9271_v32  ;;  %v7851_v32 = vld [vmem:[#allocation2 + $0x7c0] sm:$0xff] }
 0xcdb   :  { %6785 = vmatprep.subr.bf16.mxu0 %v6653_v34  ;;  %v7050_v34 = vld [vmem:[#allocation2 + $0x5d8] sm:$0xff] }
 0xcde   :  { %6786 = vmatpush1.bf16.msra.mxu0 %v6652_v46  ;;  %v9465_v46 = vrot.slane %v9267_v4, 7  ;;  %v7648_v4 = vld [vmem:[#allocation2 + $0x748] sm:$0xff] }
 0xcdf   :  { %6866 = vmatprep.subr.bf16.mxu0 %v6836_v48  ;;  %11347 = vmatmul.mubr.msk.bf16.vlgmr.msra.gmra.mrb[56].mxu1 %vm4888_vm13, %v14429_v2  ;;  %v9466_v48 = vrot.slane %v9268_v50, 6  ;;  %v7647_v50 = vld [vmem:[#allocation2 + $0x740] sm:$0xff] }
 0xce0   :  { %8957 = vmatpush1.bf16.msra.mxu1 %v8847_v60  ;;  %8988 = vmatprep.mubr.bf16.mxu1 %v13210_v0  ;;  %v7054_v60 = vld [vmem:[#allocation2 + $0x5f8] sm:$0xff] }
 0xce1   :  { %11298 = vmatmul.mubr.msk.bf16.vlgmr.msra.gmra.mrb[112].mxu0 %vm4888_vm13, %v14324_v19  ;;  %8958 = vmatprep.subr.bf16.mxu1 %v8856_v17  ;;  %v9051_v19 = vld [vmem:[#allocation2 + $0xaa0] sm:$0xff]  ;;  %v9467_v17 = vsel %vm4885_vm12, %v9466_v48, %v9465_v46  ;;  %v7857_v46 = vld [vmem:[#allocation2 + $0x7f0] sm:$0xff]  ;;  %v8042_v48 = vld [vmem:[#allocation2 + $0x808] sm:$0xff] }
 0xce2   :  { %6867 = vmatpush1.bf16.msra.mxu0 %v6835_v62  ;;  %6898 = vmatprep.mubr.bf16.mxu0 %v13210_v0  ;;  %v7053_v62 = vld [vmem:[#allocation2 + $0x5f0] sm:$0xff] }
 0xce3   :  { %6868 = vmatprep.subr.bf16.mxu0 %v6844_v63  ;;  %v14471_v63 = vpack.c.b16 %v9467_v17, %v9467_v17  ;;  %v8044_v17 = vld [vmem:[#allocation2 + $0x818] sm:$0xff] }
 0xce4   :  { %8959 = vmatpush1.bf16.msra.mxu1 %v8855_v16  ;;  %v7246_v16 = vld [vmem:[#allocation2 + $0x648] sm:$0xff] }
 0xce5   :  { %9152 = vmatprep.subr.bf16.mxu1 %v9052_v26  ;;  %v7245_v26 = vld [vmem:[#allocation2 + $0x640] sm:$0xff] }
 0xce6   :  { %6869 = vmatpush1.bf16.msra.mxu0 %v6843_v28  ;;  %v7240_v28 = vld [vmem:[#allocation2 + $0x618] sm:$0xff] }
 0xce7   :  { %6907 = vmatprep.subr.bf16.mxu0 %v6838_v10  ;;  %v7239_v10 = vld [vmem:[#allocation2 + $0x610] sm:$0xff] }
 0xce9   :  { %11301 = vmatmul.mubr.msk.bf16.vlgmr.msra.gmra.mrb[104].mxu0 %vm4888_vm13, %v14333_v47 }
 0xcea   :  { %6908 = vmatpush1.bf16.msra.mxu0 %v6837_v23  ;;  %6939 = vmatprep.mubr.bf16.mxu0 %v13210_v0  ;;  %v7247_v23 = vld [vmem:[#allocation2 + $0x650] sm:$0xff] }
 0xceb   :  { %6909 = vmatprep.subr.bf16.mxu0 %v6846_v29  ;;  %11353 = vmatmul.mubr.msk.bf16.vlgmr.msra.gmra.mrb[56].mxu1 %vm4888_vm13, %v14438_v20  ;;  %v7244_v29 = vld [vmem:[#allocation2 + $0x638] sm:$0xff] }
 0xcec   :  { %9153 = vmatpush1.bf16.msra.mxu1 %v9051_v19  ;;  %9184 = vmatprep.mubr.bf16.mxu1 %v13210_v0  ;;  %v7252_v19 = vld [vmem:[#allocation2 + $0x678] sm:$0xff] }
 0xced   :  { %9154 = vmatprep.subr.bf16.mxu1 %v9060_v31  ;;  %v7251_v31 = vld [vmem:[#allocation2 + $0x670] sm:$0xff] }
 0xcee   :  { %6910 = vmatpush1.bf16.msra.mxu0 %v6845_v51  ;;  %v7442_v51 = vld [vmem:[#allocation2 + $0x688] sm:$0xff] }
 0xcef   :  { %6989 = vmatprep.subr.bf16.mxu0 %v6842_v25  ;;  %v7441_v25 = vld [vmem:[#allocation2 + $0x680] sm:$0xff] }
 0xcf0   :  { %9155 = vmatpush1.bf16.msra.mxu1 %v9059_v42  ;;  %v7444_v42 = vld [vmem:[#allocation2 + $0x698] sm:$0xff] }
 0xcf1   :  { %11302 = vmatmul.mubr.msk.bf16.vlgmr.msra.gmra.mrb[108].mxu0 %vm4888_vm13, %v14333_v47  ;;  %9358 = vmatprep.subr.bf16.mxu1 %v9250_v44  ;;  %v7443_v44 = vld [vmem:[#allocation2 + $0x690] sm:$0xff] }
 0xcf2   :  { %6990 = vmatpush1.bf16.msra.mxu0 %v6841_v45  ;;  %7021 = vmatprep.mubr.bf16.mxu0 %v13210_v0  ;;  %v7452_v45 = vld [vmem:[#allocation2 + $0x6d8] sm:$0xff] }
 0xcf3   :  { %6991 = vmatprep.subr.bf16.mxu0 %v6850_v49  ;;  %v7451_v49 = vld [vmem:[#allocation2 + $0x6d0] sm:$0xff] }
 0xcf6   :  { %6992 = vmatpush1.bf16.msra.mxu0 %v6849_v57  ;;  %v7640_v57 = vld [vmem:[#allocation2 + $0x708] sm:$0xff] }
 0xcf7   :  { %7062 = vmatprep.subr.bf16.mxu0 %v7040_v1  ;;  %11357 = vmatmul.mubr.msk.bf16.vlgmr.msra.gmra.mrb[56].mxu1 %vm4888_vm13, %v14450_v59  ;;  %v7639_v1 = vld [vmem:[#allocation2 + $0x700] sm:$0xff] }
 0xcf8   :  { %9359 = vmatpush1.bf16.msra.mxu1 %v9249_v8  ;;  %9390 = vmatprep.mubr.bf16.mxu1 %v13210_v0  ;;  %v7642_v8 = vld [vmem:[#allocation2 + $0x718] sm:$0xff] }
 0xcf9   :  { %11304 = vmatmul.mubr.msk.bf16.vlgmr.msra.gmra.mrb[112].mxu0 %vm4888_vm13, %v14333_v47  ;;  %9360 = vmatprep.subr.bf16.mxu1 %v9258_v7  ;;  %v9453_v47 = vld [vmem:[#allocation2 + $0xba0] sm:$0xff]  ;;  %v7641_v7 = vld [vmem:[#allocation2 + $0x710] sm:$0xff] }
 0xcfa   :  { %7063 = vmatpush1.bf16.msra.mxu0 %v7039_v55  ;;  %7094 = vmatprep.mubr.bf16.mxu0 %v13210_v0  ;;  %v7650_v55 = vld [vmem:[#allocation2 + $0x758] sm:$0xff] }
 0xcfb   :  { %7064 = vmatprep.subr.bf16.mxu0 %v7048_v11  ;;  %v7649_v11 = vld [vmem:[#allocation2 + $0x750] sm:$0xff] }
 0xcfc   :  { %9361 = vmatpush1.bf16.msra.mxu1 %v9257_v21  ;;  %v7653_v21 = vld [vmem:[#allocation2 + $0x770] sm:$0xff] }
 0xcfd   :  { %9554 = vmatprep.subr.bf16.mxu1 %v9454_v24  ;;  %v7844_v24 = vld [vmem:[#allocation2 + $0x788] sm:$0xff] }
 0xcfe   :  { %7065 = vmatpush1.bf16.msra.mxu0 %v7047_v12  ;;  %v7843_v12 = vld [vmem:[#allocation2 + $0x780] sm:$0xff] }
 0xcff   :  { %7103 = vmatprep.subr.bf16.mxu0 %v7042_v30  ;;  %v7852_v30 = vld [vmem:[#allocation2 + $0x7c8] sm:$0xff] }
 0xd01   :  { %11305 = vmatmul.mubr.msk.bf16.vlgmr.msra.gmra.mrb[104].mxu0 %vm4888_vm13, %v14345_v27 }
 0xd02   :  { %7104 = vmatpush1.bf16.msra.mxu0 %v7041_v33  ;;  %7135 = vmatprep.mubr.bf16.mxu0 %v13210_v0  ;;  %v7846_v33 = vld [vmem:[#allocation2 + $0x798] sm:$0xff] }
 0xd03   :  { %7105 = vmatprep.subr.bf16.mxu0 %v7050_v34  ;;  %11363 = vmatmul.mubr.msk.bf16.vlgmr.msra.gmra.mrb[56].mxu1 %vm4888_vm13, %v14459_v18  ;;  %v7845_v34 = vld [vmem:[#allocation2 + $0x790] sm:$0xff] }
 0xd04   :  { %9555 = vmatpush1.bf16.msra.mxu1 %v9453_v47  ;;  %9586 = vmatprep.mubr.bf16.mxu1 %v13210_v0  ;;  %v7854_v47 = vld [vmem:[#allocation2 + $0x7d8] sm:$0xff] }
 0xd05   :  { %9556 = vmatprep.subr.bf16.mxu1 %v9462_v37  ;;  %v7853_v37 = vld [vmem:[#allocation2 + $0x7d0] sm:$0xff] }
 0xd06   :  { %7106 = vmatpush1.bf16.msra.mxu0 %v7049_v38  ;;  %v7850_v38 = vld [vmem:[#allocation2 + $0x7b8] sm:$0xff] }
 0xd07   :  { %7185 = vmatprep.subr.bf16.mxu0 %v7046_v43  ;;  %v7858_v43 = vld [vmem:[#allocation2 + $0x7f8] sm:$0xff] }
 0xd08   :  { %9557 = vmatpush1.bf16.msra.mxu1 %v9461_v14  ;;  %v8041_v14 = vld [vmem:[#allocation2 + $0x800] sm:$0xff] }
 0xd09   :  { %11306 = vmatmul.mubr.msk.bf16.vlgmr.msra.gmra.mrb[108].mxu0 %vm4888_vm13, %v14345_v27 }
 0xd0a   :  { %7186 = vmatpush1.bf16.msra.mxu0 %v7045_v53  ;;  %7217 = vmatprep.mubr.bf16.mxu0 %v13210_v0  ;;  %v8050_v53 = vld [vmem:[#allocation2 + $0x848] sm:$0xff] }
 0xd0b   :  { %7187 = vmatprep.subr.bf16.mxu0 %v7054_v60  ;;  %v8049_v60 = vld [vmem:[#allocation2 + $0x840] sm:$0xff] }
 0xd0e   :  { %7188 = vmatpush1.bf16.msra.mxu0 %v7053_v62  ;;  %v8043_v62 = vld [vmem:[#allocation2 + $0x810] sm:$0xff] }
 0xd0f   :  { %7268 = vmatprep.subr.bf16.mxu0 %v7238_v3  ;;  %11367 = vmatmul.mubr.msk.bf16.vlgmr.msra.gmra.mrb[56].mxu1 %vm4888_vm13, %v14471_v63  ;;  %v8052_v3 = vld [vmem:[#allocation2 + $0x858] sm:$0xff] }
 0xd11   :  { %11308 = vmatmul.mubr.msk.bf16.vlgmr.msra.gmra.mrb[112].mxu0 %vm4888_vm13, %v14345_v27  ;;  %v7243_v27 = vld [vmem:[#allocation2 + $0x630] sm:$0xff] }
 0xd12   :  { %7269 = vmatpush1.bf16.msra.mxu0 %v7237_v5  ;;  %7300 = vmatprep.mubr.bf16.mxu0 %v13210_v0  ;;  %v8051_v5 = vld [vmem:[#allocation2 + $0x850] sm:$0xff] }
 0xd13   :  { %7270 = vmatprep.subr.bf16.mxu0 %v7246_v16  ;;  %v8048_v16 = vld [vmem:[#allocation2 + $0x838] sm:$0xff] }
 0xd16   :  { %7271 = vmatpush1.bf16.msra.mxu0 %v7245_v26  ;;  %v8056_v26 = vld [vmem:[#allocation2 + $0x878] sm:$0xff] }
 0xd17   :  { %7309 = vmatprep.subr.bf16.mxu0 %v7240_v28  ;;  %v8055_v28 = vld [vmem:[#allocation2 + $0x870] sm:$0xff] }
 0xd19   :  { %11311 = vmatmul.mubr.msk.bf16.vlgmr.msra.gmra.mrb[104].mxu0 %vm4888_vm13, %v14354_v56 }
 0xd1a   :  { %7310 = vmatpush1.bf16.msra.mxu0 %v7239_v10  ;;  %7341 = vmatprep.mubr.bf16.mxu0 %v13210_v0  ;;  %v8245_v10 = vld [vmem:[#allocation2 + $0x888] sm:$0xff] }
 0xd1b   :  { %7311 = vmatprep.subr.bf16.mxu0 %v7248_v13  ;;  %v8244_v13 = vld [vmem:[#allocation2 + $0x880] sm:$0xff] }
 0xd1e   :  { %7312 = vmatpush1.bf16.msra.mxu0 %v7247_v23  ;;  %v8253_v23 = vld [vmem:[#allocation2 + $0x8c8] sm:$0xff] }
 0xd1f   :  { %7391 = vmatprep.subr.bf16.mxu0 %v7244_v29  ;;  %v8252_v29 = vld [vmem:[#allocation2 + $0x8c0] sm:$0xff] }
 0xd21   :  { %11312 = vmatmul.mubr.msk.bf16.vlgmr.msra.gmra.mrb[108].mxu0 %vm4888_vm13, %v14354_v56 }
 0xd22   :  { %7392 = vmatpush1.bf16.msra.mxu0 %v7243_v27  ;;  %7423 = vmatprep.mubr.bf16.mxu0 %v13210_v0  ;;  %v8247_v27 = vld [vmem:[#allocation2 + $0x898] sm:$0xff] }
 0xd23   :  { %7393 = vmatprep.subr.bf16.mxu0 %v7252_v19  ;;  %v8246_v19 = vld [vmem:[#allocation2 + $0x890] sm:$0xff] }
 0xd26   :  { %7394 = vmatpush1.bf16.msra.mxu0 %v7251_v31  ;;  %v8255_v31 = vld [vmem:[#allocation2 + $0x8d8] sm:$0xff] }
 0xd27   :  { %7464 = vmatprep.subr.bf16.mxu0 %v7442_v51  ;;  %v8254_v51 = vld [vmem:[#allocation2 + $0x8d0] sm:$0xff] }
 0xd29   :  { %11314 = vmatmul.mubr.msk.bf16.vlgmr.msra.gmra.mrb[112].mxu0 %vm4888_vm13, %v14354_v56  ;;  %v7447_v56 = vld [vmem:[#allocation2 + $0x6b0] sm:$0xff] }
 0xd2a   :  { %7465 = vmatpush1.bf16.msra.mxu0 %v7441_v25  ;;  %7496 = vmatprep.mubr.bf16.mxu0 %v13210_v0  ;;  %v8251_v25 = vld [vmem:[#allocation2 + $0x8b8] sm:$0xff] }
 0xd2b   :  { %7466 = vmatprep.subr.bf16.mxu0 %v7450_v39  ;;  %v8259_v39 = vld [vmem:[#allocation2 + $0x8f8] sm:$0xff] }
 0xd2e   :  { %7467 = vmatpush1.bf16.msra.mxu0 %v7449_v40  ;;  %v8258_v40 = vld [vmem:[#allocation2 + $0x8f0] sm:$0xff] }
 0xd2f   :  { %7505 = vmatprep.subr.bf16.mxu0 %v7444_v42  ;;  %v8442_v42 = vld [vmem:[#allocation2 + $0x908] sm:$0xff] }
 0xd31   :  { %11315 = vmatmul.mubr.msk.bf16.vlgmr.msra.gmra.mrb[104].mxu0 %vm4888_vm13, %v14366_v35 }
 0xd32   :  { %7506 = vmatpush1.bf16.msra.mxu0 %v7443_v44  ;;  %7537 = vmatprep.mubr.bf16.mxu0 %v13210_v0  ;;  %v8441_v44 = vld [vmem:[#allocation2 + $0x900] sm:$0xff] }
 0xd33   :  { %7507 = vmatprep.subr.bf16.mxu0 %v7452_v45  ;;  %v8450_v45 = vld [vmem:[#allocation2 + $0x948] sm:$0xff] }
 0xd36   :  { %7508 = vmatpush1.bf16.msra.mxu0 %v7451_v49  ;;  %v8449_v49 = vld [vmem:[#allocation2 + $0x940] sm:$0xff] }
 0xd37   :  { %7587 = vmatprep.subr.bf16.mxu0 %v7448_v52  ;;  %v8444_v52 = vld [vmem:[#allocation2 + $0x918] sm:$0xff] }
 0xd39   :  { %11316 = vmatmul.mubr.msk.bf16.vlgmr.msra.gmra.mrb[108].mxu0 %vm4888_vm13, %v14366_v35 }
 0xd3a   :  { %7588 = vmatpush1.bf16.msra.mxu0 %v7447_v56  ;;  %7619 = vmatprep.mubr.bf16.mxu0 %v13210_v0  ;;  %v8443_v56 = vld [vmem:[#allocation2 + $0x910] sm:$0xff] }
 0xd3b   :  { %7589 = vmatprep.subr.bf16.mxu0 %v7456_v54  ;;  %v8452_v54 = vld [vmem:[#allocation2 + $0x958] sm:$0xff] }
 0xd3e   :  { %7590 = vmatpush1.bf16.msra.mxu0 %v7455_v61  ;;  %v8451_v61 = vld [vmem:[#allocation2 + $0x950] sm:$0xff] }
 0xd3f   :  { %7670 = vmatprep.subr.bf16.mxu0 %v7640_v57  ;;  %v8448_v57 = vld [vmem:[#allocation2 + $0x938] sm:$0xff] }
 0xd41   :  { %11318 = vmatmul.mubr.msk.bf16.vlgmr.msra.gmra.mrb[112].mxu0 %vm4888_vm13, %v14366_v35  ;;  %v7645_v35 = vld [vmem:[#allocation2 + $0x730] sm:$0xff] }
 0xd42   :  { %7671 = vmatpush1.bf16.msra.mxu0 %v7639_v1  ;;  %7702 = vmatprep.mubr.bf16.mxu0 %v13210_v0  ;;  %v8456_v1 = vld [vmem:[#allocation2 + $0x978] sm:$0xff] }
 0xd43   :  { %7672 = vmatprep.subr.bf16.mxu0 %v7648_v4  ;;  %v8455_v4 = vld [vmem:[#allocation2 + $0x970] sm:$0xff] }
 0xd46   :  { %7673 = vmatpush1.bf16.msra.mxu0 %v7647_v50  ;;  %v8646_v50 = vld [vmem:[#allocation2 + $0x988] sm:$0xff] }
 0xd47   :  { %7711 = vmatprep.subr.bf16.mxu0 %v7642_v8  ;;  %v8645_v8 = vld [vmem:[#allocation2 + $0x980] sm:$0xff] }
 0xd49   :  { %11321 = vmatmul.mubr.msk.bf16.vlgmr.msra.gmra.mrb[104].mxu0 %vm4888_vm13, %v14375_v36 }
 0xd4a   :  { %7712 = vmatpush1.bf16.msra.mxu0 %v7641_v7  ;;  %7743 = vmatprep.mubr.bf16.mxu0 %v13210_v0  ;;  %v8654_v7 = vld [vmem:[#allocation2 + $0x9c8] sm:$0xff] }
 0xd4b   :  { %7713 = vmatprep.subr.bf16.mxu0 %v7650_v55  ;;  %v8653_v55 = vld [vmem:[#allocation2 + $0x9c0] sm:$0xff] }
 0xd4e   :  { %7714 = vmatpush1.bf16.msra.mxu0 %v7649_v11  ;;  %v8648_v11 = vld [vmem:[#allocation2 + $0x998] sm:$0xff] }
 0xd4f   :  { %7793 = vmatprep.subr.bf16.mxu0 %v7646_v6  ;;  %v8647_v6 = vld [vmem:[#allocation2 + $0x990] sm:$0xff] }
 0xd51   :  { %11322 = vmatmul.mubr.msk.bf16.vlgmr.msra.gmra.mrb[108].mxu0 %vm4888_vm13, %v14375_v36 }
 0xd52   :  { %7794 = vmatpush1.bf16.msra.mxu0 %v7645_v35  ;;  %7825 = vmatprep.mubr.bf16.mxu0 %v13210_v0  ;;  %v8656_v35 = vld [vmem:[#allocation2 + $0x9d8] sm:$0xff] }
 0xd53   :  { %7795 = vmatprep.subr.bf16.mxu0 %v7654_v58  ;;  %v8655_v58 = vld [vmem:[#allocation2 + $0x9d0] sm:$0xff] }
 0xd56   :  { %7796 = vmatpush1.bf16.msra.mxu0 %v7653_v21  ;;  %v8652_v21 = vld [vmem:[#allocation2 + $0x9b8] sm:$0xff] }
 0xd57   :  { %7866 = vmatprep.subr.bf16.mxu0 %v7844_v24  ;;  %v8660_v24 = vld [vmem:[#allocation2 + $0x9f8] sm:$0xff] }
 0xd59   :  { %11324 = vmatmul.mubr.msk.bf16.vlgmr.msra.gmra.mrb[112].mxu0 %vm4888_vm13, %v14375_v36  ;;  %v7849_v36 = vld [vmem:[#allocation2 + $0x7b0] sm:$0xff] }
 0xd5a   :  { %7867 = vmatpush1.bf16.msra.mxu0 %v7843_v12  ;;  %7898 = vmatprep.mubr.bf16.mxu0 %v13210_v0  ;;  %v8659_v12 = vld [vmem:[#allocation2 + $0x9f0] sm:$0xff] }
 0xd5b   :  { %7868 = vmatprep.subr.bf16.mxu0 %v7852_v30  ;;  %v8844_v30 = vld [vmem:[#allocation2 + $0xa08] sm:$0xff] }
 0xd5e   :  { %7869 = vmatpush1.bf16.msra.mxu0 %v7851_v32  ;;  %v8843_v32 = vld [vmem:[#allocation2 + $0xa00] sm:$0xff] }
 0xd5f   :  { %7907 = vmatprep.subr.bf16.mxu0 %v7846_v33  ;;  %v8852_v33 = vld [vmem:[#allocation2 + $0xa48] sm:$0xff] }
 0xd61   :  { %11325 = vmatmul.mubr.msk.bf16.vlgmr.msra.gmra.mrb[104].mxu0 %vm4888_vm13, %v14387_v15 }
 0xd62   :  { %7908 = vmatpush1.bf16.msra.mxu0 %v7845_v34  ;;  %7939 = vmatprep.mubr.bf16.mxu0 %v13210_v0  ;;  %v8851_v34 = vld [vmem:[#allocation2 + $0xa40] sm:$0xff] }
 0xd63   :  { %7909 = vmatprep.subr.bf16.mxu0 %v7854_v47  ;;  %v8846_v47 = vld [vmem:[#allocation2 + $0xa18] sm:$0xff] }
 0xd66   :  { %7910 = vmatpush1.bf16.msra.mxu0 %v7853_v37  ;;  %v8845_v37 = vld [vmem:[#allocation2 + $0xa10] sm:$0xff] }
 0xd67   :  { %7989 = vmatprep.subr.bf16.mxu0 %v7850_v38  ;;  %v8854_v38 = vld [vmem:[#allocation2 + $0xa58] sm:$0xff] }
 0xd69   :  { %11326 = vmatmul.mubr.msk.bf16.vlgmr.msra.gmra.mrb[108].mxu0 %vm4888_vm13, %v14387_v15 }
 0xd6a   :  { %7990 = vmatpush1.bf16.msra.mxu0 %v7849_v36  ;;  %8021 = vmatprep.mubr.bf16.mxu0 %v13210_v0  ;;  %v8853_v36 = vld [vmem:[#allocation2 + $0xa50] sm:$0xff] }
 0xd6b   :  { %7991 = vmatprep.subr.bf16.mxu0 %v7858_v43  ;;  %v8850_v43 = vld [vmem:[#allocation2 + $0xa38] sm:$0xff] }
 0xd6e   :  { %7992 = vmatpush1.bf16.msra.mxu0 %v7857_v46  ;;  %v8858_v46 = vld [vmem:[#allocation2 + $0xa78] sm:$0xff] }
 0xd6f   :  { %8071 = vmatprep.subr.bf16.mxu0 %v8042_v48 }
 0xd71   :  { %11328 = vmatmul.mubr.msk.bf16.vlgmr.msra.gmra.mrb[112].mxu0 %vm4888_vm13, %v14387_v15  ;;  %v8047_v15 = vld [vmem:[#allocation2 + $0x830] sm:$0xff] }
 0xd72   :  { %8072 = vmatpush1.bf16.msra.mxu0 %v8041_v14  ;;  %8103 = vmatprep.mubr.bf16.mxu0 %v13210_v0  ;;  %v8857_v14 = vld [vmem:[#allocation2 + $0xa70] sm:$0xff] }
 0xd73   :  { %8073 = vmatprep.subr.bf16.mxu0 %v8050_v53 }
 0xd76   :  { %8074 = vmatpush1.bf16.msra.mxu0 %v8049_v60 }
 0xd77   :  { %8112 = vmatprep.subr.bf16.mxu0 %v8044_v17  ;;  %v9048_v17 = vld [vmem:[#allocation2 + $0xa88] sm:$0xff] }
 0xd79   :  { %11331 = vmatmul.mubr.msk.bf16.vlgmr.msra.gmra.mrb[104].mxu0 %vm4888_vm13, %v14396_v22 }
 0xd7a   :  { %8113 = vmatpush1.bf16.msra.mxu0 %v8043_v62  ;;  %8144 = vmatprep.mubr.bf16.mxu0 %v13210_v0 }
 0xd7b   :  { %8114 = vmatprep.subr.bf16.mxu0 %v8052_v3 }
 0xd7e   :  { %8115 = vmatpush1.bf16.msra.mxu0 %v8051_v5 }
 0xd7f   :  { %8194 = vmatprep.subr.bf16.mxu0 %v8048_v16 }
 0xd81   :  { %11332 = vmatmul.mubr.msk.bf16.vlgmr.msra.gmra.mrb[108].mxu0 %vm4888_vm13, %v14396_v22 }
 0xd82   :  { %8195 = vmatpush1.bf16.msra.mxu0 %v8047_v15  ;;  %8226 = vmatprep.mubr.bf16.mxu0 %v13210_v0 }
 0xd83   :  { %8196 = vmatprep.subr.bf16.mxu0 %v8056_v26  ;;  %v9047_v26 = vld [vmem:[#allocation2 + $0xa80] sm:$0xff] }
 0xd86   :  { %8197 = vmatpush1.bf16.msra.mxu0 %v8055_v28  ;;  %v9056_v28 = vld [vmem:[#allocation2 + $0xac8] sm:$0xff] }
 0xd87   :  { %8266 = vmatprep.subr.bf16.mxu0 %v8245_v10  ;;  %v9055_v10 = vld [vmem:[#allocation2 + $0xac0] sm:$0xff] }
 0xd89   :  { %11334 = vmatmul.mubr.msk.bf16.vlgmr.msra.gmra.mrb[112].mxu0 %vm4888_vm13, %v14396_v22  ;;  %v8250_v22 = vld [vmem:[#allocation2 + $0x8b0] sm:$0xff] }
 0xd8a   :  { %8267 = vmatpush1.bf16.msra.mxu0 %v8244_v13  ;;  %8298 = vmatprep.mubr.bf16.mxu0 %v13210_v0  ;;  %v9050_v13 = vld [vmem:[#allocation2 + $0xa98] sm:$0xff] }
 0xd8b   :  { %8268 = vmatprep.subr.bf16.mxu0 %v8253_v23  ;;  %v9049_v23 = vld [vmem:[#allocation2 + $0xa90] sm:$0xff] }
 0xd8e   :  { %8269 = vmatpush1.bf16.msra.mxu0 %v8252_v29  ;;  %v9058_v29 = vld [vmem:[#allocation2 + $0xad8] sm:$0xff] }
 0xd8f   :  { %8307 = vmatprep.subr.bf16.mxu0 %v8247_v27  ;;  %v9057_v27 = vld [vmem:[#allocation2 + $0xad0] sm:$0xff] }
 0xd91   :  { %11335 = vmatmul.mubr.msk.bf16.vlgmr.msra.gmra.mrb[104].mxu0 %vm4888_vm13, %v14408_v41 }
 0xd92   :  { %8308 = vmatpush1.bf16.msra.mxu0 %v8246_v19  ;;  %8339 = vmatprep.mubr.bf16.mxu0 %v13210_v0  ;;  %v9054_v19 = vld [vmem:[#allocation2 + $0xab8] sm:$0xff] }
 0xd93   :  { %8309 = vmatprep.subr.bf16.mxu0 %v8255_v31  ;;  %v9062_v31 = vld [vmem:[#allocation2 + $0xaf8] sm:$0xff] }
 0xd96   :  { %8310 = vmatpush1.bf16.msra.mxu0 %v8254_v51  ;;  %v9061_v51 = vld [vmem:[#allocation2 + $0xaf0] sm:$0xff] }
 0xd97   :  { %8389 = vmatprep.subr.bf16.mxu0 %v8251_v25  ;;  %v9246_v25 = vld [vmem:[#allocation2 + $0xb08] sm:$0xff] }
 0xd99   :  { %11336 = vmatmul.mubr.msk.bf16.vlgmr.msra.gmra.mrb[108].mxu0 %vm4888_vm13, %v14408_v41 }
 0xd9a   :  { %8390 = vmatpush1.bf16.msra.mxu0 %v8250_v22  ;;  %8421 = vmatprep.mubr.bf16.mxu0 %v13210_v0  ;;  %v9245_v22 = vld [vmem:[#allocation2 + $0xb00] sm:$0xff] }
 0xd9b   :  { %8391 = vmatprep.subr.bf16.mxu0 %v8259_v39  ;;  %v9254_v39 = vld [vmem:[#allocation2 + $0xb48] sm:$0xff] }
 0xd9e   :  { %8392 = vmatpush1.bf16.msra.mxu0 %v8258_v40  ;;  %v9253_v40 = vld [vmem:[#allocation2 + $0xb40] sm:$0xff] }
 0xd9f   :  { %8472 = vmatprep.subr.bf16.mxu0 %v8442_v42  ;;  %v9248_v42 = vld [vmem:[#allocation2 + $0xb18] sm:$0xff] }
 0xda1   :  { %11338 = vmatmul.mubr.msk.bf16.vlgmr.msra.gmra.mrb[112].mxu0 %vm4888_vm13, %v14408_v41  ;;  %v8447_v41 = vld [vmem:[#allocation2 + $0x930] sm:$0xff] }
 0xda2   :  { %8473 = vmatpush1.bf16.msra.mxu0 %v8441_v44  ;;  %8504 = vmatprep.mubr.bf16.mxu0 %v13210_v0  ;;  %v9247_v44 = vld [vmem:[#allocation2 + $0xb10] sm:$0xff] }
 0xda3   :  { %8474 = vmatprep.subr.bf16.mxu0 %v8450_v45  ;;  %v9256_v45 = vld [vmem:[#allocation2 + $0xb58] sm:$0xff] }
 0xda6   :  { %8475 = vmatpush1.bf16.msra.mxu0 %v8449_v49  ;;  %v9255_v49 = vld [vmem:[#allocation2 + $0xb50] sm:$0xff] }
 0xda7   :  { %8513 = vmatprep.subr.bf16.mxu0 %v8444_v52  ;;  %v9252_v52 = vld [vmem:[#allocation2 + $0xb38] sm:$0xff] }
 0xda9   :  { %11341 = vmatmul.mubr.msk.bf16.vlgmr.msra.gmra.mrb[104].mxu0 %vm4888_vm13, %v14417_v9 }
 0xdaa   :  { %8514 = vmatpush1.bf16.msra.mxu0 %v8443_v56  ;;  %8545 = vmatprep.mubr.bf16.mxu0 %v13210_v0  ;;  %v9260_v56 = vld [vmem:[#allocation2 + $0xb78] sm:$0xff] }
 0xdab   :  { %8515 = vmatprep.subr.bf16.mxu0 %v8452_v54  ;;  %v9259_v54 = vld [vmem:[#allocation2 + $0xb70] sm:$0xff] }
 0xdae   :  { %8516 = vmatpush1.bf16.msra.mxu0 %v8451_v61  ;;  %v9450_v61 = vld [vmem:[#allocation2 + $0xb88] sm:$0xff] }
 0xdaf   :  { %8595 = vmatprep.subr.bf16.mxu0 %v8448_v57  ;;  %v9449_v57 = vld [vmem:[#allocation2 + $0xb80] sm:$0xff] }
 0xdb1   :  { %11342 = vmatmul.mubr.msk.bf16.vlgmr.msra.gmra.mrb[108].mxu0 %vm4888_vm13, %v14417_v9 }
 0xdb2   :  { %8596 = vmatpush1.bf16.msra.mxu0 %v8447_v41  ;;  %8627 = vmatprep.mubr.bf16.mxu0 %v13210_v0  ;;  %v9458_v41 = vld [vmem:[#allocation2 + $0xbc8] sm:$0xff] }
 0xdb3   :  { %8597 = vmatprep.subr.bf16.mxu0 %v8456_v1  ;;  %v9457_v1 = vld [vmem:[#allocation2 + $0xbc0] sm:$0xff] }
 0xdb6   :  { %8598 = vmatpush1.bf16.msra.mxu0 %v8455_v4  ;;  %v9452_v4 = vld [vmem:[#allocation2 + $0xb98] sm:$0xff] }
 0xdb7   :  { %8668 = vmatprep.subr.bf16.mxu0 %v8646_v50  ;;  %v9451_v50 = vld [vmem:[#allocation2 + $0xb90] sm:$0xff] }
 0xdb9   :  { %11344 = vmatmul.mubr.msk.bf16.vlgmr.msra.gmra.mrb[112].mxu0 %vm4888_vm13, %v14417_v9  ;;  %v8651_v9 = vld [vmem:[#allocation2 + $0x9b0] sm:$0xff] }
 0xdba   :  { %8669 = vmatpush1.bf16.msra.mxu0 %v8645_v8  ;;  %8700 = vmatprep.mubr.bf16.mxu0 %v13210_v0  ;;  %v9460_v8 = vld [vmem:[#allocation2 + $0xbd8] sm:$0xff] }
 0xdbb   :  { %8670 = vmatprep.subr.bf16.mxu0 %v8654_v7  ;;  %v9459_v7 = vld [vmem:[#allocation2 + $0xbd0] sm:$0xff] }
 0xdbe   :  { %8671 = vmatpush1.bf16.msra.mxu0 %v8653_v55  ;;  %v9456_v55 = vld [vmem:[#allocation2 + $0xbb8] sm:$0xff] }
 0xdbf   :  { %8709 = vmatprep.subr.bf16.mxu0 %v8648_v11  ;;  %v9464_v11 = vld [vmem:[#allocation2 + $0xbf8] sm:$0xff] }
 0xdc1   :  { %11345 = vmatmul.mubr.msk.bf16.vlgmr.msra.gmra.mrb[104].mxu0 %vm4888_vm13, %v14429_v2 }
 0xdc2   :  { %8710 = vmatpush1.bf16.msra.mxu0 %v8647_v6  ;;  %8741 = vmatprep.mubr.bf16.mxu0 %v13210_v0  ;;  %v9463_v6 = vld [vmem:[#allocation2 + $0xbf0] sm:$0xff] }
 0xdc3   :  { %8711 = vmatprep.subr.bf16.mxu0 %v8656_v35 }
 0xdc6   :  { %8712 = vmatpush1.bf16.msra.mxu0 %v8655_v58 }
 0xdc7   :  { %8791 = vmatprep.subr.bf16.mxu0 %v8652_v21 }
 0xdc9   :  { %11346 = vmatmul.mubr.msk.bf16.vlgmr.msra.gmra.mrb[108].mxu0 %vm4888_vm13, %v14429_v2 }
 0xdca   :  { %8792 = vmatpush1.bf16.msra.mxu0 %v8651_v9  ;;  %8823 = vmatprep.mubr.bf16.mxu0 %v13210_v0 }
 0xdcb   :  { %8793 = vmatprep.subr.bf16.mxu0 %v8660_v24 }
 0xdce   :  { %8794 = vmatpush1.bf16.msra.mxu0 %v8659_v12 }
 0xdcf   :  { %8874 = vmatprep.subr.bf16.mxu0 %v8844_v30 }
 0xdd1   :  { %11348 = vmatmul.mubr.msk.bf16.vlgmr.msra.gmra.mrb[112].mxu0 %vm4888_vm13, %v14429_v2  ;;  %v8849_v2 = vld [vmem:[#allocation2 + $0xa30] sm:$0xff] }
 0xdd2   :  { %8875 = vmatpush1.bf16.msra.mxu0 %v8843_v32  ;;  %8906 = vmatprep.mubr.bf16.mxu0 %v13210_v0 }
 0xdd3   :  { %8876 = vmatprep.subr.bf16.mxu0 %v8852_v33 }
 0xdd6   :  { %8877 = vmatpush1.bf16.msra.mxu0 %v8851_v34 }
 0xdd7   :  { %8915 = vmatprep.subr.bf16.mxu0 %v8846_v47 }
 0xdd9   :  { %11351 = vmatmul.mubr.msk.bf16.vlgmr.msra.gmra.mrb[104].mxu0 %vm4888_vm13, %v14438_v20 }
 0xdda   :  { %8916 = vmatpush1.bf16.msra.mxu0 %v8845_v37  ;;  %8947 = vmatprep.mubr.bf16.mxu0 %v13210_v0 }
 0xddb   :  { %8917 = vmatprep.subr.bf16.mxu0 %v8854_v38 }
 0xdde   :  { %8918 = vmatpush1.bf16.msra.mxu0 %v8853_v36 }
 0xddf   :  { %8997 = vmatprep.subr.bf16.mxu0 %v8850_v43 }
 0xde1   :  { %11352 = vmatmul.mubr.msk.bf16.vlgmr.msra.gmra.mrb[108].mxu0 %vm4888_vm13, %v14438_v20 }
 0xde2   :  { %8998 = vmatpush1.bf16.msra.mxu0 %v8849_v2  ;;  %9029 = vmatprep.mubr.bf16.mxu0 %v13210_v0  ;;  %v9588_v48 = vpop.f32.mrb[56].mxu1 }
 0xde3   :  { %8999 = vmatprep.subr.bf16.mxu0 %v8858_v46  ;;  %v9648_v53 = vmul.f32 0.05, %v9588_v48  ;;  %v9590_v60 = vpop.f32.mrb[57].mxu1 }
 0xde4   :  { %v9649_v62 = vmul.f32 0.05, %v9590_v60  ;;  %v9592_v3 = vpop.f32.mrb[58].mxu1 }
 0xde5   :  { %v14556_v5 = vmax.f32 %v9588_v48, %v9648_v53  ;;  %v9593_v16 = vpop.f32.mrb[59].mxu1 }
 0xde6   :  { %9000 = vmatpush1.bf16.msra.mxu0 %v8857_v14  ;;  %v14558_v15 = vmax.f32 %v9590_v60, %v9649_v62 }
 0xde7   :  { %9070 = vmatprep.subr.bf16.mxu0 %v9048_v17 }
 0xde9   :  { %11354 = vmatmul.mubr.msk.bf16.vlgmr.msra.gmra.mrb[112].mxu0 %vm4888_vm13, %v14438_v20  ;;  %v9053_v20 = vld [vmem:[#allocation2 + $0xab0] sm:$0xff] }
 0xdea   :  { %9071 = vmatpush1.bf16.msra.mxu0 %v9047_v26  ;;  %9102 = vmatprep.mubr.bf16.mxu0 %v13210_v0 }
 0xdeb   :  { %9072 = vmatprep.subr.bf16.mxu0 %v9056_v28 }
 0xdee   :  { %9073 = vmatpush1.bf16.msra.mxu0 %v9055_v10 }
 0xdef   :  { %9111 = vmatprep.subr.bf16.mxu0 %v9050_v13 }
 0xdf1   :  { %11355 = vmatmul.mubr.msk.bf16.vlgmr.msra.gmra.mrb[104].mxu0 %vm4888_vm13, %v14450_v59 }
 0xdf2   :  { %9112 = vmatpush1.bf16.msra.mxu0 %v9049_v23  ;;  %9143 = vmatprep.mubr.bf16.mxu0 %v13210_v0 }
 0xdf3   :  { %9113 = vmatprep.subr.bf16.mxu0 %v9058_v29 }
 0xdf6   :  { %9114 = vmatpush1.bf16.msra.mxu0 %v9057_v27 }
 0xdf7   :  { %9193 = vmatprep.subr.bf16.mxu0 %v9054_v19 }
 0xdf9   :  { %11356 = vmatmul.mubr.msk.bf16.vlgmr.msra.gmra.mrb[108].mxu0 %vm4888_vm13, %v14450_v59 }
 0xdfa   :  { %9194 = vmatpush1.bf16.msra.mxu0 %v9053_v20  ;;  %9225 = vmatprep.mubr.bf16.mxu0 %v13210_v0 }
 0xdfb   :  { %9195 = vmatprep.subr.bf16.mxu0 %v9062_v31 }
 0xdfe   :  { %9196 = vmatpush1.bf16.msra.mxu0 %v9061_v51 }
 0xdff   :  { %9276 = vmatprep.subr.bf16.mxu0 %v9246_v25 }
 0xe01   :  { %11358 = vmatmul.mubr.msk.bf16.vlgmr.msra.gmra.mrb[112].mxu0 %vm4888_vm13, %v14450_v59  ;;  %v9251_v59 = vld [vmem:[#allocation2 + $0xb30] sm:$0xff] }
 0xe02   :  { %9277 = vmatpush1.bf16.msra.mxu0 %v9245_v22  ;;  %9308 = vmatprep.mubr.bf16.mxu0 %v13210_v0 }
 0xe03   :  { %9278 = vmatprep.subr.bf16.mxu0 %v9254_v39 }
 0xe06   :  { %9279 = vmatpush1.bf16.msra.mxu0 %v9253_v40 }
 0xe07   :  { %9317 = vmatprep.subr.bf16.mxu0 %v9248_v42 }
 0xe09   :  { %11361 = vmatmul.mubr.msk.bf16.vlgmr.msra.gmra.mrb[104].mxu0 %vm4888_vm13, %v14459_v18 }
 0xe0a   :  { %9318 = vmatpush1.bf16.msra.mxu0 %v9247_v44  ;;  %9349 = vmatprep.mubr.bf16.mxu0 %v13210_v0 }
 0xe0b   :  { %9319 = vmatprep.subr.bf16.mxu0 %v9256_v45 }
 0xe0e   :  { %9320 = vmatpush1.bf16.msra.mxu0 %v9255_v49 }
 0xe0f   :  { %9399 = vmatprep.subr.bf16.mxu0 %v9252_v52 }
 0xe11   :  { %11362 = vmatmul.mubr.msk.bf16.vlgmr.msra.gmra.mrb[108].mxu0 %vm4888_vm13, %v14459_v18 }
 0xe12   :  { %9400 = vmatpush1.bf16.msra.mxu0 %v9251_v59  ;;  %9431 = vmatprep.mubr.bf16.mxu0 %v13210_v0 }
 0xe13   :  { %9401 = vmatprep.subr.bf16.mxu0 %v9260_v56 }
 0xe16   :  { %9402 = vmatpush1.bf16.msra.mxu0 %v9259_v54 }
 0xe17   :  { %9472 = vmatprep.subr.bf16.mxu0 %v9450_v61 }
 0xe19   :  { %11364 = vmatmul.mubr.msk.bf16.vlgmr.msra.gmra.mrb[112].mxu0 %vm4888_vm13, %v14459_v18  ;;  %v9455_v18 = vld [vmem:[#allocation2 + $0xbb0] sm:$0xff] }
 0xe1a   :  { %9473 = vmatpush1.bf16.msra.mxu0 %v9449_v57  ;;  %9504 = vmatprep.mubr.bf16.mxu0 %v13210_v0 }
 0xe1b   :  { %9474 = vmatprep.subr.bf16.mxu0 %v9458_v41 }
 0xe1e   :  { %9475 = vmatpush1.bf16.msra.mxu0 %v9457_v1 }
 0xe1f   :  { %9513 = vmatprep.subr.bf16.mxu0 %v9452_v4 }
 0xe21   :  { %11365 = vmatmul.mubr.msk.bf16.vlgmr.msra.gmra.mrb[104].mxu0 %vm4888_vm13, %v14471_v63 }
 0xe22   :  { %9514 = vmatpush1.bf16.msra.mxu0 %v9451_v50  ;;  %9545 = vmatprep.mubr.bf16.mxu0 %v13210_v0 }
 0xe23   :  { %9515 = vmatprep.subr.bf16.mxu0 %v9460_v8 }
 0xe26   :  { %9516 = vmatpush1.bf16.msra.mxu0 %v9459_v7 }
 0xe27   :  { %9595 = vmatprep.subr.bf16.mxu0 %v9456_v55 }
 0xe29   :  { %11366 = vmatmul.mubr.msk.bf16.vlgmr.msra.gmra.mrb[108].mxu0 %vm4888_vm13, %v14471_v63 }
 0xe2a   :  { %9596 = vmatpush1.bf16.msra.mxu0 %v9455_v18  ;;  %9627 = vmatprep.mubr.bf16.mxu0 %v13210_v0 }
 0xe2b   :  { %9597 = vmatprep.subr.bf16.mxu0 %v9464_v11 }
 0xe2e   :  { %9598 = vmatpush1.bf16.msra.mxu0 %v9463_v6 }
 0xe31   :  { %11368 = vmatmul.mubr.msk.bf16.vlgmr.msra.gmra.mrb[112].mxu0 %vm4888_vm13, %v14471_v63 }
 0xef4   :  { %v9506_v35 = vpop.f32.mrb[104].mxu0 }
 0xef5   :  { %v9644_v58 = vmul.f32 0.05, %v9506_v35  ;;  %v9508_v21 = vpop.f32.mrb[105].mxu0 }
 0xef6   :  { %v9645_v9 = vmul.f32 0.05, %v9508_v21  ;;  %v9510_v24 = vpop.f32.mrb[106].mxu0 }
 0xef7   :  { %v14589_v12 = vmax.f32 %v9506_v35, %v9644_v58  ;;  %v9511_v30 = vpop.f32.mrb[107].mxu0 }
 0xef8   :  { %v9653_v32 = vmax.f32 %v9508_v21, %v9645_v9 }
 0xefc   :  { %v9547_v33 = vpop.f32.mrb[108].mxu0 }
 0xefd   :  { %v9646_v34 = vmul.f32 0.05, %v9547_v33  ;;  %v9549_v47 = vpop.f32.mrb[109].mxu0 }
 0xefe   :  { %v9647_v37 = vmul.f32 0.05, %v9549_v47  ;;  %v9551_v0 = vpop.f32.mrb[110].mxu0 }
 0xeff   :  { %v14591_v38 = vmax.f32 %v9547_v33, %v9646_v34  ;;  %v9552_v36 = vpop.f32.mrb[111].mxu0 }
 0xf00   :  { %v14593_v43 = vmax.f32 %v9549_v47, %v9647_v37 }
 0xf04   :  { %v9629_v63 = vpop.f32.mrb[112].mxu0 }
 0xf05   :  { %v9650_v2 = vmul.f32 0.05, %v9629_v63  ;;  %v9631_v46 = vpop.f32.mrb[113].mxu0 }
 0xf06   :  { %v9651_v48 = vmul.f32 0.05, %v9631_v46  ;;  %v9633_v14 = vpop.f32.mrb[114].mxu0 }
 0xf07   :  { %v14595_v53 = vmax.f32 %v9629_v63, %v9650_v2  ;;  %v9634_v60 = vpop.f32.mrb[115].mxu0 }
 0xf08   :  { %v14597_v17 = vmax.f32 %v9631_v46, %v9651_v48 }
 0xf09   :  { %13187 = dma.done.wait [#allocation4 + $0x1], 65536 }
 0xf0a   :  { %13188 = vsyncadd [#allocation4 + $0x1], 4294901760  ;;  %v14599_v62 = vpack.c.bf16 %v9653_v32, %v9653_v32  ;;  %v9673_v3 = vld [vmem:[#allocation3 + $0x8] sm:$0xff]  ;;  %v9672_v16 = vld [vmem:[#allocation3] sm:$0xff]  ;;  %v14605_v55 = vpack.c.bf16 %v14589_v12, %v14589_v12  ;;  %v14609_v18 = vpack.c.bf16 %v14593_v43, %v14593_v43  ;;  %s13212_s6 = smov [#allocation15]  }
 0xf0b   :  { %v9681_v26 = vld [vmem:[#allocation3 + $0x48] sm:$0xff]  ;;  %10184 = vmatprep.subr.bf16.mxu1 %v9673_v3  ;;  %v9680_v28 = vld [vmem:[#allocation3 + $0x40] sm:$0xff]  ;;  %s10892_s24 = sshll.u32 %s13212_s6, 4  ;;  %s10893_s24 = int_to_ptr.vmem [resolvable:$true] %s10892_s24 }
 0xf0c   :  { %10216 = vmatprep.mubr.bf16.mxu1 %v14599_v62  ;;  %10544 = vmatprep.mubr.bf16.mxu0 %v14599_v62  ;;  %v9689_v10 = vld [vmem:[#allocation3 + $0x88] sm:$0xff]  ;;  %v9688_v13 = vld [vmem:[#allocation3 + $0x80] sm:$0xff]  ;;  %s13159_s1 = scalar_lea.vmem %s10893_s24, 256  ;;  %p13164_p11 = scmp.lt.s32.totalorder %s10893_s24, %s10893_s24 }
 0xf0d   :  { %10185 = vmatpush1.bf16.msra.mxu1 %v9672_v16  ;;  %v9697_v23 = vld [vmem:[#allocation3 + $0xc8] sm:$0xff]  ;;  %v9696_v29 = vld [vmem:[#allocation3 + $0xc0] sm:$0xff]  ;;  %p13160_p10 = scmp.ne.s32.totalorder %s10893_s24, %s13159_s1  ;;  %p13165_p12 = scmp.lt.s32.totalorder %s13159_s1, %s13159_s1 }
 0xf0e   :  { %10186 = vmatprep.subr.bf16.mxu1 %v9681_v26  ;;  %v9705_v27 = vld [vmem:[#allocation3 + $0x108] sm:$0xff]  ;;  %v9704_v19 = vld [vmem:[#allocation3 + $0x100] sm:$0xff] }
 0xf0f   :  { %v9713_v20 = vld [vmem:[#allocation3 + $0x148] sm:$0xff]  ;;  %v9712_v31 = vld [vmem:[#allocation3 + $0x140] sm:$0xff]  ;;  %p13166_p13 = por %p13165_p12, %p13164_p11 }
 0xf10   :  { %v9721_v51 = vld [vmem:[#allocation3 + $0x188] sm:$0xff]  ;;  %v9720_v25 = vld [vmem:[#allocation3 + $0x180] sm:$0xff] }
 0xf11   :  { %10187 = vmatpush1.bf16.msra.mxu1 %v9680_v28  ;;  %v9729_v22 = vld [vmem:[#allocation3 + $0x1c8] sm:$0xff]  ;;  %v9728_v39 = vld [vmem:[#allocation3 + $0x1c0] sm:$0xff]  ;;  %p13167_p0 = pnand %p13166_p13, %p13160_p10 }
 0xf12   :  { %10188 = vmatprep.subr.bf16.mxu1 %v9689_v10  ;;  %v9737_v40 = vld [vmem:[#allocation3 + $0x208] sm:$0xff]  ;;  %v9736_v42 = vld [vmem:[#allocation3 + $0x200] sm:$0xff] }
 0xf13   :  { %v9745_v44 = vld [vmem:[#allocation3 + $0x248] sm:$0xff]  ;;  %v9744_v45 = vld [vmem:[#allocation3 + $0x240] sm:$0xff] }
 0xf14   :  { %v9753_v49 = vld [vmem:[#allocation3 + $0x288] sm:$0xff]  ;;  %v9752_v52 = vld [vmem:[#allocation3 + $0x280] sm:$0xff] }
 0xf15   :  { %10189 = vmatpush1.bf16.msra.mxu1 %v9688_v13  ;;  %v9761_v59 = vld [vmem:[#allocation3 + $0x2c8] sm:$0xff]  ;;  %v9760_v56 = vld [vmem:[#allocation3 + $0x2c0] sm:$0xff] }
 0xf16   :  { %10190 = vmatprep.subr.bf16.mxu1 %v9697_v23  ;;  %v9769_v54 = vld [vmem:[#allocation3 + $0x308] sm:$0xff]  ;;  %v9768_v61 = vld [vmem:[#allocation3 + $0x300] sm:$0xff] }
 0xf17   :  { %v9777_v57 = vld [vmem:[#allocation3 + $0x348] sm:$0xff]  ;;  %v9776_v41 = vld [vmem:[#allocation3 + $0x340] sm:$0xff] }
 0xf18   :  { %v9785_v1 = vld [vmem:[#allocation3 + $0x388] sm:$0xff]  ;;  %v9784_v4 = vld [vmem:[#allocation3 + $0x380] sm:$0xff] }
 0xf19   :  { %10191 = vmatpush1.bf16.msra.mxu1 %v9696_v29  ;;  %v9793_v50 = vld [vmem:[#allocation3 + $0x3c8] sm:$0xff]  ;;  %v9792_v8 = vld [vmem:[#allocation3 + $0x3c0] sm:$0xff] }
 0xf1a   :  { %10192 = vmatprep.subr.bf16.mxu1 %v9705_v27  ;;  %v9801_v7 = vld [vmem:[#allocation3 + $0x408] sm:$0xff]  ;;  %v9800_v11 = vld [vmem:[#allocation3 + $0x400] sm:$0xff] }
 0xf1b   :  { %v9809_v6 = vld [vmem:[#allocation3 + $0x448] sm:$0xff]  ;;  %v9808_v35 = vld [vmem:[#allocation3 + $0x440] sm:$0xff] }
 0xf1c   :  { %v9817_v58 = vld [vmem:[#allocation3 + $0x488] sm:$0xff]  ;;  %v9816_v21 = vld [vmem:[#allocation3 + $0x480] sm:$0xff] }
 0xf1d   :  { %10193 = vmatpush1.bf16.msra.mxu1 %v9704_v19  ;;  %v9825_v9 = vld [vmem:[#allocation3 + $0x4c8] sm:$0xff]  ;;  %v9824_v24 = vld [vmem:[#allocation3 + $0x4c0] sm:$0xff]  ;;  %v14615_v19 = vpack.c.bf16 %v14591_v38, %v14591_v38 }
 0xf1e   :  { %10194 = vmatprep.subr.bf16.mxu1 %v9713_v20  ;;  %v9833_v12 = vld [vmem:[#allocation3 + $0x508] sm:$0xff]  ;;  %v9832_v30 = vld [vmem:[#allocation3 + $0x500] sm:$0xff]  ;;  %v14619_v20 = vpack.c.bf16 %v14558_v15, %v14558_v15 }
 0xf1f   :  { %v9841_v32 = vld [vmem:[#allocation3 + $0x548] sm:$0xff]  ;;  %v9840_v33 = vld [vmem:[#allocation3 + $0x540] sm:$0xff] }
 0xf20   :  { %v9849_v34 = vld [vmem:[#allocation3 + $0x588] sm:$0xff]  ;;  %v9848_v47 = vld [vmem:[#allocation3 + $0x580] sm:$0xff] }
 0xf21   :  { %10195 = vmatpush1.bf16.msra.mxu1 %v9712_v31  ;;  %v9857_v37 = vld [vmem:[#allocation3 + $0x5c8] sm:$0xff]  ;;  %v9856_v0 = vld [vmem:[#allocation3 + $0x5c0] sm:$0xff] }
 0xf22   :  { %10196 = vmatprep.subr.bf16.mxu1 %v9721_v51  ;;  %v9865_v36 = vld [vmem:[#allocation3 + $0x608] sm:$0xff]  ;;  %v9864_v43 = vld [vmem:[#allocation3 + $0x600] sm:$0xff] }
 0xf23   :  { %v9873_v63 = vld [vmem:[#allocation3 + $0x648] sm:$0xff]  ;;  %v9872_v2 = vld [vmem:[#allocation3 + $0x640] sm:$0xff] }
 0xf24   :  { %v9881_v46 = vld [vmem:[#allocation3 + $0x688] sm:$0xff]  ;;  %v9880_v48 = vld [vmem:[#allocation3 + $0x680] sm:$0xff] }
 0xf25   :  { %10197 = vmatpush1.bf16.msra.mxu1 %v9720_v25  ;;  %v9889_v14 = vld [vmem:[#allocation3 + $0x6c8] sm:$0xff]  ;;  %v9888_v60 = vld [vmem:[#allocation3 + $0x6c0] sm:$0xff] }
 0xf26   :  { %10198 = vmatprep.subr.bf16.mxu1 %v9729_v22  ;;  %v9897_v3 = vld [vmem:[#allocation3 + $0x708] sm:$0xff]  ;;  %v9896_v16 = vld [vmem:[#allocation3 + $0x700] sm:$0xff] }
 0xf27   :  { %v9905_v26 = vld [vmem:[#allocation3 + $0x748] sm:$0xff]  ;;  %v9904_v28 = vld [vmem:[#allocation3 + $0x740] sm:$0xff] }
 0xf28   :  { %v9913_v10 = vld [vmem:[#allocation3 + $0x788] sm:$0xff]  ;;  %v9912_v13 = vld [vmem:[#allocation3 + $0x780] sm:$0xff] }
 0xf29   :  { %10199 = vmatpush1.bf16.msra.mxu1 %v9728_v39  ;;  %v9921_v23 = vld [vmem:[#allocation3 + $0x7c8] sm:$0xff]  ;;  %v9920_v29 = vld [vmem:[#allocation3 + $0x7c0] sm:$0xff] }
 0xf2a   :  { %10200 = vmatprep.subr.bf16.mxu1 %v9737_v40  ;;  %v9929_v27 = vld [vmem:[#allocation3 + $0x808] sm:$0xff]  ;;  %v9928_v31 = vld [vmem:[#allocation3 + $0x800] sm:$0xff] }
 0xf2b   :  { %v9937_v51 = vld [vmem:[#allocation3 + $0x848] sm:$0xff]  ;;  %v9936_v25 = vld [vmem:[#allocation3 + $0x840] sm:$0xff] }
 0xf2c   :  { %v9945_v22 = vld [vmem:[#allocation3 + $0x888] sm:$0xff]  ;;  %v9944_v38 = vld [vmem:[#allocation3 + $0x880] sm:$0xff] }
 0xf2d   :  { %10201 = vmatpush1.bf16.msra.mxu1 %v9736_v42  ;;  %v9953_v39 = vld [vmem:[#allocation3 + $0x8c8] sm:$0xff]  ;;  %v9952_v40 = vld [vmem:[#allocation3 + $0x8c0] sm:$0xff] }
 0xf2e   :  { %10202 = vmatprep.subr.bf16.mxu1 %v9745_v44  ;;  %v9961_v15 = vld [vmem:[#allocation3 + $0x908] sm:$0xff]  ;;  %v9960_v42 = vld [vmem:[#allocation3 + $0x900] sm:$0xff] }
 0xf2f   :  { %v9969_v44 = vld [vmem:[#allocation3 + $0x948] sm:$0xff] }
 0xf31   :  { %10203 = vmatpush1.bf16.msra.mxu1 %v9744_v45  ;;  %v9968_v45 = vld [vmem:[#allocation3 + $0x940] sm:$0xff] }
 0xf32   :  { %10204 = vmatprep.subr.bf16.mxu1 %v9753_v49  ;;  %v9977_v49 = vld [vmem:[#allocation3 + $0x988] sm:$0xff] }
 0xf35   :  { %10205 = vmatpush1.bf16.msra.mxu1 %v9752_v52  ;;  %v9976_v52 = vld [vmem:[#allocation3 + $0x980] sm:$0xff] }
 0xf36   :  { %10206 = vmatprep.subr.bf16.mxu1 %v9761_v59  ;;  %v9985_v59 = vld [vmem:[#allocation3 + $0x9c8] sm:$0xff] }
 0xf39   :  { %10207 = vmatpush1.bf16.msra.mxu1 %v9760_v56  ;;  %v9984_v56 = vld [vmem:[#allocation3 + $0x9c0] sm:$0xff] }
 0xf3a   :  { %10208 = vmatprep.subr.bf16.mxu1 %v9769_v54  ;;  %v9993_v54 = vld [vmem:[#allocation3 + $0xa08] sm:$0xff] }
 0xf3d   :  { %10209 = vmatpush1.bf16.msra.mxu1 %v9768_v61  ;;  %v9992_v61 = vld [vmem:[#allocation3 + $0xa00] sm:$0xff] }
 0xf3e   :  { %10210 = vmatprep.subr.bf16.mxu1 %v9777_v57  ;;  %v10001_v57 = vld [vmem:[#allocation3 + $0xa48] sm:$0xff] }
 0xf41   :  { %10211 = vmatpush1.bf16.msra.mxu1 %v9776_v41  ;;  %v10000_v41 = vld [vmem:[#allocation3 + $0xa40] sm:$0xff] }
 0xf42   :  { %10212 = vmatprep.subr.bf16.mxu1 %v9785_v1  ;;  %v10009_v1 = vld [vmem:[#allocation3 + $0xa88] sm:$0xff] }
 0xf45   :  { %10213 = vmatpush1.bf16.msra.mxu1 %v9784_v4  ;;  %v10008_v4 = vld [vmem:[#allocation3 + $0xa80] sm:$0xff] }
 0xf46   :  { %10214 = vmatprep.subr.bf16.mxu1 %v9793_v50  ;;  %v10017_v50 = vld [vmem:[#allocation3 + $0xac8] sm:$0xff] }
 0xf49   :  { %10215 = vmatpush1.bf16.msra.mxu1 %v9792_v8  ;;  %v10016_v8 = vld [vmem:[#allocation3 + $0xac0] sm:$0xff] }
 0xf4a   :  { %10225 = vmatprep.subr.bf16.mxu1 %v9801_v7  ;;  %v10025_v7 = vld [vmem:[#allocation3 + $0xb08] sm:$0xff] }
 0xf4c   :  { %10217 = vmatmul.mubr.bf16.vlgmr.msra.gmra.mrb[60].mxu1 %v14605_v55 }
 0xf4d   :  { %10226 = vmatpush1.bf16.msra.mxu1 %v9800_v11  ;;  %10257 = vmatprep.mubr.bf16.mxu1 %v14609_v18  ;;  %v10024_v11 = vld [vmem:[#allocation3 + $0xb00] sm:$0xff] }
 0xf4e   :  { %10227 = vmatprep.subr.bf16.mxu1 %v9809_v6  ;;  %v10033_v6 = vld [vmem:[#allocation3 + $0xb48] sm:$0xff] }
 0xf51   :  { %10228 = vmatpush1.bf16.msra.mxu1 %v9808_v35  ;;  %v10032_v35 = vld [vmem:[#allocation3 + $0xb40] sm:$0xff] }
 0xf52   :  { %10229 = vmatprep.subr.bf16.mxu1 %v9817_v58  ;;  %v10041_v58 = vld [vmem:[#allocation3 + $0xb88] sm:$0xff] }
 0xf55   :  { %10230 = vmatpush1.bf16.msra.mxu1 %v9816_v21  ;;  %v10040_v21 = vld [vmem:[#allocation3 + $0xb80] sm:$0xff] }
 0xf56   :  { %10231 = vmatprep.subr.bf16.mxu1 %v9825_v9  ;;  %v10049_v9 = vld [vmem:[#allocation3 + $0xbc8] sm:$0xff] }
 0xf59   :  { %10232 = vmatpush1.bf16.msra.mxu1 %v9824_v24  ;;  %v10048_v24 = vld [vmem:[#allocation3 + $0xbc0] sm:$0xff] }
 0xf5a   :  { %10233 = vmatprep.subr.bf16.mxu1 %v9833_v12  ;;  %v10057_v12 = vld [vmem:[#allocation3 + $0xc08] sm:$0xff] }
 0xf5d   :  { %10234 = vmatpush1.bf16.msra.mxu1 %v9832_v30  ;;  %v14625_v30 = vpack.c.bf16 %v14556_v5, %v14556_v5  ;;  %v9684_v5 = vld [vmem:[#allocation3 + $0x60] sm:$0xff] }
 0xf5e   :  { %10235 = vmatprep.subr.bf16.mxu1 %v9841_v32  ;;  %v14629_v32 = vpack.c.bf16 %v14597_v17, %v14597_v17  ;;  %v9693_v17 = vld [vmem:[#allocation3 + $0xa8] sm:$0xff] }
 0xf61   :  { %10236 = vmatpush1.bf16.msra.mxu1 %v9840_v33  ;;  %v9677_v33 = vld [vmem:[#allocation3 + $0x28] sm:$0xff] }
 0xf62   :  { %10237 = vmatprep.subr.bf16.mxu1 %v9849_v34  ;;  %v9676_v34 = vld [vmem:[#allocation3 + $0x20] sm:$0xff]  ;;  %10512 = vmatprep.subr.bf16.mxu0 %v9677_v33  ;;  %v9789_v33 = vld [vmem:[#allocation3 + $0x3a8] sm:$0xff] }
 0xf63   :  { %10513 = vmatpush1.bf16.msra.mxu0 %v9676_v34  ;;  %v9788_v34 = vld [vmem:[#allocation3 + $0x3a0] sm:$0xff] }
 0xf65   :  { %10238 = vmatpush1.bf16.msra.mxu1 %v9848_v47  ;;  %v10056_v47 = vld [vmem:[#allocation3 + $0xc00] sm:$0xff] }
 0xf66   :  { %10239 = vmatprep.subr.bf16.mxu1 %v9857_v37  ;;  %v10065_v37 = vld [vmem:[#allocation3 + $0xc48] sm:$0xff] }
 0xf69   :  { %10240 = vmatpush1.bf16.msra.mxu1 %v9856_v0  ;;  %v9685_v0 = vld [vmem:[#allocation3 + $0x68] sm:$0xff] }
 0xf6a   :  { %10241 = vmatprep.subr.bf16.mxu1 %v9865_v36  ;;  %v10064_v36 = vld [vmem:[#allocation3 + $0xc40] sm:$0xff]  ;;  %10514 = vmatprep.subr.bf16.mxu0 %v9685_v0  ;;  %v9797_v0 = vld [vmem:[#allocation3 + $0x3e8] sm:$0xff] }
 0xf6b   :  { %10515 = vmatpush1.bf16.msra.mxu0 %v9684_v5  ;;  %v9796_v5 = vld [vmem:[#allocation3 + $0x3e0] sm:$0xff] }
 0xf6c   :  { %10516 = vmatprep.subr.bf16.mxu0 %v9693_v17  ;;  %v14635_v17 = vpack.c.bf16 %v14595_v53, %v14595_v53  ;;  %v9682_v53 = vld [vmem:[#allocation3 + $0x50] sm:$0xff] }
 0xf6d   :  { %10242 = vmatpush1.bf16.msra.mxu1 %v9864_v43  ;;  %v10073_v43 = vld [vmem:[#allocation3 + $0xc88] sm:$0xff] }
 0xf6e   :  { %10243 = vmatprep.subr.bf16.mxu1 %v9873_v63  ;;  %v9692_v63 = vld [vmem:[#allocation3 + $0xa0] sm:$0xff] }
 0xf6f   :  { %10517 = vmatpush1.bf16.msra.mxu0 %v9692_v63  ;;  %v9805_v63 = vld [vmem:[#allocation3 + $0x428] sm:$0xff] }
 0xf71   :  { %10244 = vmatpush1.bf16.msra.mxu1 %v9872_v2  ;;  %v10072_v2 = vld [vmem:[#allocation3 + $0xc80] sm:$0xff] }
 0xf72   :  { %10245 = vmatprep.subr.bf16.mxu1 %v9881_v46  ;;  %v10081_v46 = vld [vmem:[#allocation3 + $0xcc8] sm:$0xff] }
 0xf75   :  { %10246 = vmatpush1.bf16.msra.mxu1 %v9880_v48  ;;  %v9701_v48 = vld [vmem:[#allocation3 + $0xe8] sm:$0xff] }
 0xf76   :  { %10247 = vmatprep.subr.bf16.mxu1 %v9889_v14  ;;  %v9700_v14 = vld [vmem:[#allocation3 + $0xe0] sm:$0xff]  ;;  %10518 = vmatprep.subr.bf16.mxu0 %v9701_v48  ;;  %v9683_v48 = vld [vmem:[#allocation3 + $0x58] sm:$0xff] }
 0xf77   :  { %10519 = vmatpush1.bf16.msra.mxu0 %v9700_v14  ;;  %v9813_v14 = vld [vmem:[#allocation3 + $0x468] sm:$0xff] }
 0xf79   :  { %10248 = vmatpush1.bf16.msra.mxu1 %v9888_v60  ;;  %v10080_v60 = vld [vmem:[#allocation3 + $0xcc0] sm:$0xff] }
 0xf7a   :  { %10249 = vmatprep.subr.bf16.mxu1 %v9897_v3  ;;  %v10089_v3 = vld [vmem:[#allocation3 + $0xd08] sm:$0xff] }
 0xf7d   :  { %10250 = vmatpush1.bf16.msra.mxu1 %v9896_v16  ;;  %v9709_v16 = vld [vmem:[#allocation3 + $0x128] sm:$0xff] }
 0xf7e   :  { %10251 = vmatprep.subr.bf16.mxu1 %v9905_v26  ;;  %v9708_v26 = vld [vmem:[#allocation3 + $0x120] sm:$0xff]  ;;  %10520 = vmatprep.subr.bf16.mxu0 %v9709_v16  ;;  %v9821_v16 = vld [vmem:[#allocation3 + $0x4a8] sm:$0xff] }
 0xf7f   :  { %10521 = vmatpush1.bf16.msra.mxu0 %v9708_v26  ;;  %v9820_v26 = vld [vmem:[#allocation3 + $0x4a0] sm:$0xff] }
 0xf81   :  { %10252 = vmatpush1.bf16.msra.mxu1 %v9904_v28  ;;  %v10088_v28 = vld [vmem:[#allocation3 + $0xd00] sm:$0xff] }
 0xf82   :  { %10253 = vmatprep.subr.bf16.mxu1 %v9913_v10  ;;  %v10097_v10 = vld [vmem:[#allocation3 + $0xd48] sm:$0xff] }
 0xf85   :  { %10254 = vmatpush1.bf16.msra.mxu1 %v9912_v13  ;;  %v9717_v13 = vld [vmem:[#allocation3 + $0x168] sm:$0xff] }
 0xf86   :  { %10255 = vmatprep.subr.bf16.mxu1 %v9921_v23  ;;  %v9716_v23 = vld [vmem:[#allocation3 + $0x160] sm:$0xff]  ;;  %10522 = vmatprep.subr.bf16.mxu0 %v9717_v13  ;;  %v9829_v13 = vld [vmem:[#allocation3 + $0x4e8] sm:$0xff] }
 0xf87   :  { %10523 = vmatpush1.bf16.msra.mxu0 %v9716_v23  ;;  %v9828_v23 = vld [vmem:[#allocation3 + $0x4e0] sm:$0xff] }
 0xf89   :  { %10256 = vmatpush1.bf16.msra.mxu1 %v9920_v29  ;;  %v10096_v29 = vld [vmem:[#allocation3 + $0xd40] sm:$0xff] }
 0xf8a   :  { %10266 = vmatprep.subr.bf16.mxu1 %v9929_v27  ;;  %v10105_v27 = vld [vmem:[#allocation3 + $0xd88] sm:$0xff] }
 0xf8c   :  { %10258 = vmatmul.mubr.bf16.vlgmr.msra.gmra.mrb[60].mxu1 %v14615_v19 }
 0xf8d   :  { %10267 = vmatpush1.bf16.msra.mxu1 %v9928_v31  ;;  %10298 = vmatprep.mubr.bf16.mxu1 %v14619_v20  ;;  %v9725_v31 = vld [vmem:[#allocation3 + $0x1a8] sm:$0xff] }
 0xf8e   :  { %10268 = vmatprep.subr.bf16.mxu1 %v9937_v51  ;;  %v9724_v51 = vld [vmem:[#allocation3 + $0x1a0] sm:$0xff]  ;;  %10524 = vmatprep.subr.bf16.mxu0 %v9725_v31  ;;  %v9837_v31 = vld [vmem:[#allocation3 + $0x528] sm:$0xff] }
 0xf8f   :  { %10525 = vmatpush1.bf16.msra.mxu0 %v9724_v51  ;;  %v9836_v51 = vld [vmem:[#allocation3 + $0x520] sm:$0xff] }
 0xf91   :  { %10269 = vmatpush1.bf16.msra.mxu1 %v9936_v25  ;;  %v10104_v25 = vld [vmem:[#allocation3 + $0xd80] sm:$0xff] }
 0xf92   :  { %10270 = vmatprep.subr.bf16.mxu1 %v9945_v22  ;;  %v10113_v22 = vld [vmem:[#allocation3 + $0xdc8] sm:$0xff] }
 0xf95   :  { %10271 = vmatpush1.bf16.msra.mxu1 %v9944_v38  ;;  %v9733_v38 = vld [vmem:[#allocation3 + $0x1e8] sm:$0xff] }
 0xf96   :  { %10272 = vmatprep.subr.bf16.mxu1 %v9953_v39  ;;  %v9732_v39 = vld [vmem:[#allocation3 + $0x1e0] sm:$0xff]  ;;  %10526 = vmatprep.subr.bf16.mxu0 %v9733_v38  ;;  %v9845_v38 = vld [vmem:[#allocation3 + $0x568] sm:$0xff] }
 0xf97   :  { %10527 = vmatpush1.bf16.msra.mxu0 %v9732_v39  ;;  %v9844_v39 = vld [vmem:[#allocation3 + $0x560] sm:$0xff] }
 0xf99   :  { %10273 = vmatpush1.bf16.msra.mxu1 %v9952_v40  ;;  %v10112_v40 = vld [vmem:[#allocation3 + $0xdc0] sm:$0xff] }
 0xf9a   :  { %10274 = vmatprep.subr.bf16.mxu1 %v9961_v15  ;;  %v10121_v15 = vld [vmem:[#allocation3 + $0xe08] sm:$0xff] }
 0xf9d   :  { %10275 = vmatpush1.bf16.msra.mxu1 %v9960_v42  ;;  %v9741_v42 = vld [vmem:[#allocation3 + $0x228] sm:$0xff] }
 0xf9e   :  { %10276 = vmatprep.subr.bf16.mxu1 %v9969_v44  ;;  %v9740_v44 = vld [vmem:[#allocation3 + $0x220] sm:$0xff]  ;;  %10528 = vmatprep.subr.bf16.mxu0 %v9741_v42  ;;  %v9853_v42 = vld [vmem:[#allocation3 + $0x5a8] sm:$0xff] }
 0xf9f   :  { %10529 = vmatpush1.bf16.msra.mxu0 %v9740_v44  ;;  %v9852_v44 = vld [vmem:[#allocation3 + $0x5a0] sm:$0xff] }
 0xfa1   :  { %10277 = vmatpush1.bf16.msra.mxu1 %v9968_v45  ;;  %v10120_v45 = vld [vmem:[#allocation3 + $0xe00] sm:$0xff] }
 0xfa2   :  { %10278 = vmatprep.subr.bf16.mxu1 %v9977_v49  ;;  %v10129_v49 = vld [vmem:[#allocation3 + $0xe48] sm:$0xff] }
 0xfa5   :  { %10279 = vmatpush1.bf16.msra.mxu1 %v9976_v52  ;;  %v9749_v52 = vld [vmem:[#allocation3 + $0x268] sm:$0xff] }
 0xfa6   :  { %10280 = vmatprep.subr.bf16.mxu1 %v9985_v59  ;;  %v9748_v59 = vld [vmem:[#allocation3 + $0x260] sm:$0xff]  ;;  %10530 = vmatprep.subr.bf16.mxu0 %v9749_v52  ;;  %v9861_v52 = vld [vmem:[#allocation3 + $0x5e8] sm:$0xff] }
 0xfa7   :  { %10531 = vmatpush1.bf16.msra.mxu0 %v9748_v59  ;;  %v9860_v59 = vld [vmem:[#allocation3 + $0x5e0] sm:$0xff] }
 0xfa9   :  { %10281 = vmatpush1.bf16.msra.mxu1 %v9984_v56  ;;  %v10128_v56 = vld [vmem:[#allocation3 + $0xe40] sm:$0xff] }
 0xfaa   :  { %10282 = vmatprep.subr.bf16.mxu1 %v9993_v54  ;;  %v10137_v54 = vld [vmem:[#allocation3 + $0xe88] sm:$0xff] }
 0xfad   :  { %10283 = vmatpush1.bf16.msra.mxu1 %v9992_v61  ;;  %v9757_v61 = vld [vmem:[#allocation3 + $0x2a8] sm:$0xff] }
 0xfae   :  { %10284 = vmatprep.subr.bf16.mxu1 %v10001_v57  ;;  %v9756_v57 = vld [vmem:[#allocation3 + $0x2a0] sm:$0xff]  ;;  %10532 = vmatprep.subr.bf16.mxu0 %v9757_v61  ;;  %v9869_v61 = vld [vmem:[#allocation3 + $0x628] sm:$0xff] }
 0xfaf   :  { %10533 = vmatpush1.bf16.msra.mxu0 %v9756_v57  ;;  %v9868_v57 = vld [vmem:[#allocation3 + $0x620] sm:$0xff] }
 0xfb1   :  { %10285 = vmatpush1.bf16.msra.mxu1 %v10000_v41  ;;  %v10136_v41 = vld [vmem:[#allocation3 + $0xe80] sm:$0xff] }
 0xfb2   :  { %10286 = vmatprep.subr.bf16.mxu1 %v10009_v1  ;;  %v10145_v1 = vld [vmem:[#allocation3 + $0xec8] sm:$0xff] }
 0xfb5   :  { %10287 = vmatpush1.bf16.msra.mxu1 %v10008_v4  ;;  %v9765_v4 = vld [vmem:[#allocation3 + $0x2e8] sm:$0xff] }
 0xfb6   :  { %10288 = vmatprep.subr.bf16.mxu1 %v10017_v50  ;;  %v9764_v50 = vld [vmem:[#allocation3 + $0x2e0] sm:$0xff]  ;;  %10534 = vmatprep.subr.bf16.mxu0 %v9765_v4  ;;  %v9877_v4 = vld [vmem:[#allocation3 + $0x668] sm:$0xff] }
 0xfb7   :  { %10535 = vmatpush1.bf16.msra.mxu0 %v9764_v50  ;;  %v9876_v50 = vld [vmem:[#allocation3 + $0x660] sm:$0xff] }
 0xfb9   :  { %10289 = vmatpush1.bf16.msra.mxu1 %v10016_v8  ;;  %v10144_v8 = vld [vmem:[#allocation3 + $0xec0] sm:$0xff] }
 0xfba   :  { %10290 = vmatprep.subr.bf16.mxu1 %v10025_v7  ;;  %v10153_v7 = vld [vmem:[#allocation3 + $0xf08] sm:$0xff] }
 0xfbd   :  { %10291 = vmatpush1.bf16.msra.mxu1 %v10024_v11  ;;  %v9773_v11 = vld [vmem:[#allocation3 + $0x328] sm:$0xff] }
 0xfbe   :  { %10292 = vmatprep.subr.bf16.mxu1 %v10033_v6  ;;  %v9772_v6 = vld [vmem:[#allocation3 + $0x320] sm:$0xff]  ;;  %10536 = vmatprep.subr.bf16.mxu0 %v9773_v11  ;;  %v9885_v11 = vld [vmem:[#allocation3 + $0x6a8] sm:$0xff] }
 0xfbf   :  { %10537 = vmatpush1.bf16.msra.mxu0 %v9772_v6  ;;  %v9884_v6 = vld [vmem:[#allocation3 + $0x6a0] sm:$0xff] }
 0xfc1   :  { %10293 = vmatpush1.bf16.msra.mxu1 %v10032_v35  ;;  %v10152_v35 = vld [vmem:[#allocation3 + $0xf00] sm:$0xff] }
 0xfc2   :  { %10294 = vmatprep.subr.bf16.mxu1 %v10041_v58  ;;  %v10161_v58 = vld [vmem:[#allocation3 + $0xf48] sm:$0xff] }
 0xfc5   :  { %10295 = vmatpush1.bf16.msra.mxu1 %v10040_v21  ;;  %v9781_v21 = vld [vmem:[#allocation3 + $0x368] sm:$0xff] }
 0xfc6   :  { %10296 = vmatprep.subr.bf16.mxu1 %v10049_v9  ;;  %v9780_v9 = vld [vmem:[#allocation3 + $0x360] sm:$0xff]  ;;  %10538 = vmatprep.subr.bf16.mxu0 %v9781_v21  ;;  %v9893_v21 = vld [vmem:[#allocation3 + $0x6e8] sm:$0xff] }
 0xfc7   :  { %10539 = vmatpush1.bf16.msra.mxu0 %v9780_v9  ;;  %v9892_v9 = vld [vmem:[#allocation3 + $0x6e0] sm:$0xff] }
 0xfc8   :  { %10540 = vmatprep.subr.bf16.mxu0 %v9789_v33  ;;  %v9901_v33 = vld [vmem:[#allocation3 + $0x728] sm:$0xff] }
 0xfc9   :  { %10297 = vmatpush1.bf16.msra.mxu1 %v10048_v24  ;;  %v10160_v24 = vld [vmem:[#allocation3 + $0xf40] sm:$0xff] }
 0xfca   :  { %10307 = vmatprep.subr.bf16.mxu1 %v10057_v12  ;;  %v10169_v12 = vld [vmem:[#allocation3 + $0xf88] sm:$0xff] }
 0xfcb   :  { %10541 = vmatpush1.bf16.msra.mxu0 %v9788_v34  ;;  %v9900_v34 = vld [vmem:[#allocation3 + $0x720] sm:$0xff] }
 0xfcc   :  { %10299 = vmatmul.mubr.bf16.vlgmr.msra.gmra.mrb[60].mxu1 %v14625_v30  ;;  %10542 = vmatprep.subr.bf16.mxu0 %v9797_v0  ;;  %v9909_v0 = vld [vmem:[#allocation3 + $0x768] sm:$0xff] }
 0xfcd   :  { %10308 = vmatpush1.bf16.msra.mxu1 %v10056_v47  ;;  %10339 = vmatprep.mubr.bf16.mxu1 %v14629_v32  ;;  %v10168_v47 = vld [vmem:[#allocation3 + $0xf80] sm:$0xff] }
 0xfce   :  { %10309 = vmatprep.subr.bf16.mxu1 %v10065_v37  ;;  %v10177_v37 = vld [vmem:[#allocation3 + $0xfc8] sm:$0xff] }
 0xfcf   :  { %10543 = vmatpush1.bf16.msra.mxu0 %v9796_v5  ;;  %v9908_v5 = vld [vmem:[#allocation3 + $0x760] sm:$0xff] }
 0xfd0   :  { %10553 = vmatprep.subr.bf16.mxu0 %v9805_v63  ;;  %v9917_v63 = vld [vmem:[#allocation3 + $0x7a8] sm:$0xff] }
 0xfd1   :  { %10310 = vmatpush1.bf16.msra.mxu1 %v10064_v36  ;;  %v10176_v36 = vld [vmem:[#allocation3 + $0xfc0] sm:$0xff] }
 0xfd2   :  { %10311 = vmatprep.subr.bf16.mxu1 %v10073_v43  ;;  %v9675_v43 = vld [vmem:[#allocation3 + $0x18] sm:$0xff]  ;;  %10545 = vmatmul.mubr.bf16.vlgmr.msra.gmra.mrb[116].mxu0 %v14605_v55 }
 0xfd3   :  { %10585 = vmatprep.mubr.bf16.mxu0 %v14609_v18 }
 0xfd5   :  { %10312 = vmatpush1.bf16.msra.mxu1 %v10072_v2  ;;  %v9804_v2 = vld [vmem:[#allocation3 + $0x420] sm:$0xff] }
 0xfd6   :  { %10313 = vmatprep.subr.bf16.mxu1 %v10081_v46  ;;  %v9674_v46 = vld [vmem:[#allocation3 + $0x10] sm:$0xff]  ;;  %10554 = vmatpush1.bf16.msra.mxu0 %v9804_v2  ;;  %v9916_v2 = vld [vmem:[#allocation3 + $0x7a0] sm:$0xff] }
 0xfd7   :  { %10555 = vmatprep.subr.bf16.mxu0 %v9813_v14  ;;  %v9925_v14 = vld [vmem:[#allocation3 + $0x7e8] sm:$0xff] }
 0xfd9   :  { %10314 = vmatpush1.bf16.msra.mxu1 %v10080_v60  ;;  %v9812_v60 = vld [vmem:[#allocation3 + $0x460] sm:$0xff] }
 0xfda   :  { %10315 = vmatprep.subr.bf16.mxu1 %v10089_v3  ;;  %v9691_v3 = vld [vmem:[#allocation3 + $0x98] sm:$0xff]  ;;  %10556 = vmatpush1.bf16.msra.mxu0 %v9812_v60  ;;  %v9924_v60 = vld [vmem:[#allocation3 + $0x7e0] sm:$0xff] }
 0xfdb   :  { %10557 = vmatprep.subr.bf16.mxu0 %v9821_v16  ;;  %v9933_v16 = vld [vmem:[#allocation3 + $0x828] sm:$0xff] }
 0xfdd   :  { %10316 = vmatpush1.bf16.msra.mxu1 %v10088_v28  ;;  %v9690_v28 = vld [vmem:[#allocation3 + $0x90] sm:$0xff] }
 0xfde   :  { %10317 = vmatprep.subr.bf16.mxu1 %v10097_v10  ;;  %v9699_v10 = vld [vmem:[#allocation3 + $0xd8] sm:$0xff]  ;;  %10558 = vmatpush1.bf16.msra.mxu0 %v9820_v26  ;;  %v9932_v26 = vld [vmem:[#allocation3 + $0x820] sm:$0xff] }
 0xfdf   :  { %10559 = vmatprep.subr.bf16.mxu0 %v9829_v13  ;;  %v9941_v13 = vld [vmem:[#allocation3 + $0x868] sm:$0xff] }
 0xfe1   :  { %10318 = vmatpush1.bf16.msra.mxu1 %v10096_v29  ;;  %v9698_v29 = vld [vmem:[#allocation3 + $0xd0] sm:$0xff] }
 0xfe2   :  { %10319 = vmatprep.subr.bf16.mxu1 %v10105_v27  ;;  %v9707_v27 = vld [vmem:[#allocation3 + $0x118] sm:$0xff]  ;;  %10560 = vmatpush1.bf16.msra.mxu0 %v9828_v23  ;;  %v9940_v23 = vld [vmem:[#allocation3 + $0x860] sm:$0xff] }
 0xfe3   :  { %10561 = vmatprep.subr.bf16.mxu0 %v9837_v31  ;;  %v9949_v31 = vld [vmem:[#allocation3 + $0x8a8] sm:$0xff] }
 0xfe5   :  { %10320 = vmatpush1.bf16.msra.mxu1 %v10104_v25  ;;  %v9706_v25 = vld [vmem:[#allocation3 + $0x110] sm:$0xff] }
 0xfe6   :  { %10321 = vmatprep.subr.bf16.mxu1 %v10113_v22  ;;  %v9715_v22 = vld [vmem:[#allocation3 + $0x158] sm:$0xff]  ;;  %10562 = vmatpush1.bf16.msra.mxu0 %v9836_v51  ;;  %v9948_v51 = vld [vmem:[#allocation3 + $0x8a0] sm:$0xff] }
 0xfe7   :  { %10563 = vmatprep.subr.bf16.mxu0 %v9845_v38  ;;  %v9957_v38 = vld [vmem:[#allocation3 + $0x8e8] sm:$0xff] }
 0xfe9   :  { %10322 = vmatpush1.bf16.msra.mxu1 %v10112_v40  ;;  %v9714_v40 = vld [vmem:[#allocation3 + $0x150] sm:$0xff] }
 0xfea   :  { %10323 = vmatprep.subr.bf16.mxu1 %v10121_v15  ;;  %v9723_v15 = vld [vmem:[#allocation3 + $0x198] sm:$0xff]  ;;  %10564 = vmatpush1.bf16.msra.mxu0 %v9844_v39  ;;  %v9956_v39 = vld [vmem:[#allocation3 + $0x8e0] sm:$0xff] }
 0xfeb   :  { %10565 = vmatprep.subr.bf16.mxu0 %v9853_v42  ;;  %v9965_v42 = vld [vmem:[#allocation3 + $0x928] sm:$0xff] }
 0xfed   :  { %10324 = vmatpush1.bf16.msra.mxu1 %v10120_v45  ;;  %v9722_v45 = vld [vmem:[#allocation3 + $0x190] sm:$0xff] }
 0xfee   :  { %10325 = vmatprep.subr.bf16.mxu1 %v10129_v49  ;;  %v9731_v49 = vld [vmem:[#allocation3 + $0x1d8] sm:$0xff]  ;;  %10566 = vmatpush1.bf16.msra.mxu0 %v9852_v44  ;;  %v9964_v44 = vld [vmem:[#allocation3 + $0x920] sm:$0xff] }
 0xfef   :  { %10567 = vmatprep.subr.bf16.mxu0 %v9861_v52  ;;  %v9973_v52 = vld [vmem:[#allocation3 + $0x968] sm:$0xff] }
 0xff1   :  { %10326 = vmatpush1.bf16.msra.mxu1 %v10128_v56  ;;  %v9730_v56 = vld [vmem:[#allocation3 + $0x1d0] sm:$0xff] }
 0xff2   :  { %10327 = vmatprep.subr.bf16.mxu1 %v10137_v54  ;;  %v9739_v54 = vld [vmem:[#allocation3 + $0x218] sm:$0xff]  ;;  %10568 = vmatpush1.bf16.msra.mxu0 %v9860_v59  ;;  %v9842_v59 = vld [vmem:[#allocation3 + $0x550] sm:$0xff] }
 0xff3   :  { %10569 = vmatprep.subr.bf16.mxu0 %v9869_v61  ;;  %v9981_v61 = vld [vmem:[#allocation3 + $0x9a8] sm:$0xff] }
 0xff5   :  { %10328 = vmatpush1.bf16.msra.mxu1 %v10136_v41  ;;  %v9738_v41 = vld [vmem:[#allocation3 + $0x210] sm:$0xff] }
 0xff6   :  { %10329 = vmatprep.subr.bf16.mxu1 %v10145_v1  ;;  %v9747_v1 = vld [vmem:[#allocation3 + $0x258] sm:$0xff]  ;;  %10570 = vmatpush1.bf16.msra.mxu0 %v9868_v57  ;;  %v9850_v57 = vld [vmem:[#allocation3 + $0x590] sm:$0xff] }
 0xff7   :  { %10571 = vmatprep.subr.bf16.mxu0 %v9877_v4  ;;  %v9989_v4 = vld [vmem:[#allocation3 + $0x9e8] sm:$0xff] }
 0xff9   :  { %10330 = vmatpush1.bf16.msra.mxu1 %v10144_v8  ;;  %v9746_v8 = vld [vmem:[#allocation3 + $0x250] sm:$0xff] }
 0xffa   :  { %10331 = vmatprep.subr.bf16.mxu1 %v10153_v7  ;;  %v9755_v7 = vld [vmem:[#allocation3 + $0x298] sm:$0xff]  ;;  %10572 = vmatpush1.bf16.msra.mxu0 %v9876_v50  ;;  %v9988_v50 = vld [vmem:[#allocation3 + $0x9e0] sm:$0xff] }
 0xffb   :  { %10573 = vmatprep.subr.bf16.mxu0 %v9885_v11  ;;  %v9997_v11 = vld [vmem:[#allocation3 + $0xa28] sm:$0xff] }
 0xffd   :  { %10332 = vmatpush1.bf16.msra.mxu1 %v10152_v35  ;;  %v9754_v35 = vld [vmem:[#allocation3 + $0x290] sm:$0xff] }
 0xffe   :  { %10333 = vmatprep.subr.bf16.mxu1 %v10161_v58  ;;  %v9763_v58 = vld [vmem:[#allocation3 + $0x2d8] sm:$0xff]  ;;  %10574 = vmatpush1.bf16.msra.mxu0 %v9884_v6  ;;  %v9996_v6 = vld [vmem:[#allocation3 + $0xa20] sm:$0xff] }
 0xfff   :  { %10575 = vmatprep.subr.bf16.mxu0 %v9893_v21  ;;  %v10005_v21 = vld [vmem:[#allocation3 + $0xa68] sm:$0xff] }
0x1001   :  { %10334 = vmatpush1.bf16.msra.mxu1 %v10160_v24  ;;  %v9762_v24 = vld [vmem:[#allocation3 + $0x2d0] sm:$0xff] }
0x1002   :  { %10335 = vmatprep.subr.bf16.mxu1 %v10169_v12  ;;  %v9771_v12 = vld [vmem:[#allocation3 + $0x318] sm:$0xff]  ;;  %10576 = vmatpush1.bf16.msra.mxu0 %v9892_v9  ;;  %v10004_v9 = vld [vmem:[#allocation3 + $0xa60] sm:$0xff] }
0x1003   :  { %10577 = vmatprep.subr.bf16.mxu0 %v9901_v33  ;;  %v10013_v33 = vld [vmem:[#allocation3 + $0xaa8] sm:$0xff] }
0x1005   :  { %10336 = vmatpush1.bf16.msra.mxu1 %v10168_v47  ;;  %v9770_v47 = vld [vmem:[#allocation3 + $0x310] sm:$0xff] }
0x1006   :  { %10337 = vmatprep.subr.bf16.mxu1 %v10177_v37  ;;  %v9779_v37 = vld [vmem:[#allocation3 + $0x358] sm:$0xff]  ;;  %10578 = vmatpush1.bf16.msra.mxu0 %v9900_v34  ;;  %v10012_v34 = vld [vmem:[#allocation3 + $0xaa0] sm:$0xff] }
0x1007   :  { %10579 = vmatprep.subr.bf16.mxu0 %v9909_v0  ;;  %v10021_v0 = vld [vmem:[#allocation3 + $0xae8] sm:$0xff] }
0x1009   :  { %10338 = vmatpush1.bf16.msra.mxu1 %v10176_v36  ;;  %v9778_v36 = vld [vmem:[#allocation3 + $0x350] sm:$0xff] }
0x100a   :  { %10348 = vmatprep.subr.bf16.mxu1 %v9675_v43  ;;  %v9787_v43 = vld [vmem:[#allocation3 + $0x398] sm:$0xff]  ;;  %10580 = vmatpush1.bf16.msra.mxu0 %v9908_v5  ;;  %v10020_v5 = vld [vmem:[#allocation3 + $0xae0] sm:$0xff] }
0x100b   :  { %10581 = vmatprep.subr.bf16.mxu0 %v9917_v63  ;;  %v10029_v63 = vld [vmem:[#allocation3 + $0xb28] sm:$0xff] }
0x100c   :  { %10340 = vmatmul.mubr.bf16.vlgmr.msra.gmra.mrb[60].mxu1 %v14635_v17 }
0x100d   :  { %10349 = vmatpush1.bf16.msra.mxu1 %v9674_v46  ;;  %10380 = vmatprep.mubr.bf16.mxu1 %v14599_v62  ;;  %v9786_v46 = vld [vmem:[#allocation3 + $0x390] sm:$0xff] }
0x100e   :  { %10350 = vmatprep.subr.bf16.mxu1 %v9683_v48  ;;  %v9795_v48 = vld [vmem:[#allocation3 + $0x3d8] sm:$0xff]  ;;  %10582 = vmatpush1.bf16.msra.mxu0 %v9916_v2  ;;  %v10028_v2 = vld [vmem:[#allocation3 + $0xb20] sm:$0xff] }
0x100f   :  { %10583 = vmatprep.subr.bf16.mxu0 %v9925_v14  ;;  %v10037_v14 = vld [vmem:[#allocation3 + $0xb68] sm:$0xff] }
0x1011   :  { %10351 = vmatpush1.bf16.msra.mxu1 %v9682_v53  ;;  %v9794_v53 = vld [vmem:[#allocation3 + $0x3d0] sm:$0xff] }
0x1012   :  { %10352 = vmatprep.subr.bf16.mxu1 %v9691_v3  ;;  %v9803_v3 = vld [vmem:[#allocation3 + $0x418] sm:$0xff]  ;;  %10584 = vmatpush1.bf16.msra.mxu0 %v9924_v60  ;;  %v10036_v60 = vld [vmem:[#allocation3 + $0xb60] sm:$0xff] }
0x1013   :  { %10594 = vmatprep.subr.bf16.mxu0 %v9933_v16  ;;  %v10045_v16 = vld [vmem:[#allocation3 + $0xba8] sm:$0xff] }
0x1015   :  { %10353 = vmatpush1.bf16.msra.mxu1 %v9690_v28  ;;  %v9802_v28 = vld [vmem:[#allocation3 + $0x410] sm:$0xff]  ;;  %10586 = vmatmul.mubr.bf16.vlgmr.msra.gmra.mrb[116].mxu0 %v14615_v19 }
0x1016   :  { %10354 = vmatprep.subr.bf16.mxu1 %v9699_v10  ;;  %v9811_v10 = vld [vmem:[#allocation3 + $0x458] sm:$0xff]  ;;  %10595 = vmatpush1.bf16.msra.mxu0 %v9932_v26  ;;  %v10044_v26 = vld [vmem:[#allocation3 + $0xba0] sm:$0xff] }
0x1017   :  { %10596 = vmatprep.subr.bf16.mxu0 %v9941_v13  ;;  %10626 = vmatprep.mubr.bf16.mxu0 %v14619_v20  ;;  %v10053_v13 = vld [vmem:[#allocation3 + $0xbe8] sm:$0xff] }
0x1019   :  { %10355 = vmatpush1.bf16.msra.mxu1 %v9698_v29  ;;  %v9810_v29 = vld [vmem:[#allocation3 + $0x450] sm:$0xff] }
0x101a   :  { %10356 = vmatprep.subr.bf16.mxu1 %v9707_v27  ;;  %v9819_v27 = vld [vmem:[#allocation3 + $0x498] sm:$0xff]  ;;  %10597 = vmatpush1.bf16.msra.mxu0 %v9940_v23  ;;  %v10052_v23 = vld [vmem:[#allocation3 + $0xbe0] sm:$0xff] }
0x101b   :  { %10598 = vmatprep.subr.bf16.mxu0 %v9949_v31  ;;  %v10061_v31 = vld [vmem:[#allocation3 + $0xc28] sm:$0xff] }
0x101d   :  { %10357 = vmatpush1.bf16.msra.mxu1 %v9706_v25  ;;  %v9818_v25 = vld [vmem:[#allocation3 + $0x490] sm:$0xff] }
0x101e   :  { %10358 = vmatprep.subr.bf16.mxu1 %v9715_v22  ;;  %v9827_v22 = vld [vmem:[#allocation3 + $0x4d8] sm:$0xff]  ;;  %10599 = vmatpush1.bf16.msra.mxu0 %v9948_v51  ;;  %v10060_v51 = vld [vmem:[#allocation3 + $0xc20] sm:$0xff] }
0x101f   :  { %10600 = vmatprep.subr.bf16.mxu0 %v9957_v38  ;;  %v10069_v38 = vld [vmem:[#allocation3 + $0xc68] sm:$0xff] }
0x1021   :  { %10359 = vmatpush1.bf16.msra.mxu1 %v9714_v40  ;;  %v9826_v40 = vld [vmem:[#allocation3 + $0x4d0] sm:$0xff] }
0x1022   :  { %10360 = vmatprep.subr.bf16.mxu1 %v9723_v15  ;;  %v9835_v15 = vld [vmem:[#allocation3 + $0x518] sm:$0xff]  ;;  %10601 = vmatpush1.bf16.msra.mxu0 %v9956_v39  ;;  %v10068_v39 = vld [vmem:[#allocation3 + $0xc60] sm:$0xff] }
0x1023   :  { %10602 = vmatprep.subr.bf16.mxu0 %v9965_v42  ;;  %v10077_v42 = vld [vmem:[#allocation3 + $0xca8] sm:$0xff] }
0x1025   :  { %10361 = vmatpush1.bf16.msra.mxu1 %v9722_v45  ;;  %v9834_v45 = vld [vmem:[#allocation3 + $0x510] sm:$0xff] }
0x1026   :  { %10362 = vmatprep.subr.bf16.mxu1 %v9731_v49  ;;  %v9843_v49 = vld [vmem:[#allocation3 + $0x558] sm:$0xff]  ;;  %10603 = vmatpush1.bf16.msra.mxu0 %v9964_v44  ;;  %v10076_v44 = vld [vmem:[#allocation3 + $0xca0] sm:$0xff] }
0x1027   :  { %10604 = vmatprep.subr.bf16.mxu0 %v9973_v52  ;;  %v10085_v52 = vld [vmem:[#allocation3 + $0xce8] sm:$0xff] }
0x1029   :  { %10363 = vmatpush1.bf16.msra.mxu1 %v9730_v56  ;;  %v9972_v56 = vld [vmem:[#allocation3 + $0x960] sm:$0xff] }
0x102a   :  { %10364 = vmatprep.subr.bf16.mxu1 %v9739_v54  ;;  %v9851_v54 = vld [vmem:[#allocation3 + $0x598] sm:$0xff]  ;;  %10605 = vmatpush1.bf16.msra.mxu0 %v9972_v56  ;;  %v9954_v56 = vld [vmem:[#allocation3 + $0x8d0] sm:$0xff] }
0x102b   :  { %10606 = vmatprep.subr.bf16.mxu0 %v9981_v61  ;;  %v10093_v61 = vld [vmem:[#allocation3 + $0xd28] sm:$0xff] }
0x102d   :  { %10365 = vmatpush1.bf16.msra.mxu1 %v9738_v41  ;;  %v9980_v41 = vld [vmem:[#allocation3 + $0x9a0] sm:$0xff] }
0x102e   :  { %10366 = vmatprep.subr.bf16.mxu1 %v9747_v1  ;;  %v9859_v1 = vld [vmem:[#allocation3 + $0x5d8] sm:$0xff]  ;;  %10607 = vmatpush1.bf16.msra.mxu0 %v9980_v41  ;;  %v9962_v41 = vld [vmem:[#allocation3 + $0x910] sm:$0xff] }
0x102f   :  { %10608 = vmatprep.subr.bf16.mxu0 %v9989_v4  ;;  %v10101_v4 = vld [vmem:[#allocation3 + $0xd68] sm:$0xff] }
0x1031   :  { %10367 = vmatpush1.bf16.msra.mxu1 %v9746_v8  ;;  %v9858_v8 = vld [vmem:[#allocation3 + $0x5d0] sm:$0xff] }
0x1032   :  { %10368 = vmatprep.subr.bf16.mxu1 %v9755_v7  ;;  %v9867_v7 = vld [vmem:[#allocation3 + $0x618] sm:$0xff]  ;;  %10609 = vmatpush1.bf16.msra.mxu0 %v9988_v50  ;;  %v10100_v50 = vld [vmem:[#allocation3 + $0xd60] sm:$0xff] }
0x1033   :  { %10610 = vmatprep.subr.bf16.mxu0 %v9997_v11  ;;  %v10109_v11 = vld [vmem:[#allocation3 + $0xda8] sm:$0xff] }
0x1035   :  { %10369 = vmatpush1.bf16.msra.mxu1 %v9754_v35  ;;  %v9866_v35 = vld [vmem:[#allocation3 + $0x610] sm:$0xff] }
0x1036   :  { %10370 = vmatprep.subr.bf16.mxu1 %v9763_v58  ;;  %v9875_v58 = vld [vmem:[#allocation3 + $0x658] sm:$0xff]  ;;  %10611 = vmatpush1.bf16.msra.mxu0 %v9996_v6  ;;  %v10108_v6 = vld [vmem:[#allocation3 + $0xda0] sm:$0xff] }
0x1037   :  { %10612 = vmatprep.subr.bf16.mxu0 %v10005_v21  ;;  %v10117_v21 = vld [vmem:[#allocation3 + $0xde8] sm:$0xff] }
0x1039   :  { %10371 = vmatpush1.bf16.msra.mxu1 %v9762_v24  ;;  %v9874_v24 = vld [vmem:[#allocation3 + $0x650] sm:$0xff] }
0x103a   :  { %10372 = vmatprep.subr.bf16.mxu1 %v9771_v12  ;;  %v9883_v12 = vld [vmem:[#allocation3 + $0x698] sm:$0xff]  ;;  %10613 = vmatpush1.bf16.msra.mxu0 %v10004_v9  ;;  %v10116_v9 = vld [vmem:[#allocation3 + $0xde0] sm:$0xff] }
0x103b   :  { %10614 = vmatprep.subr.bf16.mxu0 %v10013_v33  ;;  %v10125_v33 = vld [vmem:[#allocation3 + $0xe28] sm:$0xff] }
0x103d   :  { %10373 = vmatpush1.bf16.msra.mxu1 %v9770_v47  ;;  %v9882_v47 = vld [vmem:[#allocation3 + $0x690] sm:$0xff] }
0x103e   :  { %10374 = vmatprep.subr.bf16.mxu1 %v9779_v37  ;;  %v9891_v37 = vld [vmem:[#allocation3 + $0x6d8] sm:$0xff]  ;;  %10615 = vmatpush1.bf16.msra.mxu0 %v10012_v34  ;;  %v10124_v34 = vld [vmem:[#allocation3 + $0xe20] sm:$0xff] }
0x103f   :  { %10616 = vmatprep.subr.bf16.mxu0 %v10021_v0  ;;  %v10133_v0 = vld [vmem:[#allocation3 + $0xe68] sm:$0xff] }
0x1041   :  { %10375 = vmatpush1.bf16.msra.mxu1 %v9778_v36  ;;  %v9890_v36 = vld [vmem:[#allocation3 + $0x6d0] sm:$0xff] }
0x1042   :  { %10376 = vmatprep.subr.bf16.mxu1 %v9787_v43  ;;  %v9899_v43 = vld [vmem:[#allocation3 + $0x718] sm:$0xff]  ;;  %10617 = vmatpush1.bf16.msra.mxu0 %v10020_v5  ;;  %v10132_v5 = vld [vmem:[#allocation3 + $0xe60] sm:$0xff] }
0x1043   :  { %10618 = vmatprep.subr.bf16.mxu0 %v10029_v63  ;;  %v10141_v63 = vld [vmem:[#allocation3 + $0xea8] sm:$0xff] }
0x1045   :  { %10377 = vmatpush1.bf16.msra.mxu1 %v9786_v46  ;;  %v9898_v46 = vld [vmem:[#allocation3 + $0x710] sm:$0xff] }
0x1046   :  { %10378 = vmatprep.subr.bf16.mxu1 %v9795_v48  ;;  %v9907_v48 = vld [vmem:[#allocation3 + $0x758] sm:$0xff]  ;;  %10619 = vmatpush1.bf16.msra.mxu0 %v10028_v2  ;;  %v10140_v2 = vld [vmem:[#allocation3 + $0xea0] sm:$0xff] }
0x1047   :  { %10620 = vmatprep.subr.bf16.mxu0 %v10037_v14  ;;  %v10149_v14 = vld [vmem:[#allocation3 + $0xee8] sm:$0xff] }
0x1049   :  { %10379 = vmatpush1.bf16.msra.mxu1 %v9794_v53  ;;  %v9906_v53 = vld [vmem:[#allocation3 + $0x750] sm:$0xff] }
0x104a   :  { %10389 = vmatprep.subr.bf16.mxu1 %v9803_v3  ;;  %v9915_v3 = vld [vmem:[#allocation3 + $0x798] sm:$0xff]  ;;  %10621 = vmatpush1.bf16.msra.mxu0 %v10036_v60  ;;  %v10148_v60 = vld [vmem:[#allocation3 + $0xee0] sm:$0xff] }
0x104b   :  { %10622 = vmatprep.subr.bf16.mxu0 %v10045_v16  ;;  %v10157_v16 = vld [vmem:[#allocation3 + $0xf28] sm:$0xff] }
0x104c   :  { %10381 = vmatmul.mubr.bf16.vlgmr.msra.gmra.mrb[64].mxu1 %v14605_v55 }
0x104d   :  { %10390 = vmatpush1.bf16.msra.mxu1 %v9802_v28  ;;  %10421 = vmatprep.mubr.bf16.mxu1 %v14609_v18  ;;  %v9914_v28 = vld [vmem:[#allocation3 + $0x790] sm:$0xff] }
0x104e   :  { %10391 = vmatprep.subr.bf16.mxu1 %v9811_v10  ;;  %v9923_v10 = vld [vmem:[#allocation3 + $0x7d8] sm:$0xff]  ;;  %10623 = vmatpush1.bf16.msra.mxu0 %v10044_v26  ;;  %v10156_v26 = vld [vmem:[#allocation3 + $0xf20] sm:$0xff] }
0x104f   :  { %10624 = vmatprep.subr.bf16.mxu0 %v10053_v13  ;;  %v10165_v13 = vld [vmem:[#allocation3 + $0xf68] sm:$0xff] }
0x1051   :  { %10392 = vmatpush1.bf16.msra.mxu1 %v9810_v29  ;;  %v9922_v29 = vld [vmem:[#allocation3 + $0x7d0] sm:$0xff] }
0x1052   :  { %10393 = vmatprep.subr.bf16.mxu1 %v9819_v27  ;;  %v9931_v27 = vld [vmem:[#allocation3 + $0x818] sm:$0xff]  ;;  %10625 = vmatpush1.bf16.msra.mxu0 %v10052_v23  ;;  %v10164_v23 = vld [vmem:[#allocation3 + $0xf60] sm:$0xff] }
0x1053   :  { %10635 = vmatprep.subr.bf16.mxu0 %v10061_v31  ;;  %v10173_v31 = vld [vmem:[#allocation3 + $0xfa8] sm:$0xff] }
0x1055   :  { %10394 = vmatpush1.bf16.msra.mxu1 %v9818_v25  ;;  %v9930_v25 = vld [vmem:[#allocation3 + $0x810] sm:$0xff]  ;;  %10627 = vmatmul.mubr.bf16.vlgmr.msra.gmra.mrb[116].mxu0 %v14625_v30 }
0x1056   :  { %10395 = vmatprep.subr.bf16.mxu1 %v9827_v22  ;;  %v9939_v22 = vld [vmem:[#allocation3 + $0x858] sm:$0xff]  ;;  %10636 = vmatpush1.bf16.msra.mxu0 %v10060_v51  ;;  %v10172_v51 = vld [vmem:[#allocation3 + $0xfa0] sm:$0xff] }
0x1057   :  { %10637 = vmatprep.subr.bf16.mxu0 %v10069_v38  ;;  %10667 = vmatprep.mubr.bf16.mxu0 %v14629_v32  ;;  %v10181_v38 = vld [vmem:[#allocation3 + $0xfe8] sm:$0xff] }
0x1059   :  { %10396 = vmatpush1.bf16.msra.mxu1 %v9826_v40  ;;  %v9938_v40 = vld [vmem:[#allocation3 + $0x850] sm:$0xff] }
0x105a   :  { %10397 = vmatprep.subr.bf16.mxu1 %v9835_v15  ;;  %v9947_v15 = vld [vmem:[#allocation3 + $0x898] sm:$0xff]  ;;  %10638 = vmatpush1.bf16.msra.mxu0 %v10068_v39  ;;  %v10180_v39 = vld [vmem:[#allocation3 + $0xfe0] sm:$0xff] }
0x105b   :  { %10639 = vmatprep.subr.bf16.mxu0 %v10077_v42  ;;  %v10058_v42 = vld [vmem:[#allocation3 + $0xc10] sm:$0xff] }
0x105d   :  { %10398 = vmatpush1.bf16.msra.mxu1 %v9834_v45  ;;  %v9946_v45 = vld [vmem:[#allocation3 + $0x890] sm:$0xff] }
0x105e   :  { %10399 = vmatprep.subr.bf16.mxu1 %v9843_v49  ;;  %v9955_v49 = vld [vmem:[#allocation3 + $0x8d8] sm:$0xff]  ;;  %10640 = vmatpush1.bf16.msra.mxu0 %v10076_v44 }
0x105f   :  { %10641 = vmatprep.subr.bf16.mxu0 %v10085_v52  ;;  %v10067_v44 = vld [vmem:[#allocation3 + $0xc58] sm:$0xff]  ;;  %v10074_v52 = vld [vmem:[#allocation3 + $0xc90] sm:$0xff] }
0x1061   :  { %10400 = vmatpush1.bf16.msra.mxu1 %v9842_v59  ;;  %v10084_v59 = vld [vmem:[#allocation3 + $0xce0] sm:$0xff] }
0x1062   :  { %10401 = vmatprep.subr.bf16.mxu1 %v9851_v54  ;;  %v9963_v54 = vld [vmem:[#allocation3 + $0x918] sm:$0xff]  ;;  %10642 = vmatpush1.bf16.msra.mxu0 %v10084_v59 }
0x1063   :  { %10643 = vmatprep.subr.bf16.mxu0 %v10093_v61  ;;  %v10083_v59 = vld [vmem:[#allocation3 + $0xcd8] sm:$0xff]  ;;  %v10090_v61 = vld [vmem:[#allocation3 + $0xd10] sm:$0xff] }
0x1065   :  { %10402 = vmatpush1.bf16.msra.mxu1 %v9850_v57  ;;  %v10092_v57 = vld [vmem:[#allocation3 + $0xd20] sm:$0xff] }
0x1066   :  { %10403 = vmatprep.subr.bf16.mxu1 %v9859_v1  ;;  %v9971_v1 = vld [vmem:[#allocation3 + $0x958] sm:$0xff]  ;;  %10644 = vmatpush1.bf16.msra.mxu0 %v10092_v57 }
0x1067   :  { %10645 = vmatprep.subr.bf16.mxu0 %v10101_v4  ;;  %v10099_v57 = vld [vmem:[#allocation3 + $0xd58] sm:$0xff] }
0x1068   :  { %v10107_v4 = vld [vmem:[#allocation3 + $0xd98] sm:$0xff] }
0x1069   :  { %10404 = vmatpush1.bf16.msra.mxu1 %v9858_v8  ;;  %v9970_v8 = vld [vmem:[#allocation3 + $0x950] sm:$0xff] }
0x106a   :  { %10405 = vmatprep.subr.bf16.mxu1 %v9867_v7  ;;  %v9979_v7 = vld [vmem:[#allocation3 + $0x998] sm:$0xff]  ;;  %10646 = vmatpush1.bf16.msra.mxu0 %v10100_v50 }
0x106b   :  { %10647 = vmatprep.subr.bf16.mxu0 %v10109_v11 }
0x106d   :  { %10406 = vmatpush1.bf16.msra.mxu1 %v9866_v35  ;;  %v9978_v35 = vld [vmem:[#allocation3 + $0x990] sm:$0xff] }
0x106e   :  { %10407 = vmatprep.subr.bf16.mxu1 %v9875_v58  ;;  %v9987_v58 = vld [vmem:[#allocation3 + $0x9d8] sm:$0xff]  ;;  %10648 = vmatpush1.bf16.msra.mxu0 %v10108_v6  ;;  %v10106_v6 = vld [vmem:[#allocation3 + $0xd90] sm:$0xff] }
0x106f   :  { %10649 = vmatprep.subr.bf16.mxu0 %v10117_v21  ;;  %v10123_v21 = vld [vmem:[#allocation3 + $0xe18] sm:$0xff] }
0x1071   :  { %10408 = vmatpush1.bf16.msra.mxu1 %v9874_v24  ;;  %v9986_v24 = vld [vmem:[#allocation3 + $0x9d0] sm:$0xff] }
0x1072   :  { %10409 = vmatprep.subr.bf16.mxu1 %v9883_v12  ;;  %v9995_v12 = vld [vmem:[#allocation3 + $0xa18] sm:$0xff]  ;;  %10650 = vmatpush1.bf16.msra.mxu0 %v10116_v9  ;;  %v10122_v9 = vld [vmem:[#allocation3 + $0xe10] sm:$0xff] }
0x1073   :  { %10651 = vmatprep.subr.bf16.mxu0 %v10125_v33  ;;  %v10139_v33 = vld [vmem:[#allocation3 + $0xe98] sm:$0xff] }
0x1075   :  { %10410 = vmatpush1.bf16.msra.mxu1 %v9882_v47  ;;  %v9994_v47 = vld [vmem:[#allocation3 + $0xa10] sm:$0xff] }
0x1076   :  { %10411 = vmatprep.subr.bf16.mxu1 %v9891_v37  ;;  %v10003_v37 = vld [vmem:[#allocation3 + $0xa58] sm:$0xff]  ;;  %10652 = vmatpush1.bf16.msra.mxu0 %v10124_v34  ;;  %v10138_v34 = vld [vmem:[#allocation3 + $0xe90] sm:$0xff] }
0x1077   :  { %10653 = vmatprep.subr.bf16.mxu0 %v10133_v0  ;;  %v10155_v0 = vld [vmem:[#allocation3 + $0xf18] sm:$0xff] }
0x1079   :  { %10412 = vmatpush1.bf16.msra.mxu1 %v9890_v36  ;;  %v10002_v36 = vld [vmem:[#allocation3 + $0xa50] sm:$0xff] }
0x107a   :  { %10413 = vmatprep.subr.bf16.mxu1 %v9899_v43  ;;  %v10011_v43 = vld [vmem:[#allocation3 + $0xa98] sm:$0xff]  ;;  %10654 = vmatpush1.bf16.msra.mxu0 %v10132_v5  ;;  %v10154_v5 = vld [vmem:[#allocation3 + $0xf10] sm:$0xff] }
0x107b   :  { %10655 = vmatprep.subr.bf16.mxu0 %v10141_v63  ;;  %v10171_v63 = vld [vmem:[#allocation3 + $0xf98] sm:$0xff] }
0x107d   :  { %10414 = vmatpush1.bf16.msra.mxu1 %v9898_v46  ;;  %v10010_v46 = vld [vmem:[#allocation3 + $0xa90] sm:$0xff] }
0x107e   :  { %10415 = vmatprep.subr.bf16.mxu1 %v9907_v48  ;;  %v10019_v48 = vld [vmem:[#allocation3 + $0xad8] sm:$0xff]  ;;  %10656 = vmatpush1.bf16.msra.mxu0 %v10140_v2  ;;  %v10170_v2 = vld [vmem:[#allocation3 + $0xf90] sm:$0xff] }
0x107f   :  { %10657 = vmatprep.subr.bf16.mxu0 %v10149_v14  ;;  %v9679_v14 = vld [vmem:[#allocation3 + $0x38] sm:$0xff] }
0x1081   :  { %10416 = vmatpush1.bf16.msra.mxu1 %v9906_v53  ;;  %v10018_v53 = vld [vmem:[#allocation3 + $0xad0] sm:$0xff] }
0x1082   :  { %10417 = vmatprep.subr.bf16.mxu1 %v9915_v3  ;;  %v10027_v3 = vld [vmem:[#allocation3 + $0xb18] sm:$0xff]  ;;  %10658 = vmatpush1.bf16.msra.mxu0 %v10148_v60  ;;  %v9678_v60 = vld [vmem:[#allocation3 + $0x30] sm:$0xff] }
0x1083   :  { %10659 = vmatprep.subr.bf16.mxu0 %v10157_v16  ;;  %v9695_v16 = vld [vmem:[#allocation3 + $0xb8] sm:$0xff] }
0x1085   :  { %10418 = vmatpush1.bf16.msra.mxu1 %v9914_v28  ;;  %v10026_v28 = vld [vmem:[#allocation3 + $0xb10] sm:$0xff] }
0x1086   :  { %10419 = vmatprep.subr.bf16.mxu1 %v9923_v10  ;;  %v10035_v10 = vld [vmem:[#allocation3 + $0xb58] sm:$0xff]  ;;  %10660 = vmatpush1.bf16.msra.mxu0 %v10156_v26  ;;  %v9694_v26 = vld [vmem:[#allocation3 + $0xb0] sm:$0xff] }
0x1087   :  { %10661 = vmatprep.subr.bf16.mxu0 %v10165_v13  ;;  %v9711_v13 = vld [vmem:[#allocation3 + $0x138] sm:$0xff] }
0x1089   :  { %10420 = vmatpush1.bf16.msra.mxu1 %v9922_v29  ;;  %v10034_v29 = vld [vmem:[#allocation3 + $0xb50] sm:$0xff] }
0x108a   :  { %10430 = vmatprep.subr.bf16.mxu1 %v9931_v27  ;;  %v10043_v27 = vld [vmem:[#allocation3 + $0xb98] sm:$0xff]  ;;  %10662 = vmatpush1.bf16.msra.mxu0 %v10164_v23  ;;  %v9710_v23 = vld [vmem:[#allocation3 + $0x130] sm:$0xff] }
0x108b   :  { %10663 = vmatprep.subr.bf16.mxu0 %v10173_v31  ;;  %v9727_v31 = vld [vmem:[#allocation3 + $0x1b8] sm:$0xff] }
0x108c   :  { %10422 = vmatmul.mubr.bf16.vlgmr.msra.gmra.mrb[64].mxu1 %v14615_v19 }
0x108d   :  { %10431 = vmatpush1.bf16.msra.mxu1 %v9930_v25  ;;  %10462 = vmatprep.mubr.bf16.mxu1 %v14619_v20  ;;  %v10042_v25 = vld [vmem:[#allocation3 + $0xb90] sm:$0xff] }
0x108e   :  { %10432 = vmatprep.subr.bf16.mxu1 %v9939_v22  ;;  %v10051_v22 = vld [vmem:[#allocation3 + $0xbd8] sm:$0xff]  ;;  %10664 = vmatpush1.bf16.msra.mxu0 %v10172_v51 }
0x108f   :  { %10665 = vmatprep.subr.bf16.mxu0 %v10181_v38  ;;  %v9735_v51 = vld [vmem:[#allocation3 + $0x1f8] sm:$0xff]  ;;  %v9742_v38 = vld [vmem:[#allocation3 + $0x230] sm:$0xff] }
0x1091   :  { %10433 = vmatpush1.bf16.msra.mxu1 %v9938_v40  ;;  %v10050_v40 = vld [vmem:[#allocation3 + $0xbd0] sm:$0xff] }
0x1092   :  { %10434 = vmatprep.subr.bf16.mxu1 %v9947_v15  ;;  %v10059_v15 = vld [vmem:[#allocation3 + $0xc18] sm:$0xff]  ;;  %10666 = vmatpush1.bf16.msra.mxu0 %v10180_v39 }
0x1093   :  { %v9751_v39 = vld [vmem:[#allocation3 + $0x278] sm:$0xff] }
0x1095   :  { %10435 = vmatpush1.bf16.msra.mxu1 %v9946_v45  ;;  %10668 = vmatmul.mubr.bf16.vlgmr.msra.gmra.mrb[116].mxu0 %v14635_v17  ;;  %v10066_v45 = vld [vmem:[#allocation3 + $0xc50] sm:$0xff] }
0x1096   :  { %10436 = vmatprep.subr.bf16.mxu1 %v9955_v49  ;;  %v10075_v49 = vld [vmem:[#allocation3 + $0xc98] sm:$0xff] }
0x1099   :  { %10437 = vmatpush1.bf16.msra.mxu1 %v9954_v56  ;;  %v10082_v56 = vld [vmem:[#allocation3 + $0xcd0] sm:$0xff] }
0x109a   :  { %10438 = vmatprep.subr.bf16.mxu1 %v9963_v54  ;;  %v10091_v54 = vld [vmem:[#allocation3 + $0xd18] sm:$0xff] }
0x109d   :  { %10439 = vmatpush1.bf16.msra.mxu1 %v9962_v41  ;;  %v10098_v41 = vld [vmem:[#allocation3 + $0xd50] sm:$0xff] }
0x109e   :  { %10440 = vmatprep.subr.bf16.mxu1 %v9971_v1 }
0x10a1   :  { %10441 = vmatpush1.bf16.msra.mxu1 %v9970_v8 }
0x10a2   :  { %10442 = vmatprep.subr.bf16.mxu1 %v9979_v7 }
0x10a5   :  { %10443 = vmatpush1.bf16.msra.mxu1 %v9978_v35  ;;  %v10115_v35 = vld [vmem:[#allocation3 + $0xdd8] sm:$0xff] }
0x10a6   :  { %10444 = vmatprep.subr.bf16.mxu1 %v9987_v58  ;;  %v10114_v58 = vld [vmem:[#allocation3 + $0xdd0] sm:$0xff] }
0x10a9   :  { %10445 = vmatpush1.bf16.msra.mxu1 %v9986_v24  ;;  %v10131_v24 = vld [vmem:[#allocation3 + $0xe58] sm:$0xff] }
0x10aa   :  { %10446 = vmatprep.subr.bf16.mxu1 %v9995_v12  ;;  %v10130_v12 = vld [vmem:[#allocation3 + $0xe50] sm:$0xff] }
0x10ad   :  { %10447 = vmatpush1.bf16.msra.mxu1 %v9994_v47  ;;  %v10147_v47 = vld [vmem:[#allocation3 + $0xed8] sm:$0xff] }
0x10ae   :  { %10448 = vmatprep.subr.bf16.mxu1 %v10003_v37  ;;  %v10146_v37 = vld [vmem:[#allocation3 + $0xed0] sm:$0xff] }
0x10b1   :  { %10449 = vmatpush1.bf16.msra.mxu1 %v10002_v36  ;;  %v10163_v36 = vld [vmem:[#allocation3 + $0xf58] sm:$0xff] }
0x10b2   :  { %10450 = vmatprep.subr.bf16.mxu1 %v10011_v43  ;;  %v10162_v43 = vld [vmem:[#allocation3 + $0xf50] sm:$0xff] }
0x10b5   :  { %10451 = vmatpush1.bf16.msra.mxu1 %v10010_v46  ;;  %v10179_v46 = vld [vmem:[#allocation3 + $0xfd8] sm:$0xff] }
0x10b6   :  { %10452 = vmatprep.subr.bf16.mxu1 %v10019_v48  ;;  %v10178_v48 = vld [vmem:[#allocation3 + $0xfd0] sm:$0xff] }
0x10b9   :  { %10453 = vmatpush1.bf16.msra.mxu1 %v10018_v53  ;;  %v9687_v53 = vld [vmem:[#allocation3 + $0x78] sm:$0xff] }
0x10ba   :  { %10454 = vmatprep.subr.bf16.mxu1 %v10027_v3  ;;  %v9686_v3 = vld [vmem:[#allocation3 + $0x70] sm:$0xff] }
0x10bd   :  { %10455 = vmatpush1.bf16.msra.mxu1 %v10026_v28  ;;  %v9703_v28 = vld [vmem:[#allocation3 + $0xf8] sm:$0xff] }
0x10be   :  { %10456 = vmatprep.subr.bf16.mxu1 %v10035_v10  ;;  %v9702_v10 = vld [vmem:[#allocation3 + $0xf0] sm:$0xff] }
0x10c1   :  { %10457 = vmatpush1.bf16.msra.mxu1 %v10034_v29  ;;  %v9719_v29 = vld [vmem:[#allocation3 + $0x178] sm:$0xff] }
0x10c2   :  { %10458 = vmatprep.subr.bf16.mxu1 %v10043_v27  ;;  %v9718_v27 = vld [vmem:[#allocation3 + $0x170] sm:$0xff] }
0x10c5   :  { %10459 = vmatpush1.bf16.msra.mxu1 %v10042_v25  ;;  %v9734_v25 = vld [vmem:[#allocation3 + $0x1f0] sm:$0xff] }
0x10c6   :  { %10460 = vmatprep.subr.bf16.mxu1 %v10051_v22  ;;  %v9743_v22 = vld [vmem:[#allocation3 + $0x238] sm:$0xff] }
0x10c9   :  { %10461 = vmatpush1.bf16.msra.mxu1 %v10050_v40  ;;  %v9750_v40 = vld [vmem:[#allocation3 + $0x270] sm:$0xff] }
0x10ca   :  { %10471 = vmatprep.subr.bf16.mxu1 %v10059_v15  ;;  %v9759_v15 = vld [vmem:[#allocation3 + $0x2b8] sm:$0xff] }
0x10cc   :  { %10463 = vmatmul.mubr.bf16.vlgmr.msra.gmra.mrb[64].mxu1 %v14625_v30 }
0x10cd   :  { %10472 = vmatpush1.bf16.msra.mxu1 %v10058_v42  ;;  %10503 = vmatprep.mubr.bf16.mxu1 %v14629_v32  ;;  %v9758_v42 = vld [vmem:[#allocation3 + $0x2b0] sm:$0xff] }
0x10ce   :  { %10473 = vmatprep.subr.bf16.mxu1 %v10067_v44  ;;  %v9767_v44 = vld [vmem:[#allocation3 + $0x2f8] sm:$0xff] }
0x10d1   :  { %10474 = vmatpush1.bf16.msra.mxu1 %v10066_v45  ;;  %v9766_v45 = vld [vmem:[#allocation3 + $0x2f0] sm:$0xff] }
0x10d2   :  { %10475 = vmatprep.subr.bf16.mxu1 %v10075_v49  ;;  %v9775_v49 = vld [vmem:[#allocation3 + $0x338] sm:$0xff] }
0x10d5   :  { %10476 = vmatpush1.bf16.msra.mxu1 %v10074_v52  ;;  %v9774_v52 = vld [vmem:[#allocation3 + $0x330] sm:$0xff] }
0x10d6   :  { %10477 = vmatprep.subr.bf16.mxu1 %v10083_v59  ;;  %v9783_v59 = vld [vmem:[#allocation3 + $0x378] sm:$0xff] }
0x10d9   :  { %10478 = vmatpush1.bf16.msra.mxu1 %v10082_v56  ;;  %v9782_v56 = vld [vmem:[#allocation3 + $0x370] sm:$0xff] }
0x10da   :  { %10479 = vmatprep.subr.bf16.mxu1 %v10091_v54  ;;  %v9791_v54 = vld [vmem:[#allocation3 + $0x3b8] sm:$0xff] }
0x10dd   :  { %10480 = vmatpush1.bf16.msra.mxu1 %v10090_v61  ;;  %v9790_v61 = vld [vmem:[#allocation3 + $0x3b0] sm:$0xff] }
0x10de   :  { %10481 = vmatprep.subr.bf16.mxu1 %v10099_v57  ;;  %v9799_v57 = vld [vmem:[#allocation3 + $0x3f8] sm:$0xff] }
0x10df   :  { %v14652_v1 = vpop.f32.mrb[60].mxu1 }
0x10e0   :  { %v14654_v50 = vpop.f32.mrb[61].mxu1 }
0x10e1   :  { %v10848_v8 = vcombine.low %v14652_v1, %v14654_v50  ;;  %v10345_v7 = vpop.f32.mrb[62].mxu1  ;;  %10482 = vmatpush1.bf16.msra.mxu1 %v10098_v41  ;;  %v9798_v41 = vld [vmem:[#allocation3 + $0x3f0] sm:$0xff]  ;;  %v10151_v50 = vld [vmem:[#allocation3 + $0xef8] sm:$0xff] }
0x10e2   :  { %v10346_v11 = vpop.f32.mrb[63].mxu1  ;;  %10483 = vmatprep.subr.bf16.mxu1 %v10107_v4  ;;  %v9807_v4 = vld [vmem:[#allocation3 + $0x438] sm:$0xff]  ;;  %v9806_v7 = vld [vmem:[#allocation3 + $0x430] sm:$0xff] }
0x10e3   :  { %v9815_v11 = vld [vmem:[#allocation3 + $0x478] sm:$0xff]  ;;  %v10142_v1 = vld [vmem:[#allocation3 + $0xeb0] sm:$0xff] }
0x10e5   :  { %10484 = vmatpush1.bf16.msra.mxu1 %v10106_v6  ;;  %v9814_v6 = vld [vmem:[#allocation3 + $0x470] sm:$0xff] }
0x10e6   :  { %10485 = vmatprep.subr.bf16.mxu1 %v10115_v35  ;;  %v9823_v35 = vld [vmem:[#allocation3 + $0x4b8] sm:$0xff] }
0x10e9   :  { %10486 = vmatpush1.bf16.msra.mxu1 %v10114_v58  ;;  %v9822_v58 = vld [vmem:[#allocation3 + $0x4b0] sm:$0xff] }
0x10ea   :  { %10487 = vmatprep.subr.bf16.mxu1 %v10123_v21  ;;  %v9831_v21 = vld [vmem:[#allocation3 + $0x4f8] sm:$0xff] }
0x10ed   :  { %10488 = vmatpush1.bf16.msra.mxu1 %v10122_v9  ;;  %v9830_v9 = vld [vmem:[#allocation3 + $0x4f0] sm:$0xff] }
0x10ee   :  { %10489 = vmatprep.subr.bf16.mxu1 %v10131_v24  ;;  %v9839_v24 = vld [vmem:[#allocation3 + $0x538] sm:$0xff] }
0x10f1   :  { %10490 = vmatpush1.bf16.msra.mxu1 %v10130_v12  ;;  %v9838_v12 = vld [vmem:[#allocation3 + $0x530] sm:$0xff] }
0x10f2   :  { %10491 = vmatprep.subr.bf16.mxu1 %v10139_v33  ;;  %v9847_v33 = vld [vmem:[#allocation3 + $0x578] sm:$0xff] }
0x10f5   :  { %10492 = vmatpush1.bf16.msra.mxu1 %v10138_v34  ;;  %v9855_v34 = vld [vmem:[#allocation3 + $0x5b8] sm:$0xff] }
0x10f6   :  { %10493 = vmatprep.subr.bf16.mxu1 %v10147_v47  ;;  %v9863_v47 = vld [vmem:[#allocation3 + $0x5f8] sm:$0xff] }
0x10f9   :  { %10494 = vmatpush1.bf16.msra.mxu1 %v10146_v37  ;;  %v9862_v37 = vld [vmem:[#allocation3 + $0x5f0] sm:$0xff] }
0x10fa   :  { %10495 = vmatprep.subr.bf16.mxu1 %v10155_v0  ;;  %v9871_v0 = vld [vmem:[#allocation3 + $0x638] sm:$0xff] }
0x10fd   :  { %10496 = vmatpush1.bf16.msra.mxu1 %v10154_v5  ;;  %v9870_v5 = vld [vmem:[#allocation3 + $0x630] sm:$0xff] }
0x10fe   :  { %10497 = vmatprep.subr.bf16.mxu1 %v10163_v36  ;;  %v9879_v36 = vld [vmem:[#allocation3 + $0x678] sm:$0xff] }
0x1101   :  { %10498 = vmatpush1.bf16.msra.mxu1 %v10162_v43  ;;  %v9878_v43 = vld [vmem:[#allocation3 + $0x670] sm:$0xff] }
0x1102   :  { %10499 = vmatprep.subr.bf16.mxu1 %v10171_v63  ;;  %v9887_v63 = vld [vmem:[#allocation3 + $0x6b8] sm:$0xff] }
0x1105   :  { %10500 = vmatpush1.bf16.msra.mxu1 %v10170_v2  ;;  %v9886_v2 = vld [vmem:[#allocation3 + $0x6b0] sm:$0xff] }
0x1106   :  { %10501 = vmatprep.subr.bf16.mxu1 %v10179_v46  ;;  %v9895_v46 = vld [vmem:[#allocation3 + $0x6f8] sm:$0xff] }
0x1109   :  { %10502 = vmatpush1.bf16.msra.mxu1 %v10178_v48  ;;  %v9894_v48 = vld [vmem:[#allocation3 + $0x6f0] sm:$0xff] }
0x110a   :  { %10676 = vmatprep.subr.bf16.mxu1 %v9679_v14  ;;  %v9903_v14 = vld [vmem:[#allocation3 + $0x738] sm:$0xff] }
0x110c   :  { %10504 = vmatmul.mubr.bf16.vlgmr.msra.gmra.mrb[64].mxu1 %v14635_v17 }
0x110d   :  { %10677 = vmatpush1.bf16.msra.mxu1 %v9678_v60  ;;  %10708 = vmatprep.mubr.bf16.mxu1 %v14599_v62  ;;  %v9726_v62 = vld [vmem:[#allocation3 + $0x1b0] sm:$0xff] }
0x110e   :  { %10678 = vmatprep.subr.bf16.mxu1 %v9687_v53  ;;  %v9902_v60 = vld [vmem:[#allocation3 + $0x730] sm:$0xff]  ;;  %v9911_v53 = vld [vmem:[#allocation3 + $0x778] sm:$0xff] }
0x1111   :  { %10679 = vmatpush1.bf16.msra.mxu1 %v9686_v3  ;;  %v9910_v3 = vld [vmem:[#allocation3 + $0x770] sm:$0xff] }
0x1112   :  { %10680 = vmatprep.subr.bf16.mxu1 %v9695_v16  ;;  %v9919_v16 = vld [vmem:[#allocation3 + $0x7b8] sm:$0xff] }
0x1115   :  { %10681 = vmatpush1.bf16.msra.mxu1 %v9694_v26  ;;  %v9918_v26 = vld [vmem:[#allocation3 + $0x7b0] sm:$0xff] }
0x1116   :  { %10682 = vmatprep.subr.bf16.mxu1 %v9703_v28  ;;  %v9927_v28 = vld [vmem:[#allocation3 + $0x7f8] sm:$0xff] }
0x1119   :  { %10683 = vmatpush1.bf16.msra.mxu1 %v9702_v10  ;;  %v9926_v10 = vld [vmem:[#allocation3 + $0x7f0] sm:$0xff] }
0x111a   :  { %10684 = vmatprep.subr.bf16.mxu1 %v9711_v13  ;;  %v9935_v13 = vld [vmem:[#allocation3 + $0x838] sm:$0xff] }
0x111d   :  { %10685 = vmatpush1.bf16.msra.mxu1 %v9710_v23  ;;  %v9934_v23 = vld [vmem:[#allocation3 + $0x830] sm:$0xff] }
0x111e   :  { %10686 = vmatprep.subr.bf16.mxu1 %v9719_v29  ;;  %v9943_v29 = vld [vmem:[#allocation3 + $0x878] sm:$0xff] }
0x1121   :  { %10687 = vmatpush1.bf16.msra.mxu1 %v9718_v27  ;;  %v9942_v27 = vld [vmem:[#allocation3 + $0x870] sm:$0xff] }
0x1122   :  { %10688 = vmatprep.subr.bf16.mxu1 %v9727_v31  ;;  %v9951_v31 = vld [vmem:[#allocation3 + $0x8b8] sm:$0xff] }
0x1125   :  { %10689 = vmatpush1.bf16.msra.mxu1 %v9726_v62  ;;  %v9950_v62 = vld [vmem:[#allocation3 + $0x8b0] sm:$0xff] }
0x1126   :  { %10690 = vmatprep.subr.bf16.mxu1 %v9735_v51  ;;  %v9959_v51 = vld [vmem:[#allocation3 + $0x8f8] sm:$0xff] }
0x1129   :  { %10691 = vmatpush1.bf16.msra.mxu1 %v9734_v25  ;;  %v9958_v25 = vld [vmem:[#allocation3 + $0x8f0] sm:$0xff] }
0x112a   :  { %10692 = vmatprep.subr.bf16.mxu1 %v9743_v22  ;;  %v9967_v22 = vld [vmem:[#allocation3 + $0x938] sm:$0xff] }
0x112d   :  { %10693 = vmatpush1.bf16.msra.mxu1 %v9742_v38  ;;  %v9966_v38 = vld [vmem:[#allocation3 + $0x930] sm:$0xff] }
0x112e   :  { %10694 = vmatprep.subr.bf16.mxu1 %v9751_v39  ;;  %v9975_v39 = vld [vmem:[#allocation3 + $0x978] sm:$0xff] }
0x1131   :  { %10695 = vmatpush1.bf16.msra.mxu1 %v9750_v40 }
0x1132   :  { %10696 = vmatprep.subr.bf16.mxu1 %v9759_v15 }
0x1135   :  { %10697 = vmatpush1.bf16.msra.mxu1 %v9758_v42 }
0x1136   :  { %10698 = vmatprep.subr.bf16.mxu1 %v9767_v44 }
0x1139   :  { %10699 = vmatpush1.bf16.msra.mxu1 %v9766_v45 }
0x113a   :  { %10700 = vmatprep.subr.bf16.mxu1 %v9775_v49  ;;  %v9982_v49 = vld [vmem:[#allocation3 + $0x9b0] sm:$0xff] }
0x113d   :  { %10701 = vmatpush1.bf16.msra.mxu1 %v9774_v52  ;;  %v9991_v52 = vld [vmem:[#allocation3 + $0x9f8] sm:$0xff] }
0x113e   :  { %10702 = vmatprep.subr.bf16.mxu1 %v9783_v59  ;;  %v9990_v59 = vld [vmem:[#allocation3 + $0x9f0] sm:$0xff] }
0x1141   :  { %10703 = vmatpush1.bf16.msra.mxu1 %v9782_v56  ;;  %v9999_v56 = vld [vmem:[#allocation3 + $0xa38] sm:$0xff] }
0x1142   :  { %10704 = vmatprep.subr.bf16.mxu1 %v9791_v54  ;;  %v9998_v54 = vld [vmem:[#allocation3 + $0xa30] sm:$0xff] }
0x1145   :  { %10705 = vmatpush1.bf16.msra.mxu1 %v9790_v61  ;;  %v10007_v61 = vld [vmem:[#allocation3 + $0xa78] sm:$0xff] }
0x1146   :  { %10706 = vmatprep.subr.bf16.mxu1 %v9799_v57  ;;  %v10006_v57 = vld [vmem:[#allocation3 + $0xa70] sm:$0xff] }
0x1149   :  { %10707 = vmatpush1.bf16.msra.mxu1 %v9798_v41  ;;  %v10015_v41 = vld [vmem:[#allocation3 + $0xab8] sm:$0xff] }
0x114a   :  { %10717 = vmatprep.subr.bf16.mxu1 %v9807_v4  ;;  %v10014_v4 = vld [vmem:[#allocation3 + $0xab0] sm:$0xff] }
0x114c   :  { %10709 = vmatmul.mubr.bf16.vlgmr.msra.gmra.mrb[68].mxu1 %v14605_v55  ;;  %v9846_v55 = vld [vmem:[#allocation3 + $0x570] sm:$0xff] }
0x114d   :  { %10718 = vmatpush1.bf16.msra.mxu1 %v9806_v7  ;;  %10749 = vmatprep.mubr.bf16.mxu1 %v14609_v18  ;;  %v9854_v18 = vld [vmem:[#allocation3 + $0x5b0] sm:$0xff]  ;;  %v10023_v7 = vld [vmem:[#allocation3 + $0xaf8] sm:$0xff] }
0x114e   :  { %10719 = vmatprep.subr.bf16.mxu1 %v9815_v11  ;;  %v10022_v11 = vld [vmem:[#allocation3 + $0xaf0] sm:$0xff] }
0x1151   :  { %10720 = vmatpush1.bf16.msra.mxu1 %v9814_v6  ;;  %v10031_v6 = vld [vmem:[#allocation3 + $0xb38] sm:$0xff] }
0x1152   :  { %10721 = vmatprep.subr.bf16.mxu1 %v9823_v35  ;;  %v10030_v35 = vld [vmem:[#allocation3 + $0xb30] sm:$0xff] }
0x1155   :  { %10722 = vmatpush1.bf16.msra.mxu1 %v9822_v58  ;;  %v10039_v58 = vld [vmem:[#allocation3 + $0xb78] sm:$0xff] }
0x1156   :  { %10723 = vmatprep.subr.bf16.mxu1 %v9831_v21  ;;  %v10038_v21 = vld [vmem:[#allocation3 + $0xb70] sm:$0xff] }
0x1159   :  { %10724 = vmatpush1.bf16.msra.mxu1 %v9830_v9  ;;  %v10047_v9 = vld [vmem:[#allocation3 + $0xbb8] sm:$0xff] }
0x115a   :  { %10725 = vmatprep.subr.bf16.mxu1 %v9839_v24  ;;  %v10046_v24 = vld [vmem:[#allocation3 + $0xbb0] sm:$0xff] }
0x115d   :  { %10726 = vmatpush1.bf16.msra.mxu1 %v9838_v12  ;;  %v10055_v12 = vld [vmem:[#allocation3 + $0xbf8] sm:$0xff] }
0x115e   :  { %10727 = vmatprep.subr.bf16.mxu1 %v9847_v33  ;;  %v10054_v33 = vld [vmem:[#allocation3 + $0xbf0] sm:$0xff] }
0x1161   :  { %10728 = vmatpush1.bf16.msra.mxu1 %v9846_v55  ;;  %v10063_v55 = vld [vmem:[#allocation3 + $0xc38] sm:$0xff] }
0x1162   :  { %10729 = vmatprep.subr.bf16.mxu1 %v9855_v34  ;;  %v10062_v34 = vld [vmem:[#allocation3 + $0xc30] sm:$0xff] }
0x1165   :  { %10730 = vmatpush1.bf16.msra.mxu1 %v9854_v18  ;;  %v10071_v18 = vld [vmem:[#allocation3 + $0xc78] sm:$0xff] }
0x1166   :  { %10731 = vmatprep.subr.bf16.mxu1 %v9863_v47  ;;  %v10070_v47 = vld [vmem:[#allocation3 + $0xc70] sm:$0xff] }
0x1168   :  { %v14664_v40 = vpop.f32.mrb[116].mxu0 }
0x1169   :  { %10732 = vmatpush1.bf16.msra.mxu1 %v9862_v37  ;;  %v14666_v15 = vpop.f32.mrb[117].mxu0  ;;  %v10079_v37 = vld [vmem:[#allocation3 + $0xcb8] sm:$0xff] }
0x116a   :  { %10733 = vmatprep.subr.bf16.mxu1 %v9871_v0  ;;  %v10865_v42 = vcombine.low %v14664_v40, %v14666_v15  ;;  %v10673_v44 = vpop.f32.mrb[118].mxu0  ;;  %v10078_v0 = vld [vmem:[#allocation3 + $0xcb0] sm:$0xff] }
0x116b   :  { %v10674_v45 = vpop.f32.mrb[119].mxu0  ;;  %v10158_v44 = vld [vmem:[#allocation3 + $0xf30] sm:$0xff] }
0x116c   :  { %v10167_v45 = vld [vmem:[#allocation3 + $0xf78] sm:$0xff] }
0x116d   :  { %10734 = vmatpush1.bf16.msra.mxu1 %v9870_v5  ;;  %v10087_v5 = vld [vmem:[#allocation3 + $0xcf8] sm:$0xff] }
0x116e   :  { %10735 = vmatprep.subr.bf16.mxu1 %v9879_v36  ;;  %v10086_v36 = vld [vmem:[#allocation3 + $0xcf0] sm:$0xff] }
0x1171   :  { %10736 = vmatpush1.bf16.msra.mxu1 %v9878_v43  ;;  %v13211_v43 = vmov 1983009808  }
0x1172   :  { %10737 = vmatprep.subr.bf16.mxu1 %v9887_v63  ;;  %v10851_v63 = vunpack.c.l.s4 %v13211_v43 }
0x1175   :  { %10738 = vmatpush1.bf16.msra.mxu1 %v9886_v2  ;;  %v10853_v2 = vlaneseq }
0x1176   :  { %10739 = vmatprep.subr.bf16.mxu1 %v9895_v46  ;;  %v10095_v46 = vld [vmem:[#allocation3 + $0xd38] sm:$0xff] }
0x1179   :  { %10740 = vmatpush1.bf16.msra.mxu1 %v9894_v48  ;;  %v10852_v48 = vunpack.c.0.s8 %v10851_v63 }
0x117a   :  { %10741 = vmatprep.subr.bf16.mxu1 %v9903_v14  ;;  %v10854_v14 = vshrl.u32 %v10853_v2, 7 }
0x117d   :  { %10742 = vmatpush1.bf16.msra.mxu1 %v9902_v60  ;;  %v10102_v60 = vld [vmem:[#allocation3 + $0xd70] sm:$0xff] }
0x117e   :  { %10743 = vmatprep.subr.bf16.mxu1 %v9911_v53  ;;  %v10855_v53 = vsub.s32 %v10852_v48, %v10854_v14 }
0x1181   :  { %10744 = vmatpush1.bf16.msra.mxu1 %v9910_v3 }
0x1182   :  { %10745 = vmatprep.subr.bf16.mxu1 %v9919_v16  ;;  %v10111_v16 = vld [vmem:[#allocation3 + $0xdb8] sm:$0xff] }
0x1185   :  { %10746 = vmatpush1.bf16.msra.mxu1 %v9918_v26 }
0x1186   :  { %10747 = vmatprep.subr.bf16.mxu1 %v9927_v28 }
0x1189   :  { %10748 = vmatpush1.bf16.msra.mxu1 %v9926_v10 }
0x118a   :  { %10758 = vmatprep.subr.bf16.mxu1 %v9935_v13 }
0x118c   :  { %10750 = vmatmul.mubr.bf16.vlgmr.msra.gmra.mrb[68].mxu1 %v14615_v19  ;;  %v9974_v19 = vld [vmem:[#allocation3 + $0x970] sm:$0xff] }
0x118d   :  { %10759 = vmatpush1.bf16.msra.mxu1 %v9934_v23  ;;  %10790 = vmatprep.mubr.bf16.mxu1 %v14619_v20  ;;  %v9983_v20 = vld [vmem:[#allocation3 + $0x9b8] sm:$0xff]  ;;  %v10110_v23 = vld [vmem:[#allocation3 + $0xdb0] sm:$0xff] }
0x118e   :  { %10760 = vmatprep.subr.bf16.mxu1 %v9943_v29  ;;  %v10856_v29 = vrot.slane %v10848_v8, %v10855_v53  ;;  %v10150_v8 = vld [vmem:[#allocation3 + $0xef0] sm:$0xff] }
0x1191   :  { %10761 = vmatpush1.bf16.msra.mxu1 %v9942_v27 }
0x1192   :  { %10762 = vmatprep.subr.bf16.mxu1 %v9951_v31  ;;  %v10119_v31 = vld [vmem:[#allocation3 + $0xdf8] sm:$0xff] }
0x1195   :  { %10763 = vmatpush1.bf16.msra.mxu1 %v9950_v62 }
0x1196   :  { %10764 = vmatprep.subr.bf16.mxu1 %v9959_v51  ;;  %v10118_v51 = vld [vmem:[#allocation3 + $0xdf0] sm:$0xff] }
0x1199   :  { %10765 = vmatpush1.bf16.msra.mxu1 %v9958_v25  ;;  %v10127_v25 = vld [vmem:[#allocation3 + $0xe38] sm:$0xff] }
0x119a   :  { %10766 = vmatprep.subr.bf16.mxu1 %v9967_v22  ;;  %v10126_v22 = vld [vmem:[#allocation3 + $0xe30] sm:$0xff] }
0x119d   :  { %10767 = vmatpush1.bf16.msra.mxu1 %v9966_v38  ;;  %v10135_v38 = vld [vmem:[#allocation3 + $0xe78] sm:$0xff] }
0x119e   :  { %10768 = vmatprep.subr.bf16.mxu1 %v9975_v39  ;;  %v10134_v39 = vld [vmem:[#allocation3 + $0xe70] sm:$0xff] }
0x11a1   :  { %10769 = vmatpush1.bf16.msra.mxu1 %v9974_v19  ;;  %v10143_v19 = vld [vmem:[#allocation3 + $0xeb8] sm:$0xff] }
0x11a2   :  { %10770 = vmatprep.subr.bf16.mxu1 %v9983_v20  ;;  %v10159_v20 = vld [vmem:[#allocation3 + $0xf38] sm:$0xff] }
0x11a5   :  { %10771 = vmatpush1.bf16.msra.mxu1 %v9982_v49  ;;  %v10166_v49 = vld [vmem:[#allocation3 + $0xf70] sm:$0xff] }
0x11a6   :  { %10772 = vmatprep.subr.bf16.mxu1 %v9991_v52  ;;  %v10175_v52 = vld [vmem:[#allocation3 + $0xfb8] sm:$0xff] }
0x11a9   :  { %10773 = vmatpush1.bf16.msra.mxu1 %v9990_v59  ;;  %v10174_v59 = vld [vmem:[#allocation3 + $0xfb0] sm:$0xff] }
0x11aa   :  { %10774 = vmatprep.subr.bf16.mxu1 %v9999_v56  ;;  %v10183_v56 = vld [vmem:[#allocation3 + $0xff8] sm:$0xff] }
0x11ad   :  { %10775 = vmatpush1.bf16.msra.mxu1 %v9998_v54  ;;  %v10182_v54 = vld [vmem:[#allocation3 + $0xff0] sm:$0xff] }
0x11ae   :  { %10776 = vmatprep.subr.bf16.mxu1 %v10007_v61 }
0x11b1   :  { %10777 = vmatpush1.bf16.msra.mxu1 %v10006_v57 }
0x11b2   :  { %10778 = vmatprep.subr.bf16.mxu1 %v10015_v41 }
0x11b5   :  { %10779 = vmatpush1.bf16.msra.mxu1 %v10014_v4 }
0x11b6   :  { %10780 = vmatprep.subr.bf16.mxu1 %v10023_v7 }
0x11b9   :  { %10781 = vmatpush1.bf16.msra.mxu1 %v10022_v11  ;;  %v10873_v11 = vrot.slane %v10865_v42, %v10855_v53 }
0x11ba   :  { %10782 = vmatprep.subr.bf16.mxu1 %v10031_v6 }
0x11bd   :  { %10783 = vmatpush1.bf16.msra.mxu1 %v10030_v35 }
0x11be   :  { %10784 = vmatprep.subr.bf16.mxu1 %v10039_v58 }
0x11c1   :  { %10785 = vmatpush1.bf16.msra.mxu1 %v10038_v21 }
0x11c2   :  { %10786 = vmatprep.subr.bf16.mxu1 %v10047_v9 }
0x11c5   :  { %10787 = vmatpush1.bf16.msra.mxu1 %v10046_v24 }
0x11c6   :  { %10788 = vmatprep.subr.bf16.mxu1 %v10055_v12 }
0x11c9   :  { %10789 = vmatpush1.bf16.msra.mxu1 %v10054_v33 }
0x11ca   :  { %10799 = vmatprep.subr.bf16.mxu1 %v10063_v55 }
0x11cc   :  { %10791 = vmatmul.mubr.bf16.vlgmr.msra.gmra.mrb[68].mxu1 %v14625_v30  ;;  %v10094_v30 = vld [vmem:[#allocation3 + $0xd30] sm:$0xff] }
0x11cd   :  { %10800 = vmatpush1.bf16.msra.mxu1 %v10062_v34  ;;  %10831 = vmatprep.mubr.bf16.mxu1 %v14629_v32  ;;  %v10103_v32 = vld [vmem:[#allocation3 + $0xd78] sm:$0xff] }
0x11ce   :  { %10801 = vmatprep.subr.bf16.mxu1 %v10071_v18 }
0x11d1   :  { %10802 = vmatpush1.bf16.msra.mxu1 %v10070_v47 }
0x11d2   :  { %10803 = vmatprep.subr.bf16.mxu1 %v10079_v37 }
0x11d5   :  { %10804 = vmatpush1.bf16.msra.mxu1 %v10078_v0 }
0x11d6   :  { %10805 = vmatprep.subr.bf16.mxu1 %v10087_v5 }
0x11d9   :  { %10806 = vmatpush1.bf16.msra.mxu1 %v10086_v36 }
0x11da   :  { %10807 = vmatprep.subr.bf16.mxu1 %v10095_v46 }
0x11dd   :  { %10808 = vmatpush1.bf16.msra.mxu1 %v10094_v30 }
0x11de   :  { %10809 = vmatprep.subr.bf16.mxu1 %v10103_v32 }
0x11df   :  { %v10505_v3 = vpop.f32.mrb[64].mxu1 }
0x11e0   :  { %v10507_v26 = vpop.f32.mrb[65].mxu1 }
0x11e1   :  { %v10849_v28 = vcombine.low %v10505_v3, %v10507_v26  ;;  %v10509_v10 = vpop.f32.mrb[66].mxu1  ;;  %10810 = vmatpush1.bf16.msra.mxu1 %v10102_v60 }
0x11e2   :  { %v10510_v13 = vpop.f32.mrb[67].mxu1  ;;  %10811 = vmatprep.subr.bf16.mxu1 %v10111_v16 }
0x11e3   :  { %v10863_v27 = vrot.slane %v10849_v28, %v10855_v53 }
0x11e5   :  { %v10864_v62 = vcombine.low %v10856_v29, %v10863_v27  ;;  %10812 = vmatpush1.bf16.msra.mxu1 %v10110_v23 }
0x11e6   :  { %10813 = vmatprep.subr.bf16.mxu1 %v10119_v31 }
0x11e7   :  { %10884 = vst [vmem:[#allocation15] sm:$0xff] %v10864_v62 }
0x11e9   :  { %10814 = vmatpush1.bf16.msra.mxu1 %v10118_v51 }
0x11ea   :  { %10815 = vmatprep.subr.bf16.mxu1 %v10127_v25 }
0x11ed   :  { %10816 = vmatpush1.bf16.msra.mxu1 %v10126_v22 }
0x11ee   :  { %10817 = vmatprep.subr.bf16.mxu1 %v10135_v38 }
0x11f1   :  { %10818 = vmatpush1.bf16.msra.mxu1 %v10134_v39 }
0x11f2   :  { %10819 = vmatprep.subr.bf16.mxu1 %v10143_v19 }
0x11f5   :  { %10820 = vmatpush1.bf16.msra.mxu1 %v10142_v1 }
0x11f6   :  { %10821 = vmatprep.subr.bf16.mxu1 %v10151_v50 }
0x11f9   :  { %10822 = vmatpush1.bf16.msra.mxu1 %v10150_v8 }
0x11fa   :  { %10823 = vmatprep.subr.bf16.mxu1 %v10159_v20 }
0x11fd   :  { %10824 = vmatpush1.bf16.msra.mxu1 %v10158_v44 }
0x11fe   :  { %10825 = vmatprep.subr.bf16.mxu1 %v10167_v45 }
0x1201   :  { %10826 = vmatpush1.bf16.msra.mxu1 %v10166_v49 }
0x1202   :  { %10827 = vmatprep.subr.bf16.mxu1 %v10175_v52 }
0x1205   :  { %10828 = vmatpush1.bf16.msra.mxu1 %v10174_v59 }
0x1206   :  { %10829 = vmatprep.subr.bf16.mxu1 %v10183_v56 }
0x1209   :  { %10830 = vmatpush1.bf16.msra.mxu1 %v10182_v54 }
0x120c   :  { %10832 = vmatmul.mubr.bf16.vlgmr.msra.gmra.mrb[68].mxu1 %v14635_v17 }
0x12df   :  { %v10833_v61 = vpop.f32.mrb[68].mxu1 }
0x12e0   :  { %v10835_v57 = vpop.f32.mrb[69].mxu1 }
0x12e1   :  { %v10866_v41 = vcombine.low %v10833_v61, %v10835_v57  ;;  %v10837_v4 = vpop.f32.mrb[70].mxu1 }
0x12e2   :  { %v10838_v7 = vpop.f32.mrb[71].mxu1 }
0x12e3   :  { %v10880_v6 = vrot.slane %v10866_v41, %v10855_v53 }
0x12e5   :  { %v10881_v35 = vcombine.low %v10873_v11, %v10880_v6 }
0x12e7   :  { %10885 = vst [vmem:[#allocation15 + $0x8] sm:$0xff] %v10881_v35 }
0x12e8   :  { %13170 = shalt.err (!%p13167_p0)
}
0x12e9   :  { %s13171_s19 = scalar_lea.hbm %s14698_s7, 256 }
0x12ea   :  { %p13172_p1 = scmp.ne.s32.totalorder %s14698_s7, %s13171_s19  ;;  %p13175_p2 = scmp.lt.u32.totalorder %s13171_s19, %s14698_s7 }
0x12ec   :  { %p13177_p3 = pnand %p13175_p2, %p13172_p1 }
0x12ee   :  { %13180 = shalt.err (!%p13177_p3)
}
0x12ef   :  { %10895 = dma.vmem_to_hbm [thread:$0]  %s10893_s24, 256, %s14698_s7, [#allocation11]  }
0x12f0   :  { %13189 = dma.done.wait [#allocation11], 256  }
0x12f1   :  { %13190 = vsyncadd [#allocation11], 4294967040 }
0x12f2   :  { %10899 = vsyncpa [#allocation10], 1 }
0x12f3   :  { %10900 = vsyncpa [#allocation13], 1 }
0x12f4   :  { %10901 = vsyncpa [#allocation11], 1 }
0x12f5   :  { %10902 = vsyncmov [#allocation4] }
0x12f8   :  { %s10903_s23 = vpop.sfrf %10902 }
0x12f9   :  { %p11369_p4 = scmp.ne.s32.totalorder %s10903_s23, 0 }
0x12fb   :  { %10907 = shalt.err (%p11369_p4)  }
0x12fc   :  { %10909 = vsyncmov [#allocation4 + $0x1] }
0x12ff   :  { %s10910_s26 = vpop.sfrf %10909 }
0x1300   :  { %p11370_p5 = scmp.ne.s32.totalorder %s10910_s26, 0 }
0x1302   :  { %10914 = shalt.err (%p11370_p5)  }

</bundles_post_ra>
